<compile_context>
chip_gen: v7x
topology: tpu7x:2x2x1
jax: 0.10.0
libtpu: 0.0.40
codegen_flags: <defaults>
</compile_context>

<pallas_src>
import math

import jax
import jax.numpy as jnp
from jax.experimental import pallas as pl
from jax.experimental.pallas import tpu as pltpu


# ----------------------------------------------------------------------------
# Fused kernel: conv1+ReLU -> conv2 -> avg-pool -> (+) shortcut, one batch
# element per grid step, everything stays in VMEM between the two convs.
# ----------------------------------------------------------------------------
def optimized_block_kernel(x_ref, w1_ref, b1_ref, w2_ref, b2_ref, wsc_ref,
                           bsc_ref, o_ref, xpad_ref, hpad_ref, p1_ref, p2_ref):
    _, H, W, Cin = x_ref.shape
    Cout = w1_ref.shape[1]
    Hq, Wq = H // 2, W // 2

    # --- x into a zero-padded VMEM buffer (border = conv "same" padding). -----
    x32 = x_ref[0].astype(jnp.float32)                       # (H, W, Cin)
    xpad_ref[...] = jnp.zeros_like(xpad_ref)
    xpad_ref[pl.ds(1, H), pl.ds(1, W), :] = x32

    # --- conv1 (3x3): single im2col matmul on the MXU, + bias, ReLU. ----------
    xp = xpad_ref[...]                                       # (H+2, W+2, Cin)
    for t in range(9):
        kh, kw = t // 3, t % 3
        p1_ref[:, pl.ds(t * Cin, Cin)] = (
            xp[kh:kh + H, kw:kw + W, :].reshape(H * W, Cin))
    y1 = jnp.dot(p1_ref[...].astype(jnp.bfloat16), w1_ref[...],
                 preferred_element_type=jnp.float32)         # (H*W, Cout) f32
    h = jnp.maximum(y1 + b1_ref[...], 0.0)

    # --- intermediate never leaves the chip: zero-padded VMEM buffer. ---------
    hpad_ref[...] = jnp.zeros_like(hpad_ref)
    hpad_ref[pl.ds(1, H), pl.ds(1, W), :] = h.reshape(H, W, Cout)

    # --- conv2 (3x3): again one im2col matmul, + bias. ------------------------
    hp = hpad_ref[...]                                       # (H+2, W+2, Cout)
    for t in range(9):
        kh, kw = t // 3, t % 3
        p2_ref[:, pl.ds(t * Cout, Cout)] = (
            hp[kh:kh + H, kw:kw + W, :].reshape(H * W, Cout))
    y2 = jnp.dot(p2_ref[...].astype(jnp.bfloat16), w2_ref[...],
                 preferred_element_type=jnp.float32) + b2_ref[...]

    # --- residual branch: 2x2 average pool on the VPU (reshape + adds). -------
    y5 = y2.reshape(Hq, 2, Wq, 2, Cout)
    resid = ((y5[:, 0, :, 0, :] + y5[:, 0, :, 1, :]) +
             (y5[:, 1, :, 0, :] + y5[:, 1, :, 1, :])) * 0.25  # (Hq, Wq, Cout)

    # --- shortcut: 2x2 average pool of x, then 1x1 conv (one small matmul). ---
    x5 = x32.reshape(Hq, 2, Wq, 2, Cin)
    xpool = ((x5[:, 0, :, 0, :] + x5[:, 0, :, 1, :]) +
             (x5[:, 1, :, 0, :] + x5[:, 1, :, 1, :])) * 0.25  # (Hq, Wq, Cin)
    sc = jnp.dot(xpool.reshape(Hq * Wq, Cin).astype(jnp.bfloat16), wsc_ref[...],
                 preferred_element_type=jnp.float32) + bsc_ref[...]

    # NOTE: output kept in the natural (1, Hq, Wq, Cout) layout. At production
    # channel counts (Cout >= 128) the store is already lane-dense; the large
    # intermediate (h) no longer touches HBM at all after fusion.
    o_ref[0] = resid + sc.reshape(Hq, Wq, Cout)


# ----------------------------------------------------------------------------
# Parameter construction (deterministic, mirrors the PyTorch __init__).
# ----------------------------------------------------------------------------
def _spectral_normalize(w, key, eps=1e-12):
    # w in PyTorch layout (Cout, Cin, kh, kw); one power iteration like
    # nn.utils.spectral_norm with a deterministic initial u.
    cout = w.shape[0]
    w_mat = w.reshape(cout, -1)
    u = jax.random.normal(key, (cout,), jnp.float32)
    u = u / (jnp.linalg.norm(u) + eps)
    v = w_mat.T @ u
    v = v / (jnp.linalg.norm(v) + eps)
    u = w_mat @ v
    u = u / (jnp.linalg.norm(u) + eps)
    sigma = u @ (w_mat @ v)
    return w / sigma


def init_params(key, in_ch, out_ch, ksize=3):
    k1, k2, k3, kb1, kb2, kb3, ku1, ku2, ku3 = jax.random.split(key, 9)

    def xavier(k, shape, gain):
        fan_in = shape[1] * shape[2] * shape[3]
        fan_out = shape[0] * shape[2] * shape[3]
        bound = gain * math.sqrt(6.0 / (fan_in + fan_out))
        return jax.random.uniform(k, shape, jnp.float32, -bound, bound)

    def bias(k, fan_in, n):
        bound = 1.0 / math.sqrt(fan_in)
        return jax.random.uniform(k, (1, n), jnp.float32, -bound, bound)

    w1 = xavier(k1, (out_ch, in_ch, ksize, ksize), math.sqrt(2.0))
    w2 = xavier(k2, (out_ch, out_ch, ksize, ksize), math.sqrt(2.0))
    wsc = xavier(k3, (out_ch, in_ch, 1, 1), 1.0)

    b1 = bias(kb1, in_ch * ksize * ksize, out_ch)
    b2 = bias(kb2, out_ch * ksize * ksize, out_ch)
    bsc = bias(kb3, in_ch, out_ch)

    # TODO(synk): PyTorch's spectral_norm keeps a persistent u updated every
    # forward; here we apply one deterministic power iteration at init.
    w1 = _spectral_normalize(w1, ku1)
    w2 = _spectral_normalize(w2, ku2)
    wsc = _spectral_normalize(wsc, ku3)

    # to kernel layout (kh, kw, Cin, Cout)
    w1 = jnp.transpose(w1, (2, 3, 1, 0))
    w2 = jnp.transpose(w2, (2, 3, 1, 0))
    wsc = jnp.transpose(wsc, (2, 3, 1, 0))[0, 0]   # (Cin, Cout)
    return w1, b1, w2, b2, wsc, bsc


# ----------------------------------------------------------------------------
# Wrapper: NCHW in, NCHW out; a single pallas_call does all the compute.
# ----------------------------------------------------------------------------
def optimized_block_forward(x_nchw, params):
    w1, b1, w2, b2, wsc, bsc = params      # w1/w2: (3,3,Cin,Cout), wsc: (Cin,Cout)
    N, Cin, H, W = x_nchw.shape
    Cout = w1.shape[-1]
    assert H % 2 == 0 and W % 2 == 0, "2x2 avg-pool requires even H, W"
    Hq, Wq = H // 2, W // 2

    # NHWC + bf16 storage for the MXU operands (f32 accumulation in-kernel).
    x = jnp.transpose(x_nchw, (0, 2, 3, 1)).astype(jnp.bfloat16)
    w1f = w1.reshape(9 * Cin, Cout).astype(jnp.bfloat16)     # im2col weight layout
    w2f = w2.reshape(9 * Cout, Cout).astype(jnp.bfloat16)
    wscf = wsc.astype(jnp.bfloat16)

    # TODO(synk): for real GAN resolutions/channels add a spatial row-band grid
    # axis (halo'd index_map) + explicit vmem_limit_bytes so the per-step blocks
    # stay inside v7x's 64 MiB VMEM; whole images per step are fine at these sizes.
    out = pl.pallas_call(
        optimized_block_kernel,
        out_shape=jax.ShapeDtypeStruct((N, Hq, Wq, Cout), jnp.float32),
        grid=(N,),
        in_specs=[
            pl.BlockSpec((1, H, W, Cin), lambda n: (n, 0, 0, 0)),
            pl.BlockSpec((9 * Cin, Cout), lambda n: (0, 0)),
            pl.BlockSpec((1, Cout), lambda n: (0, 0)),
            pl.BlockSpec((9 * Cout, Cout), lambda n: (0, 0)),
            pl.BlockSpec((1, Cout), lambda n: (0, 0)),
            pl.BlockSpec((Cin, Cout), lambda n: (0, 0)),
            pl.BlockSpec((1, Cout), lambda n: (0, 0)),
        ],
        out_specs=pl.BlockSpec((1, Hq, Wq, Cout), lambda n: (n, 0, 0, 0)),
        scratch_shapes=[
            pltpu.VMEM((H + 2, W + 2, Cin), jnp.float32),    # zero-padded x
            pltpu.VMEM((H + 2, W + 2, Cout), jnp.float32),   # zero-padded h (fused)
            pltpu.VMEM((H * W, 9 * Cin), jnp.float32),       # im2col patches, conv1
            pltpu.VMEM((H * W, 9 * Cout), jnp.float32),      # im2col patches, conv2
        ],
        compiler_params=pltpu.CompilerParams(dimension_semantics=("parallel",)),
    )(x, w1f, b1, w2f, b2, wscf, bsc)

    return jnp.transpose(out, (0, 3, 1, 2))                  # back to NCHW


# ----------------------------------------------------------------------------
# Pure-JAX reference (mirrors the kernel's bf16-operand / f32-accumulate math).
# ----------------------------------------------------------------------------
def _avg_pool_2x2(a):
    N, H, W, C = a.shape
    a5 = a.reshape(N, H // 2, 2, W // 2, 2, C)
    return ((a5[:, :, 0, :, 0, :] + a5[:, :, 0, :, 1, :]) +
            (a5[:, :, 1, :, 0, :] + a5[:, :, 1, :, 1, :])) * 0.25


def ref_forward(x_nchw, params):
    w1, b1, w2, b2, wsc, bsc = params
    x = jnp.transpose(x_nchw, (0, 2, 3, 1)).astype(jnp.bfloat16)
    w1b, w2b, wscb = (w.astype(jnp.bfloat16) for w in (w1, w2, wsc))
    dn = ("NHWC", "HWIO", "NHWC")
    conv = lambda a, w, pad: jax.lax.conv_general_dilated(
        a, w, (1, 1), pad, dimension_numbers=dn,
        preferred_element_type=jnp.float32)
    h = jnp.maximum(conv(x, w1b, ((1, 1), (1, 1))) + b1.reshape(1, 1, 1, -1), 0.0)
    y2 = conv(h.astype(jnp.bfloat16), w2b, ((1, 1), (1, 1))) + b2.reshape(1, 1, 1, -1)
    resid = _avg_pool_2x2(y2)
    xpool = _avg_pool_2x2(x.astype(jnp.float32)).astype(jnp.bfloat16)
    sc = conv(xpool, wscb.reshape(1, 1, *wsc.shape), ((0, 0), (0, 0)))
    sc = sc + bsc.reshape(1, 1, 1, -1)
    return jnp.transpose(resid + sc, (0, 3, 1, 2))


if __name__ == "__main__":
    key = jax.random.PRNGKey(0)
    kx, kp = jax.random.split(key)

    N, in_ch, out_ch, H, W = 2, 4, 8, 16, 16
    x = jax.random.normal(kx, (N, in_ch, H, W), jnp.float32)   # NCHW like PyTorch
    params = init_params(kp, in_ch, out_ch, ksize=3)

    out = jax.block_until_ready(optimized_block_forward(x, params))
    ref = jax.block_until_ready(ref_forward(x, params))

    assert out.shape == (N, out_ch, H // 2, W // 2), out.shape
    err = float(jnp.max(jnp.abs(out - ref)))
    assert err < 1e-2, err   # bf16 operands / f32 accumulation tolerance

    print("KERNEL_OK")
</pallas_src>

<mosaic_0001>
module attributes {stable_mosaic.version = 11 : i64} {
  func.func @optimized_block_kernel(%arg0: i32, %arg1: memref<1x16x16x4xbf16, #tpu.memory_space<vmem>>, %arg2: memref<36x8xbf16, #tpu.memory_space<vmem>>, %arg3: memref<1x8xf32, #tpu.memory_space<vmem>>, %arg4: memref<72x8xbf16, #tpu.memory_space<vmem>>, %arg5: memref<1x8xf32, #tpu.memory_space<vmem>>, %arg6: memref<4x8xbf16, #tpu.memory_space<vmem>>, %arg7: memref<1x8xf32, #tpu.memory_space<vmem>>, %arg8: memref<1x8x8x8xf32, #tpu.memory_space<vmem>>, %arg9: memref<18x18x4xf32, #tpu.memory_space<vmem>>, %arg10: memref<18x18x8xf32, #tpu.memory_space<vmem>>, %arg11: memref<256x36xf32, #tpu.memory_space<vmem>>, %arg12: memref<256x72xf32, #tpu.memory_space<vmem>>) attributes {dimension_semantics = [#tpu.dimension_semantics<parallel>], iteration_bounds = array<i64: 2>, scalar_prefetch = 0 : i64, scratch_operands = 4 : i64, tpu.core_type = #tpu.core_type<tc>, window_params = [{transform_indices = @transform_0, window_bounds = array<i64: 1, 16, 16, 4>}, {pipeline_mode = #tpu.pipeline_mode<synchronous>, transform_indices = @transform_1, window_bounds = array<i64: 36, 8>}, {pipeline_mode = #tpu.pipeline_mode<synchronous>, transform_indices = @transform_2, window_bounds = array<i64: 1, 8>}, {pipeline_mode = #tpu.pipeline_mode<synchronous>, transform_indices = @transform_3, window_bounds = array<i64: 72, 8>}, {pipeline_mode = #tpu.pipeline_mode<synchronous>, transform_indices = @transform_4, window_bounds = array<i64: 1, 8>}, {pipeline_mode = #tpu.pipeline_mode<synchronous>, transform_indices = @transform_5, window_bounds = array<i64: 4, 8>}, {pipeline_mode = #tpu.pipeline_mode<synchronous>, transform_indices = @transform_6, window_bounds = array<i64: 1, 8>}, {transform_indices = @transform_7, window_bounds = array<i64: 1, 8, 8, 8>}]} {
    %c0 = arith.constant 0 : index
    %c0_0 = arith.constant 0 : index
    %c0_1 = arith.constant 0 : index
    %c0_2 = arith.constant 0 : index
    %0 = vector.load %arg1[%c0, %c0_0, %c0_1, %c0_2] : memref<1x16x16x4xbf16, #tpu.memory_space<vmem>>, vector<1x16x16x4xbf16>
    %1 = vector.shape_cast %0 : vector<1x16x16x4xbf16> to vector<16x16x4xbf16>
    %2 = arith.extf %1 : vector<16x16x4xbf16> to vector<16x16x4xf32>
    %cst = arith.constant 0.000000e+00 : f32
    %3 = vector.broadcast %cst : f32 to vector<18x18x4xf32>
    %c0_3 = arith.constant 0 : index
    %c0_4 = arith.constant 0 : index
    %c0_5 = arith.constant 0 : index
    %4 = vector.load %arg9[%c0_3, %c0_4, %c0_5] : memref<18x18x4xf32, #tpu.memory_space<vmem>>, vector<18x18x4xf32>
    tpu.vector_store %arg9[%c0_3, %c0_4, %c0_5], %3 {strides = array<i32>} : memref<18x18x4xf32, #tpu.memory_space<vmem>>, vector<18x18x4xf32>,
    %c1 = arith.constant 1 : index
    %c1_6 = arith.constant 1 : index
    %c0_7 = arith.constant 0 : index
    %5 = vector.load %arg9[%c1, %c1_6, %c0_7] : memref<18x18x4xf32, #tpu.memory_space<vmem>>, vector<16x16x4xf32>
    tpu.vector_store %arg9[%c1, %c1_6, %c0_7], %2 {strides = array<i32>} : memref<18x18x4xf32, #tpu.memory_space<vmem>>, vector<16x16x4xf32>,
    %c0_8 = arith.constant 0 : index
    %c0_9 = arith.constant 0 : index
    %c0_10 = arith.constant 0 : index
    %6 = vector.load %arg9[%c0_8, %c0_9, %c0_10] : memref<18x18x4xf32, #tpu.memory_space<vmem>>, vector<18x18x4xf32>
    %7 = vector.extract_strided_slice %6 {offsets = [0, 0, 0], sizes = [16, 16, 4], strides = [1, 1, 1]} : vector<18x18x4xf32> to vector<16x16x4xf32>
    %8 = vector.shape_cast %7 : vector<16x16x4xf32> to vector<256x4xf32>
    %c0_11 = arith.constant 0 : index
    %c0_12 = arith.constant 0 : index
    %9 = vector.load %arg11[%c0_11, %c0_12] : memref<256x36xf32, #tpu.memory_space<vmem>>, vector<256x4xf32>
    tpu.vector_store %arg11[%c0_11, %c0_12], %8 {strides = array<i32>} : memref<256x36xf32, #tpu.memory_space<vmem>>, vector<256x4xf32>,
    %10 = vector.extract_strided_slice %6 {offsets = [0, 1, 0], sizes = [16, 16, 4], strides = [1, 1, 1]} : vector<18x18x4xf32> to vector<16x16x4xf32>
    %11 = vector.shape_cast %10 : vector<16x16x4xf32> to vector<256x4xf32>
    %c0_13 = arith.constant 0 : index
    %c4 = arith.constant 4 : index
    %12 = vector.load %arg11[%c0_13, %c4] : memref<256x36xf32, #tpu.memory_space<vmem>>, vector<256x4xf32>
    tpu.vector_store %arg11[%c0_13, %c4], %11 {strides = array<i32>} : memref<256x36xf32, #tpu.memory_space<vmem>>, vector<256x4xf32>,
    %13 = vector.extract_strided_slice %6 {offsets = [0, 2, 0], sizes = [16, 16, 4], strides = [1, 1, 1]} : vector<18x18x4xf32> to vector<16x16x4xf32>
    %14 = vector.shape_cast %13 : vector<16x16x4xf32> to vector<256x4xf32>
    %c0_14 = arith.constant 0 : index
    %c8 = arith.constant 8 : index
    %15 = vector.load %arg11[%c0_14, %c8] : memref<256x36xf32, #tpu.memory_space<vmem>>, vector<256x4xf32>
    tpu.vector_store %arg11[%c0_14, %c8], %14 {strides = array<i32>} : memref<256x36xf32, #tpu.memory_space<vmem>>, vector<256x4xf32>,
    %16 = vector.extract_strided_slice %6 {offsets = [1, 0, 0], sizes = [16, 16, 4], strides = [1, 1, 1]} : vector<18x18x4xf32> to vector<16x16x4xf32>
    %17 = vector.shape_cast %16 : vector<16x16x4xf32> to vector<256x4xf32>
    %c0_15 = arith.constant 0 : index
    %c12 = arith.constant 12 : index
    %18 = vector.load %arg11[%c0_15, %c12] : memref<256x36xf32, #tpu.memory_space<vmem>>, vector<256x4xf32>
    tpu.vector_store %arg11[%c0_15, %c12], %17 {strides = array<i32>} : memref<256x36xf32, #tpu.memory_space<vmem>>, vector<256x4xf32>,
    %19 = vector.extract_strided_slice %6 {offsets = [1, 1, 0], sizes = [16, 16, 4], strides = [1, 1, 1]} : vector<18x18x4xf32> to vector<16x16x4xf32>
    %20 = vector.shape_cast %19 : vector<16x16x4xf32> to vector<256x4xf32>
    %c0_16 = arith.constant 0 : index
    %c16 = arith.constant 16 : index
    %21 = vector.load %arg11[%c0_16, %c16] : memref<256x36xf32, #tpu.memory_space<vmem>>, vector<256x4xf32>
    tpu.vector_store %arg11[%c0_16, %c16], %20 {strides = array<i32>} : memref<256x36xf32, #tpu.memory_space<vmem>>, vector<256x4xf32>,
    %22 = vector.extract_strided_slice %6 {offsets = [1, 2, 0], sizes = [16, 16, 4], strides = [1, 1, 1]} : vector<18x18x4xf32> to vector<16x16x4xf32>
    %23 = vector.shape_cast %22 : vector<16x16x4xf32> to vector<256x4xf32>
    %c0_17 = arith.constant 0 : index
    %c20 = arith.constant 20 : index
    %24 = vector.load %arg11[%c0_17, %c20] : memref<256x36xf32, #tpu.memory_space<vmem>>, vector<256x4xf32>
    tpu.vector_store %arg11[%c0_17, %c20], %23 {strides = array<i32>} : memref<256x36xf32, #tpu.memory_space<vmem>>, vector<256x4xf32>,
    %25 = vector.extract_strided_slice %6 {offsets = [2, 0, 0], sizes = [16, 16, 4], strides = [1, 1, 1]} : vector<18x18x4xf32> to vector<16x16x4xf32>
    %26 = vector.shape_cast %25 : vector<16x16x4xf32> to vector<256x4xf32>
    %c0_18 = arith.constant 0 : index
    %c24 = arith.constant 24 : index
    %27 = vector.load %arg11[%c0_18, %c24] : memref<256x36xf32, #tpu.memory_space<vmem>>, vector<256x4xf32>
    tpu.vector_store %arg11[%c0_18, %c24], %26 {strides = array<i32>} : memref<256x36xf32, #tpu.memory_space<vmem>>, vector<256x4xf32>,
    %28 = vector.extract_strided_slice %6 {offsets = [2, 1, 0], sizes = [16, 16, 4], strides = [1, 1, 1]} : vector<18x18x4xf32> to vector<16x16x4xf32>
    %29 = vector.shape_cast %28 : vector<16x16x4xf32> to vector<256x4xf32>
    %c0_19 = arith.constant 0 : index
    %c28 = arith.constant 28 : index
    %30 = vector.load %arg11[%c0_19, %c28] : memref<256x36xf32, #tpu.memory_space<vmem>>, vector<256x4xf32>
    tpu.vector_store %arg11[%c0_19, %c28], %29 {strides = array<i32>} : memref<256x36xf32, #tpu.memory_space<vmem>>, vector<256x4xf32>,
    %31 = vector.extract_strided_slice %6 {offsets = [2, 2, 0], sizes = [16, 16, 4], strides = [1, 1, 1]} : vector<18x18x4xf32> to vector<16x16x4xf32>
    %32 = vector.shape_cast %31 : vector<16x16x4xf32> to vector<256x4xf32>
    %c0_20 = arith.constant 0 : index
    %c32 = arith.constant 32 : index
    %33 = vector.load %arg11[%c0_20, %c32] : memref<256x36xf32, #tpu.memory_space<vmem>>, vector<256x4xf32>
    tpu.vector_store %arg11[%c0_20, %c32], %32 {strides = array<i32>} : memref<256x36xf32, #tpu.memory_space<vmem>>, vector<256x4xf32>,
    %c0_21 = arith.constant 0 : index
    %c0_22 = arith.constant 0 : index
    %34 = vector.load %arg11[%c0_21, %c0_22] : memref<256x36xf32, #tpu.memory_space<vmem>>, vector<256x36xf32>
    %35 = arith.truncf %34 : vector<256x36xf32> to vector<256x36xbf16>
    %c0_23 = arith.constant 0 : index
    %c0_24 = arith.constant 0 : index
    %36 = vector.load %arg2[%c0_23, %c0_24] : memref<36x8xbf16, #tpu.memory_space<vmem>>, vector<36x8xbf16>
    %cst_25 = arith.constant dense<0.000000e+00> : vector<256x8xf32>
    %37 = tpu.matmul %35, %36, %cst_25 {dimension_numbers = #tpu.dot_dimension_numbers<[1], [0], [0], [1], [0, 0, 1, 1], [], []>} : vector<256x36xbf16>, vector<36x8xbf16>, vector<256x8xf32> -> vector<256x8xf32>
    %c0_26 = arith.constant 0 : index
    %c0_27 = arith.constant 0 : index
    %38 = vector.load %arg3[%c0_26, %c0_27] : memref<1x8xf32, #tpu.memory_space<vmem>>, vector<1x8xf32>
    %39 = vector.broadcast %38 : vector<1x8xf32> to vector<256x8xf32>
    %40 = arith.addf %37, %39 : vector<256x8xf32>
    %cst_28 = arith.constant 0.000000e+00 : f32
    %41 = vector.broadcast %cst_28 : f32 to vector<256x8xf32>
    %42 = arith.maximumf %40, %41 : vector<256x8xf32>
    %cst_29 = arith.constant 0.000000e+00 : f32
    %43 = vector.broadcast %cst_29 : f32 to vector<18x18x8xf32>
    %c0_30 = arith.constant 0 : index
    %c0_31 = arith.constant 0 : index
    %c0_32 = arith.constant 0 : index
    %44 = vector.load %arg10[%c0_30, %c0_31, %c0_32] : memref<18x18x8xf32, #tpu.memory_space<vmem>>, vector<18x18x8xf32>
    tpu.vector_store %arg10[%c0_30, %c0_31, %c0_32], %43 {strides = array<i32>} : memref<18x18x8xf32, #tpu.memory_space<vmem>>, vector<18x18x8xf32>,
    %45 = vector.shape_cast %42 : vector<256x8xf32> to vector<16x16x8xf32>
    %c1_33 = arith.constant 1 : index
    %c1_34 = arith.constant 1 : index
    %c0_35 = arith.constant 0 : index
    %46 = vector.load %arg10[%c1_33, %c1_34, %c0_35] : memref<18x18x8xf32, #tpu.memory_space<vmem>>, vector<16x16x8xf32>
    tpu.vector_store %arg10[%c1_33, %c1_34, %c0_35], %45 {strides = array<i32>} : memref<18x18x8xf32, #tpu.memory_space<vmem>>, vector<16x16x8xf32>,
    %c0_36 = arith.constant 0 : index
    %c0_37 = arith.constant 0 : index
    %c0_38 = arith.constant 0 : index
    %47 = vector.load %arg10[%c0_36, %c0_37, %c0_38] : memref<18x18x8xf32, #tpu.memory_space<vmem>>, vector<18x18x8xf32>
    %48 = vector.extract_strided_slice %47 {offsets = [0, 0, 0], sizes = [16, 16, 8], strides = [1, 1, 1]} : vector<18x18x8xf32> to vector<16x16x8xf32>
    %49 = vector.shape_cast %48 : vector<16x16x8xf32> to vector<256x8xf32>
    %c0_39 = arith.constant 0 : index
    %c0_40 = arith.constant 0 : index
    %50 = vector.load %arg12[%c0_39, %c0_40] : memref<256x72xf32, #tpu.memory_space<vmem>>, vector<256x8xf32>
    tpu.vector_store %arg12[%c0_39, %c0_40], %49 {strides = array<i32>} : memref<256x72xf32, #tpu.memory_space<vmem>>, vector<256x8xf32>,
    %51 = vector.extract_strided_slice %47 {offsets = [0, 1, 0], sizes = [16, 16, 8], strides = [1, 1, 1]} : vector<18x18x8xf32> to vector<16x16x8xf32>
    %52 = vector.shape_cast %51 : vector<16x16x8xf32> to vector<256x8xf32>
    %c0_41 = arith.constant 0 : index
    %c8_42 = arith.constant 8 : index
    %53 = vector.load %arg12[%c0_41, %c8_42] : memref<256x72xf32, #tpu.memory_space<vmem>>, vector<256x8xf32>
    tpu.vector_store %arg12[%c0_41, %c8_42], %52 {strides = array<i32>} : memref<256x72xf32, #tpu.memory_space<vmem>>, vector<256x8xf32>,
    %54 = vector.extract_strided_slice %47 {offsets = [0, 2, 0], sizes = [16, 16, 8], strides = [1, 1, 1]} : vector<18x18x8xf32> to vector<16x16x8xf32>
    %55 = vector.shape_cast %54 : vector<16x16x8xf32> to vector<256x8xf32>
    %c0_43 = arith.constant 0 : index
    %c16_44 = arith.constant 16 : index
    %56 = vector.load %arg12[%c0_43, %c16_44] : memref<256x72xf32, #tpu.memory_space<vmem>>, vector<256x8xf32>
    tpu.vector_store %arg12[%c0_43, %c16_44], %55 {strides = array<i32>} : memref<256x72xf32, #tpu.memory_space<vmem>>, vector<256x8xf32>,
    %57 = vector.extract_strided_slice %47 {offsets = [1, 0, 0], sizes = [16, 16, 8], strides = [1, 1, 1]} : vector<18x18x8xf32> to vector<16x16x8xf32>
    %58 = vector.shape_cast %57 : vector<16x16x8xf32> to vector<256x8xf32>
    %c0_45 = arith.constant 0 : index
    %c24_46 = arith.constant 24 : index
    %59 = vector.load %arg12[%c0_45, %c24_46] : memref<256x72xf32, #tpu.memory_space<vmem>>, vector<256x8xf32>
    tpu.vector_store %arg12[%c0_45, %c24_46], %58 {strides = array<i32>} : memref<256x72xf32, #tpu.memory_space<vmem>>, vector<256x8xf32>,
    %60 = vector.extract_strided_slice %47 {offsets = [1, 1, 0], sizes = [16, 16, 8], strides = [1, 1, 1]} : vector<18x18x8xf32> to vector<16x16x8xf32>
    %61 = vector.shape_cast %60 : vector<16x16x8xf32> to vector<256x8xf32>
    %c0_47 = arith.constant 0 : index
    %c32_48 = arith.constant 32 : index
    %62 = vector.load %arg12[%c0_47, %c32_48] : memref<256x72xf32, #tpu.memory_space<vmem>>, vector<256x8xf32>
    tpu.vector_store %arg12[%c0_47, %c32_48], %61 {strides = array<i32>} : memref<256x72xf32, #tpu.memory_space<vmem>>, vector<256x8xf32>,
    %63 = vector.extract_strided_slice %47 {offsets = [1, 2, 0], sizes = [16, 16, 8], strides = [1, 1, 1]} : vector<18x18x8xf32> to vector<16x16x8xf32>
    %64 = vector.shape_cast %63 : vector<16x16x8xf32> to vector<256x8xf32>
    %c0_49 = arith.constant 0 : index
    %c40 = arith.constant 40 : index
    %65 = vector.load %arg12[%c0_49, %c40] : memref<256x72xf32, #tpu.memory_space<vmem>>, vector<256x8xf32>
    tpu.vector_store %arg12[%c0_49, %c40], %64 {strides = array<i32>} : memref<256x72xf32, #tpu.memory_space<vmem>>, vector<256x8xf32>,
    %66 = vector.extract_strided_slice %47 {offsets = [2, 0, 0], sizes = [16, 16, 8], strides = [1, 1, 1]} : vector<18x18x8xf32> to vector<16x16x8xf32>
    %67 = vector.shape_cast %66 : vector<16x16x8xf32> to vector<256x8xf32>
    %c0_50 = arith.constant 0 : index
    %c48 = arith.constant 48 : index
    %68 = vector.load %arg12[%c0_50, %c48] : memref<256x72xf32, #tpu.memory_space<vmem>>, vector<256x8xf32>
    tpu.vector_store %arg12[%c0_50, %c48], %67 {strides = array<i32>} : memref<256x72xf32, #tpu.memory_space<vmem>>, vector<256x8xf32>,
    %69 = vector.extract_strided_slice %47 {offsets = [2, 1, 0], sizes = [16, 16, 8], strides = [1, 1, 1]} : vector<18x18x8xf32> to vector<16x16x8xf32>
    %70 = vector.shape_cast %69 : vector<16x16x8xf32> to vector<256x8xf32>
    %c0_51 = arith.constant 0 : index
    %c56 = arith.constant 56 : index
    %71 = vector.load %arg12[%c0_51, %c56] : memref<256x72xf32, #tpu.memory_space<vmem>>, vector<256x8xf32>
    tpu.vector_store %arg12[%c0_51, %c56], %70 {strides = array<i32>} : memref<256x72xf32, #tpu.memory_space<vmem>>, vector<256x8xf32>,
    %72 = vector.extract_strided_slice %47 {offsets = [2, 2, 0], sizes = [16, 16, 8], strides = [1, 1, 1]} : vector<18x18x8xf32> to vector<16x16x8xf32>
    %73 = vector.shape_cast %72 : vector<16x16x8xf32> to vector<256x8xf32>
    %c0_52 = arith.constant 0 : index
    %c64 = arith.constant 64 : index
    %74 = vector.load %arg12[%c0_52, %c64] : memref<256x72xf32, #tpu.memory_space<vmem>>, vector<256x8xf32>
    tpu.vector_store %arg12[%c0_52, %c64], %73 {strides = array<i32>} : memref<256x72xf32, #tpu.memory_space<vmem>>, vector<256x8xf32>,
    %c0_53 = arith.constant 0 : index
    %c0_54 = arith.constant 0 : index
    %75 = vector.load %arg12[%c0_53, %c0_54] : memref<256x72xf32, #tpu.memory_space<vmem>>, vector<256x72xf32>
    %76 = arith.truncf %75 : vector<256x72xf32> to vector<256x72xbf16>
    %c0_55 = arith.constant 0 : index
    %c0_56 = arith.constant 0 : index
    %77 = vector.load %arg4[%c0_55, %c0_56] : memref<72x8xbf16, #tpu.memory_space<vmem>>, vector<72x8xbf16>
    %cst_57 = arith.constant dense<0.000000e+00> : vector<256x8xf32>
    %78 = tpu.matmul %76, %77, %cst_57 {dimension_numbers = #tpu.dot_dimension_numbers<[1], [0], [0], [1], [0, 0, 1, 1], [], []>} : vector<256x72xbf16>, vector<72x8xbf16>, vector<256x8xf32> -> vector<256x8xf32>
    %c0_58 = arith.constant 0 : index
    %c0_59 = arith.constant 0 : index
    %79 = vector.load %arg5[%c0_58, %c0_59] : memref<1x8xf32, #tpu.memory_space<vmem>>, vector<1x8xf32>
    %80 = vector.broadcast %79 : vector<1x8xf32> to vector<256x8xf32>
    %81 = arith.addf %78, %80 : vector<256x8xf32>
    %82 = vector.shape_cast %81 : vector<256x8xf32> to vector<8x2x8x2x8xf32>
    %83 = vector.extract_strided_slice %82 {offsets = [0, 0, 0, 0, 0], sizes = [8, 1, 8, 1, 8], strides = [1, 1, 1, 1, 1]} : vector<8x2x8x2x8xf32> to vector<8x1x8x1x8xf32>
    %84 = vector.shape_cast %83 : vector<8x1x8x1x8xf32> to vector<8x8x8xf32>
    %85 = vector.extract_strided_slice %82 {offsets = [0, 0, 0, 1, 0], sizes = [8, 1, 8, 1, 8], strides = [1, 1, 1, 1, 1]} : vector<8x2x8x2x8xf32> to vector<8x1x8x1x8xf32>
    %86 = vector.shape_cast %85 : vector<8x1x8x1x8xf32> to vector<8x8x8xf32>
    %87 = arith.addf %84, %86 : vector<8x8x8xf32>
    %88 = vector.extract_strided_slice %82 {offsets = [0, 1, 0, 0, 0], sizes = [8, 1, 8, 1, 8], strides = [1, 1, 1, 1, 1]} : vector<8x2x8x2x8xf32> to vector<8x1x8x1x8xf32>
    %89 = vector.shape_cast %88 : vector<8x1x8x1x8xf32> to vector<8x8x8xf32>
    %90 = vector.extract_strided_slice %82 {offsets = [0, 1, 0, 1, 0], sizes = [8, 1, 8, 1, 8], strides = [1, 1, 1, 1, 1]} : vector<8x2x8x2x8xf32> to vector<8x1x8x1x8xf32>
    %91 = vector.shape_cast %90 : vector<8x1x8x1x8xf32> to vector<8x8x8xf32>
    %92 = arith.addf %89, %91 : vector<8x8x8xf32>
    %93 = arith.addf %87, %92 : vector<8x8x8xf32>
    %cst_60 = arith.constant 2.500000e-01 : f32
    %94 = vector.broadcast %cst_60 : f32 to vector<8x8x8xf32>
    %95 = arith.mulf %93, %94 : vector<8x8x8xf32>
    %96 = vector.shape_cast %2 : vector<16x16x4xf32> to vector<8x2x8x2x4xf32>
    %97 = vector.extract_strided_slice %96 {offsets = [0, 0, 0, 0, 0], sizes = [8, 1, 8, 1, 4], strides = [1, 1, 1, 1, 1]} : vector<8x2x8x2x4xf32> to vector<8x1x8x1x4xf32>
    %98 = vector.shape_cast %97 : vector<8x1x8x1x4xf32> to vector<8x8x4xf32>
    %99 = vector.extract_strided_slice %96 {offsets = [0, 0, 0, 1, 0], sizes = [8, 1, 8, 1, 4], strides = [1, 1, 1, 1, 1]} : vector<8x2x8x2x4xf32> to vector<8x1x8x1x4xf32>
    %100 = vector.shape_cast %99 : vector<8x1x8x1x4xf32> to vector<8x8x4xf32>
    %101 = arith.addf %98, %100 : vector<8x8x4xf32>
    %102 = vector.extract_strided_slice %96 {offsets = [0, 1, 0, 0, 0], sizes = [8, 1, 8, 1, 4], strides = [1, 1, 1, 1, 1]} : vector<8x2x8x2x4xf32> to vector<8x1x8x1x4xf32>
    %103 = vector.shape_cast %102 : vector<8x1x8x1x4xf32> to vector<8x8x4xf32>
    %104 = vector.extract_strided_slice %96 {offsets = [0, 1, 0, 1, 0], sizes = [8, 1, 8, 1, 4], strides = [1, 1, 1, 1, 1]} : vector<8x2x8x2x4xf32> to vector<8x1x8x1x4xf32>
    %105 = vector.shape_cast %104 : vector<8x1x8x1x4xf32> to vector<8x8x4xf32>
    %106 = arith.addf %103, %105 : vector<8x8x4xf32>
    %107 = arith.addf %101, %106 : vector<8x8x4xf32>
    %cst_61 = arith.constant 2.500000e-01 : f32
    %108 = vector.broadcast %cst_61 : f32 to vector<8x8x4xf32>
    %109 = arith.mulf %107, %108 : vector<8x8x4xf32>
    %110 = vector.shape_cast %109 : vector<8x8x4xf32> to vector<64x4xf32>
    %111 = arith.truncf %110 : vector<64x4xf32> to vector<64x4xbf16>
    %c0_62 = arith.constant 0 : index
    %c0_63 = arith.constant 0 : index
    %112 = vector.load %arg6[%c0_62, %c0_63] : memref<4x8xbf16, #tpu.memory_space<vmem>>, vector<4x8xbf16>
    %cst_64 = arith.constant dense<0.000000e+00> : vector<64x8xf32>
    %113 = tpu.matmul %111, %112, %cst_64 {dimension_numbers = #tpu.dot_dimension_numbers<[1], [0], [0], [1], [0, 0, 1, 1], [], []>} : vector<64x4xbf16>, vector<4x8xbf16>, vector<64x8xf32> -> vector<64x8xf32>
    %c0_65 = arith.constant 0 : index
    %c0_66 = arith.constant 0 : index
    %114 = vector.load %arg7[%c0_65, %c0_66] : memref<1x8xf32, #tpu.memory_space<vmem>>, vector<1x8xf32>
    %115 = vector.broadcast %114 : vector<1x8xf32> to vector<64x8xf32>
    %116 = arith.addf %113, %115 : vector<64x8xf32>
    %117 = vector.shape_cast %116 : vector<64x8xf32> to vector<8x8x8xf32>
    %118 = arith.addf %95, %117 : vector<8x8x8xf32>
    %c0_67 = arith.constant 0 : index
    %c0_68 = arith.constant 0 : index
    %c0_69 = arith.constant 0 : index
    %c0_70 = arith.constant 0 : index
    %119 = vector.load %arg8[%c0_67, %c0_68, %c0_69, %c0_70] : memref<1x8x8x8xf32, #tpu.memory_space<vmem>>, vector<1x8x8x8xf32>
    %120 = vector.shape_cast %119 : vector<1x8x8x8xf32> to vector<8x8x8xf32>
    %121 = vector.shape_cast %118 : vector<8x8x8xf32> to vector<1x8x8x8xf32>
    tpu.vector_store %arg8[%c0_67, %c0_68, %c0_69, %c0_70], %121 {strides = array<i32>} : memref<1x8x8x8xf32, #tpu.memory_space<vmem>>, vector<1x8x8x8xf32>,
    return
  }
  func.func @transform_0(%arg0: i32) -> (i32, i32, i32, i32) {
    %c0_i32 = arith.constant 0 : i32
    %c0_i32_0 = arith.constant 0 : i32
    %c0_i32_1 = arith.constant 0 : i32
    %c0_i32_2 = arith.constant 0 : i32
    return %arg0, %c0_i32, %c0_i32_0, %c0_i32_1 : i32, i32, i32, i32
  }
  func.func @transform_1(%arg0: i32) -> (i32, i32) {
    %c0_i32 = arith.constant 0 : i32
    %c0_i32_0 = arith.constant 0 : i32
    %c0_i32_1 = arith.constant 0 : i32
    return %c0_i32, %c0_i32_0 : i32, i32
  }
  func.func @transform_2(%arg0: i32) -> (i32, i32) {
    %c0_i32 = arith.constant 0 : i32
    %c0_i32_0 = arith.constant 0 : i32
    %c0_i32_1 = arith.constant 0 : i32
    return %c0_i32, %c0_i32_0 : i32, i32
  }
  func.func @transform_3(%arg0: i32) -> (i32, i32) {
    %c0_i32 = arith.constant 0 : i32
    %c0_i32_0 = arith.constant 0 : i32
    %c0_i32_1 = arith.constant 0 : i32
    return %c0_i32, %c0_i32_0 : i32, i32
  }
  func.func @transform_4(%arg0: i32) -> (i32, i32) {
    %c0_i32 = arith.constant 0 : i32
    %c0_i32_0 = arith.constant 0 : i32
    %c0_i32_1 = arith.constant 0 : i32
    return %c0_i32, %c0_i32_0 : i32, i32
  }
  func.func @transform_5(%arg0: i32) -> (i32, i32) {
    %c0_i32 = arith.constant 0 : i32
    %c0_i32_0 = arith.constant 0 : i32
    %c0_i32_1 = arith.constant 0 : i32
    return %c0_i32, %c0_i32_0 : i32, i32
  }
  func.func @transform_6(%arg0: i32) -> (i32, i32) {
    %c0_i32 = arith.constant 0 : i32
    %c0_i32_0 = arith.constant 0 : i32
    %c0_i32_1 = arith.constant 0 : i32
    return %c0_i32, %c0_i32_0 : i32, i32
  }
  func.func @transform_7(%arg0: i32) -> (i32, i32, i32, i32) {
    %c0_i32 = arith.constant 0 : i32
    %c0_i32_0 = arith.constant 0 : i32
    %c0_i32_1 = arith.constant 0 : i32
    %c0_i32_2 = arith.constant 0 : i32
    return %arg0, %c0_i32, %c0_i32_0, %c0_i32_1 : i32, i32, i32, i32
  }
}

</mosaic_0001>

<bundles_post_ra>
// kernel: tpu_custom_call.1
= control target key start
LH: loop header
LB: loop body
LE: loop exit
PB: predicated region body
PF: predicated region fallthrough
CT: control target
= control target key end

     0   :  { %12 = vsyncpa [#allocation7], 0  ;;  %s12841_s0 = inlined_call_operand.vmem [shape: bf16[2,16,16,4], index: 0, kind: input, shape index: {}]   ;;  %s12842_s1 = inlined_call_operand.vmem [shape: bf16[36,8], index: 1, kind: input, shape index: {}]   ;;  %s12843_s2 = inlined_call_operand.vmem [shape: f32[1,8], index: 2, kind: input, shape index: {}]   ;;  %s12844_s3 = inlined_call_operand.vmem [shape: bf16[72,8], index: 3, kind: input, shape index: {}]   ;;  %s12845_s4 = inlined_call_operand.vmem [shape: f32[1,8], index: 4, kind: input, shape index: {}]   ;;  %s12846_s5 = inlined_call_operand.vmem [shape: bf16[4,8], index: 5, kind: input, shape index: {}]   ;;  %s12847_s6 = inlined_call_operand.vmem [shape: f32[1,8], index: 6, kind: input, shape index: {}]   ;;  %s12848_s7 = inlined_call_operand.hbm [shape: f32[2,8,8,8], index: 7, kind: output, shape index: {}]  }
   0x1   :  { %14 = vsyncpa [#allocation7 + $0x1], 0  ;;  %s8433_s24 = smov 0   ;;  %s8435_s25 = smov 0  }
   0x2   :  { %s8437_s26 = smov 0   ;;  %s8439_s27 = smov 0  }
   0x3 LB: > { %s8454_s28 = sadd.s32 4294967295, %s8375_s27   ;;  %s7715_s29 = sadd.s32 4294967294, %s8375_s27   ;;  %s8375_s27 = sphi %s8439_s27, %s13519_s27   ;;  %s8371_s26 = sphi %s8437_s26, %s13518_s26   ;;  %s8367_s25 = sphi %s8435_s25, %s13517_s25   ;;  %s8363_s24 = sphi %s8433_s24, %s13516_s24  }
   0x4   : > { %s8458_s30 = sadd.s32 1, %s8375_s27   ;;  %s179_s8 = sadd.s32 1, %s8371_s26 }
   0x5   : > { %s176_s9 = ssub.s32 %s8375_s27, %s8458_s30  ;;  %p189_p0 = scmp.ne.s32.totalorder %s8371_s26, %s8367_s25 }
   0x6   : > { %p177_p1 = scmp.eq.s32.totalorder %s176_s9, 0  ;;  %p190_p2 = scmp.eq.s32.totalorder %s8454_s28, 1 }
   0x7   : > { %p195_p3 = scmp.ne.s32.totalorder %s8367_s25, %s8363_s24  ;;  %p196_p4 = scmp.eq.s32.totalorder %s7715_s29, 1 }
   0x8   : > { %s8469_s10 = scalar_select %p177_p1, %s8371_s26, %s179_s8  }
   0x9   : > { %p8471_p5 = por %p190_p2, %p189_p0  ;;  %p8475_p6 = por %p196_p4, %p195_p3 }
   0xa   : > { %p7718_p7 = scmp.ge.s32.totalorder %s8375_s27, 1  ;;  %p240_p8 = scmp.lt.s32.totalorder %s8375_s27, 3 }
   0xc   : > { %p241_p9 = pnand %p7718_p7, %p240_p8 }
   0xe   : > { %244 = sbr.rel (%p241_p9) target bundleno = 1765 (0x6e5), region = 48 }
  0x15   : > { %vm342_vm0 = vcmask 31744   ;;  %p272_p10 = scmp.lt.s32.totalorder %s8454_s28, 1  ;;  %vm345_vm1 = vcmask 25600   ;;  %v12849_v0 = vmov 0.0   ;;  %vm565_vm2 = vcmask 1046528   ;;  %s8378_s18 = smov 4  }
  0x16   : > { %343 = vst.msk [vmem:[#allocation2] sm:$0xff] %vm342_vm0, %v12849_v0  ;;  %344 = vst.msk [vmem:[#allocation2 + $0x8] sm:$0xff] %vm342_vm0, %v12849_v0  ;;  %vm13153_vm3 = vcmask 1045504   ;;  %s8379_s19 = smov 8   ;;  %vm742_vm4 = vcmask 64544   ;;  %s8380_s20 = smov 12  }
  0x17   : > { %347 = vst.msk [vmem:[#allocation2 + $0x18] sm:$0xff] %vm342_vm0, %v12849_v0  ;;  %348 = vst.msk [vmem:[#allocation2 + $0x20] sm:$0xff] %vm342_vm0, %v12849_v0  ;;  %s273_s13 = scalar_select %p272_p10, %s8454_s28, 1  ;;  %vm952_vm5 = vcmask 97344   ;;  %vm1083_vm6 = vcmask 130144   ;;  %vm1218_vm7 = vcmask 162944  }
  0x18   : > { %350 = vst.msk [vmem:[#allocation2 + $0x30] sm:$0xff] %vm342_vm0, %v12849_v0  ;;  %351 = vst.msk [vmem:[#allocation2 + $0x38] sm:$0xff] %vm342_vm0, %v12849_v0  ;;  %s8381_s21 = smov 16   ;;  %s8382_s22 = smov 20   ;;  %vm1909_vm8 = vcmask 1041408   ;;  %vm1352_vm9 = vcmask 195744  }
  0x19   : > { %353 = vst.msk [vmem:[#allocation2 + $0x48] sm:$0xff] %vm342_vm0, %v12849_v0  ;;  %354 = vst.msk [vmem:[#allocation2 + $0x50] sm:$0xff] %vm342_vm0, %v12849_v0  ;;  %s8030_s14 = sshll.u32 %s273_s13, 7  ;;  %s8383_s23 = smov 24   ;;  %vm1483_vm10 = vcmask 228544   ;;  %vm1618_vm11 = vcmask 261344  }
  0x1a   : > { %356 = vst.msk [vmem:[#allocation2 + $0x60] sm:$0xff] %vm342_vm0, %v12849_v0  ;;  %357 = vst.msk [vmem:[#allocation2 + $0x68] sm:$0xff] %vm342_vm0, %v12849_v0  ;;  %s8596_s17 = scalar_lea.vmem %s12841_s0, %s8030_s14  ;;  %s8384_s29 = smov 28   ;;  %vm1752_vm12 = vcmask 294144   ;;  %vm1860_vm13 = vcmask 293888   ;;  %vm13152_vm14 = vcmask 64512  }
  0x1b   : > { %359 = vst.msk [vmem:[#allocation2 + $0x78] sm:$0xff] %vm342_vm0, %v12849_v0  ;;  %360 = vst.msk [vmem:[#allocation2 + $0x80] sm:$0xff] %vm342_vm0, %v12849_v0  ;;  %v8033_v1 = vld [vmem:[%s8596_s17] sm:$0xff]   ;;  %v8096_v2 = vld [vmem:[%s8596_s17 + $0x8] sm:$0xff]   ;;  %s8385_s15 = smov 32   ;;  %vm2109_vm15 = vcmask 58368  }
  0x1c   : > { %362 = vst.msk [vmem:[#allocation2 + $0x90] sm:$0xff] %vm342_vm0, %v12849_v0  ;;  %363 = vst.msk [vmem:[#allocation2 + $0x98] sm:$0xff] %vm342_vm0, %v12849_v0  ;;  %v8097_v3 = vld [vmem:[%s8596_s17 + $0x10] sm:$0xff]   ;;  %v8601_v4 = vunpack.c.l.bf16 %v8033_v1  ;;  %v8603_v5 = vunpack.c.h.bf16 %v8033_v1  ;;  %v8605_v6 = vunpack.c.l.bf16 %v8096_v2  ;;  %v8607_v7 = vunpack.c.h.bf16 %v8096_v2  ;;  %v8098_v8 = vld [vmem:[%s8596_s17 + $0x18] sm:$0xff]   ;;  %s8388_s8 = smov 48   ;;  %s8390_s9 = smov 64  }
  0x1d   : > { %365 = vst.msk [vmem:[#allocation2 + $0xa8] sm:$0xff] %vm342_vm0, %v12849_v0  ;;  %366 = vst.msk [vmem:[#allocation2 + $0xb0] sm:$0xff] %vm342_vm0, %v12849_v0  ;;  %v8099_v9 = vld [vmem:[%s8596_s17 + $0x20] sm:$0xff]   ;;  %v8100_v10 = vld [vmem:[%s8596_s17 + $0x28] sm:$0xff]   ;;  %v8618_v14 = vunpack.c.l.bf16 %v8097_v3  ;;  %v8620_v15 = vunpack.c.h.bf16 %v8097_v3  ;;  %v8622_v16 = vunpack.c.l.bf16 %v8098_v8  ;;  %v8624_v17 = vunpack.c.h.bf16 %v8098_v8  ;;  %s269_s16 = sand.u32 1, %s8367_s25   ;;  %s8031_s13 = sshll.u32 %s8454_s28, 10 }
  0x1e   : > { %368 = vst.msk [vmem:[#allocation2 + $0xc0] sm:$0xff] %vm342_vm0, %v12849_v0  ;;  %369 = vst.msk [vmem:[#allocation2 + $0xc8] sm:$0xff] %vm342_vm0, %v12849_v0  ;;  %v8612_v11 = vld [vmem:[#allocation2] sm:$0xff]  ;;  %v8614_v12 = vld [vmem:[#allocation2 + $0x8] sm:$0xff]  ;;  %v8641_v21 = vunpack.c.l.bf16 %v8099_v9  ;;  %v8654_v25 = vunpack.c.h.bf16 %v8099_v9  ;;  %v8656_v26 = vunpack.c.l.bf16 %v8100_v10  ;;  %v8658_v27 = vunpack.c.h.bf16 %v8100_v10  ;;  %s12799_s28 = scalar_lea.sflag [#allocation7], %s269_s16 }
  0x1f   : > { %371 = vst.msk [vmem:[#allocation2 + $0xd8] sm:$0xff] %vm342_vm0, %v12849_v0  ;;  %372 = vst.msk [vmem:[#allocation2 + $0xe0] sm:$0xff] %vm342_vm0, %v12849_v0  ;;  %v566_v18 = vrot.slane %v8612_v11, 1  ;;  %v567_v19 = vrot.slane %v8614_v12, 1  ;;  %v8101_v22 = vld [vmem:[%s8596_s17 + $0x30] sm:$0xff]   ;;  %v8102_v23 = vld [vmem:[%s8596_s17 + $0x38] sm:$0xff]  }
  0x20   : > { %374 = vst.msk [vmem:[#allocation2 + $0xf0] sm:$0xff] %vm342_vm0, %v12849_v0  ;;  %375 = vst.msk [vmem:[#allocation2 + $0xf8] sm:$0xff] %vm342_vm0, %v12849_v0  ;;  %v8103_v24 = vld [vmem:[%s8596_s17 + $0x40] sm:$0xff]   ;;  %v8660_v28 = vunpack.c.l.bf16 %v8101_v22  ;;  %v8104_v29 = vld [vmem:[%s8596_s17 + $0x48] sm:$0xff]   ;;  %v8669_v34 = vunpack.c.h.bf16 %v8101_v22  ;;  %v8671_v35 = vunpack.c.l.bf16 %v8102_v23  ;;  %v8684_v38 = vunpack.c.h.bf16 %v8102_v23 }
  0x21   : > { %377 = vst.msk [vmem:[#allocation2 + $0x108] sm:$0xff] %vm342_vm0, %v12849_v0  ;;  %378 = vst.msk [vmem:[#allocation2 + $0x110] sm:$0xff] %vm342_vm0, %v12849_v0  ;;  %v8105_v30 = vld [vmem:[%s8596_s17 + $0x50] sm:$0xff]   ;;  %v8106_v31 = vld [vmem:[%s8596_s17 + $0x58] sm:$0xff]   ;;  %v568_v32 = vsel %vm565_vm2, %v566_v18, %v567_v19  ;;  %v8686_v39 = vunpack.c.l.bf16 %v8103_v24  ;;  %v8688_v40 = vunpack.c.h.bf16 %v8103_v24  ;;  %v8690_v41 = vunpack.c.l.bf16 %v8104_v29 }
  0x22   : > { %380 = vst.msk [vmem:[#allocation2 + $0x120] sm:$0xff] %vm342_vm0, %v12849_v0  ;;  %381 = vst.msk [vmem:[#allocation2 + $0x128] sm:$0xff] %vm342_vm0, %v12849_v0  ;;  %v8107_v36 = vld [vmem:[%s8596_s17 + $0x60] sm:$0xff]   ;;  %v8108_v37 = vld [vmem:[%s8596_s17 + $0x68] sm:$0xff]   ;;  %646 = vrot.lane.b32.xlu0 %v568_v32, %s8378_s18  ;;  %v8697_v43 = vunpack.c.h.bf16 %v8104_v29  ;;  %v8699_v44 = vunpack.c.l.bf16 %v8105_v30  ;;  %v8701_v45 = vunpack.c.h.bf16 %v8105_v30  ;;  %v8703_v46 = vunpack.c.l.bf16 %v8106_v31 }
  0x23   : > { %383 = vst.msk [vmem:[#allocation2 + $0x138] sm:$0xff] %vm342_vm0, %v12849_v0  ;;  %384 = vst.msk [vmem:[#allocation2 + $0x140] sm:$0xff] %vm342_vm0, %v12849_v0  ;;  %v8109_v42 = vld [vmem:[%s8596_s17 + $0x70] sm:$0xff]   ;;  %v8713_v47 = vunpack.c.h.bf16 %v8106_v31  ;;  %v8715_v48 = vunpack.c.l.bf16 %v8107_v36  ;;  %v8717_v49 = vunpack.c.h.bf16 %v8107_v36  ;;  %v8719_v50 = vunpack.c.l.bf16 %v8108_v37 }
  0x24   : > { %386 = vst.msk [vmem:[#allocation2 + $0x150] sm:$0xff] %vm342_vm0, %v12849_v0  ;;  %387 = vst.msk [vmem:[#allocation2 + $0x158] sm:$0xff] %vm342_vm0, %v12849_v0  ;;  %v8729_v51 = vunpack.c.h.bf16 %v8108_v37  ;;  %v8731_v52 = vunpack.c.l.bf16 %v8109_v42  ;;  %v8733_v53 = vunpack.c.h.bf16 %v8109_v42  ;;  %v776_v54 = vrot.slane %v8612_v11, 2 }
  0x25   : > { %389 = vst.msk [vmem:[#allocation2 + $0x168] sm:$0xff] %vm342_vm0, %v12849_v0  ;;  %390 = vst.msk [vmem:[#allocation2 + $0x170] sm:$0xff] %vm342_vm0, %v12849_v0  ;;  %v12851_v58 = vrot.slane %v8614_v12, 2 }
  0x26   : > { %392 = vst.msk [vmem:[#allocation2 + $0x180] sm:$0xff] %vm342_vm0, %v12849_v0  ;;  %393 = vst.msk [vmem:[#allocation2 + $0x188] sm:$0xff] %vm342_vm0, %v12849_v0 }
  0x27   : > { %395 = vst.msk [vmem:[#allocation2 + $0x198] sm:$0xff] %vm342_vm0, %v12849_v0  ;;  %396 = vst.msk [vmem:[#allocation2 + $0x1a0] sm:$0xff] %vm342_vm0, %v12849_v0 }
  0x28   : > { %349 = vst.msk [vmem:[#allocation2 + $0x28] sm:$0x3] %vm345_vm1, %v12849_v0  ;;  %346 = vst.msk [vmem:[#allocation2 + $0x10] sm:$0x3] %vm345_vm1, %v12849_v0 }
  0x29   : > { %352 = vst.msk [vmem:[#allocation2 + $0x40] sm:$0x3] %vm345_vm1, %v12849_v0  ;;  %355 = vst.msk [vmem:[#allocation2 + $0x58] sm:$0x3] %vm345_vm1, %v12849_v0 }
  0x2a   : > { %358 = vst.msk [vmem:[#allocation2 + $0x70] sm:$0x3] %vm345_vm1, %v12849_v0  ;;  %361 = vst.msk [vmem:[#allocation2 + $0x88] sm:$0x3] %vm345_vm1, %v12849_v0 }
  0x2b   : > { %364 = vst.msk [vmem:[#allocation2 + $0xa0] sm:$0x3] %vm345_vm1, %v12849_v0  ;;  %367 = vst.msk [vmem:[#allocation2 + $0xb8] sm:$0x3] %vm345_vm1, %v12849_v0 }
  0x2c   : > { %370 = vst.msk [vmem:[#allocation2 + $0xd0] sm:$0x3] %vm345_vm1, %v12849_v0  ;;  %373 = vst.msk [vmem:[#allocation2 + $0xe8] sm:$0x3] %vm345_vm1, %v12849_v0 }
  0x2d   : > { %376 = vst.msk [vmem:[#allocation2 + $0x100] sm:$0x3] %vm345_vm1, %v12849_v0  ;;  %379 = vst.msk [vmem:[#allocation2 + $0x118] sm:$0x3] %vm345_vm1, %v12849_v0 }
  0x2e   : > { %382 = vst.msk [vmem:[#allocation2 + $0x130] sm:$0x3] %vm345_vm1, %v12849_v0  ;;  %385 = vst.msk [vmem:[#allocation2 + $0x148] sm:$0x3] %vm345_vm1, %v12849_v0 }
  0x2f   : > { %388 = vst.msk [vmem:[#allocation2 + $0x160] sm:$0x3] %vm345_vm1, %v12849_v0  ;;  %391 = vst.msk [vmem:[#allocation2 + $0x178] sm:$0x3] %vm345_vm1, %v12849_v0  ;;  %v8616_v13 = vld [vmem:[#allocation2 + $0x10] sm:$0x3] }
  0x30   : > { %394 = vst.msk [vmem:[#allocation2 + $0x190] sm:$0x3] %vm345_vm1, %v12849_v0  ;;  %397 = vst.msk [vmem:[#allocation2 + $0x1a8] sm:$0x3] %vm345_vm1, %v12849_v0  ;;  %v569_v20 = vrot.slane %v8616_v13, 1  ;;  %vm2505_vm1 = vcmask 130112  }
  0x31   : > { %13157 = vst [vmem:[#allocation9_spill] sm:$0xff] %v8601_v4  ;;  %13158 = vst [vmem:[#allocation10_spill] sm:$0xff] %v8603_v5 }
  0x32   : > { %13159 = vst [vmem:[#allocation11_spill] sm:$0xff] %v8605_v6  ;;  %13160 = vst [vmem:[#allocation12_spill] sm:$0xff] %v8607_v7  ;;  %v570_v33 = vsel %vm565_vm2, %v567_v19, %v569_v20 }
  0x33   : > { %13161 = vst [vmem:[#allocation13_spill] sm:$0xff] %v8618_v14  ;;  %13162 = vst [vmem:[#allocation14_spill] sm:$0xff] %v8620_v15  ;;  %648 = vrot.lane.b32.xlu0 %v570_v33, %s8378_s18 }
  0x34   : > { %13163 = vst [vmem:[#allocation15_spill] sm:$0xff] %v8622_v16  ;;  %13164 = vst [vmem:[#allocation16_spill] sm:$0xff] %v8624_v17 }
  0x35   : > { %485 = vst.msk [vmem:[#allocation4] sm:$0xff] %vm342_vm0, %v8612_v11  ;;  %486 = vst.msk [vmem:[#allocation4 + $0x8] sm:$0xff] %vm342_vm0, %v8614_v12  ;;  %v8787_v11 = vsel %vm13153_vm3, %v776_v54, %v12851_v58 }
  0x36   : > { %399 = vst.msk [vmem:[#allocation2 + $0x19] sm:$0xff] %vm342_vm0, %v8601_v4  ;;  %400 = vst.msk [vmem:[#allocation2 + $0x21] sm:$0xff] %vm342_vm0, %v8603_v5 }
  0x37   : > { %401 = vst.msk [vmem:[#allocation2 + $0x31] sm:$0xff] %vm342_vm0, %v8605_v6  ;;  %402 = vst.msk [vmem:[#allocation2 + $0x39] sm:$0xff] %vm342_vm0, %v8607_v7 }
  0x38   : > { %13165 = vst [vmem:[#allocation17_spill] sm:$0xff] %v8641_v21  ;;  %403 = vst.msk [vmem:[#allocation2 + $0x49] sm:$0xff] %vm342_vm0, %v8618_v14 }
  0x39   : > { %404 = vst.msk [vmem:[#allocation2 + $0x51] sm:$0xff] %vm342_vm0, %v8620_v15  ;;  %405 = vst.msk [vmem:[#allocation2 + $0x61] sm:$0xff] %vm342_vm0, %v8622_v16 }
  0x3a   : > { %406 = vst.msk [vmem:[#allocation2 + $0x69] sm:$0xff] %vm342_vm0, %v8624_v17  ;;  %13166 = vst [vmem:[#allocation18_spill] sm:$0xff] %v8654_v25 }
  0x3b   : > { %13167 = vst [vmem:[#allocation19_spill] sm:$0xff] %v8656_v26  ;;  %13168 = vst [vmem:[#allocation20_spill] sm:$0xff] %v8658_v27 }
  0x3c   : > { %13169 = vst [vmem:[#allocation21_spill] sm:$0xff] %v8660_v28  ;;  %407 = vst.msk [vmem:[#allocation2 + $0x79] sm:$0xff] %vm342_vm0, %v8641_v21 }
  0x3d   : > { %13170 = vst [vmem:[#allocation22_spill] sm:$0xff] %v8669_v34  ;;  %13171 = vst [vmem:[#allocation23_spill] sm:$0xff] %v8671_v35  ;;  %v8736_v55 = vld [vmem:[#allocation2 + $0x18] sm:$0xff]  ;;  %v8738_v56 = vld [vmem:[#allocation2 + $0x20] sm:$0xff] }
  0x3e   : > { %408 = vst.msk [vmem:[#allocation2 + $0x81] sm:$0xff] %vm342_vm0, %v8654_v25  ;;  %409 = vst.msk [vmem:[#allocation2 + $0x91] sm:$0xff] %vm342_vm0, %v8656_v26  ;;  %v8741_v57 = vld [vmem:[#allocation2 + $0x28] sm:$0x3]  ;;  %v571_v59 = vrot.slane %v8736_v55, 1  ;;  %v572_v60 = vrot.slane %v8738_v56, 1 }
  0x3f   : > { %410 = vst.msk [vmem:[#allocation2 + $0x99] sm:$0xff] %vm342_vm0, %v8658_v27  ;;  %411 = vst.msk [vmem:[#allocation2 + $0xa9] sm:$0xff] %vm342_vm0, %v8660_v28  ;;  %v574_v61 = vrot.slane %v8741_v57, 1  ;;  %v8759_v62 = vld [vmem:[#allocation2 + $0x30] sm:$0xff]  ;;  %v8761_v63 = vld [vmem:[#allocation2 + $0x38] sm:$0xff] }
  0x40   : > { %13172 = vst [vmem:[#allocation24_spill] sm:$0xff] %v8684_v38  ;;  %13173 = vst [vmem:[#allocation25_spill] sm:$0xff] %v8686_v39  ;;  %v8763_v1 = vld [vmem:[#allocation2 + $0x48] sm:$0xff]  ;;  %v576_v2 = vrot.slane %v8759_v62, 1  ;;  %v577_v3 = vrot.slane %v8761_v63, 1  ;;  %v8779_v9 = vld [vmem:[#allocation2 + $0x50] sm:$0xff]  ;;  %v8790_v18 = vsel %vm565_vm2, %v571_v59, %v572_v60 }
  0x41   : > { %13174 = vst [vmem:[#allocation26_spill] sm:$0xff] %v8688_v40  ;;  %13175 = vst [vmem:[#allocation27_spill] sm:$0xff] %v8690_v41  ;;  %v8777_v8 = vld [vmem:[#allocation2 + $0x40] sm:$0x3]  ;;  %v581_v10 = vrot.slane %v8763_v1, 1  ;;  %v582_v19 = vrot.slane %v8779_v9, 1  ;;  %650 = vrot.lane.b32.xlu1 %v8790_v18, %s8378_s18  ;;  %v8811_v29 = vsel %vm565_vm2, %v572_v60, %v574_v61 }
  0x42   : > { %412 = vst.msk [vmem:[#allocation2 + $0xb1] sm:$0xff] %vm342_vm0, %v8669_v34  ;;  %413 = vst.msk [vmem:[#allocation2 + $0xc1] sm:$0xff] %vm342_vm0, %v8671_v35  ;;  %v8795_v20 = vld [vmem:[#allocation2 + $0x60] sm:$0xff]  ;;  %v8797_v22 = vld [vmem:[#allocation2 + $0x68] sm:$0xff]  ;;  %v8802_v23 = vsel %vm565_vm2, %v576_v2, %v577_v3  ;;  %v579_v30 = vrot.slane %v8777_v8, 1  ;;  %v779_v34 = vrot.slane %v8616_v13, 2 }
  0x43   : > { %13176 = vst [vmem:[#allocation28_spill] sm:$0xff] %v8697_v43  ;;  %13177 = vst [vmem:[#allocation29_spill] sm:$0xff] %v8699_v44  ;;  %v8808_v24 = vld [vmem:[#allocation2 + $0x78] sm:$0xff]  ;;  %654 = vrot.lane.b32.xlu0 %v8802_v23, %s8378_s18  ;;  %v8823_v33 = vsel %vm565_vm2, %v581_v10, %v582_v19  ;;  %v586_v37 = vrot.slane %v8795_v20, 1  ;;  %v587_v42 = vrot.slane %v8797_v22, 1 }
  0x44   : > { %13178 = vst [vmem:[#allocation30_spill] sm:$0xff] %v8701_v45  ;;  %13179 = vst [vmem:[#allocation31_spill] sm:$0xff] %v8703_v46  ;;  %v8825_v36 = vld [vmem:[#allocation2 + $0x58] sm:$0x3]  ;;  %v8852_v10 = vsel %vm565_vm2, %v577_v3, %v579_v30  ;;  %v8857_v58 = vld [vmem:[#allocation2 + $0x70] sm:$0x3] }
  0x45   : > { %414 = vst.msk [vmem:[#allocation2 + $0xc9] sm:$0xff] %vm342_vm0, %v8684_v38  ;;  %415 = vst.msk [vmem:[#allocation2 + $0xd9] sm:$0xff] %vm342_vm0, %v8686_v39  ;;  %v8816_v31 = vld [vmem:[#allocation2 + $0x80] sm:$0xff]  ;;  %v8820_v32 = vld [vmem:[#allocation2 + $0x90] sm:$0xff]  ;;  %652 = vrot.lane.b32.xlu1 %v8811_v29, %s8378_s18  ;;  %v584_v0 = vrot.slane %v8825_v36, 1  ;;  %v8868_v3 = vsel %vm565_vm2, %v586_v37, %v587_v42  ;;  %v591_v30 = vrot.slane %v8808_v24, 1 }
  0x46   : > { %416 = vst.msk [vmem:[#allocation2 + $0xe1] sm:$0xff] %vm342_vm0, %v8688_v40  ;;  %417 = vst.msk [vmem:[#allocation2 + $0xf1] sm:$0xff] %vm342_vm0, %v8690_v41  ;;  %v8831_v54 = vld [vmem:[#allocation2 + $0x98] sm:$0xff]  ;;  %v8835_v59 = vld [vmem:[#allocation2 + $0xa8] sm:$0xff]  ;;  %v589_v40 = vrot.slane %v8857_v58, 1 }
  0x47   : > { %13180 = vst [vmem:[#allocation32_spill] sm:$0xff] %v8713_v47  ;;  %13181 = vst [vmem:[#allocation33_spill] sm:$0xff] %v8715_v48  ;;  %658 = vrot.lane.b32.xlu0 %v8823_v33, %s8378_s18  ;;  %v597_v39 = vrot.slane %v8831_v54, 1  ;;  %v8951_v25 = vld [vmem:[#allocation2 + $0xa0] sm:$0x3]  ;;  %v601_v21 = vrot.slane %v8835_v59, 1 }
  0x48   : > { %13182 = vst [vmem:[#allocation34_spill] sm:$0xff] %v8717_v49  ;;  %13183 = vst [vmem:[#allocation35_spill] sm:$0xff] %v8719_v50  ;;  %v8941_v27 = vsel %vm565_vm2, %v587_v42, %v589_v40  ;;  %v13205_v40 = vrot.slane %v8614_v12, 2 }
  0x49   : > { %418 = vst.msk [vmem:[#allocation2 + $0xf9] sm:$0xff] %vm342_vm0, %v8697_v43  ;;  %419 = vst.msk [vmem:[#allocation2 + $0x109] sm:$0xff] %vm342_vm0, %v8699_v44  ;;  %v8839_v60 = vld [vmem:[#allocation2 + $0xb0] sm:$0xff]  ;;  %v8847_v61 = vld [vmem:[#allocation2 + $0xc0] sm:$0xff]  ;;  %656 = vrot.lane.b32.xlu1 %v8852_v10, %s8378_s18  ;;  %v8899_v43 = vsel %vm565_vm2, %v582_v19, %v584_v0  ;;  %v596_v19 = vrot.slane %v8820_v32, 1 }
  0x4a   : > { %420 = vst.msk [vmem:[#allocation2 + $0x111] sm:$0xff] %vm342_vm0, %v8701_v45  ;;  %421 = vst.msk [vmem:[#allocation2 + $0x121] sm:$0xff] %vm342_vm0, %v8703_v46  ;;  %v8915_v0 = vld [vmem:[#allocation2 + $0x88] sm:$0x3]  ;;  %v602_v17 = vrot.slane %v8839_v60, 1  ;;  %v8958_v42 = vsel %vm13153_vm3, %v13205_v40, %v779_v34  ;;  %v606_v12 = vrot.slane %v8847_v61, 1 }
  0x4b   : > { %13184 = vst [vmem:[#allocation36_spill] sm:$0xff] %v8729_v51  ;;  %13185 = vst [vmem:[#allocation37_spill] sm:$0xff] %v8731_v52  ;;  %662 = vrot.lane.b32.xlu0 %v8868_v3, %s8378_s18  ;;  %v594_v26 = vrot.slane %v8915_v0, 1  ;;  %v8949_v13 = vsel %vm565_vm2, %v596_v19, %v597_v39  ;;  %v599_v19 = vrot.slane %v8951_v25, 1  ;;  %v8971_v5 = vld [vmem:[#allocation2 + $0xb8] sm:$0x3] }
  0x4c   : > { %13186 = vst [vmem:[#allocation38_spill] sm:$0xff] %v8733_v53  ;;  %422 = vst.msk [vmem:[#allocation2 + $0x129] sm:$0xff] %vm342_vm0, %v8713_v47  ;;  %v8849_v2 = vld [vmem:[#allocation2 + $0xc8] sm:$0xff]  ;;  %v8969_v7 = vsel %vm565_vm2, %v601_v21, %v602_v17  ;;  %v8986_v40 = vld [vmem:[#allocation2 + $0xd0] sm:$0x3] }
  0x4d   : > { %423 = vst.msk [vmem:[#allocation2 + $0x139] sm:$0xff] %vm342_vm0, %v8715_v48  ;;  %424 = vst.msk [vmem:[#allocation2 + $0x141] sm:$0xff] %vm342_vm0, %v8717_v49  ;;  %660 = vrot.lane.b32.xlu1 %v8899_v43, %s8378_s18  ;;  %v607_v34 = vrot.slane %v8849_v2, 1  ;;  %v9001_v6 = vld [vmem:[#allocation2 + $0xe8] sm:$0x3] }
  0x4e   : > { %425 = vst.msk [vmem:[#allocation2 + $0x151] sm:$0xff] %vm342_vm0, %v8719_v50  ;;  %487 = vst.msk [vmem:[#allocation4 + $0x10] sm:$0xff] %vm342_vm0, %v8736_v55  ;;  %v8876_v50 = vld [vmem:[#allocation2 + $0xf0] sm:$0xff] }
  0x4f   : > { %488 = vst.msk [vmem:[#allocation4 + $0x18] sm:$0xff] %vm342_vm0, %v8738_v56  ;;  %426 = vst.msk [vmem:[#allocation2 + $0x159] sm:$0xff] %vm342_vm0, %v8729_v51  ;;  %v592_v51 = vrot.slane %v8816_v31, 1  ;;  %v8984_v21 = vsel %vm565_vm2, %v606_v12, %v607_v34  ;;  %v616_v4 = vrot.slane %v8876_v50, 1 }
  0x50   : > { %427 = vst.msk [vmem:[#allocation2 + $0x169] sm:$0xff] %vm342_vm0, %v8731_v52  ;;  %428 = vst.msk [vmem:[#allocation2 + $0x171] sm:$0xff] %vm342_vm0, %v8733_v53  ;;  %v8863_v53 = vld [vmem:[#allocation2 + $0xd8] sm:$0xff]  ;;  %v8865_v52 = vld [vmem:[#allocation2 + $0xe0] sm:$0xff] }
  0x51   : > { %489 = vst.msk [vmem:[#allocation4 + $0x20] sm:$0xff] %vm342_vm0, %v8759_v62  ;;  %490 = vst.msk [vmem:[#allocation4 + $0x28] sm:$0xff] %vm342_vm0, %v8761_v63  ;;  %v8878_v49 = vld [vmem:[#allocation2 + $0xf8] sm:$0xff]  ;;  %v8880_v48 = vld [vmem:[#allocation2 + $0x108] sm:$0xff]  ;;  %v8913_v41 = vsel %vm565_vm2, %v591_v30, %v592_v51  ;;  %664 = vrot.lane.b32.xlu1 %v8941_v27, %s8378_s18  ;;  %v8963_v15 = vsel %vm565_vm2, %v592_v51, %v594_v26  ;;  %v8978_v26 = vsel %vm565_vm2, %v597_v39, %v599_v19 }
  0x52   : > { %491 = vst.msk [vmem:[#allocation4 + $0x30] sm:$0xff] %vm342_vm0, %v8763_v1  ;;  %492 = vst.msk [vmem:[#allocation4 + $0x38] sm:$0xff] %vm342_vm0, %v8779_v9  ;;  %v8886_v37 = vld [vmem:[#allocation2 + $0x110] sm:$0xff]  ;;  %v8894_v47 = vld [vmem:[#allocation2 + $0x120] sm:$0xff]  ;;  %666 = vrot.lane.b32.xlu0 %v8913_v41, %s8378_s18  ;;  %v604_v51 = vrot.slane %v8971_v5, 1  ;;  %v611_v16 = vrot.slane %v8863_v53, 1 }
  0x53   : > { %493 = vst.msk [vmem:[#allocation4 + $0x40] sm:$0xff] %vm342_vm0, %v8795_v20  ;;  %494 = vst.msk [vmem:[#allocation4 + $0x48] sm:$0xff] %vm342_vm0, %v8797_v22  ;;  %v8896_v45 = vld [vmem:[#allocation2 + $0x128] sm:$0xff]  ;;  %v612_v14 = vrot.slane %v8865_v52, 1  ;;  %v609_v19 = vrot.slane %v8986_v40, 1 }
  0x54   : > { %495 = vst.msk [vmem:[#allocation4 + $0x50] sm:$0xff] %vm342_vm0, %v8808_v24  ;;  %496 = vst.msk [vmem:[#allocation4 + $0x58] sm:$0xff] %vm342_vm0, %v8816_v31  ;;  %v8908_v46 = vld [vmem:[#allocation2 + $0x138] sm:$0xff]  ;;  %v8910_v44 = vld [vmem:[#allocation2 + $0x140] sm:$0xff]  ;;  %v8993_v39 = vsel %vm565_vm2, %v602_v17, %v604_v51  ;;  %v614_v51 = vrot.slane %v9001_v6, 1 }
  0x55   : > { %497 = vst.msk [vmem:[#allocation4 + $0x60] sm:$0xff] %vm342_vm0, %v8820_v32  ;;  %498 = vst.msk [vmem:[#allocation4 + $0x68] sm:$0xff] %vm342_vm0, %v8831_v54  ;;  %v8923_v38 = vld [vmem:[#allocation2 + $0x150] sm:$0xff]  ;;  %668 = vrot.lane.b32.xlu1 %v8963_v15, %s8378_s18  ;;  %v8999_v12 = vsel %vm565_vm2, %v611_v16, %v612_v14  ;;  %v9008_v17 = vsel %vm565_vm2, %v607_v34, %v609_v19 }
  0x56   : > { %499 = vst.msk [vmem:[#allocation4 + $0x70] sm:$0xff] %vm342_vm0, %v8835_v59  ;;  %500 = vst.msk [vmem:[#allocation4 + $0x78] sm:$0xff] %vm342_vm0, %v8839_v60  ;;  %v8925_v35 = vld [vmem:[#allocation2 + $0x158] sm:$0xff]  ;;  %670 = vrot.lane.b32.xlu0 %v8949_v13, %s8378_s18  ;;  %v9023_v34 = vsel %vm565_vm2, %v612_v14, %v614_v51 }
  0x57   : > { %13187 = vst [vmem:[#allocation39_spill] sm:$0xff] %v8852_v10  ;;  %501 = vst.msk [vmem:[#allocation4 + $0x80] sm:$0xff] %vm342_vm0, %v8847_v61  ;;  %v8931_v30 = vld [vmem:[#allocation2 + $0x168] sm:$0xff]  ;;  %v8936_v28 = vld [vmem:[#allocation2 + $0x170] sm:$0xff] }
  0x58   : > { %502 = vst.msk [vmem:[#allocation4 + $0x88] sm:$0xff] %vm342_vm0, %v8849_v2  ;;  %13188 = vst [vmem:[#allocation40_spill] sm:$0xff] %v8868_v3 }
  0x59   : > { %503 = vst.msk [vmem:[#allocation4 + $0x90] sm:$0xff] %vm342_vm0, %v8863_v53  ;;  %504 = vst.msk [vmem:[#allocation4 + $0x98] sm:$0xff] %vm342_vm0, %v8865_v52  ;;  %672 = vrot.lane.b32.xlu1 %v8978_v26, %s8378_s18 }
  0x5a   : > { %13189 = vst [vmem:[#allocation41_spill] sm:$0xff] %v8876_v50  ;;  %13190 = vst [vmem:[#allocation42_spill] sm:$0xff] %v8878_v49  ;;  %674 = vrot.lane.b32.xlu0 %v8969_v7, %s8378_s18 }
  0x5b   : > { %13191 = vst [vmem:[#allocation43_spill] sm:$0xff] %v8880_v48  ;;  %505 = vst.msk [vmem:[#allocation4 + $0xa0] sm:$0xff] %vm342_vm0, %v8876_v50 }
  0x5c   : > { %506 = vst.msk [vmem:[#allocation4 + $0xa8] sm:$0xff] %vm342_vm0, %v8878_v49  ;;  %13192 = vst [vmem:[#allocation44_spill] sm:$0xff] %v8886_v37 }
  0x5d   : > { %507 = vst.msk [vmem:[#allocation4 + $0xb0] sm:$0xff] %vm342_vm0, %v8880_v48  ;;  %508 = vst.msk [vmem:[#allocation4 + $0xb8] sm:$0xff] %vm342_vm0, %v8886_v37  ;;  %676 = vrot.lane.b32.xlu1 %v8993_v39, %s8378_s18 }
  0x5e   : > { %13193 = vst [vmem:[#allocation45_spill] sm:$0xff] %v8894_v47  ;;  %13194 = vst [vmem:[#allocation46_spill] sm:$0xff] %v8896_v45  ;;  %678 = vrot.lane.b32.xlu0 %v8984_v21, %s8378_s18 }
  0x5f   : > { %13195 = vst [vmem:[#allocation47_spill] sm:$0xff] %v8899_v43  ;;  %509 = vst.msk [vmem:[#allocation4 + $0xc0] sm:$0xff] %vm342_vm0, %v8894_v47  ;;  %v642_v43 = vrot.slane %v8936_v28, 1 }
  0x60   : > { %510 = vst.msk [vmem:[#allocation4 + $0xc8] sm:$0xff] %vm342_vm0, %v8896_v45  ;;  %13196 = vst [vmem:[#allocation48_spill] sm:$0xff] %v8908_v46 }
  0x61   : > { %13197 = vst [vmem:[#allocation49_spill] sm:$0xff] %v8910_v44  ;;  %13198 = vst [vmem:[#allocation50_spill] sm:$0xff] %v8913_v41  ;;  %680 = vrot.lane.b32.xlu1 %v9008_v17, %s8378_s18  ;;  %v637_v41 = vrot.slane %v8925_v35, 1 }
  0x62   : > { %511 = vst.msk [vmem:[#allocation4 + $0xd0] sm:$0xff] %vm342_vm0, %v8908_v46  ;;  %512 = vst.msk [vmem:[#allocation4 + $0xd8] sm:$0xff] %vm342_vm0, %v8910_v44  ;;  %682 = vrot.lane.b32.xlu0 %v8999_v12, %s8378_s18 }
  0x63   : > { %13199 = vst [vmem:[#allocation51_spill] sm:$0xff] %v8923_v38  ;;  %13200 = vst [vmem:[#allocation52_spill] sm:$0xff] %v8925_v35 }
  0x64   : > { %513 = vst.msk [vmem:[#allocation4 + $0xe0] sm:$0xff] %vm342_vm0, %v8923_v38  ;;  %514 = vst.msk [vmem:[#allocation4 + $0xe8] sm:$0xff] %vm342_vm0, %v8925_v35 }
  0x65   : > { %13201 = vst [vmem:[#allocation53_spill] sm:$0xff] %v8931_v30  ;;  %13202 = vst [vmem:[#allocation54_spill] sm:$0xff] %v8936_v28  ;;  %684 = vrot.lane.b32.xlu1 %v9023_v34, %s8378_s18 }
  0x66   : > { %515 = vst.msk [vmem:[#allocation4 + $0xf0] sm:$0xff] %vm342_vm0, %v8931_v30  ;;  %13203 = vst [vmem:[#allocation55_spill] sm:$0xff] %v8941_v27  ;;  %v632_v27 = vrot.slane %v8910_v44, 1 }
  0x67   : > { %516 = vst.msk [vmem:[#allocation4 + $0xf8] sm:$0xff] %vm342_vm0, %v8936_v28  ;;  %13204 = vst [vmem:[#allocation56_spill] sm:$0xff] %v8949_v13  ;;  %v627_v13 = vrot.slane %v8896_v45, 1 }
  0x68   : > { %13206 = vst [vmem:[#allocation57_spill] sm:$0xff] %v8963_v15  ;;  %13207 = vst [vmem:[#allocation58_spill] sm:$0xff] %v8969_v7  ;;  %v617_v7 = vrot.slane %v8878_v49, 1  ;;  %v622_v15 = vrot.slane %v8886_v37, 1 }
  0x69   : > { %13208 = vst [vmem:[#allocation59_spill] sm:$0xff] %v8978_v26  ;;  %13209 = vst [vmem:[#allocation60_spill] sm:$0xff] %v8984_v21  ;;  %v9016_v21 = vld [vmem:[#allocation2 + $0x100] sm:$0x3]  ;;  %v621_v26 = vrot.slane %v8880_v48, 1 }
  0x6a   : > { %13210 = vst [vmem:[#allocation61_spill] sm:$0xff] %v8993_v39  ;;  %13211 = vst [vmem:[#allocation62_spill] sm:$0xff] %v8999_v12  ;;  %v9014_v16 = vsel %vm565_vm2, %v616_v4, %v617_v7  ;;  %v619_v19 = vrot.slane %v9016_v21, 1  ;;  %v9031_v12 = vld [vmem:[#allocation2 + $0x118] sm:$0x3]  ;;  %v626_v39 = vrot.slane %v8894_v47, 1 }
  0x6b   : > { %13212 = vst [vmem:[#allocation63_spill] sm:$0xff] %v9008_v17  ;;  %13213 = vst [vmem:[#allocation64_spill] sm:$0xff] %v9014_v16  ;;  %686 = vrot.lane.b32.xlu0 %v9014_v16, %s8378_s18  ;;  %v9029_v4 = vsel %vm565_vm2, %v621_v26, %v622_v15  ;;  %v624_v51 = vrot.slane %v9031_v12, 1  ;;  %v9046_v16 = vld [vmem:[#allocation2 + $0x130] sm:$0x3]  ;;  %v631_v17 = vrot.slane %v8908_v46, 1 }
  0x6c   : > { %13214 = vst [vmem:[#allocation65_spill] sm:$0xff] %v9023_v34  ;;  %13215 = vst [vmem:[#allocation66_spill] sm:$0xff] %v9029_v4  ;;  %v9038_v14 = vsel %vm565_vm2, %v617_v7, %v619_v19  ;;  %v9044_v26 = vsel %vm565_vm2, %v626_v39, %v627_v13  ;;  %v629_v19 = vrot.slane %v9046_v16, 1  ;;  %v636_v34 = vrot.slane %v8923_v38, 1 }
  0x6d   : > { %13216 = vst [vmem:[#allocation67_spill] sm:$0xff] %v9038_v14  ;;  %13217 = vst [vmem:[#allocation68_spill] sm:$0xff] %v9044_v26  ;;  %688 = vrot.lane.b32.xlu1 %v9038_v14, %s8378_s18  ;;  %v9053_v7 = vsel %vm565_vm2, %v622_v15, %v624_v51  ;;  %v9059_v39 = vsel %vm565_vm2, %v631_v17, %v632_v27  ;;  %v641_v14 = vrot.slane %v8931_v30, 1 }
  0x6e   : > { %13218 = vst [vmem:[#allocation69_spill] sm:$0xff] %v9053_v7  ;;  %13219 = vst [vmem:[#allocation70_spill] sm:$0xff] %v9059_v39  ;;  %v9068_v15 = vsel %vm565_vm2, %v627_v13, %v629_v19  ;;  %v9074_v17 = vsel %vm565_vm2, %v636_v34, %v637_v41 }
  0x6f   : > { %690 = vrot.lane.b32.xlu0 %v9029_v4, %s8378_s18  ;;  %v9061_v4 = vld [vmem:[#allocation2 + $0x148] sm:$0x3]  ;;  %13220 = vst [vmem:[#allocation71_spill] sm:$0xff] %v9068_v15  ;;  %13221 = vst [vmem:[#allocation72_spill] sm:$0xff] %v9074_v17  ;;  %v9090_v34 = vsel %vm565_vm2, %v641_v14, %v642_v43 }
  0x70   : > { %v634_v51 = vrot.slane %v9061_v4, 1  ;;  %13223 = vst [vmem:[#allocation74_spill] sm:$0xff] %v9090_v34 }
  0x71   : > { %692 = vrot.lane.b32.xlu1 %v9053_v7, %s8378_s18  ;;  %v9092_v7 = vld [vmem:[#allocation2 + $0x178] sm:$0x3] }
  0x72   : > { %v9083_v13 = vsel %vm565_vm2, %v632_v27, %v634_v51  ;;  %v644_v14 = vrot.slane %v9092_v7, 1  ;;  %v782_v51 = vrot.slane %v8738_v56, 2 }
  0x73   : > { %694 = vrot.lane.b32.xlu0 %v9044_v26, %s8378_s18  ;;  %v9076_v26 = vld [vmem:[#allocation2 + $0x160] sm:$0x3]  ;;  %13222 = vst [vmem:[#allocation73_spill] sm:$0xff] %v9083_v13 }
  0x74   : > { %v639_v19 = vrot.slane %v9076_v26, 1 }
  0x75   : > { %696 = vrot.lane.b32.xlu1 %v9068_v15, %s8378_s18 }
  0x76   : > { %v9105_v27 = vsel %vm565_vm2, %v637_v41, %v639_v19  ;;  %v786_v19 = vrot.slane %v8759_v62, 2 }
  0x77   : > { %698 = vrot.lane.b32.xlu0 %v9059_v39, %s8378_s18  ;;  %v8110_v39 = vld [vmem:[%s8596_s17 + $0x78] sm:$0xff]   ;;  %13226 = vst [vmem:[#allocation77_spill] sm:$0xff] %v9105_v27  ;;  %s8389_s17 = smov 56  }
  0x78   : > { %v9094_v3 = vunpack.c.l.bf16 %v8110_v39  ;;  %v9096_v10 = vunpack.c.h.bf16 %v8110_v39  ;;  %v781_v39 = vrot.slane %v8736_v55, 2 }
  0x79   : > { %700 = vrot.lane.b32.xlu1 %v9083_v13, %s8378_s18 }
  0x7a   : > { %13224 = vst [vmem:[#allocation75_spill] sm:$0xff] %v9094_v3  ;;  %13225 = vst [vmem:[#allocation76_spill] sm:$0xff] %v9096_v10  ;;  %v9120_v41 = vsel %vm13153_vm3, %v781_v39, %v782_v51  ;;  %v792_v39 = vrot.slane %v8779_v9, 2 }
  0x7b   : > { %702 = vrot.lane.b32.xlu0 %v9074_v17, %s8378_s18  ;;  %429 = vst.msk [vmem:[#allocation2 + $0x181] sm:$0xff] %vm342_vm0, %v9094_v3  ;;  %430 = vst.msk [vmem:[#allocation2 + $0x189] sm:$0xff] %vm342_vm0, %v9096_v10  ;;  %v9115_v3 = vsel %vm565_vm2, %v642_v43, %v644_v14  ;;  %v787_v10 = vrot.slane %v8761_v63, 2  ;;  %v784_v43 = vrot.slane %v8741_v57, 2 }
  0x7c   : > { %13227 = vst [vmem:[#allocation78_spill] sm:$0xff] %v9115_v3  ;;  %13228 = vst [vmem:[#allocation79_spill] sm:$0xff] %v9120_v41 }
  0x7d   : > { %704 = vrot.lane.b32.xlu1 %v9105_v27, %s8378_s18  ;;  %v9130_v14 = vsel %vm13153_vm3, %v786_v19, %v787_v10  ;;  %v9137_v27 = vsel %vm13153_vm3, %v782_v51, %v784_v43  ;;  %v796_v19 = vrot.slane %v8795_v20, 2  ;;  %v794_v51 = vrot.slane %v8825_v36, 2 }
  0x7e   : > { %13229 = vst [vmem:[#allocation80_spill] sm:$0xff] %v9137_v27  ;;  %v801_v43 = vrot.slane %v8808_v24, 2 }
  0x7f   : > { %706 = vrot.lane.b32.xlu0 %v9090_v34, %s8378_s18 }
  0x81   : > { %708 = vrot.lane.b32.xlu1 %v9115_v3, %s8378_s18  ;;  %v797_v3 = vrot.slane %v8797_v22, 2 }
  0x83   : > { %856 = vrot.lane.b32.xlu0 %v8787_v11, %s8379_s19  ;;  %v791_v11 = vrot.slane %v8763_v1, 2 }
  0x85   : > { %858 = vrot.lane.b32.xlu1 %v8958_v42, %s8379_s19  ;;  %v9143_v57 = vsel %vm13153_vm3, %v791_v11, %v792_v39  ;;  %v802_v11 = vrot.slane %v8816_v31, 2 }
  0x87   : > { %860 = vrot.lane.b32.xlu0 %v9120_v41, %s8379_s19  ;;  %v789_v41 = vrot.slane %v8777_v8, 2  ;;  %v9156_v8 = vsel %vm13153_vm3, %v796_v19, %v797_v3  ;;  %v9169_v36 = vsel %vm13153_vm3, %v801_v43, %v802_v11  ;;  %v807_v19 = vrot.slane %v8831_v54, 2 }
  0x88   : > { %v812_v43 = vrot.slane %v8839_v60, 2 }
  0x89   : > { %862 = vrot.lane.b32.xlu1 %v9137_v27, %s8379_s19  ;;  %v9150_v42 = vsel %vm13153_vm3, %v787_v10, %v789_v41  ;;  %v9163_v27 = vsel %vm13153_vm3, %v792_v39, %v794_v51  ;;  %v799_v10 = vrot.slane %v8857_v58, 2  ;;  %v806_v41 = vrot.slane %v8820_v32, 2 }
  0x8a   : > { %13230 = vst [vmem:[#allocation81_spill] sm:$0xff] %v9150_v42  ;;  %13231 = vst [vmem:[#allocation82_spill] sm:$0xff] %v9163_v27  ;;  %v804_v39 = vrot.slane %v8915_v0, 2  ;;  %v811_v51 = vrot.slane %v8835_v59, 2 }
  0x8b   : > { %864 = vrot.lane.b32.xlu0 %v9130_v14, %s8379_s19  ;;  %v9182_v58 = vsel %vm13153_vm3, %v806_v41, %v807_v19  ;;  %v817_v41 = vrot.slane %v8849_v2, 2 }
  0x8c   : > { %v9195_v0 = vsel %vm13153_vm3, %v811_v51, %v812_v43  ;;  %v822_v51 = vrot.slane %v8865_v52, 2 }
  0x8d   : > { %866 = vrot.lane.b32.xlu1 %v9150_v42, %s8379_s19  ;;  %v9176_v42 = vsel %vm13153_vm3, %v797_v3, %v799_v10  ;;  %v809_v3 = vrot.slane %v8951_v25, 2  ;;  %v816_v10 = vrot.slane %v8847_v61, 2 }
  0x8e   : > { %13232 = vst [vmem:[#allocation83_spill] sm:$0xff] %v9176_v42 }
  0x8f   : > { %868 = vrot.lane.b32.xlu0 %v9143_v57, %s8379_s19  ;;  %v9208_v25 = vsel %vm13153_vm3, %v816_v10, %v817_v41  ;;  %v827_v10 = vrot.slane %v8878_v49, 2 }
  0x91   : > { %870 = vrot.lane.b32.xlu1 %v9163_v27, %s8379_s19  ;;  %v9189_v27 = vsel %vm13153_vm3, %v802_v11, %v804_v39  ;;  %v814_v11 = vrot.slane %v8971_v5, 2  ;;  %v821_v39 = vrot.slane %v8863_v53, 2 }
  0x92   : > { %13233 = vst [vmem:[#allocation84_spill] sm:$0xff] %v9189_v27 }
  0x93   : > { %872 = vrot.lane.b32.xlu0 %v9156_v8, %s8379_s19  ;;  %v9221_v5 = vsel %vm13153_vm3, %v821_v39, %v822_v51  ;;  %v832_v39 = vrot.slane %v8886_v37, 2 }
  0x94   : > { %13236 = vst [vmem:[#allocation87_spill] sm:$0xff] %v9221_v5 }
  0x95   : > { %874 = vrot.lane.b32.xlu1 %v9176_v42, %s8379_s19  ;;  %v9202_v42 = vsel %vm13153_vm3, %v807_v19, %v809_v3  ;;  %v819_v19 = vrot.slane %v8986_v40, 2  ;;  %v826_v3 = vrot.slane %v8876_v50, 2 }
  0x96   : > { %13234 = vst [vmem:[#allocation85_spill] sm:$0xff] %v9202_v42 }
  0x97   : > { %876 = vrot.lane.b32.xlu0 %v9169_v36, %s8379_s19  ;;  %v9234_v40 = vsel %vm13153_vm3, %v826_v3, %v827_v10  ;;  %v837_v3 = vrot.slane %v8896_v45, 2 }
  0x98   : > { %13238 = vst [vmem:[#allocation89_spill] sm:$0xff] %v9234_v40 }
  0x99   : > { %878 = vrot.lane.b32.xlu1 %v9189_v27, %s8379_s19  ;;  %v9215_v27 = vsel %vm13153_vm3, %v812_v43, %v814_v11  ;;  %v824_v43 = vrot.slane %v9001_v6, 2  ;;  %v831_v11 = vrot.slane %v8880_v48, 2 }
  0x9a   : > { %13235 = vst [vmem:[#allocation86_spill] sm:$0xff] %v9215_v27 }
  0x9b   : > { %880 = vrot.lane.b32.xlu0 %v9182_v58, %s8379_s19  ;;  %v9247_v6 = vsel %vm13153_vm3, %v831_v11, %v832_v39  ;;  %v842_v11 = vrot.slane %v8910_v44, 2 }
  0x9c   : > { %13240 = vst [vmem:[#allocation91_spill] sm:$0xff] %v9247_v6 }
  0x9d   : > { %882 = vrot.lane.b32.xlu1 %v9202_v42, %s8379_s19  ;;  %v9228_v42 = vsel %vm13153_vm3, %v817_v41, %v819_v19  ;;  %v829_v41 = vrot.slane %v9016_v21, 2  ;;  %v836_v19 = vrot.slane %v8894_v47, 2 }
  0x9e   : > { %13237 = vst [vmem:[#allocation88_spill] sm:$0xff] %v9228_v42 }
  0x9f   : > { %884 = vrot.lane.b32.xlu0 %v9195_v0, %s8379_s19  ;;  %v9260_v21 = vsel %vm13153_vm3, %v836_v19, %v837_v3  ;;  %v846_v19 = vrot.slane %v8923_v38, 2 }
  0xa0   : > { %13242 = vst [vmem:[#allocation93_spill] sm:$0xff] %v9260_v21 }
  0xa1   : > { %886 = vrot.lane.b32.xlu1 %v9215_v27, %s8379_s19  ;;  %v9241_v27 = vsel %vm13153_vm3, %v822_v51, %v824_v43  ;;  %v834_v51 = vrot.slane %v9031_v12, 2  ;;  %v841_v43 = vrot.slane %v8908_v46, 2  ;;  %v647_v12 = vpop.permute.xlu0 %646 }
  0xa2   : > { %13239 = vst [vmem:[#allocation90_spill] sm:$0xff] %v9241_v27  ;;  %743 = vst.msk [vmem:[#allocation4] sm:$0xff] %vm742_vm4, %v647_v12 }
  0xa3   : > { %888 = vrot.lane.b32.xlu0 %v9208_v25, %s8379_s19 }
  0xa5   : > { %890 = vrot.lane.b32.xlu1 %v9228_v42, %s8379_s19  ;;  %v9254_v42 = vsel %vm13153_vm3, %v827_v10, %v829_v41  ;;  %v839_v10 = vrot.slane %v9046_v16, 2  ;;  %v9273_v41 = vsel %vm13153_vm3, %v841_v43, %v842_v11  ;;  %v844_v16 = vrot.slane %v9061_v4, 2 }
  0xa6   : > { %13241 = vst [vmem:[#allocation92_spill] sm:$0xff] %v9254_v42  ;;  %13243 = vst [vmem:[#allocation94_spill] sm:$0xff] %v9273_v41  ;;  %v849_v4 = vrot.slane %v9076_v26, 2  ;;  %v854_v26 = vrot.slane %v9092_v7, 2 }
  0xa7   : > { %892 = vrot.lane.b32.xlu0 %v9221_v5, %s8379_s19 }
  0xa9   : > { %894 = vrot.lane.b32.xlu1 %v9241_v27, %s8379_s19  ;;  %v9267_v27 = vsel %vm13153_vm3, %v832_v39, %v834_v51  ;;  %v9281_v39 = vsel %vm13153_vm3, %v837_v3, %v839_v10  ;;  %v649_v51 = vpop.permute.xlu0 %648  ;;  %v9295_v3 = vsel %vm13153_vm3, %v842_v11, %v844_v16 }
  0xaa   : > { %744 = vst.msk [vmem:[#allocation4 + $0x8] sm:$0xff] %vm742_vm4, %v649_v51 }
  0xab   : > { %896 = vrot.lane.b32.xlu0 %v9234_v40, %s8379_s19 }
  0xad   : > { %898 = vrot.lane.b32.xlu1 %v9254_v42, %s8379_s19  ;;  %v852_v42 = vrot.slane %v8936_v28, 2 }
  0xaf   : > { %900 = vrot.lane.b32.xlu0 %v9247_v6, %s8379_s19  ;;  %v847_v6 = vrot.slane %v8925_v35, 2  ;;  %v9318_v51 = vsel %vm13153_vm3, %v852_v42, %v854_v26 }
  0xb1   : > { %902 = vrot.lane.b32.xlu1 %v9267_v27, %s8379_s19  ;;  %v9287_v43 = vsel %vm13153_vm3, %v846_v19, %v847_v6  ;;  %v9308_v11 = vsel %vm13153_vm3, %v847_v6, %v849_v4 }
  0xb3   : > { %904 = vrot.lane.b32.xlu0 %v9260_v21, %s8379_s19  ;;  %v851_v21 = vrot.slane %v8931_v30, 2  ;;  %v651_v10 = vpop.permute.xlu1 %650 }
  0xb4   : > { %745 = vst.msk [vmem:[#allocation4 + $0x10] sm:$0xff] %vm742_vm4, %v651_v10 }
  0xb5   : > { %906 = vrot.lane.b32.xlu1 %v9281_v39, %s8379_s19  ;;  %v9301_v12 = vsel %vm13153_vm3, %v851_v21, %v852_v42  ;;  %v655_v19 = vpop.permute.xlu0 %654 }
  0xb6   : > { %747 = vst.msk [vmem:[#allocation4 + $0x20] sm:$0xff] %vm742_vm4, %v655_v19 }
  0xb7   : > { %908 = vrot.lane.b32.xlu0 %v9273_v41, %s8379_s19  ;;  %v653_v16 = vpop.permute.xlu1 %652 }
  0xb8   : > { %746 = vst.msk [vmem:[#allocation4 + $0x18] sm:$0xff] %vm742_vm4, %v653_v16 }
  0xb9   : > { %910 = vrot.lane.b32.xlu1 %v9295_v3, %s8379_s19  ;;  %v659_v21 = vpop.permute.xlu0 %658 }
  0xba   : > { %749 = vst.msk [vmem:[#allocation4 + $0x30] sm:$0xff] %vm742_vm4, %v659_v21 }
  0xbb   : > { %912 = vrot.lane.b32.xlu0 %v9287_v43, %s8379_s19  ;;  %v657_v6 = vpop.permute.xlu1 %656 }
  0xbc   : > { %748 = vst.msk [vmem:[#allocation4 + $0x28] sm:$0xff] %vm742_vm4, %v657_v6 }
  0xbd   : > { %914 = vrot.lane.b32.xlu1 %v9308_v11, %s8379_s19  ;;  %v663_v7 = vpop.permute.xlu0 %662 }
  0xbe   : > { %751 = vst.msk [vmem:[#allocation4 + $0x40] sm:$0xff] %vm742_vm4, %v663_v7 }
  0xbf   : > { %916 = vrot.lane.b32.xlu0 %v9301_v12, %s8379_s19  ;;  %v661_v4 = vpop.permute.xlu1 %660 }
  0xc0   : > { %750 = vst.msk [vmem:[#allocation4 + $0x38] sm:$0xff] %vm742_vm4, %v661_v4 }
  0xc1   : > { %918 = vrot.lane.b32.xlu1 %v9318_v51, %s8379_s19 }
  0xc3   : > { %987 = vrot.lane.b32.xlu0 %v8736_v55, %s8380_s20  ;;  %v665_v55 = vpop.permute.xlu1 %664 }
  0xc4   : > { %v667_v42 = vpop.permute.xlu0 %666  ;;  %752 = vst.msk [vmem:[#allocation4 + $0x48] sm:$0xff] %vm742_vm4, %v665_v55 }
  0xc5   : > { %989 = vrot.lane.b32.xlu1 %v8738_v56, %s8380_s20  ;;  %753 = vst.msk [vmem:[#allocation4 + $0x50] sm:$0xff] %vm742_vm4, %v667_v42 }
  0xc7   : > { %991 = vrot.lane.b32.xlu0 %v8759_v62, %s8380_s20  ;;  %v669_v19 = vpop.permute.xlu1 %668 }
  0xc8   : > { %v671_v10 = vpop.permute.xlu0 %670  ;;  %754 = vst.msk [vmem:[#allocation4 + $0x58] sm:$0xff] %vm742_vm4, %v669_v19 }
  0xc9   : > { %993 = vrot.lane.b32.xlu1 %v8761_v63, %s8380_s20  ;;  %755 = vst.msk [vmem:[#allocation4 + $0x60] sm:$0xff] %vm742_vm4, %v671_v10 }
  0xcb   : > { %995 = vrot.lane.b32.xlu0 %v8763_v1, %s8380_s20  ;;  %v673_v26 = vpop.permute.xlu1 %672 }
  0xcc   : > { %v675_v56 = vpop.permute.xlu0 %674  ;;  %756 = vst.msk [vmem:[#allocation4 + $0x68] sm:$0xff] %vm742_vm4, %v673_v26 }
  0xcd   : > { %997 = vrot.lane.b32.xlu1 %v8779_v9, %s8380_s20  ;;  %757 = vst.msk [vmem:[#allocation4 + $0x70] sm:$0xff] %vm742_vm4, %v675_v56 }
  0xcf   : > { %999 = vrot.lane.b32.xlu0 %v8795_v20, %s8380_s20  ;;  %v677_v21 = vpop.permute.xlu1 %676 }
  0xd0   : > { %v679_v16 = vpop.permute.xlu0 %678  ;;  %758 = vst.msk [vmem:[#allocation4 + $0x78] sm:$0xff] %vm742_vm4, %v677_v21 }
  0xd1   : > { %1001 = vrot.lane.b32.xlu1 %v8797_v22, %s8380_s20  ;;  %759 = vst.msk [vmem:[#allocation4 + $0x80] sm:$0xff] %vm742_vm4, %v679_v16 }
  0xd3   : > { %1003 = vrot.lane.b32.xlu0 %v8808_v24, %s8380_s20  ;;  %v681_v7 = vpop.permute.xlu1 %680 }
  0xd4   : > { %v683_v6 = vpop.permute.xlu0 %682  ;;  %760 = vst.msk [vmem:[#allocation4 + $0x88] sm:$0xff] %vm742_vm4, %v681_v7 }
  0xd5   : > { %1005 = vrot.lane.b32.xlu1 %v8816_v31, %s8380_s20  ;;  %761 = vst.msk [vmem:[#allocation4 + $0x90] sm:$0xff] %vm742_vm4, %v683_v6 }
  0xd7   : > { %1007 = vrot.lane.b32.xlu0 %v8820_v32, %s8380_s20  ;;  %v685_v42 = vpop.permute.xlu1 %684 }
  0xd8   : > { %762 = vst.msk [vmem:[#allocation4 + $0x98] sm:$0xff] %vm742_vm4, %v685_v42 }
  0xd9   : > { %1009 = vrot.lane.b32.xlu1 %v8831_v54, %s8380_s20 }
  0xdb   : > { %1011 = vrot.lane.b32.xlu0 %v8835_v59, %s8380_s20 }
  0xdd   : > { %v687_v4 = vpop.permute.xlu0 %686  ;;  %1013 = vrot.lane.b32.xlu1 %v8839_v60, %s8380_s20 }
  0xde   : > { %763 = vst.msk [vmem:[#allocation4 + $0xa0] sm:$0xff] %vm742_vm4, %v687_v4 }
  0xdf   : > { %1015 = vrot.lane.b32.xlu0 %v8847_v61, %s8380_s20  ;;  %v689_v10 = vpop.permute.xlu1 %688 }
  0xe0   : > { %764 = vst.msk [vmem:[#allocation4 + $0xa8] sm:$0xff] %vm742_vm4, %v689_v10 }
  0xe1   : > { %v691_v55 = vpop.permute.xlu0 %690  ;;  %1017 = vrot.lane.b32.xlu1 %v8849_v2, %s8380_s20 }
  0xe2   : > { %765 = vst.msk [vmem:[#allocation4 + $0xb0] sm:$0xff] %vm742_vm4, %v691_v55 }
  0xe3   : > { %1019 = vrot.lane.b32.xlu0 %v8863_v53, %s8380_s20  ;;  %v693_v56 = vpop.permute.xlu1 %692 }
  0xe4   : > { %766 = vst.msk [vmem:[#allocation4 + $0xb8] sm:$0xff] %vm742_vm4, %v693_v56  ;;  %v9406_v56 = vld [vmem:[#allocation2 + $0x180] sm:$0xff] }
  0xe5   : > { %v695_v19 = vpop.permute.xlu0 %694  ;;  %1021 = vrot.lane.b32.xlu1 %v8865_v52, %s8380_s20  ;;  %13244 = vst [vmem:[#allocation95_spill] sm:$0xff] %v9406_v56 }
  0xe6   : > { %767 = vst.msk [vmem:[#allocation4 + $0xc0] sm:$0xff] %vm742_vm4, %v695_v19 }
  0xe7   : > { %1023 = vrot.lane.b32.xlu0 %v8876_v50, %s8380_s20  ;;  %v697_v16 = vpop.permute.xlu1 %696 }
  0xe8   : > { %768 = vst.msk [vmem:[#allocation4 + $0xc8] sm:$0xff] %vm742_vm4, %v697_v16 }
  0xe9   : > { %v699_v26 = vpop.permute.xlu0 %698  ;;  %1025 = vrot.lane.b32.xlu1 %v8878_v49, %s8380_s20 }
  0xea   : > { %769 = vst.msk [vmem:[#allocation4 + $0xd0] sm:$0xff] %vm742_vm4, %v699_v26 }
  0xeb   : > { %1027 = vrot.lane.b32.xlu0 %v8880_v48, %s8380_s20  ;;  %v701_v6 = vpop.permute.xlu1 %700 }
  0xec   : > { %770 = vst.msk [vmem:[#allocation4 + $0xd8] sm:$0xff] %vm742_vm4, %v701_v6  ;;  %v9418_v6 = vld [vmem:[#allocation2 + $0x188] sm:$0xff] }
  0xed   : > { %v703_v21 = vpop.permute.xlu0 %702  ;;  %1029 = vrot.lane.b32.xlu1 %v8886_v37, %s8380_s20  ;;  %13245 = vst [vmem:[#allocation96_spill] sm:$0xff] %v9418_v6 }
  0xee   : > { %771 = vst.msk [vmem:[#allocation4 + $0xe0] sm:$0xff] %vm742_vm4, %v703_v21 }
  0xef   : > { %1031 = vrot.lane.b32.xlu0 %v8894_v47, %s8380_s20  ;;  %v705_v4 = vpop.permute.xlu1 %704 }
  0xf0   : > { %772 = vst.msk [vmem:[#allocation4 + $0xe8] sm:$0xff] %vm742_vm4, %v705_v4 }
  0xf1   : > { %v707_v7 = vpop.permute.xlu0 %706  ;;  %1033 = vrot.lane.b32.xlu1 %v8896_v45, %s8380_s20 }
  0xf2   : > { %773 = vst.msk [vmem:[#allocation4 + $0xf0] sm:$0xff] %vm742_vm4, %v707_v7 }
  0xf3   : > { %1035 = vrot.lane.b32.xlu0 %v8908_v46, %s8380_s20  ;;  %v709_v55 = vpop.permute.xlu1 %708 }
  0xf4   : > { %774 = vst.msk [vmem:[#allocation4 + $0xf8] sm:$0xff] %vm742_vm4, %v709_v55  ;;  %vm2714_vm4 = vcmask 195712  }
  0xf5   : > { %v857_v42 = vpop.permute.xlu0 %856  ;;  %1037 = vrot.lane.b32.xlu1 %v8910_v44, %s8380_s20 }
  0xf6   : > { %953 = vst.msk [vmem:[#allocation4] sm:$0xff] %vm952_vm5, %v857_v42 }
  0xf7   : > { %1039 = vrot.lane.b32.xlu0 %v8923_v38, %s8380_s20  ;;  %v859_v19 = vpop.permute.xlu1 %858 }
  0xf8   : > { %954 = vst.msk [vmem:[#allocation4 + $0x8] sm:$0xff] %vm952_vm5, %v859_v19  ;;  %v13246_v19 = vld [vmem:[#allocation39_spill] sm:$0xff] }
  0xf9   : > { %v861_v10 = vpop.permute.xlu0 %860  ;;  %1041 = vrot.lane.b32.xlu1 %v8925_v35, %s8380_s20 }
  0xfa   : > { %955 = vst.msk [vmem:[#allocation4 + $0x10] sm:$0xff] %vm952_vm5, %v861_v10 }
  0xfb   : > { %1043 = vrot.lane.b32.xlu0 %v8931_v30, %s8380_s20  ;;  %v863_v16 = vpop.permute.xlu1 %862 }
  0xfc   : > { %956 = vst.msk [vmem:[#allocation4 + $0x18] sm:$0xff] %vm952_vm5, %v863_v16 }
  0xfd   : > { %v865_v26 = vpop.permute.xlu0 %864  ;;  %1045 = vrot.lane.b32.xlu1 %v8936_v28, %s8380_s20 }
  0xfe   : > { %957 = vst.msk [vmem:[#allocation4 + $0x20] sm:$0xff] %vm952_vm5, %v865_v26  ;;  %v13247_v26 = vld [vmem:[#allocation40_spill] sm:$0xff] }
  0xff   : > { %1047 = vrot.lane.b32.xlu0 %v9406_v56, %s8380_s20  ;;  %v867_v7 = vpop.permute.xlu1 %866 }
 0x100   : > { %958 = vst.msk [vmem:[#allocation4 + $0x28] sm:$0xff] %vm952_vm5, %v867_v7  ;;  %v13249_v7 = vld [vmem:[#allocation50_spill] sm:$0xff] }
 0x101   : > { %v869_v21 = vpop.permute.xlu0 %868  ;;  %1049 = vrot.lane.b32.xlu1 %v9418_v6, %s8380_s20 }
 0x102   : > { %959 = vst.msk [vmem:[#allocation4 + $0x30] sm:$0xff] %vm952_vm5, %v869_v21  ;;  %v13248_v21 = vld [vmem:[#allocation47_spill] sm:$0xff] }
 0x103   : > { %1122 = vrot.lane.b32.xlu0 %v8790_v18, %s8381_s21  ;;  %v871_v42 = vpop.permute.xlu1 %870 }
 0x104   : > { %960 = vst.msk [vmem:[#allocation4 + $0x38] sm:$0xff] %vm952_vm5, %v871_v42 }
 0x105   : > { %v873_v4 = vpop.permute.xlu0 %872  ;;  %1124 = vrot.lane.b32.xlu1 %v8811_v29, %s8381_s21 }
 0x106   : > { %961 = vst.msk [vmem:[#allocation4 + $0x40] sm:$0xff] %vm952_vm5, %v873_v4 }
 0x107   : > { %1126 = vrot.lane.b32.xlu0 %v8802_v23, %s8381_s21  ;;  %v875_v18 = vpop.permute.xlu1 %874 }
 0x108   : > { %962 = vst.msk [vmem:[#allocation4 + $0x48] sm:$0xff] %vm952_vm5, %v875_v18  ;;  %v13251_v18 = vld [vmem:[#allocation56_spill] sm:$0xff] }
 0x109   : > { %v877_v55 = vpop.permute.xlu0 %876  ;;  %1128 = vrot.lane.b32.xlu1 %v13246_v19, %s8381_s21 }
 0x10a   : > { %963 = vst.msk [vmem:[#allocation4 + $0x50] sm:$0xff] %vm952_vm5, %v877_v55  ;;  %v13250_v55 = vld [vmem:[#allocation55_spill] sm:$0xff] }
 0x10b   : > { %1130 = vrot.lane.b32.xlu0 %v8823_v33, %s8381_s21  ;;  %v879_v16 = vpop.permute.xlu1 %878 }
 0x10c   : > { %964 = vst.msk [vmem:[#allocation4 + $0x58] sm:$0xff] %vm952_vm5, %v879_v16 }
 0x10d   : > { %v881_v10 = vpop.permute.xlu0 %880  ;;  %1132 = vrot.lane.b32.xlu1 %v13248_v21, %s8381_s21 }
 0x10e   : > { %965 = vst.msk [vmem:[#allocation4 + $0x60] sm:$0xff] %vm952_vm5, %v881_v10 }
 0x10f   : > { %1134 = vrot.lane.b32.xlu0 %v13247_v26, %s8381_s21  ;;  %v883_v4 = vpop.permute.xlu1 %882 }
 0x110   : > { %966 = vst.msk [vmem:[#allocation4 + $0x68] sm:$0xff] %vm952_vm5, %v883_v4  ;;  %v13253_v4 = vld [vmem:[#allocation58_spill] sm:$0xff] }
 0x111   : > { %v885_v29 = vpop.permute.xlu0 %884  ;;  %1136 = vrot.lane.b32.xlu1 %v13250_v55, %s8381_s21 }
 0x112   : > { %967 = vst.msk [vmem:[#allocation4 + $0x70] sm:$0xff] %vm952_vm5, %v885_v29  ;;  %v13252_v29 = vld [vmem:[#allocation57_spill] sm:$0xff] }
 0x113   : > { %1138 = vrot.lane.b32.xlu0 %v13249_v7, %s8381_s21  ;;  %v887_v10 = vpop.permute.xlu1 %886 }
 0x114   : > { %968 = vst.msk [vmem:[#allocation4 + $0x78] sm:$0xff] %vm952_vm5, %v887_v10  ;;  %v13255_v10 = vld [vmem:[#allocation60_spill] sm:$0xff] }
 0x115   : > { %v889_v42 = vpop.permute.xlu0 %888  ;;  %1140 = vrot.lane.b32.xlu1 %v13252_v29, %s8381_s21 }
 0x116   : > { %969 = vst.msk [vmem:[#allocation4 + $0x80] sm:$0xff] %vm952_vm5, %v889_v42  ;;  %v13254_v42 = vld [vmem:[#allocation59_spill] sm:$0xff] }
 0x117   : > { %1142 = vrot.lane.b32.xlu0 %v13251_v18, %s8381_s21  ;;  %v891_v28 = vpop.permute.xlu1 %890 }
 0x118   : > { %970 = vst.msk [vmem:[#allocation4 + $0x88] sm:$0xff] %vm952_vm5, %v891_v28  ;;  %v13257_v28 = vld [vmem:[#allocation62_spill] sm:$0xff] }
 0x119   : > { %v893_v16 = vpop.permute.xlu0 %892  ;;  %1144 = vrot.lane.b32.xlu1 %v13254_v42, %s8381_s21 }
 0x11a   : > { %971 = vst.msk [vmem:[#allocation4 + $0x90] sm:$0xff] %vm952_vm5, %v893_v16  ;;  %v13256_v16 = vld [vmem:[#allocation61_spill] sm:$0xff] }
 0x11b   : > { %1146 = vrot.lane.b32.xlu0 %v13253_v4, %s8381_s21  ;;  %v895_v30 = vpop.permute.xlu1 %894 }
 0x11c   : > { %972 = vst.msk [vmem:[#allocation4 + $0x98] sm:$0xff] %vm952_vm5, %v895_v30  ;;  %v13259_v30 = vld [vmem:[#allocation64_spill] sm:$0xff] }
 0x11d   : > { %v897_v35 = vpop.permute.xlu0 %896  ;;  %1148 = vrot.lane.b32.xlu1 %v13256_v16, %s8381_s21 }
 0x11e   : > { %973 = vst.msk [vmem:[#allocation4 + $0xa0] sm:$0xff] %vm952_vm5, %v897_v35  ;;  %v13258_v35 = vld [vmem:[#allocation63_spill] sm:$0xff] }
 0x11f   : > { %1150 = vrot.lane.b32.xlu0 %v13255_v10, %s8381_s21  ;;  %v899_v44 = vpop.permute.xlu1 %898 }
 0x120   : > { %974 = vst.msk [vmem:[#allocation4 + $0xa8] sm:$0xff] %vm952_vm5, %v899_v44  ;;  %v13261_v44 = vld [vmem:[#allocation66_spill] sm:$0xff] }
 0x121   : > { %v901_v38 = vpop.permute.xlu0 %900  ;;  %1152 = vrot.lane.b32.xlu1 %v13258_v35, %s8381_s21 }
 0x122   : > { %975 = vst.msk [vmem:[#allocation4 + $0xb0] sm:$0xff] %vm952_vm5, %v901_v38  ;;  %v13260_v38 = vld [vmem:[#allocation65_spill] sm:$0xff] }
 0x123   : > { %1154 = vrot.lane.b32.xlu0 %v13257_v28, %s8381_s21  ;;  %v903_v46 = vpop.permute.xlu1 %902 }
 0x124   : > { %976 = vst.msk [vmem:[#allocation4 + $0xb8] sm:$0xff] %vm952_vm5, %v903_v46  ;;  %v13263_v46 = vld [vmem:[#allocation68_spill] sm:$0xff] }
 0x125   : > { %v905_v45 = vpop.permute.xlu0 %904  ;;  %1156 = vrot.lane.b32.xlu1 %v13260_v38, %s8381_s21 }
 0x126   : > { %977 = vst.msk [vmem:[#allocation4 + $0xc0] sm:$0xff] %vm952_vm5, %v905_v45  ;;  %v13262_v45 = vld [vmem:[#allocation67_spill] sm:$0xff] }
 0x127   : > { %1158 = vrot.lane.b32.xlu0 %v13259_v30, %s8381_s21  ;;  %v907_v37 = vpop.permute.xlu1 %906 }
 0x128   : > { %978 = vst.msk [vmem:[#allocation4 + $0xc8] sm:$0xff] %vm952_vm5, %v907_v37  ;;  %v13265_v37 = vld [vmem:[#allocation70_spill] sm:$0xff] }
 0x129   : > { %v909_v47 = vpop.permute.xlu0 %908  ;;  %1160 = vrot.lane.b32.xlu1 %v13262_v45, %s8381_s21 }
 0x12a   : > { %979 = vst.msk [vmem:[#allocation4 + $0xd0] sm:$0xff] %vm952_vm5, %v909_v47  ;;  %v13264_v47 = vld [vmem:[#allocation69_spill] sm:$0xff] }
 0x12b   : > { %1162 = vrot.lane.b32.xlu0 %v13261_v44, %s8381_s21  ;;  %v911_v30 = vpop.permute.xlu1 %910 }
 0x12c   : > { %980 = vst.msk [vmem:[#allocation4 + $0xd8] sm:$0xff] %vm952_vm5, %v911_v30  ;;  %v1117_v30 = vrot.slane %v9406_v56, 1 }
 0x12d   : > { %v913_v49 = vpop.permute.xlu0 %912  ;;  %1164 = vrot.lane.b32.xlu1 %v13264_v47, %s8381_s21 }
 0x12e   : > { %981 = vst.msk [vmem:[#allocation4 + $0xe0] sm:$0xff] %vm952_vm5, %v913_v49 }
 0x12f   : > { %1166 = vrot.lane.b32.xlu0 %v13263_v46, %s8381_s21  ;;  %v915_v44 = vpop.permute.xlu1 %914 }
 0x130   : > { %982 = vst.msk [vmem:[#allocation4 + $0xe8] sm:$0xff] %vm952_vm5, %v915_v44 }
 0x131   : > { %v917_v48 = vpop.permute.xlu0 %916  ;;  %1168 = vrot.lane.b32.xlu1 %v9068_v15, %s8381_s21 }
 0x132   : > { %983 = vst.msk [vmem:[#allocation4 + $0xf0] sm:$0xff] %vm952_vm5, %v917_v48  ;;  %v1118_v48 = vrot.slane %v9418_v6, 1 }
 0x133   : > { %1170 = vrot.lane.b32.xlu0 %v13265_v37, %s8381_s21  ;;  %v919_v46 = vpop.permute.xlu1 %918 }
 0x134   : > { %984 = vst.msk [vmem:[#allocation4 + $0xf8] sm:$0xff] %vm952_vm5, %v919_v46  ;;  %v13267_v46 = vld [vmem:[#allocation77_spill] sm:$0xff]  ;;  %vm3687_vm5 = vcmask 1043456  }
 0x135   : > { %v988_v49 = vpop.permute.xlu0 %987  ;;  %1172 = vrot.lane.b32.xlu1 %v9083_v13, %s8381_s21  ;;  %v13268_v13 = vld [vmem:[#allocation78_spill] sm:$0xff] }
 0x136   : > { %1084 = vst.msk [vmem:[#allocation4] sm:$0xff] %vm1083_vm6, %v988_v49  ;;  %v9509_v49 = vsel %vm565_vm2, %v1117_v30, %v1118_v48 }
 0x137   : > { %1174 = vrot.lane.b32.xlu0 %v9074_v17, %s8381_s21  ;;  %v990_v44 = vpop.permute.xlu1 %989  ;;  %13266 = vst [vmem:[#allocation39_spill] sm:$0xff] %v9509_v49  ;;  %v9511_v17 = vld [vmem:[#allocation2 + $0x190] sm:$0x3] }
 0x138   : > { %1085 = vst.msk [vmem:[#allocation4 + $0x8] sm:$0xff] %vm1083_vm6, %v990_v44 }
 0x139   : > { %v992_v37 = vpop.permute.xlu0 %991  ;;  %1176 = vrot.lane.b32.xlu1 %v13267_v46, %s8381_s21 }
 0x13a   : > { %1086 = vst.msk [vmem:[#allocation4 + $0x10] sm:$0xff] %vm1083_vm6, %v992_v37  ;;  %v1120_v37 = vrot.slane %v9511_v17, 1 }
 0x13b   : > { %1178 = vrot.lane.b32.xlu0 %v9090_v34, %s8381_s21  ;;  %v994_v34 = vpop.permute.xlu1 %993 }
 0x13c   : > { %1087 = vst.msk [vmem:[#allocation4 + $0x18] sm:$0xff] %vm1083_vm6, %v994_v34  ;;  %v9525_v44 = vsel %vm565_vm2, %v1118_v48, %v1120_v37  ;;  %v13271_v37 = vld [vmem:[#allocation80_spill] sm:$0xff] }
 0x13d   : > { %v996_v15 = vpop.permute.xlu0 %995  ;;  %1180 = vrot.lane.b32.xlu1 %v13268_v13, %s8381_s21  ;;  %13269 = vst [vmem:[#allocation40_spill] sm:$0xff] %v9525_v44 }
 0x13e   : > { %1088 = vst.msk [vmem:[#allocation4 + $0x20] sm:$0xff] %vm1083_vm6, %v996_v15  ;;  %v13270_v15 = vld [vmem:[#allocation79_spill] sm:$0xff] }
 0x13f   : > { %1182 = vrot.lane.b32.xlu0 %v9509_v49, %s8381_s21  ;;  %v998_v46 = vpop.permute.xlu1 %997 }
 0x140   : > { %1089 = vst.msk [vmem:[#allocation4 + $0x28] sm:$0xff] %vm1083_vm6, %v998_v46 }
 0x141   : > { %v1000_v30 = vpop.permute.xlu0 %999  ;;  %1184 = vrot.lane.b32.xlu1 %v9525_v44, %s8381_s21 }
 0x142   : > { %1090 = vst.msk [vmem:[#allocation4 + $0x30] sm:$0xff] %vm1083_vm6, %v1000_v30 }
 0x143   : > { %1256 = vrot.lane.b32.xlu0 %v13270_v15, %s8382_s22  ;;  %v1002_v34 = vpop.permute.xlu1 %1001 }
 0x144   : > { %1091 = vst.msk [vmem:[#allocation4 + $0x38] sm:$0xff] %vm1083_vm6, %v1002_v34 }
 0x145   : > { %v1004_v49 = vpop.permute.xlu0 %1003  ;;  %1258 = vrot.lane.b32.xlu1 %v13271_v37, %s8382_s22 }
 0x146   : > { %1092 = vst.msk [vmem:[#allocation4 + $0x40] sm:$0xff] %vm1083_vm6, %v1004_v49  ;;  %v13272_v49 = vld [vmem:[#allocation81_spill] sm:$0xff] }
 0x147   : > { %1260 = vrot.lane.b32.xlu0 %v9130_v14, %s8382_s22  ;;  %v1006_v46 = vpop.permute.xlu1 %1005 }
 0x148   : > { %1093 = vst.msk [vmem:[#allocation4 + $0x48] sm:$0xff] %vm1083_vm6, %v1006_v46 }
 0x149   : > { %v1008_v48 = vpop.permute.xlu0 %1007  ;;  %1262 = vrot.lane.b32.xlu1 %v13272_v49, %s8382_s22 }
 0x14a   : > { %1094 = vst.msk [vmem:[#allocation4 + $0x50] sm:$0xff] %vm1083_vm6, %v1008_v48  ;;  %v13273_v48 = vld [vmem:[#allocation82_spill] sm:$0xff] }
 0x14b   : > { %1264 = vrot.lane.b32.xlu0 %v9143_v57, %s8382_s22  ;;  %v1010_v15 = vpop.permute.xlu1 %1009 }
 0x14c   : > { %1095 = vst.msk [vmem:[#allocation4 + $0x58] sm:$0xff] %vm1083_vm6, %v1010_v15 }
 0x14d   : > { %v1012_v30 = vpop.permute.xlu0 %1011  ;;  %1266 = vrot.lane.b32.xlu1 %v13273_v48, %s8382_s22 }
 0x14e   : > { %1096 = vst.msk [vmem:[#allocation4 + $0x60] sm:$0xff] %vm1083_vm6, %v1012_v30  ;;  %v13274_v30 = vld [vmem:[#allocation83_spill] sm:$0xff] }
 0x14f   : > { %1268 = vrot.lane.b32.xlu0 %v9156_v8, %s8382_s22  ;;  %v1014_v37 = vpop.permute.xlu1 %1013 }
 0x150   : > { %1097 = vst.msk [vmem:[#allocation4 + $0x68] sm:$0xff] %vm1083_vm6, %v1014_v37 }
 0x151   : > { %v1016_v34 = vpop.permute.xlu0 %1015  ;;  %1270 = vrot.lane.b32.xlu1 %v13274_v30, %s8382_s22 }
 0x152   : > { %1098 = vst.msk [vmem:[#allocation4 + $0x70] sm:$0xff] %vm1083_vm6, %v1016_v34  ;;  %v13275_v34 = vld [vmem:[#allocation84_spill] sm:$0xff] }
 0x153   : > { %1272 = vrot.lane.b32.xlu0 %v9169_v36, %s8382_s22  ;;  %v1018_v15 = vpop.permute.xlu1 %1017 }
 0x154   : > { %1099 = vst.msk [vmem:[#allocation4 + $0x78] sm:$0xff] %vm1083_vm6, %v1018_v15 }
 0x155   : > { %v1020_v46 = vpop.permute.xlu0 %1019  ;;  %1274 = vrot.lane.b32.xlu1 %v13275_v34, %s8382_s22 }
 0x156   : > { %1100 = vst.msk [vmem:[#allocation4 + $0x80] sm:$0xff] %vm1083_vm6, %v1020_v46  ;;  %v13276_v46 = vld [vmem:[#allocation85_spill] sm:$0xff] }
 0x157   : > { %1276 = vrot.lane.b32.xlu0 %v9182_v58, %s8382_s22  ;;  %v1022_v37 = vpop.permute.xlu1 %1021 }
 0x158   : > { %1101 = vst.msk [vmem:[#allocation4 + $0x88] sm:$0xff] %vm1083_vm6, %v1022_v37 }
 0x159   : > { %v1024_v44 = vpop.permute.xlu0 %1023  ;;  %1278 = vrot.lane.b32.xlu1 %v13276_v46, %s8382_s22 }
 0x15a   : > { %1102 = vst.msk [vmem:[#allocation4 + $0x90] sm:$0xff] %vm1083_vm6, %v1024_v44  ;;  %v13277_v44 = vld [vmem:[#allocation86_spill] sm:$0xff] }
 0x15b   : > { %1280 = vrot.lane.b32.xlu0 %v9195_v0, %s8382_s22  ;;  %v1026_v15 = vpop.permute.xlu1 %1025 }
 0x15c   : > { %1103 = vst.msk [vmem:[#allocation4 + $0x98] sm:$0xff] %vm1083_vm6, %v1026_v15 }
 0x15d   : > { %v1028_v13 = vpop.permute.xlu0 %1027  ;;  %1282 = vrot.lane.b32.xlu1 %v13277_v44, %s8382_s22 }
 0x15e   : > { %1104 = vst.msk [vmem:[#allocation4 + $0xa0] sm:$0xff] %vm1083_vm6, %v1028_v13  ;;  %v13278_v13 = vld [vmem:[#allocation88_spill] sm:$0xff] }
 0x15f   : > { %1284 = vrot.lane.b32.xlu0 %v9208_v25, %s8382_s22  ;;  %v1030_v37 = vpop.permute.xlu1 %1029 }
 0x160   : > { %1105 = vst.msk [vmem:[#allocation4 + $0xa8] sm:$0xff] %vm1083_vm6, %v1030_v37  ;;  %v13280_v37 = vld [vmem:[#allocation91_spill] sm:$0xff] }
 0x161   : > { %v1032_v47 = vpop.permute.xlu0 %1031  ;;  %1286 = vrot.lane.b32.xlu1 %v13278_v13, %s8382_s22 }
 0x162   : > { %1106 = vst.msk [vmem:[#allocation4 + $0xb0] sm:$0xff] %vm1083_vm6, %v1032_v47  ;;  %v13279_v47 = vld [vmem:[#allocation90_spill] sm:$0xff] }
 0x163   : > { %1288 = vrot.lane.b32.xlu0 %v9221_v5, %s8382_s22  ;;  %v1034_v15 = vpop.permute.xlu1 %1033 }
 0x164   : > { %1107 = vst.msk [vmem:[#allocation4 + $0xb8] sm:$0xff] %vm1083_vm6, %v1034_v15  ;;  %v13282_v15 = vld [vmem:[#allocation93_spill] sm:$0xff] }
 0x165   : > { %v1036_v45 = vpop.permute.xlu0 %1035  ;;  %1290 = vrot.lane.b32.xlu1 %v13279_v47, %s8382_s22 }
 0x166   : > { %1108 = vst.msk [vmem:[#allocation4 + $0xc0] sm:$0xff] %vm1083_vm6, %v1036_v45  ;;  %v13281_v45 = vld [vmem:[#allocation92_spill] sm:$0xff] }
 0x167   : > { %1292 = vrot.lane.b32.xlu0 %v9234_v40, %s8382_s22  ;;  %v1038_v5 = vpop.permute.xlu1 %1037 }
 0x168   : > { %1109 = vst.msk [vmem:[#allocation4 + $0xc8] sm:$0xff] %vm1083_vm6, %v1038_v5 }
 0x169   : > { %v1040_v50 = vpop.permute.xlu0 %1039  ;;  %1294 = vrot.lane.b32.xlu1 %v13281_v45, %s8382_s22 }
 0x16a   : > { %1110 = vst.msk [vmem:[#allocation4 + $0xd0] sm:$0xff] %vm1083_vm6, %v1040_v50 }
 0x16b   : > { %1296 = vrot.lane.b32.xlu0 %v13280_v37, %s8382_s22  ;;  %v1042_v40 = vpop.permute.xlu1 %1041 }
 0x16c   : > { %1111 = vst.msk [vmem:[#allocation4 + $0xd8] sm:$0xff] %vm1083_vm6, %v1042_v40  ;;  %v1251_v40 = vrot.slane %v9406_v56, 2 }
 0x16d   : > { %v1044_v13 = vpop.permute.xlu0 %1043  ;;  %1298 = vrot.lane.b32.xlu1 %v9267_v27, %s8382_s22 }
 0x16e   : > { %1112 = vst.msk [vmem:[#allocation4 + $0xe0] sm:$0xff] %vm1083_vm6, %v1044_v13  ;;  %v1252_v13 = vrot.slane %v9418_v6, 2 }
 0x16f   : > { %1300 = vrot.lane.b32.xlu0 %v13282_v15, %s8382_s22  ;;  %v1046_v50 = vpop.permute.xlu1 %1045 }
 0x170   : > { %1113 = vst.msk [vmem:[#allocation4 + $0xe8] sm:$0xff] %vm1083_vm6, %v1046_v50 }
 0x171   : > { %v1048_v47 = vpop.permute.xlu0 %1047  ;;  %1302 = vrot.lane.b32.xlu1 %v9281_v39, %s8382_s22 }
 0x172   : > { %1114 = vst.msk [vmem:[#allocation4 + $0xf0] sm:$0xff] %vm1083_vm6, %v1048_v47 }
 0x173   : > { %1304 = vrot.lane.b32.xlu0 %v9273_v41, %s8382_s22  ;;  %v1050_v47 = vpop.permute.xlu1 %1049 }
 0x174   : > { %1115 = vst.msk [vmem:[#allocation4 + $0xf8] sm:$0xff] %vm1083_vm6, %v1050_v47  ;;  %vm6741_vm6 = vcmask 1041409  }
 0x175   : > { %v1123_v5 = vpop.permute.xlu0 %1122  ;;  %1306 = vrot.lane.b32.xlu1 %v9295_v3, %s8382_s22 }
 0x176   : > { %1219 = vst.msk [vmem:[#allocation4] sm:$0xff] %vm1218_vm7, %v1123_v5  ;;  %v9616_v5 = vsel %vm13153_vm3, %v1251_v40, %v1252_v13 }
 0x177   : > { %1308 = vrot.lane.b32.xlu0 %v9287_v43, %s8382_s22  ;;  %v1125_v50 = vpop.permute.xlu1 %1124 }
 0x178   : > { %1220 = vst.msk [vmem:[#allocation4 + $0x8] sm:$0xff] %vm1218_vm7, %v1125_v50 }
 0x179   : > { %v1127_v41 = vpop.permute.xlu0 %1126  ;;  %1310 = vrot.lane.b32.xlu1 %v9308_v11, %s8382_s22 }
 0x17a   : > { %1221 = vst.msk [vmem:[#allocation4 + $0x10] sm:$0xff] %vm1218_vm7, %v1127_v41  ;;  %v1254_v41 = vrot.slane %v9511_v17, 2 }
 0x17b   : > { %1312 = vrot.lane.b32.xlu0 %v9301_v12, %s8382_s22  ;;  %v1129_v47 = vpop.permute.xlu1 %1128 }
 0x17c   : > { %1222 = vst.msk [vmem:[#allocation4 + $0x18] sm:$0xff] %vm1218_vm7, %v1129_v47  ;;  %v9630_v40 = vsel %vm13153_vm3, %v1252_v13, %v1254_v41  ;;  %v8304_v41 = vld [vmem:[%s12842_s1 + $0x8] sm:$0xff]   ;;  %v8305_v47 = vld [vmem:[%s12842_s1 + $0x10] ss:$0 sps:$4 sm:$0x33]  }
 0x17d   : > { %v1131_v56 = vpop.permute.xlu0 %1130  ;;  %1314 = vrot.lane.b32.xlu1 %v9318_v51, %s8382_s22 }
 0x17e   : > { %1223 = vst.msk [vmem:[#allocation4 + $0x20] sm:$0xff] %vm1218_vm7, %v1131_v56 }
 0x17f   : > { %1316 = vrot.lane.b32.xlu0 %v9616_v5, %s8382_s22  ;;  %v1133_v56 = vpop.permute.xlu1 %1132 }
 0x180   : > { %1224 = vst.msk [vmem:[#allocation4 + $0x28] sm:$0xff] %vm1218_vm7, %v1133_v56 }
 0x181   : > { %v1135_v6 = vpop.permute.xlu0 %1134  ;;  %1318 = vrot.lane.b32.xlu1 %v9630_v40, %s8382_s22 }
 0x182   : > { %1225 = vst.msk [vmem:[#allocation4 + $0x30] sm:$0xff] %vm1218_vm7, %v1135_v6 }
 0x183   : > { %1387 = vrot.lane.b32.xlu0 %v8759_v62, %s8383_s23  ;;  %v1137_v6 = vpop.permute.xlu1 %1136 }
 0x184   : > { %1226 = vst.msk [vmem:[#allocation4 + $0x38] sm:$0xff] %vm1218_vm7, %v1137_v6 }
 0x185   : > { %v1139_v17 = vpop.permute.xlu0 %1138  ;;  %1389 = vrot.lane.b32.xlu1 %v8761_v63, %s8383_s23 }
 0x186   : > { %1227 = vst.msk [vmem:[#allocation4 + $0x40] sm:$0xff] %vm1218_vm7, %v1139_v17 }
 0x187   : > { %1391 = vrot.lane.b32.xlu0 %v8763_v1, %s8383_s23  ;;  %v1141_v62 = vpop.permute.xlu1 %1140 }
 0x188   : > { %1228 = vst.msk [vmem:[#allocation4 + $0x48] sm:$0xff] %vm1218_vm7, %v1141_v62 }
 0x189   : > { %v1143_v13 = vpop.permute.xlu0 %1142  ;;  %1393 = vrot.lane.b32.xlu1 %v8779_v9, %s8383_s23 }
 0x18a   : > { %1229 = vst.msk [vmem:[#allocation4 + $0x50] sm:$0xff] %vm1218_vm7, %v1143_v13  ;;  %v13284_v13 = vld [vmem:[#allocation88_spill] sm:$0xff] }
 0x18b   : > { %1395 = vrot.lane.b32.xlu0 %v8795_v20, %s8383_s23  ;;  %v1145_v1 = vpop.permute.xlu1 %1144 }
 0x18c   : > { %1230 = vst.msk [vmem:[#allocation4 + $0x58] sm:$0xff] %vm1218_vm7, %v1145_v1  ;;  %v13287_v1 = vld [vmem:[#allocation43_spill] sm:$0xff] }
 0x18d   : > { %v1147_v50 = vpop.permute.xlu0 %1146  ;;  %1397 = vrot.lane.b32.xlu1 %v8797_v22, %s8383_s23 }
 0x18e   : > { %1231 = vst.msk [vmem:[#allocation4 + $0x60] sm:$0xff] %vm1218_vm7, %v1147_v50  ;;  %v13286_v50 = vld [vmem:[#allocation90_spill] sm:$0xff] }
 0x18f   : > { %1399 = vrot.lane.b32.xlu0 %v8808_v24, %s8383_s23  ;;  %v1149_v20 = vpop.permute.xlu1 %1148 }
 0x190   : > { %1232 = vst.msk [vmem:[#allocation4 + $0x68] sm:$0xff] %vm1218_vm7, %v1149_v20 }
 0x191   : > { %v1151_v63 = vpop.permute.xlu0 %1150  ;;  %1401 = vrot.lane.b32.xlu1 %v8816_v31, %s8383_s23 }
 0x192   : > { %1233 = vst.msk [vmem:[#allocation4 + $0x70] sm:$0xff] %vm1218_vm7, %v1151_v63 }
 0x193   : > { %1403 = vrot.lane.b32.xlu0 %v8820_v32, %s8383_s23  ;;  %v1153_v24 = vpop.permute.xlu1 %1152 }
 0x194   : > { %1234 = vst.msk [vmem:[#allocation4 + $0x78] sm:$0xff] %vm1218_vm7, %v1153_v24  ;;  %v13289_v24 = vld [vmem:[#allocation64_spill] sm:$0xff] }
 0x195   : > { %v1155_v9 = vpop.permute.xlu0 %1154  ;;  %1405 = vrot.lane.b32.xlu1 %v8831_v54, %s8383_s23 }
 0x196   : > { %1235 = vst.msk [vmem:[#allocation4 + $0x80] sm:$0xff] %vm1218_vm7, %v1155_v9  ;;  %v13288_v9 = vld [vmem:[#allocation42_spill] sm:$0xff] }
 0x197   : > { %1407 = vrot.lane.b32.xlu0 %v8835_v59, %s8383_s23  ;;  %v1157_v32 = vpop.permute.xlu1 %1156 }
 0x198   : > { %1236 = vst.msk [vmem:[#allocation4 + $0x88] sm:$0xff] %vm1218_vm7, %v1157_v32 }
 0x199   : > { %v1159_v22 = vpop.permute.xlu0 %1158  ;;  %1409 = vrot.lane.b32.xlu1 %v8839_v60, %s8383_s23 }
 0x19a   : > { %1237 = vst.msk [vmem:[#allocation4 + $0x90] sm:$0xff] %vm1218_vm7, %v1159_v22 }
 0x19b   : > { %1411 = vrot.lane.b32.xlu0 %v8847_v61, %s8383_s23  ;;  %v1161_v59 = vpop.permute.xlu1 %1160 }
 0x19c   : > { %1238 = vst.msk [vmem:[#allocation4 + $0x98] sm:$0xff] %vm1218_vm7, %v1161_v59  ;;  %v13291_v59 = vld [vmem:[#allocation66_spill] sm:$0xff] }
 0x19d   : > { %v1163_v31 = vpop.permute.xlu0 %1162  ;;  %1413 = vrot.lane.b32.xlu1 %v8849_v2, %s8383_s23 }
 0x19e   : > { %1239 = vst.msk [vmem:[#allocation4 + $0xa0] sm:$0xff] %vm1218_vm7, %v1163_v31  ;;  %v13290_v31 = vld [vmem:[#allocation44_spill] sm:$0xff] }
 0x19f   : > { %1415 = vrot.lane.b32.xlu0 %v8863_v53, %s8383_s23  ;;  %v1165_v61 = vpop.permute.xlu1 %1164  ;;  %v8303_v53 = vld [vmem:[%s12842_s1] sm:$0xff]  }
 0x1a0   : > { %1240 = vst.msk [vmem:[#allocation4 + $0xa8] sm:$0xff] %vm1218_vm7, %v1165_v61  ;;  %8156 = vmatprep.subr.bf16.mxu0 %v8303_v53 }
 0x1a1   : > { %v1167_v54 = vpop.permute.xlu0 %1166  ;;  %1417 = vrot.lane.b32.xlu1 %v8865_v52, %s8383_s23  ;;  %8157 = vmatpush3.bf16.msra.mxu0 %v8303_v53  ;;  %v13293_v53 = vld [vmem:[#allocation89_spill] sm:$0xff] }
 0x1a2   : > { %1241 = vst.msk [vmem:[#allocation4 + $0xb0] sm:$0xff] %vm1218_vm7, %v1167_v54  ;;  %8158 = vmatprep.subr.bf16.mxu0 %v8304_v41 }
 0x1a3   : > { %1522 = vrot.lane.b32.xlu0 %v8802_v23, %s8384_s29  ;;  %v1169_v2 = vpop.permute.xlu1 %1168 }
 0x1a4   : > { %1242 = vst.msk [vmem:[#allocation4 + $0xb8] sm:$0xff] %vm1218_vm7, %v1169_v2 }
 0x1a5   : > { %v1171_v60 = vpop.permute.xlu0 %1170  ;;  %1524 = vrot.lane.b32.xlu1 %v13246_v19, %s8384_s29  ;;  %8159 = vmatpush3.bf16.msra.mxu0 %v8304_v41  ;;  %v13294_v41 = vld [vmem:[#allocation69_spill] sm:$0xff] }
 0x1a6   : > { %1243 = vst.msk [vmem:[#allocation4 + $0xc0] sm:$0xff] %vm1218_vm7, %v1171_v60  ;;  %8246 = vmatprep.subr.msk.bf16.mxu0 %vm1909_vm8, %v8305_v47  ;;  %v13292_v60 = vld [vmem:[#allocation67_spill] sm:$0xff] }
 0x1a7   : > { %1526 = vrot.lane.b32.xlu0 %v8823_v33, %s8384_s29  ;;  %v1173_v52 = vpop.permute.xlu1 %1172 }
 0x1a8   : > { %1244 = vst.msk [vmem:[#allocation4 + $0xc8] sm:$0xff] %vm1218_vm7, %v1173_v52 }
 0x1a9   : > { %v1175_v23 = vpop.permute.xlu0 %1174  ;;  %1528 = vrot.lane.b32.xlu1 %v13248_v21, %s8384_s29 }
 0x1aa   : > { %1245 = vst.msk [vmem:[#allocation4 + $0xd0] sm:$0xff] %vm1218_vm7, %v1175_v23 }
 0x1ab   : > { %1656 = vrot.lane.b32.xlu0 %v9130_v14, %s8385_s15  ;;  %v1911_v14 = vsel %vm1909_vm8, %v8305_v47, 0  ;;  %v1177_v19 = vpop.permute.xlu1 %1176  ;;  %v13295_v47 = vld [vmem:[#allocation45_spill] sm:$0xff] }
 0x1ac   : > { %8161 = vmatpush3.bf16.msra.mxu0 %v1911_v14  ;;  %1246 = vst.msk [vmem:[#allocation4 + $0xd8] sm:$0xff] %vm1218_vm7, %v1177_v19 }
 0x1ad   : > { %v1179_v33 = vpop.permute.xlu0 %1178  ;;  %1658 = vrot.lane.b32.xlu1 %v13272_v49, %s8385_s15 }
 0x1ae   : > { %1247 = vst.msk [vmem:[#allocation4 + $0xe0] sm:$0xff] %vm1218_vm7, %v1179_v33 }
 0x1af   : > { %1660 = vrot.lane.b32.xlu0 %v9143_v57, %s8385_s15  ;;  %v1181_v21 = vpop.permute.xlu1 %1180 }
 0x1b0   : > { %1248 = vst.msk [vmem:[#allocation4 + $0xe8] sm:$0xff] %vm1218_vm7, %v1181_v21  ;;  %v13297_v21 = vld [vmem:[#allocation46_spill] sm:$0xff] }
 0x1b1   : > { %v1183_v56 = vpop.permute.xlu0 %1182  ;;  %1662 = vrot.lane.b32.xlu1 %v13273_v48, %s8385_s15 }
 0x1b2   : > { %1249 = vst.msk [vmem:[#allocation4 + $0xf0] sm:$0xff] %vm1218_vm7, %v1183_v56 }
 0x1b3   : > { %1530 = vrot.lane.b32.xlu0 %v13247_v26, %s8384_s29  ;;  %v1185_v17 = vpop.permute.xlu1 %1184 }
 0x1b4   : > { %1250 = vst.msk [vmem:[#allocation4 + $0xf8] sm:$0xff] %vm1218_vm7, %v1185_v17  ;;  %vm6744_vm7 = vcmask 1042434  }
 0x1b5   : > { %v1257_v57 = vpop.permute.xlu0 %1256  ;;  %1532 = vrot.lane.b32.xlu1 %v13250_v55, %s8384_s29 }
 0x1b6   : > { %1353 = vst.msk [vmem:[#allocation4] sm:$0xff] %vm1352_vm9, %v1257_v57  ;;  %v13298_v57 = vld [vmem:[#allocation68_spill] sm:$0xff] }
 0x1b7   : > { %1534 = vrot.lane.b32.xlu0 %v13249_v7, %s8384_s29  ;;  %v1259_v26 = vpop.permute.xlu1 %1258 }
 0x1b8   : > { %1354 = vst.msk [vmem:[#allocation4 + $0x8] sm:$0xff] %vm1352_vm9, %v1259_v26  ;;  %v13300_v26 = vld [vmem:[#allocation70_spill] sm:$0xff] }
 0x1b9   : > { %v1261_v49 = vpop.permute.xlu0 %1260  ;;  %1536 = vrot.lane.b32.xlu1 %v13252_v29, %s8384_s29 }
 0x1ba   : > { %1355 = vst.msk [vmem:[#allocation4 + $0x10] sm:$0xff] %vm1352_vm9, %v1261_v49  ;;  %v13299_v49 = vld [vmem:[#allocation49_spill] sm:$0xff] }
 0x1bb   : > { %1664 = vrot.lane.b32.xlu0 %v9156_v8, %s8385_s15  ;;  %v1263_v7 = vpop.permute.xlu1 %1262 }
 0x1bc   : > { %1356 = vst.msk [vmem:[#allocation4 + $0x18] sm:$0xff] %vm1352_vm9, %v1263_v7 }
 0x1bd   : > { %v1265_v48 = vpop.permute.xlu0 %1264  ;;  %1666 = vrot.lane.b32.xlu1 %v13274_v30, %s8385_s15 }
 0x1be   : > { %1357 = vst.msk [vmem:[#allocation4 + $0x20] sm:$0xff] %vm1352_vm9, %v1265_v48 }
 0x1bf   : > { %1668 = vrot.lane.b32.xlu0 %v9169_v36, %s8385_s15  ;;  %v1267_v8 = vpop.permute.xlu1 %1266 }
 0x1c0   : > { %1358 = vst.msk [vmem:[#allocation4 + $0x28] sm:$0xff] %vm1352_vm9, %v1267_v8 }
 0x1c1   : > { %v1269_v55 = vpop.permute.xlu0 %1268  ;;  %1670 = vrot.lane.b32.xlu1 %v13275_v34, %s8385_s15 }
 0x1c2   : > { %1359 = vst.msk [vmem:[#allocation4 + $0x30] sm:$0xff] %vm1352_vm9, %v1269_v55  ;;  %v13301_v55 = vld [vmem:[#allocation71_spill] sm:$0xff] }
 0x1c3   : > { %1538 = vrot.lane.b32.xlu0 %v13251_v18, %s8384_s29  ;;  %v1271_v36 = vpop.permute.xlu1 %1270 }
 0x1c4   : > { %1360 = vst.msk [vmem:[#allocation4 + $0x38] sm:$0xff] %vm1352_vm9, %v1271_v36  ;;  %v13302_v36 = vld [vmem:[#allocation73_spill] sm:$0xff] }
 0x1c5   : > { %v1273_v29 = vpop.permute.xlu0 %1272  ;;  %1540 = vrot.lane.b32.xlu1 %v13254_v42, %s8384_s29 }
 0x1c6   : > { %1361 = vst.msk [vmem:[#allocation4 + $0x40] sm:$0xff] %vm1352_vm9, %v1273_v29 }
 0x1c7   : > { %1542 = vrot.lane.b32.xlu0 %v13253_v4, %s8384_s29  ;;  %v1275_v18 = vpop.permute.xlu1 %1274 }
 0x1c8   : > { %1362 = vst.msk [vmem:[#allocation4 + $0x48] sm:$0xff] %vm1352_vm9, %v1275_v18 }
 0x1c9   : > { %v1277_v30 = vpop.permute.xlu0 %1276  ;;  %1544 = vrot.lane.b32.xlu1 %v13256_v16, %s8384_s29 }
 0x1ca   : > { %1363 = vst.msk [vmem:[#allocation4 + $0x50] sm:$0xff] %vm1352_vm9, %v1277_v30  ;;  %v13303_v30 = vld [vmem:[#allocation94_spill] sm:$0xff] }
 0x1cb   : > { %1672 = vrot.lane.b32.xlu0 %v9182_v58, %s8385_s15  ;;  %v1279_v4 = vpop.permute.xlu1 %1278 }
 0x1cc   : > { %1364 = vst.msk [vmem:[#allocation4 + $0x58] sm:$0xff] %vm1352_vm9, %v1279_v4 }
 0x1cd   : > { %v1281_v34 = vpop.permute.xlu0 %1280  ;;  %1674 = vrot.lane.b32.xlu1 %v13276_v46, %s8385_s15 }
 0x1ce   : > { %1365 = vst.msk [vmem:[#allocation4 + $0x60] sm:$0xff] %vm1352_vm9, %v1281_v34 }
 0x1cf   : > { %1676 = vrot.lane.b32.xlu0 %v9195_v0, %s8385_s15  ;;  %v1283_v58 = vpop.permute.xlu1 %1282 }
 0x1d0   : > { %1366 = vst.msk [vmem:[#allocation4 + $0x68] sm:$0xff] %vm1352_vm9, %v1283_v58  ;;  %v13305_v58 = vld [vmem:[#allocation53_spill] sm:$0xff] }
 0x1d1   : > { %v1285_v42 = vpop.permute.xlu0 %1284  ;;  %1678 = vrot.lane.b32.xlu1 %v13277_v44, %s8385_s15 }
 0x1d2   : > { %1367 = vst.msk [vmem:[#allocation4 + $0x70] sm:$0xff] %vm1352_vm9, %v1285_v42 }
 0x1d3   : > { %1546 = vrot.lane.b32.xlu0 %v13255_v10, %s8384_s29  ;;  %v1287_v0 = vpop.permute.xlu1 %1286 }
 0x1d4   : > { %1368 = vst.msk [vmem:[#allocation4 + $0x78] sm:$0xff] %vm1352_vm9, %v1287_v0  ;;  %v13306_v0 = vld [vmem:[#allocation52_spill] sm:$0xff] }
 0x1d5   : > { %v1289_v16 = vpop.permute.xlu0 %1288  ;;  %1548 = vrot.lane.b32.xlu1 %v13258_v35, %s8384_s29 }
 0x1d6   : > { %1369 = vst.msk [vmem:[#allocation4 + $0x80] sm:$0xff] %vm1352_vm9, %v1289_v16 }
 0x1d7   : > { %1550 = vrot.lane.b32.xlu0 %v13257_v28, %s8384_s29  ;;  %v1291_v10 = vpop.permute.xlu1 %1290  ;;  %v13283_v28 = vld [vmem:[#allocation87_spill] sm:$0xff] }
 0x1d8   : > { %1370 = vst.msk [vmem:[#allocation4 + $0x88] sm:$0xff] %vm1352_vm9, %v1291_v10 }
 0x1d9   : > { %v1293_v46 = vpop.permute.xlu0 %1292  ;;  %1552 = vrot.lane.b32.xlu1 %v13260_v38, %s8384_s29 }
 0x1da   : > { %1371 = vst.msk [vmem:[#allocation4 + $0x90] sm:$0xff] %vm1352_vm9, %v1293_v46  ;;  %v13307_v46 = vld [vmem:[#allocation72_spill] sm:$0xff] }
 0x1db   : > { %1680 = vrot.lane.b32.xlu0 %v9208_v25, %s8385_s15  ;;  %v1295_v6 = vpop.permute.xlu1 %1294  ;;  %v13285_v25 = vld [vmem:[#allocation41_spill] sm:$0xff] }
 0x1dc   : > { %1372 = vst.msk [vmem:[#allocation4 + $0x98] sm:$0xff] %vm1352_vm9, %v1295_v6 }
 0x1dd   : > { %v1297_v44 = vpop.permute.xlu0 %1296  ;;  %1682 = vrot.lane.b32.xlu1 %v13284_v13, %s8385_s15  ;;  %v13310_v13 = vld [vmem:[#allocation77_spill] sm:$0xff] }
 0x1de   : > { %1373 = vst.msk [vmem:[#allocation4 + $0xa0] sm:$0xff] %vm1352_vm9, %v1297_v44  ;;  %v13308_v44 = vld [vmem:[#allocation54_spill] sm:$0xff] }
 0x1df   : > { %1684 = vrot.lane.b32.xlu0 %v13283_v28, %s8385_s15  ;;  %v1299_v62 = vpop.permute.xlu1 %1298  ;;  %v13309_v28 = vld [vmem:[#allocation74_spill] sm:$0xff] }
 0x1e0   : > { %1374 = vst.msk [vmem:[#allocation4 + $0xa8] sm:$0xff] %vm1352_vm9, %v1299_v62 }
 0x1e1   : > { %v1301_v35 = vpop.permute.xlu0 %1300  ;;  %1686 = vrot.lane.b32.xlu1 %v13286_v50, %s8385_s15 }
 0x1e2   : > { %1375 = vst.msk [vmem:[#allocation4 + $0xb0] sm:$0xff] %vm1352_vm9, %v1301_v35 }
 0x1e3   : > { %1419 = vrot.lane.b32.xlu0 %v13285_v25, %s8383_s23  ;;  %v1303_v63 = vpop.permute.xlu1 %1302 }
 0x1e4   : > { %1376 = vst.msk [vmem:[#allocation4 + $0xb8] sm:$0xff] %vm1352_vm9, %v1303_v63  ;;  %v13312_v63 = vld [vmem:[#allocation95_spill] sm:$0xff] }
 0x1e5   : > { %v1305_v38 = vpop.permute.xlu0 %1304  ;;  %1421 = vrot.lane.b32.xlu1 %v13288_v9, %s8383_s23 }
 0x1e6   : > { %1377 = vst.msk [vmem:[#allocation4 + $0xc0] sm:$0xff] %vm1352_vm9, %v1305_v38  ;;  %v13311_v38 = vld [vmem:[#allocation78_spill] sm:$0xff] }
 0x1e7   : > { %1423 = vrot.lane.b32.xlu0 %v13287_v1, %s8383_s23  ;;  %v1307_v22 = vpop.permute.xlu1 %1306 }
 0x1e8   : > { %1378 = vst.msk [vmem:[#allocation4 + $0xc8] sm:$0xff] %vm1352_vm9, %v1307_v22 }
 0x1e9   : > { %v1309_v20 = vpop.permute.xlu0 %1308  ;;  %1425 = vrot.lane.b32.xlu1 %v13290_v31, %s8383_s23 }
 0x1ea   : > { %1379 = vst.msk [vmem:[#allocation4 + $0xd0] sm:$0xff] %vm1352_vm9, %v1309_v20 }
 0x1eb   : > { %1554 = vrot.lane.b32.xlu0 %v13289_v24, %s8384_s29  ;;  %v1311_v54 = vpop.permute.xlu1 %1310  ;;  %v482_v24 = vld [vmem:[#allocation2 + $0x198] sm:$0xff] }
 0x1ec   : > { %1380 = vst.msk [vmem:[#allocation4 + $0xd8] sm:$0xff] %vm1352_vm9, %v1311_v54  ;;  %v1517_v54 = vrot.slane %v482_v24, 1 }
 0x1ed   : > { %v1313_v32 = vpop.permute.xlu0 %1312  ;;  %1556 = vrot.lane.b32.xlu1 %v13292_v60, %s8384_s29 }
 0x1ee   : > { %1381 = vst.msk [vmem:[#allocation4 + $0xe0] sm:$0xff] %vm1352_vm9, %v1313_v32 }
 0x1ef   : > { %1558 = vrot.lane.b32.xlu0 %v13291_v59, %s8384_s29  ;;  %v1315_v2 = vpop.permute.xlu1 %1314 }
 0x1f0   : > { %1382 = vst.msk [vmem:[#allocation4 + $0xe8] sm:$0xff] %vm1352_vm9, %v1315_v2  ;;  %v13313_v2 = vld [vmem:[#allocation96_spill] sm:$0xff] }
 0x1f1   : > { %v1317_v61 = vpop.permute.xlu0 %1316  ;;  %1560 = vrot.lane.b32.xlu1 %v13294_v41, %s8384_s29 }
 0x1f2   : > { %1383 = vst.msk [vmem:[#allocation4 + $0xf0] sm:$0xff] %vm1352_vm9, %v1317_v61 }
 0x1f3   : > { %1688 = vrot.lane.b32.xlu0 %v13293_v53, %s8385_s15  ;;  %v1319_v52 = vpop.permute.xlu1 %1318 }
 0x1f4   : > { %1384 = vst.msk [vmem:[#allocation4 + $0xf8] sm:$0xff] %vm1352_vm9, %v1319_v52  ;;  %v484_v52 = vld [vmem:[#allocation2 + $0x1a8] sm:$0x3]  ;;  %vm6750_vm9 = vcmask 1044484  }
 0x1f5   : > { %v1388_v23 = vpop.permute.xlu0 %1387  ;;  %1690 = vrot.lane.b32.xlu1 %v13281_v45, %s8385_s15 }
 0x1f6   : > { %1484 = vst.msk [vmem:[#allocation4] sm:$0xff] %vm1483_vm10, %v1388_v23 }
 0x1f7   : > { %1692 = vrot.lane.b32.xlu0 %v13280_v37, %s8385_s15  ;;  %v1390_v14 = vpop.permute.xlu1 %1389  ;;  %v13296_v37 = vld [vmem:[#allocation48_spill] sm:$0xff] }
 0x1f8   : > { %1485 = vst.msk [vmem:[#allocation4 + $0x8] sm:$0xff] %vm1483_vm10, %v1390_v14  ;;  %v1651_v14 = vrot.slane %v482_v24, 2 }
 0x1f9   : > { %v1392_v33 = vpop.permute.xlu0 %1391  ;;  %1694 = vrot.lane.b32.xlu1 %v9267_v27, %s8385_s15 }
 0x1fa   : > { %1486 = vst.msk [vmem:[#allocation4 + $0x10] sm:$0xff] %vm1483_vm10, %v1392_v33 }
 0x1fb   : > { %1427 = vrot.lane.b32.xlu0 %v13295_v47, %s8383_s23  ;;  %v1394_v56 = vpop.permute.xlu1 %1393  ;;  %v1520_v47 = vrot.slane %v484_v52, 1 }
 0x1fc   : > { %1487 = vst.msk [vmem:[#allocation4 + $0x18] sm:$0xff] %vm1483_vm10, %v1394_v56 }
 0x1fd   : > { %v1396_v19 = vpop.permute.xlu0 %1395  ;;  %1429 = vrot.lane.b32.xlu1 %v13297_v21, %s8383_s23 }
 0x1fe   : > { %1488 = vst.msk [vmem:[#allocation4 + $0x20] sm:$0xff] %vm1483_vm10, %v1396_v19 }
 0x1ff   : > { %1431 = vrot.lane.b32.xlu0 %v13296_v37, %s8383_s23  ;;  %v1398_v17 = vpop.permute.xlu1 %1397 }
 0x200   : > { %1489 = vst.msk [vmem:[#allocation4 + $0x28] sm:$0xff] %vm1483_vm10, %v1398_v17 }
 0x201   : > { %v1400_v45 = vpop.permute.xlu0 %1399  ;;  %1433 = vrot.lane.b32.xlu1 %v13299_v49, %s8383_s23 }
 0x202   : > { %1490 = vst.msk [vmem:[#allocation4 + $0x30] sm:$0xff] %vm1483_vm10, %v1400_v45  ;;  %v13315_v45 = vld [vmem:[#allocation40_spill] sm:$0xff] }
 0x203   : > { %1562 = vrot.lane.b32.xlu0 %v13298_v57, %s8384_s29  ;;  %v1402_v48 = vpop.permute.xlu1 %1401 }
 0x204   : > { %1491 = vst.msk [vmem:[#allocation4 + $0x38] sm:$0xff] %vm1483_vm10, %v1402_v48 }
 0x205   : > { %v1404_v27 = vpop.permute.xlu0 %1403  ;;  %1564 = vrot.lane.b32.xlu1 %v13301_v55, %s8384_s29  ;;  %v1654_v55 = vrot.slane %v484_v52, 2 }
 0x206   : > { %1492 = vst.msk [vmem:[#allocation4 + $0x40] sm:$0xff] %vm1483_vm10, %v1404_v27 }
 0x207   : > { %1566 = vrot.lane.b32.xlu0 %v13300_v26, %s8384_s29  ;;  %v1406_v8 = vpop.permute.xlu1 %1405 }
 0x208   : > { %1493 = vst.msk [vmem:[#allocation4 + $0x48] sm:$0xff] %vm1483_vm10, %v1406_v8 }
 0x209   : > { %v1408_v7 = vpop.permute.xlu0 %1407  ;;  %1568 = vrot.lane.b32.xlu1 %v13302_v36, %s8384_s29 }
 0x20a   : > { %1494 = vst.msk [vmem:[#allocation4 + $0x50] sm:$0xff] %vm1483_vm10, %v1408_v7 }
 0x20b   : > { %1696 = vrot.lane.b32.xlu0 %v13282_v15, %s8385_s15  ;;  %v1410_v18 = vpop.permute.xlu1 %1409  ;;  %v13304_v15 = vld [vmem:[#allocation51_spill] sm:$0xff] }
 0x20c   : > { %1495 = vst.msk [vmem:[#allocation4 + $0x58] sm:$0xff] %vm1483_vm10, %v1410_v18 }
 0x20d   : > { %v1412_v29 = vpop.permute.xlu0 %1411  ;;  %1698 = vrot.lane.b32.xlu1 %v9281_v39, %s8385_s15 }
 0x20e   : > { %1496 = vst.msk [vmem:[#allocation4 + $0x60] sm:$0xff] %vm1483_vm10, %v1412_v29 }
 0x20f   : > { %1700 = vrot.lane.b32.xlu0 %v13303_v30, %s8385_s15  ;;  %v1414_v4 = vpop.permute.xlu1 %1413 }
 0x210   : > { %1497 = vst.msk [vmem:[#allocation4 + $0x68] sm:$0xff] %vm1483_vm10, %v1414_v4 }
 0x211   : > { %v1416_v34 = vpop.permute.xlu0 %1415  ;;  %1702 = vrot.lane.b32.xlu1 %v9295_v3, %s8385_s15 }
 0x212   : > { %1498 = vst.msk [vmem:[#allocation4 + $0x70] sm:$0xff] %vm1483_vm10, %v1416_v34 }
 0x213   : > { %1435 = vrot.lane.b32.xlu0 %v13304_v15, %s8383_s23  ;;  %v1418_v16 = vpop.permute.xlu1 %1417 }
 0x214   : > { %1499 = vst.msk [vmem:[#allocation4 + $0x78] sm:$0xff] %vm1483_vm10, %v1418_v16 }
 0x215   : > { %v1523_v42 = vpop.permute.xlu0 %1522  ;;  %1437 = vrot.lane.b32.xlu1 %v13306_v0, %s8383_s23 }
 0x216   : > { %1619 = vst.msk [vmem:[#allocation4] sm:$0xff] %vm1618_vm11, %v1523_v42 }
 0x217   : > { %1439 = vrot.lane.b32.xlu0 %v13305_v58, %s8383_s23  ;;  %v1525_v10 = vpop.permute.xlu1 %1524 }
 0x218   : > { %1620 = vst.msk [vmem:[#allocation4 + $0x8] sm:$0xff] %vm1618_vm11, %v1525_v10 }
 0x219   : > { %v1527_v39 = vpop.permute.xlu0 %1526  ;;  %1441 = vrot.lane.b32.xlu1 %v13308_v44, %s8383_s23 }
 0x21a   : > { %1621 = vst.msk [vmem:[#allocation4 + $0x10] sm:$0xff] %vm1618_vm11, %v1527_v39 }
 0x21b   : > { %1570 = vrot.lane.b32.xlu0 %v13307_v46, %s8384_s29  ;;  %v1529_v6 = vpop.permute.xlu1 %1528 }
 0x21c   : > { %1622 = vst.msk [vmem:[#allocation4 + $0x18] sm:$0xff] %vm1618_vm11, %v1529_v6 }
 0x21d   : > { %v1657_v3 = vpop.permute.xlu0 %1656  ;;  %1572 = vrot.lane.b32.xlu1 %v13310_v13, %s8384_s29 }
 0x21e   : > { %1753 = vst.msk [vmem:[#allocation4] sm:$0xff] %vm1752_vm12, %v1657_v3 }
 0x21f   : > { %1574 = vrot.lane.b32.xlu0 %v13309_v28, %s8384_s29  ;;  %v1659_v25 = vpop.permute.xlu1 %1658 }
 0x220   : > { %1754 = vst.msk [vmem:[#allocation4 + $0x8] sm:$0xff] %vm1752_vm12, %v1659_v25 }
 0x221   : > { %v1661_v35 = vpop.permute.xlu0 %1660  ;;  %1576 = vrot.lane.b32.xlu1 %v13311_v38, %s8384_s29 }
 0x222   : > { %1755 = vst.msk [vmem:[#allocation4 + $0x10] sm:$0xff] %vm1752_vm12, %v1661_v35 }
 0x223   : > { %1704 = vrot.lane.b32.xlu0 %v9287_v43, %s8385_s15  ;;  %v1663_v50 = vpop.permute.xlu1 %1662 }
 0x224   : > { %1756 = vst.msk [vmem:[#allocation4 + $0x18] sm:$0xff] %vm1752_vm12, %v1663_v50 }
 0x225   : > { %v1531_v62 = vpop.permute.xlu0 %1530  ;;  %1706 = vrot.lane.b32.xlu1 %v9308_v11, %s8385_s15  ;;  %v1785_v43 = vld [vmem:[#allocation4] sm:$0xff] }
 0x226   : > { %1623 = vst.msk [vmem:[#allocation4 + $0x20] sm:$0xff] %vm1618_vm11, %v1531_v62  ;;  %v483_v11 = vld [vmem:[#allocation2 + $0x1a0] sm:$0xff] }
 0x227   : > { %1708 = vrot.lane.b32.xlu0 %v9301_v12, %s8385_s15  ;;  %v1533_v20 = vpop.permute.xlu1 %1532  ;;  %v1786_v9 = vld [vmem:[#allocation4 + $0x8] sm:$0xff]  ;;  %v1518_v61 = vrot.slane %v483_v11, 1  ;;  %v1652_v19 = vrot.slane %v483_v11, 2 }
 0x228   : > { %1624 = vst.msk [vmem:[#allocation4 + $0x28] sm:$0xff] %vm1618_vm11, %v1533_v20  ;;  %v1817_v12 = vpack.c.bf16 %v1786_v9, %v1785_v43 }
 0x229   : > { %v1535_v1 = vpop.permute.xlu0 %1534  ;;  %1710 = vrot.lane.b32.xlu1 %v9318_v51, %s8385_s15  ;;  %v1787_v32 = vld [vmem:[#allocation4 + $0x10] sm:$0xff]  ;;  %v1519_v41 = vsel %vm565_vm2, %v1517_v54, %v1518_v61  ;;  %v1521_v57 = vsel %vm565_vm2, %v1518_v61, %v1520_v47  ;;  %v1653_v49 = vsel %vm13153_vm3, %v1651_v14, %v1652_v19  ;;  %v1655_v30 = vsel %vm13153_vm3, %v1652_v19, %v1654_v55 }
 0x22a   : > { %1625 = vst.msk [vmem:[#allocation4 + $0x30] sm:$0xff] %vm1618_vm11, %v1535_v1  ;;  %8162 = vmatprep.mubr.msk.bf16.mxu0 %vm1860_vm13, %v1817_v12  ;;  %v13314_v51 = vld [vmem:[#allocation39_spill] sm:$0xff] }
 0x22b   : > { %1443 = vrot.lane.b32.xlu0 %v13312_v63, %s8383_s23  ;;  %v1537_v31 = vpop.permute.xlu1 %1536  ;;  %v1788_v59 = vld [vmem:[#allocation4 + $0x18] sm:$0xff] }
 0x22c   : > { %1626 = vst.msk [vmem:[#allocation4 + $0x38] sm:$0xff] %vm1618_vm11, %v1537_v31  ;;  %v1818_v60 = vpack.c.bf16 %v1788_v59, %v1787_v32 }
 0x22d   : > { %v1665_v22 = vpop.permute.xlu0 %1664  ;;  %1445 = vrot.lane.b32.xlu1 %v13313_v2, %s8383_s23 }
 0x22e   : > { %1757 = vst.msk [vmem:[#allocation4 + $0x20] sm:$0xff] %vm1752_vm12, %v1665_v22  ;;  %8163 = vmatmul.mubr.msk.bf16.vlgmr.msra.gmra.mrb[0].mxu0 %vm1860_vm13, %v1818_v60 }
 0x22f   : > { %1447 = vrot.lane.b32.xlu0 %v482_v24, %s8383_s23  ;;  %v1667_v23 = vpop.permute.xlu1 %1666 }
 0x230   : > { %1758 = vst.msk [vmem:[#allocation4 + $0x28] sm:$0xff] %vm1752_vm12, %v1667_v23 }
 0x231   : > { %v1669_v53 = vpop.permute.xlu0 %1668  ;;  %1449 = vrot.lane.b32.xlu1 %v483_v11, %s8383_s23 }
 0x232   : > { %1759 = vst.msk [vmem:[#allocation4 + $0x30] sm:$0xff] %vm1752_vm12, %v1669_v53 }
 0x233   : > { %1578 = vrot.lane.b32.xlu0 %v13314_v51, %s8384_s29  ;;  %v1671_v37 = vpop.permute.xlu1 %1670 }
 0x234   : > { %1760 = vst.msk [vmem:[#allocation4 + $0x38] sm:$0xff] %vm1752_vm12, %v1671_v37 }
 0x235   : > { %v1539_v33 = vpop.permute.xlu0 %1538  ;;  %1580 = vrot.lane.b32.xlu1 %v13315_v45, %s8384_s29  ;;  %v1789_v21 = vld [vmem:[#allocation4 + $0x20] sm:$0xff] }
 0x236   : > { %1627 = vst.msk [vmem:[#allocation4 + $0x40] sm:$0xff] %vm1618_vm11, %v1539_v33 }
 0x237   : > { %1582 = vrot.lane.b32.xlu0 %v1519_v41, %s8384_s29  ;;  %v1541_v17 = vpop.permute.xlu1 %1540  ;;  %v1790_v27 = vld [vmem:[#allocation4 + $0x28] sm:$0xff] }
 0x238   : > { %1628 = vst.msk [vmem:[#allocation4 + $0x48] sm:$0xff] %vm1618_vm11, %v1541_v17  ;;  %v1819_v26 = vpack.c.bf16 %v1790_v27, %v1789_v21 }
 0x239   : > { %v1543_v56 = vpop.permute.xlu0 %1542  ;;  %1584 = vrot.lane.b32.xlu1 %v1521_v57, %s8384_s29  ;;  %v1791_v7 = vld [vmem:[#allocation4 + $0x30] sm:$0xff] }
 0x23a   : > { %1629 = vst.msk [vmem:[#allocation4 + $0x50] sm:$0xff] %vm1618_vm11, %v1543_v56  ;;  %8166 = vmatprep.mubr.msk.bf16.mxu0 %vm1860_vm13, %v1819_v26  ;;  %v13316_v26 = vmov 0.0  }
 0x23b   : > { %1712 = vrot.lane.b32.xlu0 %v9616_v5, %s8385_s15  ;;  %v1545_v8 = vpop.permute.xlu1 %1544  ;;  %v1792_v5 = vld [vmem:[#allocation4 + $0x38] sm:$0xff]  ;;  %2114 = vst.msk [vmem:[#allocation3 + $0x30] sm:$0xff] %vm13152_vm14, %v13316_v26  ;;  %2115 = vst.msk [vmem:[#allocation3 + $0x38] sm:$0xff] %vm13152_vm14, %v13316_v26 }
 0x23c   : > { %1630 = vst.msk [vmem:[#allocation4 + $0x58] sm:$0xff] %vm1618_vm11, %v1545_v8  ;;  %v1820_v29 = vpack.c.bf16 %v1792_v5, %v1791_v7 }
 0x23d   : > { %v1673_v48 = vpop.permute.xlu0 %1672  ;;  %1714 = vrot.lane.b32.xlu1 %v9630_v40, %s8385_s15  ;;  %2107 = vst.msk [vmem:[#allocation3] sm:$0xff] %vm13152_vm14, %v13316_v26  ;;  %2108 = vst.msk [vmem:[#allocation3 + $0x8] sm:$0xff] %vm13152_vm14, %v13316_v26 }
 0x23e   : > { %1761 = vst.msk [vmem:[#allocation4 + $0x40] sm:$0xff] %vm1752_vm12, %v1673_v48  ;;  %8167 = vmatmul.mubr.msk.bf16.gmra.mrb[4].mxu0 %vm1860_vm13, %v1820_v29 }
 0x23f   : > { %1716 = vrot.lane.b32.xlu0 %v1653_v49, %s8385_s15  ;;  %v1675_v18 = vpop.permute.xlu1 %1674  ;;  %2111 = vst.msk [vmem:[#allocation3 + $0x18] sm:$0xff] %vm13152_vm14, %v13316_v26  ;;  %2112 = vst.msk [vmem:[#allocation3 + $0x20] sm:$0xff] %vm13152_vm14, %v13316_v26 }
 0x240   : > { %1762 = vst.msk [vmem:[#allocation4 + $0x48] sm:$0xff] %vm1752_vm12, %v1675_v18 }
 0x241   : > { %v1677_v36 = vpop.permute.xlu0 %1676  ;;  %1718 = vrot.lane.b32.xlu1 %v1655_v30, %s8385_s15  ;;  %2117 = vst.msk [vmem:[#allocation3 + $0x48] sm:$0xff] %vm13152_vm14, %v13316_v26  ;;  %2118 = vst.msk [vmem:[#allocation3 + $0x50] sm:$0xff] %vm13152_vm14, %v13316_v26 }
 0x242   : > { %1763 = vst.msk [vmem:[#allocation4 + $0x50] sm:$0xff] %vm1752_vm12, %v1677_v36 }
 0x243   : > { %v1679_v15 = vpop.permute.xlu1 %1678  ;;  %2120 = vst.msk [vmem:[#allocation3 + $0x60] sm:$0xff] %vm13152_vm14, %v13316_v26  ;;  %2121 = vst.msk [vmem:[#allocation3 + $0x68] sm:$0xff] %vm13152_vm14, %v13316_v26 }
 0x244   : > { %1764 = vst.msk [vmem:[#allocation4 + $0x58] sm:$0xff] %vm1752_vm12, %v1679_v15  ;;  %v10094_v15 = vld [vmem:[#allocation3 + $0x8] sm:$0xff] }
 0x245   : > { %v1547_v34 = vpop.permute.xlu0 %1546  ;;  %v1793_v42 = vld [vmem:[#allocation4 + $0x40] sm:$0xff]  ;;  %2123 = vst.msk [vmem:[#allocation3 + $0x78] sm:$0xff] %vm13152_vm14, %v13316_v26  ;;  %2124 = vst.msk [vmem:[#allocation3 + $0x80] sm:$0xff] %vm13152_vm14, %v13316_v26 }
 0x246   : > { %1631 = vst.msk [vmem:[#allocation4 + $0x60] sm:$0xff] %vm1618_vm11, %v1547_v34  ;;  %v10092_v34 = vld [vmem:[#allocation3] sm:$0xff] }
 0x247   : > { %v1549_v40 = vpop.permute.xlu1 %1548  ;;  %v1794_v58 = vld [vmem:[#allocation4 + $0x48] sm:$0xff]  ;;  %2126 = vst.msk [vmem:[#allocation3 + $0x90] sm:$0xff] %vm13152_vm14, %v13316_v26  ;;  %2127 = vst.msk [vmem:[#allocation3 + $0x98] sm:$0xff] %vm13152_vm14, %v13316_v26 }
 0x248   : > { %1632 = vst.msk [vmem:[#allocation4 + $0x68] sm:$0xff] %vm1618_vm11, %v1549_v40  ;;  %v1821_v16 = vpack.c.bf16 %v1794_v58, %v1793_v42  ;;  %v2329_v42 = vrot.slane %v10092_v34, 1  ;;  %v2330_v40 = vrot.slane %v10094_v15, 1 }
 0x249   : > { %v1551_v4 = vpop.permute.xlu0 %1550  ;;  %v1795_v0 = vld [vmem:[#allocation4 + $0x50] sm:$0xff]  ;;  %2129 = vst.msk [vmem:[#allocation3 + $0xa8] sm:$0xff] %vm13152_vm14, %v13316_v26  ;;  %2130 = vst.msk [vmem:[#allocation3 + $0xb0] sm:$0xff] %vm13152_vm14, %v13316_v26 }
 0x24a   : > { %1633 = vst.msk [vmem:[#allocation4 + $0x70] sm:$0xff] %vm1618_vm11, %v1551_v4  ;;  %8170 = vmatprep.mubr.msk.bf16.mxu0 %vm1860_vm13, %v1821_v16 }
 0x24b   : > { %v1553_v46 = vpop.permute.xlu1 %1552  ;;  %v1796_v10 = vld [vmem:[#allocation4 + $0x58] sm:$0xff]  ;;  %2132 = vst.msk [vmem:[#allocation3 + $0xc0] sm:$0xff] %vm13152_vm14, %v13316_v26  ;;  %2133 = vst.msk [vmem:[#allocation3 + $0xc8] sm:$0xff] %vm13152_vm14, %v13316_v26 }
 0x24c   : > { %1634 = vst.msk [vmem:[#allocation4 + $0x78] sm:$0xff] %vm1618_vm11, %v1553_v46  ;;  %v1822_v3 = vpack.c.bf16 %v1796_v10, %v1795_v0 }
 0x24d   : > { %v1681_v39 = vpop.permute.xlu0 %1680  ;;  %2135 = vst.msk [vmem:[#allocation3 + $0xd8] sm:$0xff] %vm13152_vm14, %v13316_v26  ;;  %2136 = vst.msk [vmem:[#allocation3 + $0xe0] sm:$0xff] %vm13152_vm14, %v13316_v26 }
 0x24e   : > { %1765 = vst.msk [vmem:[#allocation4 + $0x60] sm:$0xff] %vm1752_vm12, %v1681_v39  ;;  %8171 = vmatmul.mubr.msk.bf16.gmra.mrb[8].mxu0 %vm1860_vm13, %v1822_v3  ;;  %v2331_v39 = vsel %vm565_vm2, %v2329_v42, %v2330_v40 }
 0x24f   : > { %v1683_v28 = vpop.permute.xlu1 %1682  ;;  %2138 = vst.msk [vmem:[#allocation3 + $0xf0] sm:$0xff] %vm13152_vm14, %v13316_v26  ;;  %2139 = vst.msk [vmem:[#allocation3 + $0xf8] sm:$0xff] %vm13152_vm14, %v13316_v26  ;;  %2409 = vrot.lane.b32.xlu0 %v2331_v39, %s8379_s19 }
 0x250   : > { %1766 = vst.msk [vmem:[#allocation4 + $0x68] sm:$0xff] %vm1752_vm12, %v1683_v28 }
 0x251   : > { %v1685_v44 = vpop.permute.xlu0 %1684  ;;  %2141 = vst.msk [vmem:[#allocation3 + $0x108] sm:$0xff] %vm13152_vm14, %v13316_v26  ;;  %2142 = vst.msk [vmem:[#allocation3 + $0x110] sm:$0xff] %vm13152_vm14, %v13316_v26 }
 0x252   : > { %1767 = vst.msk [vmem:[#allocation4 + $0x70] sm:$0xff] %vm1752_vm12, %v1685_v44 }
 0x253   : > { %v1687_v35 = vpop.permute.xlu1 %1686  ;;  %2144 = vst.msk [vmem:[#allocation3 + $0x120] sm:$0xff] %vm13152_vm14, %v13316_v26  ;;  %2145 = vst.msk [vmem:[#allocation3 + $0x128] sm:$0xff] %vm13152_vm14, %v13316_v26 }
 0x254   : > { %1768 = vst.msk [vmem:[#allocation4 + $0x78] sm:$0xff] %vm1752_vm12, %v1687_v35 }
 0x255   : > { %v1420_v6 = vpop.permute.xlu0 %1419  ;;  %v1797_v25 = vld [vmem:[#allocation4 + $0x60] sm:$0xff]  ;;  %2147 = vst.msk [vmem:[#allocation3 + $0x138] sm:$0xff] %vm13152_vm14, %v13316_v26  ;;  %2148 = vst.msk [vmem:[#allocation3 + $0x140] sm:$0xff] %vm13152_vm14, %v13316_v26 }
 0x256   : > { %1500 = vst.msk [vmem:[#allocation4 + $0x80] sm:$0xff] %vm1483_vm10, %v1420_v6 }
 0x257   : > { %v1422_v62 = vpop.permute.xlu1 %1421  ;;  %v1798_v38 = vld [vmem:[#allocation4 + $0x68] sm:$0xff]  ;;  %2150 = vst.msk [vmem:[#allocation3 + $0x150] sm:$0xff] %vm13152_vm14, %v13316_v26  ;;  %2151 = vst.msk [vmem:[#allocation3 + $0x158] sm:$0xff] %vm13152_vm14, %v13316_v26 }
 0x258   : > { %1501 = vst.msk [vmem:[#allocation4 + $0x88] sm:$0xff] %vm1483_vm10, %v1422_v62  ;;  %v1823_v50 = vpack.c.bf16 %v1798_v38, %v1797_v25 }
 0x259   : > { %v1424_v13 = vpop.permute.xlu0 %1423  ;;  %v1799_v43 = vld [vmem:[#allocation4 + $0x70] sm:$0xff]  ;;  %2153 = vst.msk [vmem:[#allocation3 + $0x168] sm:$0xff] %vm13152_vm14, %v13316_v26  ;;  %2154 = vst.msk [vmem:[#allocation3 + $0x170] sm:$0xff] %vm13152_vm14, %v13316_v26 }
 0x25a   : > { %1502 = vst.msk [vmem:[#allocation4 + $0x90] sm:$0xff] %vm1483_vm10, %v1424_v13  ;;  %8174 = vmatprep.mubr.msk.bf16.mxu0 %vm1860_vm13, %v1823_v50 }
 0x25b   : > { %v1426_v63 = vpop.permute.xlu1 %1425  ;;  %v1800_v20 = vld [vmem:[#allocation4 + $0x78] sm:$0xff]  ;;  %2156 = vst.msk [vmem:[#allocation3 + $0x180] sm:$0xff] %vm13152_vm14, %v13316_v26  ;;  %2157 = vst.msk [vmem:[#allocation3 + $0x188] sm:$0xff] %vm13152_vm14, %v13316_v26 }
 0x25c   : > { %1503 = vst.msk [vmem:[#allocation4 + $0x98] sm:$0xff] %vm1483_vm10, %v1426_v63  ;;  %v1824_v9 = vpack.c.bf16 %v1800_v20, %v1799_v43 }
 0x25d   : > { %v1555_v1 = vpop.permute.xlu0 %1554  ;;  %2159 = vst.msk [vmem:[#allocation3 + $0x198] sm:$0xff] %vm13152_vm14, %v13316_v26  ;;  %2160 = vst.msk [vmem:[#allocation3 + $0x1a0] sm:$0xff] %vm13152_vm14, %v13316_v26 }
 0x25e   : > { %1635 = vst.msk [vmem:[#allocation4 + $0x80] sm:$0xff] %vm1618_vm11, %v1555_v1  ;;  %8175 = vmatmul.mubr.msk.bf16.gmra.mrb[12].mxu0 %vm1860_vm13, %v1824_v9 }
 0x25f   : > { %v1557_v12 = vpop.permute.xlu1 %1556  ;;  %2116 = vst.msk [vmem:[#allocation3 + $0x40] sm:$0x3] %vm2109_vm15, %v13316_v26  ;;  %2110 = vst.msk [vmem:[#allocation3 + $0x10] sm:$0x3] %vm2109_vm15, %v13316_v26 }
 0x260   : > { %1636 = vst.msk [vmem:[#allocation4 + $0x88] sm:$0xff] %vm1618_vm11, %v1557_v12 }
 0x261   : > { %v1559_v24 = vpop.permute.xlu0 %1558  ;;  %2113 = vst.msk [vmem:[#allocation3 + $0x28] sm:$0x3] %vm2109_vm15, %v13316_v26  ;;  %2119 = vst.msk [vmem:[#allocation3 + $0x58] sm:$0x3] %vm2109_vm15, %v13316_v26 }
 0x262   : > { %1637 = vst.msk [vmem:[#allocation4 + $0x90] sm:$0xff] %vm1618_vm11, %v1559_v24 }
 0x263   : > { %v1561_v32 = vpop.permute.xlu1 %1560  ;;  %2122 = vst.msk [vmem:[#allocation3 + $0x70] sm:$0x3] %vm2109_vm15, %v13316_v26  ;;  %2125 = vst.msk [vmem:[#allocation3 + $0x88] sm:$0x3] %vm2109_vm15, %v13316_v26 }
 0x264   : > { %1638 = vst.msk [vmem:[#allocation4 + $0x98] sm:$0xff] %vm1618_vm11, %v1561_v32 }
 0x265   : > { %v1689_v22 = vpop.permute.xlu0 %1688  ;;  %2128 = vst.msk [vmem:[#allocation3 + $0xa0] sm:$0x3] %vm2109_vm15, %v13316_v26  ;;  %2131 = vst.msk [vmem:[#allocation3 + $0xb8] sm:$0x3] %vm2109_vm15, %v13316_v26 }
 0x266   : > { %1769 = vst.msk [vmem:[#allocation4 + $0x80] sm:$0xff] %vm1752_vm12, %v1689_v22  ;;  %v10096_v4 = vld [vmem:[#allocation3 + $0x10] sm:$0x3] }
 0x267   : > { %v1691_v31 = vpop.permute.xlu1 %1690  ;;  %2134 = vst.msk [vmem:[#allocation3 + $0xd0] sm:$0x3] %vm2109_vm15, %v13316_v26  ;;  %2137 = vst.msk [vmem:[#allocation3 + $0xe8] sm:$0x3] %vm2109_vm15, %v13316_v26  ;;  %v2332_v58 = vrot.slane %v10096_v4, 1 }
 0x268   : > { %1770 = vst.msk [vmem:[#allocation4 + $0x88] sm:$0xff] %vm1752_vm12, %v1691_v31 }
 0x269   : > { %v1693_v11 = vpop.permute.xlu0 %1692  ;;  %2140 = vst.msk [vmem:[#allocation3 + $0x100] sm:$0x3] %vm2109_vm15, %v13316_v26  ;;  %2143 = vst.msk [vmem:[#allocation3 + $0x118] sm:$0x3] %vm2109_vm15, %v13316_v26  ;;  %v2333_v0 = vsel %vm565_vm2, %v2330_v40, %v2332_v58 }
 0x26a   : > { %1771 = vst.msk [vmem:[#allocation4 + $0x90] sm:$0xff] %vm1752_vm12, %v1693_v11  ;;  %2411 = vrot.lane.b32.xlu1 %v2333_v0, %s8379_s19 }
 0x26b   : > { %v1695_v54 = vpop.permute.xlu1 %1694  ;;  %2146 = vst.msk [vmem:[#allocation3 + $0x130] sm:$0x3] %vm2109_vm15, %v13316_v26  ;;  %2149 = vst.msk [vmem:[#allocation3 + $0x148] sm:$0x3] %vm2109_vm15, %v13316_v26 }
 0x26c   : > { %1772 = vst.msk [vmem:[#allocation4 + $0x98] sm:$0xff] %vm1752_vm12, %v1695_v54 }
 0x26d   : > { %v1428_v59 = vpop.permute.xlu0 %1427  ;;  %v1801_v60 = vld [vmem:[#allocation4 + $0x80] sm:$0xff]  ;;  %2152 = vst.msk [vmem:[#allocation3 + $0x160] sm:$0x3] %vm2109_vm15, %v13316_v26  ;;  %2155 = vst.msk [vmem:[#allocation3 + $0x178] sm:$0x3] %vm2109_vm15, %v13316_v26 }
 0x26e   : > { %1504 = vst.msk [vmem:[#allocation4 + $0xa0] sm:$0xff] %vm1483_vm10, %v1428_v59 }
 0x26f   : > { %v1430_v53 = vpop.permute.xlu1 %1429  ;;  %v1802_v2 = vld [vmem:[#allocation4 + $0x88] sm:$0xff]  ;;  %2158 = vst.msk [vmem:[#allocation3 + $0x190] sm:$0x3] %vm2109_vm15, %v13316_v26  ;;  %2161 = vst.msk [vmem:[#allocation3 + $0x1a8] sm:$0x3] %vm2109_vm15, %v13316_v26  ;;  %vm2980_vm15 = vcmask 326912  }
 0x270   : > { %1505 = vst.msk [vmem:[#allocation4 + $0xa8] sm:$0xff] %vm1483_vm10, %v1430_v53  ;;  %v1825_v51 = vpack.c.bf16 %v1802_v2, %v1801_v60 }
 0x271   : > { %v1432_v61 = vpop.permute.xlu0 %1431  ;;  %v1803_v41 = vld [vmem:[#allocation4 + $0x90] sm:$0xff]  ;;  %2249 = vst.msk [vmem:[#allocation5] sm:$0xff] %vm13152_vm14, %v10092_v34  ;;  %2250 = vst.msk [vmem:[#allocation5 + $0x8] sm:$0xff] %vm13152_vm14, %v10094_v15 }
 0x272   : > { %1506 = vst.msk [vmem:[#allocation4 + $0xb0] sm:$0xff] %vm1483_vm10, %v1432_v61  ;;  %8178 = vmatprep.mubr.msk.bf16.mxu0 %vm1860_vm13, %v1825_v51  ;;  %v10136_v51 = vld [vmem:[%s12843_s2] ss:$0 sm:$0xff] }
 0x273   : > { %v1434_v52 = vpop.permute.xlu1 %1433  ;;  %v1804_v33 = vld [vmem:[#allocation4 + $0x98] sm:$0xff] }
 0x274   : > { %1507 = vst.msk [vmem:[#allocation4 + $0xb8] sm:$0xff] %vm1483_vm10, %v1434_v52  ;;  %v1826_v47 = vpack.c.bf16 %v1804_v33, %v1803_v41 }
 0x275   : > { %v1563_v23 = vpop.permute.xlu0 %1562 }
 0x276   : > { %1639 = vst.msk [vmem:[#allocation4 + $0xa0] sm:$0xff] %vm1618_vm11, %v1563_v23  ;;  %8179 = vmatmul.mubr.msk.bf16.gmra.mrb[16].mxu0 %vm1860_vm13, %v1826_v47 }
 0x277   : > { %v1565_v19 = vpop.permute.xlu1 %1564 }
 0x278   : > { %1640 = vst.msk [vmem:[#allocation4 + $0xa8] sm:$0xff] %vm1618_vm11, %v1565_v19 }
 0x279   : > { %v1567_v14 = vpop.permute.xlu0 %1566 }
 0x27a   : > { %1641 = vst.msk [vmem:[#allocation4 + $0xb0] sm:$0xff] %vm1618_vm11, %v1567_v14 }
 0x27b   : > { %v1569_v56 = vpop.permute.xlu1 %1568 }
 0x27c   : > { %1642 = vst.msk [vmem:[#allocation4 + $0xb8] sm:$0xff] %vm1618_vm11, %v1569_v56 }
 0x27d   : > { %v1697_v37 = vpop.permute.xlu0 %1696 }
 0x27e   : > { %1773 = vst.msk [vmem:[#allocation4 + $0xa0] sm:$0xff] %vm1752_vm12, %v1697_v37 }
 0x27f   : > { %v1699_v21 = vpop.permute.xlu1 %1698 }
 0x280   : > { %1774 = vst.msk [vmem:[#allocation4 + $0xa8] sm:$0xff] %vm1752_vm12, %v1699_v21 }
 0x281   : > { %v1701_v45 = vpop.permute.xlu0 %1700 }
 0x282   : > { %1775 = vst.msk [vmem:[#allocation4 + $0xb0] sm:$0xff] %vm1752_vm12, %v1701_v45 }
 0x283   : > { %v1703_v17 = vpop.permute.xlu1 %1702 }
 0x284   : > { %1776 = vst.msk [vmem:[#allocation4 + $0xb8] sm:$0xff] %vm1752_vm12, %v1703_v17 }
 0x285   : > { %v1436_v57 = vpop.permute.xlu0 %1435  ;;  %v9976_v49 = vld [vmem:[#allocation4 + $0xa0] sm:$0xff] }
 0x286   : > { %1508 = vst.msk [vmem:[#allocation4 + $0xc0] sm:$0xff] %vm1483_vm10, %v1436_v57 }
 0x287   : > { %v1438_v48 = vpop.permute.xlu1 %1437  ;;  %v1806_v7 = vld [vmem:[#allocation4 + $0xa8] sm:$0xff] }
 0x288   : > { %1509 = vst.msk [vmem:[#allocation4 + $0xc8] sm:$0xff] %vm1483_vm10, %v1438_v48  ;;  %v1827_v55 = vpack.c.bf16 %v1806_v7, %v9976_v49 }
 0x289   : > { %v1440_v27 = vpop.permute.xlu0 %1439  ;;  %v1807_v5 = vld [vmem:[#allocation4 + $0xb0] sm:$0xff] }
 0x28a   : > { %1510 = vst.msk [vmem:[#allocation4 + $0xd0] sm:$0xff] %vm1483_vm10, %v1440_v27  ;;  %8182 = vmatprep.mubr.msk.bf16.mxu0 %vm1860_vm13, %v1827_v55 }
 0x28b   : > { %v1442_v29 = vpop.permute.xlu1 %1441  ;;  %v1808_v36 = vld [vmem:[#allocation4 + $0xb8] sm:$0xff] }
 0x28c   : > { %1511 = vst.msk [vmem:[#allocation4 + $0xd8] sm:$0xff] %vm1483_vm10, %v1442_v29  ;;  %v1828_v30 = vpack.c.bf16 %v1808_v36, %v1807_v5 }
 0x28d   : > { %v1571_v8 = vpop.permute.xlu0 %1570 }
 0x28e   : > { %1643 = vst.msk [vmem:[#allocation4 + $0xc0] sm:$0xff] %vm1618_vm11, %v1571_v8  ;;  %8183 = vmatmul.mubr.msk.bf16.gmra.mrb[20].mxu0 %vm1860_vm13, %v1828_v30 }
 0x28f   : > { %v1573_v16 = vpop.permute.xlu1 %1572 }
 0x290   : > { %1644 = vst.msk [vmem:[#allocation4 + $0xc8] sm:$0xff] %vm1618_vm11, %v1573_v16 }
 0x291   : > { %v1575_v18 = vpop.permute.xlu0 %1574 }
 0x292   : > { %1645 = vst.msk [vmem:[#allocation4 + $0xd0] sm:$0xff] %vm1618_vm11, %v1575_v18 }
 0x293   : > { %v1577_v10 = vpop.permute.xlu1 %1576 }
 0x294   : > { %1646 = vst.msk [vmem:[#allocation4 + $0xd8] sm:$0xff] %vm1618_vm11, %v1577_v10 }
 0x295   : > { %v1705_v46 = vpop.permute.xlu0 %1704 }
 0x296   : > { %1777 = vst.msk [vmem:[#allocation4 + $0xc0] sm:$0xff] %vm1752_vm12, %v1705_v46 }
 0x297   : > { %v1707_v44 = vpop.permute.xlu1 %1706 }
 0x298   : > { %1778 = vst.msk [vmem:[#allocation4 + $0xc8] sm:$0xff] %vm1752_vm12, %v1707_v44 }
 0x299   : > { %v1709_v3 = vpop.permute.xlu0 %1708 }
 0x29a   : > { %1779 = vst.msk [vmem:[#allocation4 + $0xd0] sm:$0xff] %vm1752_vm12, %v1709_v3 }
 0x29b   : > { %v1711_v6 = vpop.permute.xlu1 %1710 }
 0x29c   : > { %1780 = vst.msk [vmem:[#allocation4 + $0xd8] sm:$0xff] %vm1752_vm12, %v1711_v6 }
 0x29d   : > { %v1444_v28 = vpop.permute.xlu0 %1443  ;;  %v1809_v13 = vld [vmem:[#allocation4 + $0xc0] sm:$0xff] }
 0x29e   : > { %1512 = vst.msk [vmem:[#allocation4 + $0xe0] sm:$0xff] %vm1483_vm10, %v1444_v28 }
 0x29f   : > { %v1446_v25 = vpop.permute.xlu1 %1445  ;;  %v1810_v62 = vld [vmem:[#allocation4 + $0xc8] sm:$0xff] }
 0x2a0   : > { %1513 = vst.msk [vmem:[#allocation4 + $0xe8] sm:$0xff] %vm1483_vm10, %v1446_v25  ;;  %v1829_v38 = vpack.c.bf16 %v1810_v62, %v1809_v13 }
 0x2a1   : > { %v1448_v35 = vpop.permute.xlu0 %1447  ;;  %v1811_v1 = vld [vmem:[#allocation4 + $0xd0] sm:$0xff] }
 0x2a2   : > { %1514 = vst.msk [vmem:[#allocation4 + $0xf0] sm:$0xff] %vm1483_vm10, %v1448_v35  ;;  %8186 = vmatprep.mubr.msk.bf16.mxu0 %vm1860_vm13, %v1829_v38 }
 0x2a3   : > { %v1450_v43 = vpop.permute.xlu1 %1449  ;;  %v1812_v63 = vld [vmem:[#allocation4 + $0xd8] sm:$0xff] }
 0x2a4   : > { %1515 = vst.msk [vmem:[#allocation4 + $0xf8] sm:$0xff] %vm1483_vm10, %v1450_v43  ;;  %v1830_v20 = vpack.c.bf16 %v1812_v63, %v1811_v1  ;;  %vm6753_vm10 = vcmask 1045509  }
 0x2a5   : > { %v1579_v50 = vpop.permute.xlu0 %1578 }
 0x2a6   : > { %1647 = vst.msk [vmem:[#allocation4 + $0xe0] sm:$0xff] %vm1618_vm11, %v1579_v50  ;;  %8187 = vmatmul.mubr.msk.bf16.gmra.mrb[24].mxu0 %vm1860_vm13, %v1830_v20 }
 0x2a7   : > { %v1581_v24 = vpop.permute.xlu1 %1580 }
 0x2a8   : > { %1648 = vst.msk [vmem:[#allocation4 + $0xe8] sm:$0xff] %vm1618_vm11, %v1581_v24 }
 0x2a9   : > { %v1583_v9 = vpop.permute.xlu0 %1582 }
 0x2aa   : > { %1649 = vst.msk [vmem:[#allocation4 + $0xf0] sm:$0xff] %vm1618_vm11, %v1583_v9 }
 0x2ab   : > { %v1585_v22 = vpop.permute.xlu1 %1584 }
 0x2ac   : > { %1650 = vst.msk [vmem:[#allocation4 + $0xf8] sm:$0xff] %vm1618_vm11, %v1585_v22  ;;  %vm6756_vm11 = vcmask 1046534  }
 0x2ad   : > { %v1713_v12 = vpop.permute.xlu0 %1712 }
 0x2ae   : > { %1781 = vst.msk [vmem:[#allocation4 + $0xe0] sm:$0xff] %vm1752_vm12, %v1713_v12 }
 0x2af   : > { %v1715_v11 = vpop.permute.xlu1 %1714 }
 0x2b0   : > { %1782 = vst.msk [vmem:[#allocation4 + $0xe8] sm:$0xff] %vm1752_vm12, %v1715_v11 }
 0x2b1   : > { %v1717_v32 = vpop.permute.xlu0 %1716 }
 0x2b2   : > { %1783 = vst.msk [vmem:[#allocation4 + $0xf0] sm:$0xff] %vm1752_vm12, %v1717_v32 }
 0x2b3   : > { %v1719_v31 = vpop.permute.xlu1 %1718 }
 0x2b4   : > { %1784 = vst.msk [vmem:[#allocation4 + $0xf8] sm:$0xff] %vm1752_vm12, %v1719_v31  ;;  %vm13154_vm12 = vcmask 1047559  }
 0x2b5   : > { %v1813_v59 = vld [vmem:[#allocation4 + $0xe0] sm:$0xff] }
 0x2b7   : > { %v1814_v54 = vld [vmem:[#allocation4 + $0xe8] sm:$0xff] }
 0x2b8   : > { %v1831_v61 = vpack.c.bf16 %v1814_v54, %v1813_v59 }
 0x2b9   : > { %v1815_v60 = vld [vmem:[#allocation4 + $0xf0] sm:$0xff] }
 0x2ba   : > { %8190 = vmatprep.mubr.msk.bf16.mxu0 %vm1860_vm13, %v1831_v61 }
 0x2bb   : > { %v1816_v53 = vld [vmem:[#allocation4 + $0xf8] sm:$0xff] }
 0x2bc   : > { %v1832_v2 = vpack.c.bf16 %v1816_v53, %v1815_v60 }
 0x2be   : > { %8191 = vmatmul.mubr.msk.bf16.gmra.mrb[28].mxu0 %vm1860_vm13, %v1832_v2  ;;  %vm2845_vm13 = vcmask 261312  }
 0x2c1   : > { %v2410_v33 = vpop.permute.xlu0 %2409 }
 0x2c2   : > { %2506 = vst.msk [vmem:[#allocation5] sm:$0xff] %vm2505_vm1, %v2410_v33 }
 0x2dc   : > { %v2412_v19 = vpop.permute.xlu1 %2411 }
 0x2dd   : > { %2507 = vst.msk [vmem:[#allocation5 + $0x8] sm:$0xff] %vm2505_vm1, %v2412_v19 }
 0x301   : > { %v8164_v23 = vpop.f32.mrb[0].mxu0 }
 0x302   : > { %v1956_v41 = vadd.f32 %v8164_v23, %v10136_v51  ;;  %v1947_v52 = vpop.f32.mrb[1].mxu0 }
 0x303   : > { %v1948_v47 = vadd.f32 %v10136_v51, %v1947_v52  ;;  %v8165_v14 = vpop.f32.mrb[2].mxu0 }
 0x304   : > { %v2076_v37 = vmax.f32 %v1956_v41, 0.0  ;;  %v1959_v56 = vadd.f32 %v8165_v14, %v10136_v51  ;;  %v1950_v45 = vpop.f32.mrb[3].mxu0 }
 0x305   : > { %v2074_v21 = vmax.f32 %v1948_v47, 0.0  ;;  %v1951_v57 = vadd.f32 %v10136_v51, %v1950_v45 }
 0x306   : > { %2165 = vst.msk [vmem:[#allocation3 + $0x31] sm:$0xff] %vm13152_vm14, %v2076_v37  ;;  %v2077_v17 = vmax.f32 %v1959_v56, 0.0 }
 0x307   : > { %2163 = vst.msk [vmem:[#allocation3 + $0x19] sm:$0xff] %vm13152_vm14, %v2074_v21  ;;  %v2075_v27 = vmax.f32 %v1951_v57, 0.0 }
 0x308   : > { %2166 = vst.msk [vmem:[#allocation3 + $0x39] sm:$0xff] %vm13152_vm14, %v2077_v17 }
 0x309   : > { %2164 = vst.msk [vmem:[#allocation3 + $0x21] sm:$0xff] %vm13152_vm14, %v2075_v27 }
 0x30d   : > { %v10148_v49 = vld [vmem:[#allocation3 + $0x30] sm:$0xff] }
 0x30e   : > { %v10150_v26 = vld [vmem:[#allocation3 + $0x18] sm:$0xff]  ;;  %2253 = vst.msk [vmem:[#allocation5 + $0x20] sm:$0xff] %vm13152_vm14, %v10148_v49  ;;  %v2339_v35 = vrot.slane %v10148_v49, 1 }
 0x30f   : > { %2251 = vst.msk [vmem:[#allocation5 + $0x10] sm:$0xff] %vm13152_vm14, %v10150_v26  ;;  %v10156_v48 = vld [vmem:[#allocation3 + $0x38] sm:$0xff]  ;;  %v10162_v8 = vld [vmem:[#allocation3 + $0x40] sm:$0x3]  ;;  %v2334_v30 = vrot.slane %v10150_v26, 1 }
 0x310   : > { %v10158_v7 = vld [vmem:[#allocation3 + $0x20] sm:$0xff]  ;;  %v10160_v55 = vld [vmem:[#allocation3 + $0x28] sm:$0x3]  ;;  %2254 = vst.msk [vmem:[#allocation5 + $0x28] sm:$0xff] %vm13152_vm14, %v10156_v48  ;;  %v2340_v40 = vrot.slane %v10156_v48, 1  ;;  %v2342_v46 = vrot.slane %v10162_v8, 1 }
 0x311   : > { %v8168_v5 = vpop.f32.mrb[4].mxu0  ;;  %v2335_v29 = vrot.slane %v10158_v7, 1  ;;  %v2337_v36 = vrot.slane %v10160_v55, 1  ;;  %2252 = vst.msk [vmem:[#allocation5 + $0x18] sm:$0xff] %vm13152_vm14, %v10158_v7 }
 0x312   : > { %v1972_v18 = vadd.f32 %v8168_v5, %v10136_v51  ;;  %v1963_v42 = vpop.f32.mrb[5].mxu0  ;;  %v10191_v62 = vsel %vm565_vm2, %v2340_v40, %v2342_v46  ;;  %v10194_v38 = vsel %vm565_vm2, %v2339_v35, %v2340_v40 }
 0x313   : > { %v1964_v58 = vadd.f32 %v10136_v51, %v1963_v42  ;;  %v8169_v16 = vpop.f32.mrb[6].mxu0  ;;  %v10175_v39 = vsel %vm565_vm2, %v2335_v29, %v2337_v36  ;;  %v10178_v0 = vsel %vm565_vm2, %v2334_v30, %v2335_v29 }
 0x314   : > { %v2080_v10 = vmax.f32 %v1972_v18, 0.0  ;;  %v1975_v3 = vadd.f32 %v8169_v16, %v10136_v51  ;;  %v1966_v44 = vpop.f32.mrb[7].mxu0  ;;  %2415 = vrot.lane.b32.xlu1 %v10175_v39, %s8379_s19  ;;  %2413 = vrot.lane.b32.xlu0 %v10178_v0, %s8379_s19 }
 0x315   : > { %v2078_v28 = vmax.f32 %v1964_v58, 0.0  ;;  %v1967_v6 = vadd.f32 %v10136_v51, %v1966_v44 }
 0x316   : > { %2169 = vst.msk [vmem:[#allocation3 + $0x61] sm:$0xff] %vm13152_vm14, %v2080_v10  ;;  %v2081_v13 = vmax.f32 %v1975_v3, 0.0 }
 0x317   : > { %2167 = vst.msk [vmem:[#allocation3 + $0x49] sm:$0xff] %vm13152_vm14, %v2078_v28  ;;  %v2079_v25 = vmax.f32 %v1967_v6, 0.0 }
 0x318   : > { %2170 = vst.msk [vmem:[#allocation3 + $0x69] sm:$0xff] %vm13152_vm14, %v2081_v13  ;;  %2419 = vrot.lane.b32.xlu1 %v10191_v62, %s8379_s19  ;;  %2417 = vrot.lane.b32.xlu0 %v10194_v38, %s8379_s19 }
 0x319   : > { %2168 = vst.msk [vmem:[#allocation3 + $0x51] sm:$0xff] %vm13152_vm14, %v2079_v25 }
 0x31d   : > { %v10202_v50 = vld [vmem:[#allocation3 + $0x60] sm:$0xff] }
 0x31e   : > { %13317 = vst [vmem:[#allocation47_spill] sm:$0xff] %v10202_v50  ;;  %v10204_v1 = vld [vmem:[#allocation3 + $0x48] sm:$0xff]  ;;  %2257 = vst.msk [vmem:[#allocation5 + $0x40] sm:$0xff] %vm13152_vm14, %v10202_v50  ;;  %v2349_v14 = vrot.slane %v10202_v50, 1 }
 0x31f   : > { %2255 = vst.msk [vmem:[#allocation5 + $0x30] sm:$0xff] %vm13152_vm14, %v10204_v1  ;;  %v10210_v43 = vld [vmem:[#allocation3 + $0x68] sm:$0xff]  ;;  %v10216_v9 = vld [vmem:[#allocation3 + $0x70] sm:$0x3]  ;;  %v2344_v32 = vrot.slane %v10204_v1, 1 }
 0x320   : > { %v10212_v63 = vld [vmem:[#allocation3 + $0x50] sm:$0xff]  ;;  %v10214_v20 = vld [vmem:[#allocation3 + $0x58] sm:$0x3]  ;;  %2258 = vst.msk [vmem:[#allocation5 + $0x48] sm:$0xff] %vm13152_vm14, %v10210_v43  ;;  %v2350_v59 = vrot.slane %v10210_v43, 1  ;;  %v2352_v2 = vrot.slane %v10216_v9, 1 }
 0x321   : > { %v8172_v24 = vpop.f32.mrb[8].mxu0  ;;  %v2345_v12 = vrot.slane %v10212_v63, 1  ;;  %v2347_v22 = vrot.slane %v10214_v20, 1  ;;  %2256 = vst.msk [vmem:[#allocation5 + $0x38] sm:$0xff] %vm13152_vm14, %v10212_v63 }
 0x322   : > { %v1988_v11 = vadd.f32 %v8172_v24, %v10136_v51  ;;  %v1979_v31 = vpop.f32.mrb[9].mxu0  ;;  %v10245_v56 = vsel %vm565_vm2, %v2350_v59, %v2352_v2  ;;  %v10248_v45 = vsel %vm565_vm2, %v2349_v14, %v2350_v59 }
 0x323   : > { %v1980_v54 = vadd.f32 %v10136_v51, %v1979_v31  ;;  %v8173_v61 = vpop.f32.mrb[10].mxu0  ;;  %v10229_v60 = vsel %vm565_vm2, %v2345_v12, %v2347_v22  ;;  %v10232_v53 = vsel %vm565_vm2, %v2344_v32, %v2345_v12  ;;  %13320 = vst [vmem:[#allocation56_spill] sm:$0xff] %v10245_v56  ;;  %13321 = vst [vmem:[#allocation57_spill] sm:$0xff] %v10248_v45 }
 0x324   : > { %13318 = vst [vmem:[#allocation50_spill] sm:$0xff] %v10229_v60  ;;  %13319 = vst [vmem:[#allocation55_spill] sm:$0xff] %v10232_v53  ;;  %v2084_v23 = vmax.f32 %v1988_v11, 0.0  ;;  %v1991_v41 = vadd.f32 %v8173_v61, %v10136_v51  ;;  %v1982_v52 = vpop.f32.mrb[11].mxu0  ;;  %2423 = vrot.lane.b32.xlu1 %v10229_v60, %s8379_s19  ;;  %2421 = vrot.lane.b32.xlu0 %v10232_v53, %s8379_s19 }
 0x325   : > { %v2082_v33 = vmax.f32 %v1980_v54, 0.0  ;;  %v1983_v47 = vadd.f32 %v10136_v51, %v1982_v52 }
 0x326   : > { %2173 = vst.msk [vmem:[#allocation3 + $0x91] sm:$0xff] %vm13152_vm14, %v2084_v23  ;;  %v2085_v19 = vmax.f32 %v1991_v41, 0.0 }
 0x327   : > { %2171 = vst.msk [vmem:[#allocation3 + $0x79] sm:$0xff] %vm13152_vm14, %v2082_v33  ;;  %v2083_v37 = vmax.f32 %v1983_v47, 0.0 }
 0x328   : > { %2174 = vst.msk [vmem:[#allocation3 + $0x99] sm:$0xff] %vm13152_vm14, %v2085_v19  ;;  %2427 = vrot.lane.b32.xlu1 %v10245_v56, %s8379_s19  ;;  %2425 = vrot.lane.b32.xlu0 %v10248_v45, %s8379_s19 }
 0x329   : > { %2172 = vst.msk [vmem:[#allocation3 + $0x81] sm:$0xff] %vm13152_vm14, %v2083_v37 }
 0x32d   : > { %v10256_v21 = vld [vmem:[#allocation3 + $0x90] sm:$0xff] }
 0x32e   : > { %13322 = vst [vmem:[#allocation58_spill] sm:$0xff] %v10256_v21  ;;  %v10258_v57 = vld [vmem:[#allocation3 + $0x78] sm:$0xff]  ;;  %2261 = vst.msk [vmem:[#allocation5 + $0x60] sm:$0xff] %vm13152_vm14, %v10256_v21  ;;  %v2359_v12 = vrot.slane %v10256_v21, 1 }
 0x32f   : > { %13323 = vst [vmem:[#allocation59_spill] sm:$0xff] %v10258_v57  ;;  %2259 = vst.msk [vmem:[#allocation5 + $0x50] sm:$0xff] %vm13152_vm14, %v10258_v57  ;;  %v10264_v17 = vld [vmem:[#allocation3 + $0x98] sm:$0xff]  ;;  %v10270_v29 = vld [vmem:[#allocation3 + $0xa0] sm:$0x3]  ;;  %v2354_v42 = vrot.slane %v10258_v57, 1 }
 0x330   : > { %13324 = vst [vmem:[#allocation60_spill] sm:$0xff] %v10264_v17  ;;  %v10266_v27 = vld [vmem:[#allocation3 + $0x80] sm:$0xff]  ;;  %v10268_v5 = vld [vmem:[#allocation3 + $0x88] sm:$0x3]  ;;  %2262 = vst.msk [vmem:[#allocation5 + $0x68] sm:$0xff] %vm13152_vm14, %v10264_v17  ;;  %v2360_v16 = vrot.slane %v10264_v17, 1 }
 0x331   : > { %13325 = vst [vmem:[#allocation61_spill] sm:$0xff] %v10266_v27  ;;  %v8176_v36 = vpop.f32.mrb[12].mxu0  ;;  %v2355_v30 = vrot.slane %v10266_v27, 1  ;;  %v2357_v18 = vrot.slane %v10268_v5, 1  ;;  %2260 = vst.msk [vmem:[#allocation5 + $0x58] sm:$0xff] %vm13152_vm14, %v10266_v27  ;;  %v2362_v28 = vrot.slane %v10270_v29, 1 }
 0x332   : > { %v2004_v40 = vadd.f32 %v8176_v36, %v10136_v51  ;;  %v1995_v58 = vpop.f32.mrb[13].mxu0  ;;  %v10302_v31 = vsel %vm565_vm2, %v2359_v12, %v2360_v16 }
 0x333   : > { %v1996_v46 = vadd.f32 %v10136_v51, %v1995_v58  ;;  %v8177_v10 = vpop.f32.mrb[14].mxu0  ;;  %v10283_v3 = vsel %vm565_vm2, %v2355_v30, %v2357_v18  ;;  %v10286_v44 = vsel %vm565_vm2, %v2354_v42, %v2355_v30  ;;  %v10299_v11 = vsel %vm565_vm2, %v2360_v16, %v2362_v28  ;;  %13329 = vst [vmem:[#allocation79_spill] sm:$0xff] %v10302_v31 }
 0x334   : > { %13326 = vst [vmem:[#allocation62_spill] sm:$0xff] %v10283_v3  ;;  %13327 = vst [vmem:[#allocation63_spill] sm:$0xff] %v10286_v44  ;;  %v2088_v6 = vmax.f32 %v2004_v40, 0.0  ;;  %v2007_v35 = vadd.f32 %v8177_v10, %v10136_v51  ;;  %v1998_v13 = vpop.f32.mrb[15].mxu0  ;;  %2431 = vrot.lane.b32.xlu1 %v10283_v3, %s8379_s19  ;;  %2429 = vrot.lane.b32.xlu0 %v10286_v44, %s8379_s19 }
 0x335   : > { %v2086_v25 = vmax.f32 %v1996_v46, 0.0  ;;  %v1999_v24 = vadd.f32 %v10136_v51, %v1998_v13  ;;  %13328 = vst [vmem:[#allocation65_spill] sm:$0xff] %v10299_v11 }
 0x336   : > { %2177 = vst.msk [vmem:[#allocation3 + $0xc1] sm:$0xff] %vm13152_vm14, %v2088_v6  ;;  %v2089_v22 = vmax.f32 %v2007_v35, 0.0 }
 0x337   : > { %2175 = vst.msk [vmem:[#allocation3 + $0xa9] sm:$0xff] %vm13152_vm14, %v2086_v25  ;;  %v2087_v32 = vmax.f32 %v1999_v24, 0.0 }
 0x338   : > { %2178 = vst.msk [vmem:[#allocation3 + $0xc9] sm:$0xff] %vm13152_vm14, %v2089_v22  ;;  %2435 = vrot.lane.b32.xlu1 %v10299_v11, %s8379_s19  ;;  %2433 = vrot.lane.b32.xlu0 %v10302_v31, %s8379_s19 }
 0x339   : > { %2176 = vst.msk [vmem:[#allocation3 + $0xb1] sm:$0xff] %vm13152_vm14, %v2087_v32 }
 0x33d   : > { %v10310_v59 = vld [vmem:[#allocation3 + $0xc0] sm:$0xff] }
 0x33e   : > { %13330 = vst [vmem:[#allocation80_spill] sm:$0xff] %v10310_v59  ;;  %v10312_v54 = vld [vmem:[#allocation3 + $0xa8] sm:$0xff]  ;;  %2265 = vst.msk [vmem:[#allocation5 + $0x80] sm:$0xff] %vm13152_vm14, %v10310_v59  ;;  %v2369_v30 = vrot.slane %v10310_v59, 1 }
 0x33f   : > { %13331 = vst [vmem:[#allocation81_spill] sm:$0xff] %v10312_v54  ;;  %2263 = vst.msk [vmem:[#allocation5 + $0x70] sm:$0xff] %vm13152_vm14, %v10312_v54  ;;  %v10318_v61 = vld [vmem:[#allocation3 + $0xc8] sm:$0xff]  ;;  %v10324_v41 = vld [vmem:[#allocation3 + $0xd0] sm:$0x3]  ;;  %v2364_v47 = vrot.slane %v10312_v54, 1 }
 0x340   : > { %13332 = vst [vmem:[#allocation82_spill] sm:$0xff] %v10318_v61  ;;  %v10320_v2 = vld [vmem:[#allocation3 + $0xb0] sm:$0xff]  ;;  %v10322_v23 = vld [vmem:[#allocation3 + $0xb8] sm:$0x3]  ;;  %2266 = vst.msk [vmem:[#allocation5 + $0x88] sm:$0xff] %vm13152_vm14, %v10318_v61  ;;  %v2370_v37 = vrot.slane %v10318_v61, 1 }
 0x341   : > { %13333 = vst [vmem:[#allocation83_spill] sm:$0xff] %v10320_v2  ;;  %v2365_v52 = vrot.slane %v10320_v2, 1  ;;  %v2367_v33 = vrot.slane %v10322_v23, 1  ;;  %2264 = vst.msk [vmem:[#allocation5 + $0x78] sm:$0xff] %vm13152_vm14, %v10320_v2  ;;  %v2372_v36 = vrot.slane %v10324_v41, 1 }
 0x342   : > { %v10350_v42 = vsel %vm565_vm2, %v2369_v30, %v2370_v37 }
 0x343   : > { %v10334_v14 = vsel %vm565_vm2, %v2365_v52, %v2367_v33  ;;  %v10337_v19 = vsel %vm565_vm2, %v2364_v47, %v2365_v52  ;;  %v10347_v18 = vsel %vm565_vm2, %v2370_v37, %v2372_v36  ;;  %13337 = vst [vmem:[#allocation91_spill] sm:$0xff] %v10350_v42 }
 0x344   : > { %13334 = vst [vmem:[#allocation84_spill] sm:$0xff] %v10334_v14  ;;  %13335 = vst [vmem:[#allocation85_spill] sm:$0xff] %v10337_v19  ;;  %2439 = vrot.lane.b32.xlu1 %v10334_v14, %s8379_s19  ;;  %2437 = vrot.lane.b32.xlu0 %v10337_v19, %s8379_s19 }
 0x345   : > { %13336 = vst [vmem:[#allocation86_spill] sm:$0xff] %v10347_v18 }
 0x348   : > { %2443 = vrot.lane.b32.xlu1 %v10347_v18, %s8379_s19  ;;  %2441 = vrot.lane.b32.xlu0 %v10350_v42, %s8379_s19 }
 0x349   : > { %v8180_v40 = vpop.f32.mrb[16].mxu0 }
 0x34a   : > { %v2020_v58 = vadd.f32 %v8180_v40, %v10136_v51  ;;  %v2011_v16 = vpop.f32.mrb[17].mxu0 }
 0x34b   : > { %v2012_v46 = vadd.f32 %v10136_v51, %v2011_v16  ;;  %v8181_v10 = vpop.f32.mrb[18].mxu0 }
 0x34c   : > { %v2092_v28 = vmax.f32 %v2020_v58, 0.0  ;;  %v2023_v6 = vadd.f32 %v8181_v10, %v10136_v51  ;;  %v2014_v35 = vpop.f32.mrb[19].mxu0 }
 0x34d   : > { %v2090_v13 = vmax.f32 %v2012_v46, 0.0  ;;  %v2015_v25 = vadd.f32 %v10136_v51, %v2014_v35 }
 0x34e   : > { %2181 = vst.msk [vmem:[#allocation3 + $0xf1] sm:$0xff] %vm13152_vm14, %v2092_v28  ;;  %v2093_v24 = vmax.f32 %v2023_v6, 0.0 }
 0x34f   : > { %2179 = vst.msk [vmem:[#allocation3 + $0xd9] sm:$0xff] %vm13152_vm14, %v2090_v13  ;;  %v2091_v12 = vmax.f32 %v2015_v25, 0.0 }
 0x350   : > { %2182 = vst.msk [vmem:[#allocation3 + $0xf9] sm:$0xff] %vm13152_vm14, %v2093_v24 }
 0x351   : > { %2180 = vst.msk [vmem:[#allocation3 + $0xe1] sm:$0xff] %vm13152_vm14, %v2091_v12 }
 0x355   : > { %v10364_v22 = vld [vmem:[#allocation3 + $0xf0] sm:$0xff] }
 0x356   : > { %13338 = vst [vmem:[#allocation92_spill] sm:$0xff] %v10364_v22  ;;  %v10366_v32 = vld [vmem:[#allocation3 + $0xd8] sm:$0xff]  ;;  %2269 = vst.msk [vmem:[#allocation5 + $0xa0] sm:$0xff] %vm13152_vm14, %v10364_v22  ;;  %v2379_v28 = vrot.slane %v10364_v22, 1 }
 0x357   : > { %13339 = vst [vmem:[#allocation93_spill] sm:$0xff] %v10366_v32  ;;  %2267 = vst.msk [vmem:[#allocation5 + $0x90] sm:$0xff] %vm13152_vm14, %v10366_v32  ;;  %v10372_v52 = vld [vmem:[#allocation3 + $0xf8] sm:$0xff]  ;;  %v10378_v37 = vld [vmem:[#allocation3 + $0x100] sm:$0x3]  ;;  %v2374_v40 = vrot.slane %v10366_v32, 1 }
 0x358   : > { %13340 = vst [vmem:[#allocation87_spill] sm:$0xff] %v10372_v52  ;;  %v10374_v33 = vld [vmem:[#allocation3 + $0xe0] sm:$0xff]  ;;  %v10376_v47 = vld [vmem:[#allocation3 + $0xe8] sm:$0x3]  ;;  %2270 = vst.msk [vmem:[#allocation5 + $0xa8] sm:$0xff] %vm13152_vm14, %v10372_v52  ;;  %v2380_v46 = vrot.slane %v10372_v52, 1 }
 0x359   : > { %13341 = vst [vmem:[#allocation88_spill] sm:$0xff] %v10374_v33  ;;  %v2375_v36 = vrot.slane %v10374_v33, 1  ;;  %v2377_v30 = vrot.slane %v10376_v47, 1  ;;  %2268 = vst.msk [vmem:[#allocation5 + $0x98] sm:$0xff] %vm13152_vm14, %v10374_v33  ;;  %v2382_v10 = vrot.slane %v10378_v37, 1 }
 0x35a   : > { %v10404_v35 = vsel %vm565_vm2, %v2379_v28, %v2380_v46 }
 0x35b   : > { %v10388_v58 = vsel %vm565_vm2, %v2375_v36, %v2377_v30  ;;  %v10391_v16 = vsel %vm565_vm2, %v2374_v40, %v2375_v36  ;;  %v10401_v6 = vsel %vm565_vm2, %v2380_v46, %v2382_v10  ;;  %13345 = vst [vmem:[#allocation42_spill] sm:$0xff] %v10404_v35 }
 0x35c   : > { %13342 = vst [vmem:[#allocation41_spill] sm:$0xff] %v10388_v58  ;;  %13343 = vst [vmem:[#allocation90_spill] sm:$0xff] %v10391_v16  ;;  %2447 = vrot.lane.b32.xlu1 %v10388_v58, %s8379_s19  ;;  %2445 = vrot.lane.b32.xlu0 %v10391_v16, %s8379_s19 }
 0x35d   : > { %13344 = vst [vmem:[#allocation43_spill] sm:$0xff] %v10401_v6 }
 0x360   : > { %2451 = vrot.lane.b32.xlu1 %v10401_v6, %s8379_s19  ;;  %2449 = vrot.lane.b32.xlu0 %v10404_v35, %s8379_s19 }
 0x361   : > { %v8184_v13 = vpop.f32.mrb[20].mxu0 }
 0x362   : > { %v2036_v25 = vadd.f32 %v8184_v13, %v10136_v51  ;;  %v2027_v24 = vpop.f32.mrb[21].mxu0 }
 0x363   : > { %v2028_v12 = vadd.f32 %v10136_v51, %v2027_v24  ;;  %v8185_v36 = vpop.f32.mrb[22].mxu0 }
 0x364   : > { %v2096_v30 = vmax.f32 %v2036_v25, 0.0  ;;  %v2039_v40 = vadd.f32 %v8185_v36, %v10136_v51  ;;  %v2030_v10 = vpop.f32.mrb[23].mxu0 }
 0x365   : > { %v2094_v16 = vmax.f32 %v2028_v12, 0.0  ;;  %v2031_v46 = vadd.f32 %v10136_v51, %v2030_v10 }
 0x366   : > { %2185 = vst.msk [vmem:[#allocation3 + $0x121] sm:$0xff] %vm13152_vm14, %v2096_v30  ;;  %v2097_v28 = vmax.f32 %v2039_v40, 0.0 }
 0x367   : > { %2183 = vst.msk [vmem:[#allocation3 + $0x109] sm:$0xff] %vm13152_vm14, %v2094_v16  ;;  %v2095_v35 = vmax.f32 %v2031_v46, 0.0 }
 0x368   : > { %2186 = vst.msk [vmem:[#allocation3 + $0x129] sm:$0xff] %vm13152_vm14, %v2097_v28 }
 0x369   : > { %2184 = vst.msk [vmem:[#allocation3 + $0x111] sm:$0xff] %vm13152_vm14, %v2095_v35 }
 0x36d   : > { %v10418_v13 = vld [vmem:[#allocation3 + $0x120] sm:$0xff] }
 0x36e   : > { %13346 = vst [vmem:[#allocation64_spill] sm:$0xff] %v10418_v13  ;;  %v10420_v24 = vld [vmem:[#allocation3 + $0x108] sm:$0xff]  ;;  %2273 = vst.msk [vmem:[#allocation5 + $0xc0] sm:$0xff] %vm13152_vm14, %v10418_v13  ;;  %v2389_v58 = vrot.slane %v10418_v13, 1 }
 0x36f   : > { %13347 = vst [vmem:[#allocation44_spill] sm:$0xff] %v10420_v24  ;;  %2271 = vst.msk [vmem:[#allocation5 + $0xb0] sm:$0xff] %vm13152_vm14, %v10420_v24  ;;  %v10426_v25 = vld [vmem:[#allocation3 + $0x128] sm:$0xff]  ;;  %v10432_v36 = vld [vmem:[#allocation3 + $0x130] sm:$0x3]  ;;  %v2384_v40 = vrot.slane %v10420_v24, 1 }
 0x370   : > { %13348 = vst [vmem:[#allocation66_spill] sm:$0xff] %v10426_v25  ;;  %v10428_v12 = vld [vmem:[#allocation3 + $0x110] sm:$0xff]  ;;  %v10430_v16 = vld [vmem:[#allocation3 + $0x118] sm:$0x3]  ;;  %2274 = vst.msk [vmem:[#allocation5 + $0xc8] sm:$0xff] %vm13152_vm14, %v10426_v25  ;;  %v2390_v28 = vrot.slane %v10426_v25, 1 }
 0x371   : > { %13349 = vst [vmem:[#allocation67_spill] sm:$0xff] %v10428_v12  ;;  %v2385_v35 = vrot.slane %v10428_v12, 1  ;;  %v2387_v30 = vrot.slane %v10430_v16, 1  ;;  %2272 = vst.msk [vmem:[#allocation5 + $0xb8] sm:$0xff] %vm13152_vm14, %v10428_v12  ;;  %v2392_v6 = vrot.slane %v10432_v36, 1 }
 0x373   : > { %v10442_v10 = vsel %vm565_vm2, %v2385_v35, %v2387_v30  ;;  %v10445_v46 = vsel %vm565_vm2, %v2384_v40, %v2385_v35  ;;  %v10455_v42 = vsel %vm565_vm2, %v2390_v28, %v2392_v6  ;;  %v10458_v30 = vsel %vm565_vm2, %v2389_v58, %v2390_v28 }
 0x374   : > { %13350 = vst [vmem:[#allocation89_spill] sm:$0xff] %v10442_v10  ;;  %13351 = vst [vmem:[#allocation69_spill] sm:$0xff] %v10445_v46  ;;  %2455 = vrot.lane.b32.xlu1 %v10442_v10, %s8379_s19  ;;  %2453 = vrot.lane.b32.xlu0 %v10445_v46, %s8379_s19 }
 0x375   : > { %13352 = vst [vmem:[#allocation45_spill] sm:$0xff] %v10455_v42  ;;  %13353 = vst [vmem:[#allocation48_spill] sm:$0xff] %v10458_v30 }
 0x378   : > { %2459 = vrot.lane.b32.xlu1 %v10455_v42, %s8379_s19  ;;  %2457 = vrot.lane.b32.xlu0 %v10458_v30, %s8379_s19 }
 0x379   : > { %v8188_v35 = vpop.f32.mrb[24].mxu0 }
 0x37a   : > { %v2052_v40 = vadd.f32 %v8188_v35, %v10136_v51  ;;  %v2043_v10 = vpop.f32.mrb[25].mxu0 }
 0x37b   : > { %v2044_v46 = vadd.f32 %v10136_v51, %v2043_v10  ;;  %v8189_v18 = vpop.f32.mrb[26].mxu0 }
 0x37c   : > { %v2100_v19 = vmax.f32 %v2052_v40, 0.0  ;;  %v2055_v6 = vadd.f32 %v8189_v18, %v10136_v51  ;;  %v2046_v14 = vpop.f32.mrb[27].mxu0 }
 0x37d   : > { %v2098_v31 = vmax.f32 %v2044_v46, 0.0  ;;  %v2047_v58 = vadd.f32 %v10136_v51, %v2046_v14 }
 0x37e   : > { %2189 = vst.msk [vmem:[#allocation3 + $0x151] sm:$0xff] %vm13152_vm14, %v2100_v19  ;;  %v2101_v28 = vmax.f32 %v2055_v6, 0.0 }
 0x37f   : > { %2187 = vst.msk [vmem:[#allocation3 + $0x139] sm:$0xff] %vm13152_vm14, %v2098_v31  ;;  %v2099_v30 = vmax.f32 %v2047_v58, 0.0 }
 0x380   : > { %2190 = vst.msk [vmem:[#allocation3 + $0x159] sm:$0xff] %vm13152_vm14, %v2101_v28 }
 0x381   : > { %2188 = vst.msk [vmem:[#allocation3 + $0x141] sm:$0xff] %vm13152_vm14, %v2099_v30 }
 0x385   : > { %v10472_v35 = vld [vmem:[#allocation3 + $0x150] sm:$0xff] }
 0x386   : > { %13354 = vst [vmem:[#allocation46_spill] sm:$0xff] %v10472_v35  ;;  %v2416_v10 = vpop.permute.xlu1 %2415  ;;  %v2414_v40 = vpop.permute.xlu0 %2413  ;;  %v10474_v42 = vld [vmem:[#allocation3 + $0x138] sm:$0xff]  ;;  %2277 = vst.msk [vmem:[#allocation5 + $0xe0] sm:$0xff] %vm13152_vm14, %v10472_v35 }
 0x387   : > { %13355 = vst [vmem:[#allocation68_spill] sm:$0xff] %v10474_v42  ;;  %2509 = vst.msk [vmem:[#allocation5 + $0x18] sm:$0xff] %vm2505_vm1, %v2416_v10  ;;  %v10482_v31 = vld [vmem:[#allocation3 + $0x158] sm:$0xff]  ;;  %v10488_v18 = vld [vmem:[#allocation3 + $0x160] sm:$0x3]  ;;  %v2394_v6 = vrot.slane %v10474_v42, 1 }
 0x388   : > { %2508 = vst.msk [vmem:[#allocation5 + $0x10] sm:$0xff] %vm2505_vm1, %v2414_v40  ;;  %13356 = vst [vmem:[#allocation49_spill] sm:$0xff] %v10482_v31  ;;  %v10484_v14 = vld [vmem:[#allocation3 + $0x140] sm:$0xff]  ;;  %v10486_v19 = vld [vmem:[#allocation3 + $0x148] sm:$0x3]  ;;  %v2400_v11 = vrot.slane %v10482_v31, 1 }
 0x389   : > { %2275 = vst.msk [vmem:[#allocation5 + $0xd0] sm:$0xff] %vm13152_vm14, %v10474_v42  ;;  %13357 = vst [vmem:[#allocation70_spill] sm:$0xff] %v10484_v14  ;;  %v2395_v46 = vrot.slane %v10484_v14, 1  ;;  %v2397_v30 = vrot.slane %v10486_v19, 1  ;;  %v2402_v44 = vrot.slane %v10488_v18, 1 }
 0x38a   : > { %2278 = vst.msk [vmem:[#allocation5 + $0xe8] sm:$0xff] %vm13152_vm14, %v10482_v31  ;;  %2276 = vst.msk [vmem:[#allocation5 + $0xd8] sm:$0xff] %vm13152_vm14, %v10484_v14  ;;  %v2420_v58 = vpop.permute.xlu1 %2419  ;;  %v2418_v28 = vpop.permute.xlu0 %2417 }
 0x38b   : > { %2511 = vst.msk [vmem:[#allocation5 + $0x28] sm:$0xff] %vm2505_vm1, %v2420_v58  ;;  %2510 = vst.msk [vmem:[#allocation5 + $0x20] sm:$0xff] %vm2505_vm1, %v2418_v28  ;;  %v10500_v10 = vsel %vm565_vm2, %v2395_v46, %v2397_v30  ;;  %v10503_v40 = vsel %vm565_vm2, %v2394_v6, %v2395_v46  ;;  %v2399_v58 = vrot.slane %v10472_v35, 1  ;;  %v10513_v28 = vsel %vm565_vm2, %v2400_v11, %v2402_v44 }
 0x38c   : > { %13358 = vst [vmem:[#allocation71_spill] sm:$0xff] %v10500_v10  ;;  %13359 = vst [vmem:[#allocation73_spill] sm:$0xff] %v10503_v40  ;;  %2463 = vrot.lane.b32.xlu1 %v10500_v10, %s8379_s19  ;;  %2461 = vrot.lane.b32.xlu0 %v10503_v40, %s8379_s19 }
 0x38d   : > { %13360 = vst [vmem:[#allocation94_spill] sm:$0xff] %v10513_v28  ;;  %v10516_v30 = vsel %vm565_vm2, %v2399_v58, %v2400_v11 }
 0x38e   : > { %13361 = vst [vmem:[#allocation51_spill] sm:$0xff] %v10516_v30 }
 0x390   : > { %2467 = vrot.lane.b32.xlu1 %v10513_v28, %s8379_s19  ;;  %2465 = vrot.lane.b32.xlu0 %v10516_v30, %s8379_s19 }
 0x391   : > { %v8192_v46 = vpop.f32.mrb[28].mxu0 }
 0x392   : > { %v2068_v6 = vadd.f32 %v8192_v46, %v10136_v51  ;;  %v2059_v10 = vpop.f32.mrb[29].mxu0  ;;  %v2538_v46 = vrot.slane %v10092_v34, 2  ;;  %v2544_v34 = vrot.slane %v10158_v7, 2 }
 0x393   : > { %v2060_v40 = vadd.f32 %v10136_v51, %v2059_v10  ;;  %v8193_v3 = vpop.f32.mrb[30].mxu0 }
 0x394   : > { %v2104_v45 = vmax.f32 %v2068_v6, 0.0  ;;  %v2071_v44 = vadd.f32 %v8193_v3, %v10136_v51  ;;  %v2062_v56 = vpop.f32.mrb[31].mxu0 }
 0x395   : > { %v2102_v53 = vmax.f32 %v2060_v40, 0.0  ;;  %v2063_v11 = vadd.f32 %v10136_v51, %v2062_v56 }
 0x396   : > { %2193 = vst.msk [vmem:[#allocation3 + $0x181] sm:$0xff] %vm13152_vm14, %v2104_v45  ;;  %v2105_v58 = vmax.f32 %v2071_v44, 0.0  ;;  %v2424_v28 = vpop.permute.xlu1 %2423  ;;  %v2422_v60 = vpop.permute.xlu0 %2421  ;;  %v2541_v45 = vrot.slane %v10096_v4, 2 }
 0x397   : > { %2191 = vst.msk [vmem:[#allocation3 + $0x169] sm:$0xff] %vm13152_vm14, %v2102_v53  ;;  %v2103_v30 = vmax.f32 %v2063_v11, 0.0 }
 0x398   : > { %2513 = vst.msk [vmem:[#allocation5 + $0x38] sm:$0xff] %vm2505_vm1, %v2424_v28  ;;  %2512 = vst.msk [vmem:[#allocation5 + $0x30] sm:$0xff] %vm2505_vm1, %v2422_v60  ;;  %v2539_v60 = vrot.slane %v10094_v15, 2 }
 0x399   : > { %2194 = vst.msk [vmem:[#allocation3 + $0x189] sm:$0xff] %vm13152_vm14, %v2105_v58  ;;  %2192 = vst.msk [vmem:[#allocation3 + $0x171] sm:$0xff] %vm13152_vm14, %v2103_v30 }
 0x39a   : > { %v2428_v3 = vpop.permute.xlu1 %2427  ;;  %v2426_v10 = vpop.permute.xlu0 %2425  ;;  %v2542_v15 = vsel %vm13153_vm3, %v2539_v60, %v2541_v45  ;;  %v2540_v4 = vsel %vm13153_vm3, %v2538_v46, %v2539_v60  ;;  %v2548_v46 = vrot.slane %v10148_v49, 2 }
 0x39b   : > { %2515 = vst.msk [vmem:[#allocation5 + $0x48] sm:$0xff] %vm2505_vm1, %v2428_v3  ;;  %2514 = vst.msk [vmem:[#allocation5 + $0x40] sm:$0xff] %vm2505_vm1, %v2426_v10  ;;  %v2546_v3 = vrot.slane %v10160_v55, 2  ;;  %v2543_v10 = vrot.slane %v10150_v26, 2  ;;  %v2549_v55 = vrot.slane %v10156_v48, 2 }
 0x39d   : > { %v10572_v60 = vsel %vm13153_vm3, %v2544_v34, %v2546_v3 }
 0x39e   : > { %v10534_v51 = vld [vmem:[#allocation3 + $0x168] sm:$0xff] }
 0x39f   : > { %13362 = vst [vmem:[#allocation53_spill] sm:$0xff] %v10534_v51  ;;  %2279 = vst.msk [vmem:[#allocation5 + $0xf0] sm:$0xff] %vm13152_vm14, %v10534_v51  ;;  %v2404_v30 = vrot.slane %v10534_v51, 1 }
 0x3a0   : > { %v10538_v53 = vld [vmem:[#allocation3 + $0x170] sm:$0xff]  ;;  %v10540_v56 = vld [vmem:[#allocation3 + $0x178] sm:$0x3] }
 0x3a1   : > { %13363 = vst [vmem:[#allocation52_spill] sm:$0xff] %v10538_v53  ;;  %v2405_v40 = vrot.slane %v10538_v53, 1  ;;  %v2407_v28 = vrot.slane %v10540_v56, 1  ;;  %2280 = vst.msk [vmem:[#allocation5 + $0xf8] sm:$0xff] %vm13152_vm14, %v10538_v53  ;;  %vm3514_vm14 = vcmask 589312  }
 0x3a3   : > { %v10551_v6 = vsel %vm565_vm2, %v2405_v40, %v2407_v28  ;;  %v10554_v44 = vsel %vm565_vm2, %v2404_v30, %v2405_v40  ;;  %v10575_v28 = vsel %vm13153_vm3, %v2543_v10, %v2544_v34  ;;  %v2551_v30 = vrot.slane %v10162_v8, 2 }
 0x3a4   : > { %13364 = vst [vmem:[#allocation72_spill] sm:$0xff] %v10551_v6  ;;  %13365 = vst [vmem:[#allocation54_spill] sm:$0xff] %v10554_v44  ;;  %2471 = vrot.lane.b32.xlu1 %v10551_v6, %s8379_s19  ;;  %2469 = vrot.lane.b32.xlu0 %v10554_v44, %s8379_s19  ;;  %v2553_v8 = vrot.slane %v10204_v1, 2  ;;  %v2559_v10 = vrot.slane %v10210_v43, 2 }
 0x3a6   : > { %v2432_v11 = vpop.permute.xlu1 %2431  ;;  %v2430_v58 = vpop.permute.xlu0 %2429 }
 0x3a7   : > { %2517 = vst.msk [vmem:[#allocation5 + $0x58] sm:$0xff] %vm2505_vm1, %v2432_v11  ;;  %2516 = vst.msk [vmem:[#allocation5 + $0x50] sm:$0xff] %vm2505_vm1, %v2430_v58  ;;  %v2554_v11 = vrot.slane %v10212_v63, 2  ;;  %v2556_v58 = vrot.slane %v10214_v20, 2  ;;  %v2558_v20 = vrot.slane %v10202_v50, 2 }
 0x3a8   : > { %2620 = vrot.lane.b32.xlu1 %v2542_v15, %s8381_s21  ;;  %2618 = vrot.lane.b32.xlu0 %v2540_v4, %s8381_s21  ;;  %v10585_v15 = vsel %vm13153_vm3, %v2549_v55, %v2551_v30  ;;  %v10588_v4 = vsel %vm13153_vm3, %v2548_v46, %v2549_v55 }
 0x3a9   : > { %v10598_v34 = vsel %vm13153_vm3, %v2554_v11, %v2556_v58  ;;  %v10601_v3 = vsel %vm13153_vm3, %v2553_v8, %v2554_v11  ;;  %v10616_v46 = vsel %vm13153_vm3, %v2558_v20, %v2559_v10  ;;  %v2566_v11 = vrot.slane %v10268_v5, 2 }
 0x3aa   : > { %v2436_v40 = vpop.permute.xlu1 %2435  ;;  %v2434_v45 = vpop.permute.xlu0 %2433  ;;  %v2563_v58 = vrot.slane %v10258_v57, 2  ;;  %v2569_v5 = vrot.slane %v10264_v17, 2  ;;  %v2571_v20 = vrot.slane %v10270_v29, 2  ;;  %v2573_v29 = vrot.slane %v10312_v54, 2 }
 0x3ab   : > { %2519 = vst.msk [vmem:[#allocation5 + $0x68] sm:$0xff] %vm2505_vm1, %v2436_v40  ;;  %2518 = vst.msk [vmem:[#allocation5 + $0x60] sm:$0xff] %vm2505_vm1, %v2434_v45  ;;  %v2561_v40 = vrot.slane %v10216_v9, 2  ;;  %v2564_v9 = vrot.slane %v10266_v27, 2 }
 0x3ac   : > { %2624 = vrot.lane.b32.xlu1 %v10572_v60, %s8381_s21  ;;  %2622 = vrot.lane.b32.xlu0 %v10575_v28, %s8381_s21 }
 0x3ad   : > { %v10613_v30 = vsel %vm13153_vm3, %v2559_v10, %v2561_v40  ;;  %v10628_v10 = vsel %vm13153_vm3, %v2564_v9, %v2566_v11  ;;  %v10631_v40 = vsel %vm13153_vm3, %v2563_v58, %v2564_v9  ;;  %v2574_v9 = vrot.slane %v10320_v2, 2 }
 0x3ae   : > { %13366 = vst [vmem:[#allocation74_spill] sm:$0xff] %v10628_v10  ;;  %13367 = vst [vmem:[#allocation77_spill] sm:$0xff] %v10631_v40  ;;  %v2576_v58 = vrot.slane %v10322_v23, 2  ;;  %v2578_v23 = vrot.slane %v10310_v59, 2 }
 0x3b0   : > { %2628 = vrot.lane.b32.xlu1 %v10585_v15, %s8381_s21  ;;  %2626 = vrot.lane.b32.xlu0 %v10588_v4, %s8381_s21 }
 0x3b4   : > { %2632 = vrot.lane.b32.xlu1 %v10598_v34, %s8381_s21  ;;  %2630 = vrot.lane.b32.xlu0 %v10601_v3, %s8381_s21 }
 0x3b6   : > { %v2440_v45 = vpop.permute.xlu1 %2439  ;;  %v2438_v55 = vpop.permute.xlu0 %2437 }
 0x3b7   : > { %2521 = vst.msk [vmem:[#allocation5 + $0x78] sm:$0xff] %vm2505_vm1, %v2440_v45  ;;  %2520 = vst.msk [vmem:[#allocation5 + $0x70] sm:$0xff] %vm2505_vm1, %v2438_v55  ;;  %v2568_v55 = vrot.slane %v10256_v21, 2 }
 0x3b8   : > { %2636 = vrot.lane.b32.xlu1 %v10613_v30, %s8381_s21  ;;  %2634 = vrot.lane.b32.xlu0 %v10616_v46, %s8381_s21 }
 0x3b9   : > { %v10644_v11 = vsel %vm13153_vm3, %v2568_v55, %v2569_v5  ;;  %v2581_v55 = vrot.slane %v10324_v41, 2  ;;  %v2583_v41 = vrot.slane %v10366_v32, 2 }
 0x3ba   : > { %v2444_v8 = vpop.permute.xlu1 %2443  ;;  %v2442_v45 = vpop.permute.xlu0 %2441  ;;  %13369 = vst [vmem:[#allocation95_spill] sm:$0xff] %v10644_v11 }
 0x3bb   : > { %2523 = vst.msk [vmem:[#allocation5 + $0x88] sm:$0xff] %vm2505_vm1, %v2444_v8  ;;  %2522 = vst.msk [vmem:[#allocation5 + $0x80] sm:$0xff] %vm2505_vm1, %v2442_v45  ;;  %v10641_v8 = vsel %vm13153_vm3, %v2569_v5, %v2571_v20  ;;  %v10654_v45 = vsel %vm13153_vm3, %v2574_v9, %v2576_v58  ;;  %v10657_v20 = vsel %vm13153_vm3, %v2573_v29, %v2574_v9  ;;  %v2579_v5 = vrot.slane %v10318_v61, 2 }
 0x3bc   : > { %2640 = vrot.lane.b32.xlu1 %v10628_v10, %s8381_s21  ;;  %2638 = vrot.lane.b32.xlu0 %v10631_v40, %s8381_s21  ;;  %13368 = vst [vmem:[#allocation78_spill] sm:$0xff] %v10641_v8  ;;  %13370 = vst [vmem:[#allocation96_spill] sm:$0xff] %v10654_v45  ;;  %v2584_v9 = vrot.slane %v10374_v33, 2  ;;  %v2586_v29 = vrot.slane %v10376_v47, 2  ;;  %v2588_v47 = vrot.slane %v10364_v22, 2 }
 0x3bd   : > { %13371 = vst [vmem:[#allocation39_spill] sm:$0xff] %v10657_v20  ;;  %v10667_v44 = vsel %vm13153_vm3, %v2579_v5, %v2581_v55  ;;  %v10670_v58 = vsel %vm13153_vm3, %v2578_v23, %v2579_v5  ;;  %v2589_v5 = vrot.slane %v10372_v52, 2  ;;  %v2591_v23 = vrot.slane %v10378_v37, 2  ;;  %v13399_v52 = vld [vmem:[#allocation55_spill] sm:$0xff] }
 0x3be   : > { %13372 = vst [vmem:[#allocation40_spill] sm:$0xff] %v10667_v44  ;;  %13373 = vst [vmem:[#allocation97_spill] sm:$0xff] %v10670_v58  ;;  %v10680_v6 = vsel %vm13153_vm3, %v2584_v9, %v2586_v29  ;;  %v10683_v55 = vsel %vm13153_vm3, %v2583_v41, %v2584_v9  ;;  %v2594_v37 = vrot.slane %v10428_v12, 2  ;;  %v2596_v41 = vrot.slane %v10430_v16, 2 }
 0x3bf   : > { %13374 = vst [vmem:[#allocation98_spill] sm:$0xff] %v10680_v6  ;;  %13375 = vst [vmem:[#allocation99_spill] sm:$0xff] %v10683_v55  ;;  %v10695_v9 = vsel %vm13153_vm3, %v2589_v5, %v2591_v23  ;;  %v10698_v29 = vsel %vm13153_vm3, %v2588_v47, %v2589_v5  ;;  %v2599_v16 = vrot.slane %v10426_v25, 2  ;;  %v2601_v47 = vrot.slane %v10432_v36, 2 }
 0x3c0   : > { %2644 = vrot.lane.b32.xlu1 %v10641_v8, %s8381_s21  ;;  %2642 = vrot.lane.b32.xlu0 %v10644_v11, %s8381_s21  ;;  %13376 = vst [vmem:[#allocation100_spill] sm:$0xff] %v10695_v9  ;;  %13377 = vst [vmem:[#allocation101_spill] sm:$0xff] %v10698_v29  ;;  %v10710_v5 = vsel %vm13153_vm3, %v2594_v37, %v2596_v41  ;;  %v2603_v36 = vrot.slane %v10474_v42, 2 }
 0x3c1   : > { %13378 = vst [vmem:[#allocation102_spill] sm:$0xff] %v10710_v5 }
 0x3c4   : > { %2648 = vrot.lane.b32.xlu1 %v10654_v45, %s8381_s21  ;;  %2646 = vrot.lane.b32.xlu0 %v10657_v20, %s8381_s21 }
 0x3c8   : > { %2652 = vrot.lane.b32.xlu1 %v10667_v44, %s8381_s21  ;;  %2650 = vrot.lane.b32.xlu0 %v10670_v58, %s8381_s21 }
 0x3cc   : > { %2656 = vrot.lane.b32.xlu1 %v10680_v6, %s8381_s21  ;;  %2654 = vrot.lane.b32.xlu0 %v10683_v55, %s8381_s21 }
 0x3ce   : > { %v2448_v33 = vpop.permute.xlu1 %2447  ;;  %v2446_v32 = vpop.permute.xlu0 %2445 }
 0x3cf   : > { %2525 = vst.msk [vmem:[#allocation5 + $0x98] sm:$0xff] %vm2505_vm1, %v2448_v33  ;;  %2524 = vst.msk [vmem:[#allocation5 + $0x90] sm:$0xff] %vm2505_vm1, %v2446_v32  ;;  %v2593_v33 = vrot.slane %v10420_v24, 2 }
 0x3d0   : > { %2660 = vrot.lane.b32.xlu1 %v10695_v9, %s8381_s21  ;;  %2658 = vrot.lane.b32.xlu0 %v10698_v29, %s8381_s21  ;;  %v13398_v9 = vld [vmem:[#allocation50_spill] sm:$0xff] }
 0x3d1   : > { %v10713_v23 = vsel %vm13153_vm3, %v2593_v33, %v2594_v37  ;;  %v2604_v37 = vrot.slane %v10484_v14, 2  ;;  %v2606_v33 = vrot.slane %v10486_v19, 2  ;;  %v2608_v19 = vrot.slane %v10472_v35, 2  ;;  %v13397_v14 = vld [vmem:[#allocation16_spill] sm:$0xff] }
 0x3d2   : > { %v2452_v22 = vpop.permute.xlu1 %2451  ;;  %v2450_v32 = vpop.permute.xlu0 %2449  ;;  %13379 = vst [vmem:[#allocation103_spill] sm:$0xff] %v10713_v23 }
 0x3d3   : > { %2527 = vst.msk [vmem:[#allocation5 + $0xa8] sm:$0xff] %vm2505_vm1, %v2452_v22  ;;  %2526 = vst.msk [vmem:[#allocation5 + $0xa0] sm:$0xff] %vm2505_vm1, %v2450_v32  ;;  %v2598_v22 = vrot.slane %v10418_v13, 2  ;;  %v10723_v32 = vsel %vm13153_vm3, %v2599_v16, %v2601_v47  ;;  %v10736_v13 = vsel %vm13153_vm3, %v2604_v37, %v2606_v33  ;;  %v10739_v47 = vsel %vm13153_vm3, %v2603_v36, %v2604_v37 }
 0x3d4   : > { %2664 = vrot.lane.b32.xlu1 %v10710_v5, %s8381_s21  ;;  %2662 = vrot.lane.b32.xlu0 %v10713_v23, %s8381_s21  ;;  %13380 = vst [vmem:[#allocation104_spill] sm:$0xff] %v10723_v32  ;;  %13382 = vst [vmem:[#allocation106_spill] sm:$0xff] %v10736_v13  ;;  %v2614_v37 = vrot.slane %v10538_v53, 2  ;;  %v2616_v36 = vrot.slane %v10540_v56, 2 }
 0x3d5   : > { %v10726_v41 = vsel %vm13153_vm3, %v2598_v22, %v2599_v16  ;;  %13383 = vst [vmem:[#allocation107_spill] sm:$0xff] %v10739_v47  ;;  %v2609_v16 = vrot.slane %v10482_v31, 2  ;;  %v2611_v22 = vrot.slane %v10488_v18, 2  ;;  %v2613_v18 = vrot.slane %v10534_v51, 2 }
 0x3d6   : > { %13381 = vst [vmem:[#allocation105_spill] sm:$0xff] %v10726_v41  ;;  %v10762_v35 = vsel %vm13153_vm3, %v2614_v37, %v2616_v36  ;;  %v8387_v36 = vmov 1983009808  }
 0x3d7   : > { %v10749_v42 = vsel %vm13153_vm3, %v2609_v16, %v2611_v22  ;;  %v10752_v33 = vsel %vm13153_vm3, %v2608_v19, %v2609_v16  ;;  %13386 = vst [vmem:[#allocation110_spill] sm:$0xff] %v10762_v35  ;;  %v10765_v22 = vsel %vm13153_vm3, %v2613_v18, %v2614_v37  ;;  %v3886_v18 = vunpack.c.l.s4 %v8387_v36 }
 0x3d8   : > { %2668 = vrot.lane.b32.xlu1 %v10723_v32, %s8381_s21  ;;  %2666 = vrot.lane.b32.xlu0 %v10726_v41, %s8381_s21  ;;  %13384 = vst [vmem:[#allocation108_spill] sm:$0xff] %v10749_v42  ;;  %13385 = vst [vmem:[#allocation109_spill] sm:$0xff] %v10752_v33  ;;  %v5347_v41 = vcombine.high %v13397_v14, %v13397_v14  ;;  %vm3638_vm3 = vcmask 588800  }
 0x3d9   : > { %13387 = vst [vmem:[#allocation111_spill] sm:$0xff] %v10765_v22 }
 0x3dc   : > { %2672 = vrot.lane.b32.xlu1 %v10736_v13, %s8381_s21  ;;  %2670 = vrot.lane.b32.xlu0 %v10739_v47, %s8381_s21 }
 0x3e0   : > { %2676 = vrot.lane.b32.xlu1 %v10749_v42, %s8381_s21  ;;  %2674 = vrot.lane.b32.xlu0 %v10752_v33, %s8381_s21 }
 0x3e4   : > { %2680 = vrot.lane.b32.xlu1 %v10762_v35, %s8381_s21  ;;  %2678 = vrot.lane.b32.xlu0 %v10765_v22, %s8381_s21  ;;  %s8386_s21 = smov 40  }
 0x3e6   : > { %v2456_v56 = vpop.permute.xlu1 %2455  ;;  %v2454_v16 = vpop.permute.xlu0 %2453 }
 0x3e7   : > { %2529 = vst.msk [vmem:[#allocation5 + $0xb8] sm:$0xff] %vm2505_vm1, %v2456_v56  ;;  %2528 = vst.msk [vmem:[#allocation5 + $0xb0] sm:$0xff] %vm2505_vm1, %v2454_v16  ;;  %v3888_v56 = vlaneseq }
 0x3e8   : > { %2751 = vrot.lane.b32.xlu1 %v10158_v7, %s8383_s23  ;;  %2749 = vrot.lane.b32.xlu0 %v10150_v26, %s8383_s23 }
 0x3e9   : > { %v10814_v16 = vshrl.u32 %v3888_v56, 7 }
 0x3ea   : > { %v2460_v19 = vpop.permute.xlu1 %2459  ;;  %v2458_v37 = vpop.permute.xlu0 %2457 }
 0x3eb   : > { %2531 = vst.msk [vmem:[#allocation5 + $0xc8] sm:$0xff] %vm2505_vm1, %v2460_v19  ;;  %2530 = vst.msk [vmem:[#allocation5 + $0xc0] sm:$0xff] %vm2505_vm1, %v2458_v37  ;;  %v8307_v37 = vld [vmem:[%s12844_s3 + $0x8] sm:$0xff]  }
 0x3ec   : > { %2755 = vrot.lane.b32.xlu1 %v10156_v48, %s8383_s23  ;;  %2753 = vrot.lane.b32.xlu0 %v10148_v49, %s8383_s23  ;;  %13388 = vst [vmem:[#allocation112_spill] sm:$0xff] %v10814_v16 }
 0x3f0   : > { %2759 = vrot.lane.b32.xlu1 %v10212_v63, %s8383_s23  ;;  %2757 = vrot.lane.b32.xlu0 %v10204_v1, %s8383_s23 }
 0x3f4   : > { %2763 = vrot.lane.b32.xlu1 %v10210_v43, %s8383_s23  ;;  %2761 = vrot.lane.b32.xlu0 %v10202_v50, %s8383_s23 }
 0x3f8   : > { %2886 = vrot.lane.b32.xlu1 %v10175_v39, %s8385_s15  ;;  %2884 = vrot.lane.b32.xlu0 %v10178_v0, %s8385_s15 }
 0x3fc   : > { %2890 = vrot.lane.b32.xlu1 %v10191_v62, %s8385_s15  ;;  %2888 = vrot.lane.b32.xlu0 %v10194_v38, %s8385_s15 }
 0x3fe   : > { %v2464_v26 = vpop.permute.xlu1 %2463  ;;  %v2462_v7 = vpop.permute.xlu0 %2461 }
 0x3ff   : > { %2533 = vst.msk [vmem:[#allocation5 + $0xd8] sm:$0xff] %vm2505_vm1, %v2464_v26  ;;  %2532 = vst.msk [vmem:[#allocation5 + $0xd0] sm:$0xff] %vm2505_vm1, %v2462_v7  ;;  %v13390_v26 = vld [vmem:[#allocation9_spill] sm:$0xff] }
 0x400   : > { %3020 = vrot.lane.b32.xlu1 %v10572_v60, %s8386_s21  ;;  %3018 = vrot.lane.b32.xlu0 %v10575_v28, %s8386_s21  ;;  %v8306_v60 = vld [vmem:[%s12844_s3] sm:$0xff]   ;;  %v3887_v28 = vunpack.c.0.s8 %v3886_v18  ;;  %v5228_v7 = vcombine.high %v13390_v26, %v13390_v26 }
 0x401   : > { %8194 = vmatprep.subr.bf16.mxu1 %v8306_v60 }
 0x402   : > { %v2468_v39 = vpop.permute.xlu1 %2467  ;;  %v2466_v0 = vpop.permute.xlu0 %2465  ;;  %8195 = vmatpush3.bf16.msra.mxu1 %v8306_v60  ;;  %v10817_v19 = vsub.s32 %v3887_v28, %v10814_v16  ;;  %v13393_v60 = vld [vmem:[#allocation15_spill] sm:$0xff] }
 0x403   : > { %2535 = vst.msk [vmem:[#allocation5 + $0xe8] sm:$0xff] %vm2505_vm1, %v2468_v39  ;;  %2534 = vst.msk [vmem:[#allocation5 + $0xe0] sm:$0xff] %vm2505_vm1, %v2466_v0  ;;  %v13391_v0 = vld [vmem:[#allocation11_spill] sm:$0xff]  ;;  %8196 = vmatprep.subr.bf16.mxu1 %v8307_v37  ;;  %v5330_v28 = vcombine.high %v13393_v60, %v13393_v60 }
 0x404   : > { %3024 = vrot.lane.b32.xlu1 %v10585_v15, %s8386_s21  ;;  %3022 = vrot.lane.b32.xlu0 %v10588_v4, %s8386_s21  ;;  %13389 = vst [vmem:[#allocation113_spill] sm:$0xff] %v10817_v19  ;;  %v10830_v39 = vrot.slane %v13390_v26, %v10817_v19  ;;  %v5262_v36 = vcombine.high %v13391_v0, %v13391_v0 }
 0x405   : > { %v10847_v26 = vrot.slane %v5228_v7, %v10817_v19  ;;  %v10885_v35 = vrot.slane %v5330_v28, %v10817_v19  ;;  %v10950_v23 = vrot.slane %v13397_v14, %v10817_v19  ;;  %v10959_v12 = vrot.slane %v5347_v41, %v10817_v19  ;;  %v8310_v14 = vld [vmem:[%s12844_s3 + $0x20] ss:$0 sps:$4 sm:$0xff]  }
 0x406   : > { %8197 = vmatpush3.bf16.msra.mxu1 %v8307_v37  ;;  %v10850_v16 = vrot.slane %v5262_v36, %v10817_v19  ;;  %v8308_v37 = vld [vmem:[%s12844_s3 + $0x10] sm:$0xff]   ;;  %v10865_v7 = vcombine.high %v10830_v39, %v10830_v39  ;;  %v7892_v32 = vrot.slane %v10830_v39, 9  ;;  %v3689_v45 = vsel %vm3687_vm5, %v8310_v14, 0 }
 0x407   : > { %8198 = vmatprep.subr.bf16.mxu1 %v8308_v37  ;;  %v10889_v51 = vcombine.high %v10847_v26, %v10847_v26  ;;  %v10946_v25 = vcombine.high %v10885_v35, %v10885_v35  ;;  %v10974_v6 = vcombine.high %v10950_v23, %v10950_v23  ;;  %v10978_v58 = vcombine.high %v10959_v12, %v10959_v12 }
 0x408   : > { %3151 = vrot.lane.b32.xlu1 %v10156_v48, %s8388_s8  ;;  %3149 = vrot.lane.b32.xlu0 %v10148_v49, %s8388_s8  ;;  %v10836_v48 = vrot.slane %v13391_v0, %v10817_v19  ;;  %v13392_v49 = vld [vmem:[#allocation13_spill] sm:$0xff]  ;;  %v10854_v0 = vrot.slane %v13393_v60, %v10817_v19  ;;  %v13394_v60 = vld [vmem:[#allocation10_spill] sm:$0xff]  ;;  %v10904_v28 = vcombine.high %v10850_v16, %v10850_v16  ;;  %v7893_v29 = vrot.slane %v10865_v7, 9 }
 0x409   : > { %v5296_v18 = vcombine.high %v13392_v49, %v13392_v49  ;;  %v10842_v56 = vrot.slane %v13392_v49, %v10817_v19  ;;  %v7895_v55 = vrot.slane %v10889_v51, 9 }
 0x40a   : > { %v10869_v36 = vcombine.high %v10836_v48, %v10836_v48  ;;  %8199 = vmatpush3.bf16.msra.mxu1 %v8308_v37  ;;  %v8309_v37 = vld [vmem:[%s12844_s3 + $0x18] sm:$0xff]  }
 0x40b   : > { %v10872_v49 = vrot.slane %v5296_v18, %v10817_v19  ;;  %v10882_v22 = vcombine.high %v10842_v56, %v10842_v56  ;;  %v13395_v18 = vld [vmem:[#allocation12_spill] sm:$0xff]  ;;  %8200 = vmatprep.subr.bf16.mxu1 %v8309_v37  ;;  %v7900_v2 = vrot.slane %v10842_v56, 9 }
 0x40c   : > { %3155 = vrot.lane.b32.xlu1 %v10212_v63, %s8388_s8  ;;  %3153 = vrot.lane.b32.xlu0 %v10204_v1, %s8388_s8  ;;  %v5245_v63 = vcombine.high %v13394_v60, %v13394_v60  ;;  %v10878_v1 = vrot.slane %v13394_v60, %v10817_v19  ;;  %v5279_v53 = vcombine.high %v13395_v18, %v13395_v18  ;;  %v13396_v60 = vld [vmem:[#allocation14_spill] sm:$0xff] }
 0x40d   : > { %v10895_v33 = vrot.slane %v13395_v18, %v10817_v19  ;;  %v5313_v42 = vcombine.high %v13396_v60, %v13396_v60  ;;  %v10908_v47 = vcombine.high %v10872_v49, %v10872_v49  ;;  %v10912_v13 = vrot.slane %v13396_v60, %v10817_v19 }
 0x40e   : > { %v10900_v31 = vrot.slane %v5245_v63, %v10817_v19  ;;  %v5260_v63 = vcombine.high %v10878_v1, %v10878_v1  ;;  %v10924_v18 = vrot.slane %v5279_v53, %v10817_v19  ;;  %8201 = vmatpush3.bf16.msra.mxu1 %v8309_v37  ;;  %v7894_v37 = vrot.slane %v10847_v26, 9 }
 0x40f   : > { %v10927_v60 = vrot.slane %v5313_v42, %v10817_v19  ;;  %v5328_v42 = vcombine.high %v10912_v13, %v10912_v13  ;;  %v7896_v41 = vrot.slane %v10878_v1, 9  ;;  %8247 = vmatprep.subr.msk.bf16.mxu1 %vm3687_vm5, %v8310_v14  ;;  %v7901_v11 = vrot.slane %v10882_v22, 9 }
 0x410   : > { %3286 = vrot.lane.b32.xlu1 %v10191_v62, %s8389_s17  ;;  %3284 = vrot.lane.b32.xlu0 %v10194_v38, %s8389_s17  ;;  %v10931_v62 = vcombine.high %v10895_v33, %v10895_v33  ;;  %v10935_v38 = vcombine.high %v10854_v0, %v10854_v0  ;;  %v5261_v53 = vcombine.high %v10900_v31, %v10900_v31  ;;  %v7897_v44 = vrot.slane %v5260_v63, 9 }
 0x411   : > { %v10954_v5 = vcombine.high %v10924_v18, %v10924_v18  ;;  %v5329_v24 = vcombine.high %v10927_v60, %v10927_v60  ;;  %v7898_v59 = vrot.slane %v10900_v31, 9  ;;  %v7902_v8 = vrot.slane %v10872_v49, 9 }
 0x412   : > { %v7899_v54 = vrot.slane %v5261_v53, 9  ;;  %8203 = vmatpush3.bf16.msra.mxu1 %v3689_v45  ;;  %v7903_v21 = vrot.slane %v10908_v47, 9  ;;  %v7904_v17 = vrot.slane %v10912_v13, 9  ;;  %v7905_v40 = vrot.slane %v5328_v42, 9 }
 0x413   : > { %v7906_v14 = vrot.slane %v10927_v60, 9  ;;  %v10997_v45 = vadd.f32 %v7893_v29, %v10865_v7  ;;  %v11000_v10 = vadd.f32 %v7894_v37, %v10847_v26  ;;  %v11003_v19 = vadd.f32 %v7895_v55, %v10889_v51 }
 0x414   : > { %3290 = vrot.lane.b32.xlu1 %v13398_v9, %s8389_s17  ;;  %3288 = vrot.lane.b32.xlu0 %v13399_v52, %s8389_s17  ;;  %v11009_v50 = vadd.f32 %v7897_v44, %v5260_v63  ;;  %v11014_v29 = vadd.f32 %v7899_v54, %v5261_v53  ;;  %v11022_v51 = vadd.f32 %v7901_v11, %v10882_v22  ;;  %v7963_v22 = vrot.slane %v10954_v5, 9 }
 0x415   : > { %v11025_v55 = vadd.f32 %v7902_v8, %v10872_v49  ;;  %v11028_v44 = vadd.f32 %v7903_v21, %v10908_v47  ;;  %v11043_v54 = vadd.f32 %v7906_v14, %v10927_v60  ;;  %v7960_v8 = vrot.slane %v10895_v33, 9 }
 0x416   : > { %v2472_v61 = vpop.permute.xlu1 %2471  ;;  %v2470_v20 = vpop.permute.xlu0 %2469  ;;  %v7961_v47 = vrot.slane %v10931_v62, 9  ;;  %v7965_v26 = vrot.slane %v10935_v38, 9  ;;  %v7966_v7 = vrot.slane %v10885_v35, 9  ;;  %v7967_v49 = vrot.slane %v10946_v25, 9 }
 0x417   : > { %2537 = vst.msk [vmem:[#allocation5 + $0xf8] sm:$0xff] %vm2505_vm1, %v2472_v61  ;;  %2536 = vst.msk [vmem:[#allocation5 + $0xf0] sm:$0xff] %vm2505_vm1, %v2470_v20  ;;  %v7907_v61 = vrot.slane %v5329_v24, 9  ;;  %v10994_v20 = vadd.f32 %v7892_v32, %v10830_v39  ;;  %v11012_v32 = vadd.f32 %v7898_v59, %v10900_v31  ;;  %v11017_v39 = vadd.f32 %v7900_v2, %v10842_v56 }
 0x418   : > { %3420 = vrot.lane.b32.xlu1 %v10585_v15, %s8390_s9  ;;  %3418 = vrot.lane.b32.xlu0 %v10588_v4, %s8390_s9  ;;  %v11006_v15 = vadd.f32 %v7896_v41, %v10878_v1  ;;  %v7956_v4 = vrot.slane %v10836_v48, 9  ;;  %v11031_v59 = vadd.f32 %v7904_v17, %v10912_v13  ;;  %v7957_v17 = vrot.slane %v10869_v36, 9 }
 0x419   : > { %v11045_v21 = vadd.f32 %v7907_v61, %v5329_v24  ;;  %v7958_v13 = vrot.slane %v10850_v16, 9  ;;  %v7959_v31 = vrot.slane %v10904_v28, 9  ;;  %v7962_v24 = vrot.slane %v10924_v18, 9 }
 0x41a   : > { %v2621_v57 = vpop.permute.xlu1 %2620  ;;  %v2619_v27 = vpop.permute.xlu0 %2618  ;;  %v7964_v56 = vrot.slane %v10854_v0, 9  ;;  %v7968_v1 = vrot.slane %v10950_v23, 9  ;;  %v7969_v63 = vrot.slane %v10974_v6, 9  ;;  %v7970_v60 = vrot.slane %v10959_v12, 9 }
 0x41b   : > { %2716 = vst.msk [vmem:[#allocation5 + $0x8] sm:$0xff] %vm2714_vm4, %v2621_v57  ;;  %2715 = vst.msk [vmem:[#allocation5] sm:$0xff] %vm2714_vm4, %v2619_v27  ;;  %v6604_v57 = vld [vmem:[%s12846_s5] sm:$0x3]  ;;  %v11040_v27 = vadd.f32 %v7905_v40, %v5328_v42  ;;  %v7971_v53 = vrot.slane %v10978_v58, 9  ;;  %v6349_v42 = vadd.f32 %v7957_v17, %v10869_v36  ;;  %v6348_v37 = vadd.f32 %v7956_v4, %v10836_v48 }
 0x41c   : > { %3424 = vrot.lane.b32.xlu1 %v10598_v34, %s8390_s9  ;;  %3422 = vrot.lane.b32.xlu0 %v10601_v3, %s8390_s9  ;;  %v6876_v2 = vsel %vm1909_vm8, %v6604_v57, 0  ;;  %v6350_v41 = vadd.f32 %v7958_v13, %v10850_v16  ;;  %v6351_v14 = vadd.f32 %v7959_v31, %v10904_v28  ;;  %v6352_v61 = vadd.f32 %v7960_v8, %v10895_v33  ;;  %v13400_v28 = vld [vmem:[#allocation56_spill] sm:$0xff] }
 0x41d   : > { %8248 = vmatprep.subr.msk.bf16.mxu0 %vm1909_vm8, %v6604_v57  ;;  %v6357_v16 = vadd.f32 %v7965_v26, %v10935_v38  ;;  %v6358_v48 = vadd.f32 %v7966_v7, %v10885_v35  ;;  %v6359_v33 = vadd.f32 %v7967_v49, %v10946_v25  ;;  %v6360_v36 = vadd.f32 %v7968_v1, %v10950_v23 }
 0x41e   : > { %v2625_v11 = vpop.permute.xlu1 %2624  ;;  %v2623_v40 = vpop.permute.xlu0 %2622  ;;  %8237 = vmatpush3.bf16.msra.mxu0 %v6876_v2  ;;  %v6354_v2 = vadd.f32 %v7962_v24, %v10924_v18  ;;  %v13401_v18 = vld [vmem:[#allocation57_spill] sm:$0xff]  ;;  %v6363_v38 = vadd.f32 %v7971_v53, %v10978_v58  ;;  %v6414_v35 = vadd.f32 %v6350_v41, %v11000_v10  ;;  %v6415_v25 = vadd.f32 %v6351_v14, %v11003_v19 }
 0x41f   : > { %2718 = vst.msk [vmem:[#allocation5 + $0x18] sm:$0xff] %vm2714_vm4, %v2625_v11  ;;  %2717 = vst.msk [vmem:[#allocation5 + $0x10] sm:$0xff] %vm2714_vm4, %v2623_v40  ;;  %v6355_v11 = vadd.f32 %v7963_v22, %v10954_v5  ;;  %v6356_v40 = vadd.f32 %v7964_v56, %v10854_v0  ;;  %v6361_v5 = vadd.f32 %v7969_v63, %v10974_v6  ;;  %vm6747_vm8 = vcmask 1043459  }
 0x420   : > { %2894 = vrot.lane.b32.xlu1 %v13398_v9, %s8385_s15  ;;  %2892 = vrot.lane.b32.xlu0 %v13399_v52, %s8385_s15  ;;  %v6353_v52 = vadd.f32 %v7961_v47, %v10931_v62  ;;  %v6362_v0 = vadd.f32 %v7970_v60, %v10959_v12  ;;  %v6413_v62 = vadd.f32 %v6349_v42, %v10997_v45  ;;  %vm3114_vm1 = vcmask 392512  }
 0x421   : > { %v6416_v23 = vadd.f32 %v6352_v61, %v11006_v15  ;;  %v6412_v13 = vadd.f32 %v6348_v37, %v10994_v20  ;;  %v6418_v6 = vadd.f32 %v6354_v2, %v11012_v32  ;;  %v6419_v12 = vadd.f32 %v6355_v11, %v11014_v29  ;;  %v13402_v11 = vld [vmem:[#allocation47_spill] sm:$0xff] }
 0x422   : > { %v2629_v9 = vpop.permute.xlu1 %2628  ;;  %v2627_v57 = vpop.permute.xlu0 %2626  ;;  %v6417_v31 = vadd.f32 %v6353_v52, %v11009_v50  ;;  %v6420_v10 = vadd.f32 %v6356_v40, %v11017_v39  ;;  %v6421_v58 = vadd.f32 %v6357_v16, %v11022_v51  ;;  %v6422_v19 = vadd.f32 %v6358_v48, %v11025_v55 }
 0x423   : > { %2720 = vst.msk [vmem:[#allocation5 + $0x28] sm:$0xff] %vm2714_vm4, %v2629_v9  ;;  %2719 = vst.msk [vmem:[#allocation5 + $0x20] sm:$0xff] %vm2714_vm4, %v2627_v57  ;;  %v6423_v45 = vadd.f32 %v6359_v33, %v11028_v44  ;;  %v6424_v50 = vadd.f32 %v6360_v36, %v11031_v59  ;;  %v6425_v20 = vadd.f32 %v6361_v5, %v11040_v27  ;;  %v6477_v32 = vmul.f32 0.25, %v6413_v62 }
 0x424   : > { %2898 = vrot.lane.b32.xlu1 %v13400_v28, %s8385_s15  ;;  %2896 = vrot.lane.b32.xlu0 %v13401_v18, %s8385_s15  ;;  %v6426_v15 = vadd.f32 %v6362_v0, %v11043_v54  ;;  %v6427_v29 = vadd.f32 %v6363_v38, %v11045_v21  ;;  %v6478_v39 = vmul.f32 0.25, %v6414_v35  ;;  %v6479_v51 = vmul.f32 0.25, %v6415_v25 }
 0x425   : > { %v6480_v55 = vmul.f32 0.25, %v6416_v23  ;;  %v6476_v47 = vmul.f32 0.25, %v6412_v13  ;;  %v6481_v24 = vmul.f32 0.25, %v6417_v31  ;;  %v6483_v22 = vmul.f32 0.25, %v6419_v12  ;;  %v13403_v12 = vld [vmem:[#allocation61_spill] sm:$0xff] }
 0x426   : > { %v2633_v4 = vpop.permute.xlu1 %2632  ;;  %v2631_v17 = vpop.permute.xlu0 %2630  ;;  %v6485_v59 = vmul.f32 0.25, %v6421_v58  ;;  %v6486_v27 = vmul.f32 0.25, %v6422_v19  ;;  %v6487_v54 = vmul.f32 0.25, %v6423_v45  ;;  %v6488_v21 = vmul.f32 0.25, %v6424_v50 }
 0x427   : > { %2722 = vst.msk [vmem:[#allocation5 + $0x38] sm:$0xff] %vm2714_vm4, %v2633_v4  ;;  %2721 = vst.msk [vmem:[#allocation5 + $0x30] sm:$0xff] %vm2714_vm4, %v2631_v17  ;;  %v6489_v56 = vmul.f32 0.25, %v6425_v20  ;;  %v6490_v26 = vmul.f32 0.25, %v6426_v15  ;;  %v6541_v7 = vpack.c.bf16 %v6477_v32, %v6477_v32  ;;  %v6491_v49 = vmul.f32 0.25, %v6427_v29 }
 0x428   : > { %3028 = vrot.lane.b32.xlu1 %v10598_v34, %s8386_s21  ;;  %3026 = vrot.lane.b32.xlu0 %v10601_v3, %s8386_s21  ;;  %v6482_v34 = vmul.f32 0.25, %v6418_v6  ;;  %v6484_v3 = vmul.f32 0.25, %v6420_v10  ;;  %v6542_v1 = vpack.c.bf16 %v6478_v39, %v6478_v39  ;;  %v6543_v63 = vpack.c.bf16 %v6479_v51, %v6479_v51  ;;  %v13404_v10 = vld [vmem:[#allocation59_spill] sm:$0xff] }
 0x429   : > { %v6544_v60 = vpack.c.bf16 %v6480_v55, %v6480_v55  ;;  %v6540_v37 = vpack.c.bf16 %v6476_v47, %v6476_v47  ;;  %v6545_v41 = vpack.c.bf16 %v6481_v24, %v6481_v24  ;;  %v6547_v61 = vpack.c.bf16 %v6483_v22, %v6483_v22 }
 0x42a   : > { %v2637_v8 = vpop.permute.xlu1 %2636  ;;  %v2635_v44 = vpop.permute.xlu0 %2634  ;;  %v6546_v14 = vpack.c.bf16 %v6482_v34, %v6482_v34  ;;  %v6548_v9 = vpack.c.bf16 %v6484_v3, %v6484_v3  ;;  %v6549_v57 = vpack.c.bf16 %v6485_v59, %v6485_v59  ;;  %v6550_v52 = vpack.c.bf16 %v6486_v27, %v6486_v27 }
 0x42b   : > { %2724 = vst.msk [vmem:[#allocation5 + $0x48] sm:$0xff] %vm2714_vm4, %v2637_v8  ;;  %2723 = vst.msk [vmem:[#allocation5 + $0x40] sm:$0xff] %vm2714_vm4, %v2635_v44  ;;  %v6551_v2 = vpack.c.bf16 %v6487_v54, %v6487_v54  ;;  %v6552_v40 = vpack.c.bf16 %v6488_v21, %v6488_v21  ;;  %v6553_v16 = vpack.c.bf16 %v6489_v56, %v6489_v56  ;;  %v6677_v33 = vunpack.c.l.b16 %v6541_v7 }
 0x42c   : > { %3032 = vrot.lane.b32.xlu1 %v10613_v30, %s8386_s21  ;;  %3030 = vrot.lane.b32.xlu0 %v10616_v46, %s8386_s21  ;;  %v6554_v48 = vpack.c.bf16 %v6490_v26, %v6490_v26  ;;  %v6555_v36 = vpack.c.bf16 %v6491_v49, %v6491_v49  ;;  %v6678_v5 = vunpack.c.l.b16 %v6542_v1  ;;  %v6679_v0 = vunpack.c.l.b16 %v6543_v63  ;;  %v13405_v63 = vld [vmem:[#allocation17_spill] sm:$0xff] }
 0x42d   : > { %v6680_v62 = vunpack.c.l.b16 %v6544_v60  ;;  %v6676_v25 = vunpack.c.l.b16 %v6540_v37  ;;  %v6681_v23 = vunpack.c.l.b16 %v6545_v41  ;;  %v6682_v4 = vunpack.c.l.b16 %v6546_v14  ;;  %v13408_v14 = vld [vmem:[#allocation113_spill] sm:$0xff] }
 0x42e   : > { %v2641_v53 = vpop.permute.xlu1 %2640  ;;  %v2639_v42 = vpop.permute.xlu0 %2638  ;;  %v11126_v17 = vunpack.c.l.b16 %v6547_v61  ;;  %v6685_v13 = vunpack.c.l.b16 %v6549_v57  ;;  %v6686_v31 = vunpack.c.l.b16 %v6550_v52  ;;  %v6687_v6 = vunpack.c.l.b16 %v6551_v2 }
 0x42f   : > { %2726 = vst.msk [vmem:[#allocation5 + $0x58] sm:$0xff] %vm2714_vm4, %v2641_v53  ;;  %2725 = vst.msk [vmem:[#allocation5 + $0x50] sm:$0xff] %vm2714_vm4, %v2639_v42  ;;  %v6688_v58 = vunpack.c.l.b16 %v6552_v40  ;;  %v6689_v19 = vunpack.c.l.b16 %v6553_v16  ;;  %v6740_v45 = vrot.slane %v6677_v33, 7  ;;  %v6743_v50 = vrot.slane %v6678_v5, 6  ;;  %v13406_v53 = vld [vmem:[#allocation62_spill] sm:$0xff]  ;;  %v13407_v42 = vld [vmem:[#allocation63_spill] sm:$0xff] }
 0x430   : > { %3159 = vrot.lane.b32.xlu1 %v10210_v43, %s8388_s8  ;;  %3157 = vrot.lane.b32.xlu0 %v13402_v11, %s8388_s8  ;;  %v6684_v43 = vunpack.c.l.b16 %v6548_v9  ;;  %v6746_v20 = vrot.slane %v6679_v0, 5  ;;  %v6749_v15 = vrot.slane %v6680_v62, 4  ;;  %v6690_v39 = vunpack.c.l.b16 %v6554_v48  ;;  %v13409_v9 = vld [vmem:[#allocation18_spill] sm:$0xff] }
 0x431   : > { %v6742_v51 = vsel %vm6741_vm6, %v6740_v45, %v6676_v25  ;;  %v6752_v55 = vrot.slane %v6681_v23, 3  ;;  %v6691_v8 = vunpack.c.l.b16 %v6555_v36  ;;  %v6755_v47 = vrot.slane %v6682_v4, 2  ;;  %v13410_v36 = vld [vmem:[#allocation19_spill] sm:$0xff] }
 0x432   : > { %v2645_v38 = vpop.permute.xlu1 %2644  ;;  %v2643_v35 = vpop.permute.xlu0 %2642  ;;  %v6745_v44 = vsel %vm6744_vm7, %v6743_v50, %v6742_v51  ;;  %v6761_v34 = vrot.slane %v6685_v13, 7  ;;  %v6763_v22 = vrot.slane %v6686_v31, 6  ;;  %v6758_v59 = vrot.slane %v11126_v17, 1  ;;  %v13414_v51 = vld [vmem:[#allocation23_spill] sm:$0xff] }
 0x433   : > { %2728 = vst.msk [vmem:[#allocation5 + $0x68] sm:$0xff] %vm2714_vm4, %v2645_v38  ;;  %2727 = vst.msk [vmem:[#allocation5 + $0x60] sm:$0xff] %vm2714_vm4, %v2643_v35  ;;  %v6748_v24 = vsel %vm6747_vm8, %v6746_v20, %v6745_v44  ;;  %v6765_v27 = vrot.slane %v6687_v6, 5  ;;  %v6767_v54 = vrot.slane %v6688_v58, 4  ;;  %v6769_v7 = vrot.slane %v6689_v19, 3  ;;  %v13411_v35 = vld [vmem:[#allocation20_spill] sm:$0xff] }
 0x434   : > { %3163 = vrot.lane.b32.xlu1 %v13403_v12, %s8388_s8  ;;  %3161 = vrot.lane.b32.xlu0 %v13404_v10, %s8388_s8  ;;  %v6751_v3 = vsel %vm6750_vm9, %v6749_v15, %v6748_v24  ;;  %v6771_v1 = vrot.slane %v6690_v39, 2  ;;  %v5364_v60 = vcombine.high %v13405_v63, %v13405_v63  ;;  %v6773_v41 = vrot.slane %v6691_v8, 1  ;;  %v13412_v19 = vld [vmem:[#allocation21_spill] sm:$0xff]  ;;  %v13413_v20 = vld [vmem:[#allocation22_spill] sm:$0xff] }
 0x435   : > { %v6754_v26 = vsel %vm6753_vm10, %v6752_v55, %v6751_v3  ;;  %v11160_v61 = vrot.slane %v13405_v63, %v13408_v14  ;;  %v5381_v57 = vcombine.high %v13409_v9, %v13409_v9  ;;  %v11170_v11 = vrot.slane %v13409_v9, %v13408_v14  ;;  %v13415_v8 = vld [vmem:[#allocation74_spill] sm:$0xff]  ;;  %v13416_v44 = vld [vmem:[#allocation77_spill] sm:$0xff] }
 0x436   : > { %v2649_v32 = vpop.permute.xlu1 %2648  ;;  %v2647_v29 = vpop.permute.xlu0 %2646  ;;  %v11166_v2 = vrot.slane %v5364_v60, %v13408_v14  ;;  %v5398_v5 = vcombine.high %v13410_v36, %v13410_v36  ;;  %v11184_v38 = vrot.slane %v13410_v36, %v13408_v14  ;;  %v5415_v25 = vcombine.high %v13411_v35, %v13411_v35 }
 0x437   : > { %2730 = vst.msk [vmem:[#allocation5 + $0x78] sm:$0xff] %vm2714_vm4, %v2649_v32  ;;  %2729 = vst.msk [vmem:[#allocation5 + $0x70] sm:$0xff] %vm2714_vm4, %v2647_v29  ;;  %v11180_v62 = vrot.slane %v5381_v57, %v13408_v14  ;;  %v11195_v4 = vcombine.high %v11160_v61, %v11160_v61  ;;  %v5432_v45 = vcombine.high %v13412_v19, %v13412_v19  ;;  %vm3380_vm5 = vcmask 523712  }
 0x438   : > { %3294 = vrot.lane.b32.xlu1 %v13400_v28, %s8389_s17  ;;  %3292 = vrot.lane.b32.xlu0 %v13401_v18, %s8389_s17  ;;  %v6762_v28 = vsel %vm6741_vm6, %v6761_v34, %v6684_v43  ;;  %v6757_v18 = vsel %vm6756_vm11, %v6755_v47, %v6754_v26  ;;  %v11198_v17 = vrot.slane %v5398_v5, %v13408_v14  ;;  %v7910_v57 = vrot.slane %v11166_v2, 9 }
 0x439   : > { %v6764_v49 = vsel %vm6744_vm7, %v6763_v22, %v6762_v28  ;;  %v6760_v48 = vsel %vm13154_vm12, %v6758_v59, %v6757_v18  ;;  %v11202_v13 = vcombine.high %v11166_v2, %v11166_v2  ;;  %v11213_v58 = vrot.slane %v5415_v25, %v13408_v14 }
 0x43a   : > { %v2653_v21 = vpop.permute.xlu1 %2652  ;;  %v2651_v56 = vpop.permute.xlu0 %2650  ;;  %v6766_v37 = vsel %vm6747_vm8, %v6765_v27, %v6764_v49  ;;  %v11219_v50 = vrot.slane %v13412_v19, %v13408_v14  ;;  %v5449_v15 = vcombine.high %v13413_v20, %v13413_v20  ;;  %v5397_v32 = vcombine.high %v11180_v62, %v11180_v62  ;;  %v13419_v19 = vld [vmem:[#allocation58_spill] sm:$0xff] }
 0x43b   : > { %2732 = vst.msk [vmem:[#allocation5 + $0x88] sm:$0xff] %vm2714_vm4, %v2653_v21  ;;  %2731 = vst.msk [vmem:[#allocation5 + $0x80] sm:$0xff] %vm2714_vm4, %v2651_v56  ;;  %v6768_v52 = vsel %vm6750_vm9, %v6767_v54, %v6766_v37  ;;  %v11230_v29 = vcombine.high %v11184_v38, %v11184_v38  ;;  %v11234_v39 = vrot.slane %v13413_v20, %v13408_v14  ;;  %v7908_v22 = vrot.slane %v11160_v61, 9  ;;  %v13417_v54 = vld [vmem:[#allocation24_spill] sm:$0xff] }
 0x43c   : > { %3298 = vrot.lane.b32.xlu1 %v13406_v53, %s8389_s17  ;;  %3296 = vrot.lane.b32.xlu0 %v13407_v42, %s8389_s17  ;;  %v6770_v33 = vsel %vm6753_vm10, %v6769_v7, %v6768_v52  ;;  %v5466_v55 = vcombine.high %v13414_v51, %v13414_v51  ;;  %v11244_v47 = vcombine.high %v11198_v17, %v11198_v17  ;;  %v7909_v49 = vrot.slane %v11195_v4, 9 }
 0x43d   : > { %v6772_v0 = vsel %vm6756_vm11, %v6771_v1, %v6770_v33  ;;  %v5446_v24 = vrot.slane %v5432_v45, %v13408_v14  ;;  %v11248_v34 = vrot.slane %v5449_v15, %v13408_v14  ;;  %v11257_v59 = vrot.slane %v13414_v51, %v13408_v14 }
 0x43e   : > { %v2657_v40 = vpop.permute.xlu1 %2656  ;;  %v2655_v16 = vpop.permute.xlu0 %2654  ;;  %v6774_v23 = vsel %vm13154_vm12, %v6773_v41, %v6772_v0  ;;  %v11260_v27 = vrot.slane %v5466_v55, %v13408_v14  ;;  %v5483_v21 = vcombine.high %v13417_v54, %v13417_v54  ;;  %v11266_v28 = vcombine.high %v11213_v58, %v11213_v58 }
 0x43f   : > { %2734 = vst.msk [vmem:[#allocation5 + $0x98] sm:$0xff] %vm2714_vm4, %v2657_v40  ;;  %2733 = vst.msk [vmem:[#allocation5 + $0x90] sm:$0xff] %vm2714_vm4, %v2655_v16  ;;  %v6859_v43 = vpack.c.b16 %v6774_v23, %v6760_v48  ;;  %v5447_v7 = vcombine.high %v11219_v50, %v11219_v50  ;;  %v11272_v18 = vrot.slane %v13417_v54, %v13408_v14  ;;  %v7911_v52 = vrot.slane %v11202_v13, 9 }
 0x440   : > { %3428 = vrot.lane.b32.xlu1 %v10613_v30, %s8390_s9  ;;  %3426 = vrot.lane.b32.xlu0 %v10616_v46, %s8390_s9  ;;  %v11206_v30 = vcombine.high %v11170_v11, %v11170_v11  ;;  %v11210_v46 = vrot.slane %v13411_v35, %v13408_v14  ;;  %v5448_v1 = vcombine.high %v5446_v24, %v5446_v24  ;;  %v7914_v16 = vrot.slane %v11180_v62, 9 }
 0x441   : > { %8238 = vmatprep.mubr.msk.bf16.mxu0 %vm342_vm0, %v6859_v43  ;;  %v5464_v63 = vcombine.high %v11234_v39, %v11234_v39  ;;  %v5465_v60 = vcombine.high %v11248_v34, %v11248_v34  ;;  %v11282_v37 = vrot.slane %v5483_v21, %v13408_v14  ;;  %v11290_v41 = vcombine.high %v11257_v59, %v11257_v59 }
 0x442   : > { %v2661_v31 = vpop.permute.xlu1 %2660  ;;  %v2659_v6 = vpop.permute.xlu0 %2658  ;;  %v11253_v3 = vcombine.high %v11210_v46, %v11210_v46  ;;  %v11294_v9 = vcombine.high %v11260_v27, %v11260_v27  ;;  %v11300_v40 = vcombine.high %v11272_v18, %v11272_v18  ;;  %v7915_v5 = vrot.slane %v5397_v32, 9 }
 0x443   : > { %2736 = vst.msk [vmem:[#allocation5 + $0xa8] sm:$0xff] %vm2714_vm4, %v2661_v31  ;;  %2735 = vst.msk [vmem:[#allocation5 + $0xa0] sm:$0xff] %vm2714_vm4, %v2659_v6  ;;  %v11307_v36 = vcombine.high %v11282_v37, %v11282_v37  ;;  %v7916_v0 = vrot.slane %v11219_v50, 9  ;;  %v7917_v35 = vrot.slane %v5447_v7, 9  ;;  %v7918_v25 = vrot.slane %v5446_v24, 9  ;;  %v13418_v6 = vld [vmem:[#allocation60_spill] sm:$0xff] }
 0x444   : > { %3432 = vrot.lane.b32.xlu1 %v13415_v8, %s8390_s9  ;;  %3430 = vrot.lane.b32.xlu0 %v13416_v44, %s8390_s9  ;;  %v7919_v23 = vrot.slane %v5448_v1, 9  ;;  %v7920_v43 = vrot.slane %v11234_v39, 9  ;;  %v7921_v31 = vrot.slane %v5464_v63, 9  ;;  %v7922_v45 = vrot.slane %v11248_v34, 9 }
 0x445   : > { %v7923_v20 = vrot.slane %v5465_v60, 9  ;;  %v11319_v15 = vadd.f32 %v7908_v22, %v11160_v61  ;;  %v11322_v51 = vadd.f32 %v7909_v49, %v11195_v4  ;;  %v11325_v55 = vadd.f32 %v7910_v57, %v11166_v2 }
 0x446   : > { %v2665_v56 = vpop.permute.xlu1 %2664  ;;  %v2663_v26 = vpop.permute.xlu0 %2662  ;;  %v11328_v54 = vadd.f32 %v7911_v52, %v11202_v13  ;;  %v11338_v61 = vadd.f32 %v7914_v16, %v11180_v62  ;;  %v11340_v4 = vadd.f32 %v7915_v5, %v5397_v32  ;;  %v11343_v2 = vadd.f32 %v7916_v0, %v11219_v50  ;;  %v13420_v5 = vld [vmem:[#allocation65_spill] sm:$0xff]  ;;  %v13421_v0 = vld [vmem:[#allocation79_spill] sm:$0xff] }
 0x447   : > { %2738 = vst.msk [vmem:[#allocation5 + $0xb8] sm:$0xff] %vm2714_vm4, %v2665_v56  ;;  %2737 = vst.msk [vmem:[#allocation5 + $0xb0] sm:$0xff] %vm2714_vm4, %v2663_v26  ;;  %v7972_v56 = vrot.slane %v11184_v38, 9  ;;  %v6118_v13 = vadd.f32 %v7918_v25, %v5446_v24  ;;  %v11347_v22 = vadd.f32 %v7919_v23, %v5448_v1  ;;  %v11350_v49 = vadd.f32 %v7920_v43, %v11234_v39 }
 0x448   : > { %2767 = vrot.lane.b32.xlu1 %v13403_v12, %s8383_s23  ;;  %2765 = vrot.lane.b32.xlu0 %v13404_v10, %s8383_s23  ;;  %v7912_v12 = vrot.slane %v11170_v11, 9  ;;  %v7913_v10 = vrot.slane %v11206_v30, 9  ;;  %v11356_v62 = vadd.f32 %v7921_v31, %v5464_v63  ;;  %v7973_v50 = vrot.slane %v11230_v29, 9 }
 0x449   : > { %v7974_v32 = vrot.slane %v11198_v17, 9  ;;  %v11363_v24 = vadd.f32 %v7923_v20, %v5465_v60  ;;  %v7975_v39 = vrot.slane %v11244_v47, 9  ;;  %v7979_v63 = vrot.slane %v11266_v28, 9 }
 0x44a   : > { %v2669_v48 = vpop.permute.xlu1 %2668  ;;  %v2667_v33 = vpop.permute.xlu0 %2666  ;;  %v11331_v21 = vadd.f32 %v7912_v12, %v11170_v11  ;;  %v6117_v11 = vadd.f32 %v7917_v35, %v5447_v7  ;;  %v7976_v7 = vrot.slane %v11210_v46, 9  ;;  %v7982_v52 = vrot.slane %v11260_v27, 9 }
 0x44b   : > { %2740 = vst.msk [vmem:[#allocation5 + $0xc8] sm:$0xff] %vm2714_vm4, %v2669_v48  ;;  %2739 = vst.msk [vmem:[#allocation5 + $0xc0] sm:$0xff] %vm2714_vm4, %v2667_v33  ;;  %v11335_v33 = vadd.f32 %v7913_v10, %v11206_v30  ;;  %v11359_v30 = vadd.f32 %v7922_v45, %v11248_v34  ;;  %v7981_v34 = vrot.slane %v11290_v41, 9  ;;  %v7980_v60 = vrot.slane %v11257_v59, 9 }
 0x44c   : > { %2771 = vrot.lane.b32.xlu1 %v13418_v6, %s8383_s23  ;;  %2769 = vrot.lane.b32.xlu0 %v13419_v19, %s8383_s23  ;;  %v7983_v12 = vrot.slane %v11294_v9, 9  ;;  %v7984_v10 = vrot.slane %v11272_v18, 9  ;;  %v7985_v16 = vrot.slane %v11300_v40, 9  ;;  %v7986_v35 = vrot.slane %v11282_v37, 9 }
 0x44d   : > { %v7987_v25 = vrot.slane %v11307_v36, 9  ;;  %v6365_v23 = vadd.f32 %v7973_v50, %v11230_v29  ;;  %v6366_v43 = vadd.f32 %v7974_v32, %v11198_v17  ;;  %v6364_v31 = vadd.f32 %v7972_v56, %v11184_v38 }
 0x44e   : > { %v2673_v26 = vpop.permute.xlu1 %2672  ;;  %v2671_v48 = vpop.permute.xlu0 %2670  ;;  %v6367_v45 = vadd.f32 %v7975_v39, %v11244_v47  ;;  %v6368_v20 = vadd.f32 %v7976_v7, %v11210_v46  ;;  %v6371_v14 = vadd.f32 %v7979_v63, %v11266_v28  ;;  %v6374_v29 = vadd.f32 %v7982_v52, %v11260_v27 }
 0x44f   : > { %2742 = vst.msk [vmem:[#allocation5 + $0xd8] sm:$0xff] %vm2714_vm4, %v2673_v26  ;;  %2741 = vst.msk [vmem:[#allocation5 + $0xd0] sm:$0xff] %vm2714_vm4, %v2671_v48  ;;  %v6372_v38 = vadd.f32 %v7980_v60, %v11257_v59  ;;  %v6375_v17 = vadd.f32 %v7983_v12, %v11294_v9  ;;  %v6376_v46 = vadd.f32 %v7984_v10, %v11272_v18 }
 0x450   : > { %2902 = vrot.lane.b32.xlu1 %v13406_v53, %s8385_s15  ;;  %2900 = vrot.lane.b32.xlu0 %v13407_v42, %s8385_s15  ;;  %v7977_v53 = vrot.slane %v11253_v3, 9  ;;  %v7978_v42 = vrot.slane %v11213_v58, 9  ;;  %v6377_v47 = vadd.f32 %v7985_v16, %v11300_v40  ;;  %v6430_v27 = vadd.f32 %v6366_v43, %v11325_v55 }
 0x451   : > { %v6379_v59 = vadd.f32 %v7987_v25, %v11307_v36  ;;  %v6431_v28 = vadd.f32 %v6367_v45, %v11328_v54  ;;  %v6432_v18 = vadd.f32 %v6368_v20, %v11331_v21  ;;  %v6428_v40 = vadd.f32 %v6364_v31, %v11319_v15  ;;  %v13422_v21 = vld [vmem:[#allocation78_spill] sm:$0xff]  ;;  %v13423_v15 = vld [vmem:[#allocation95_spill] sm:$0xff] }
 0x452   : > { %v2677_v1 = vpop.permute.xlu1 %2676  ;;  %v2675_v57 = vpop.permute.xlu0 %2674  ;;  %v6369_v26 = vadd.f32 %v7977_v53, %v11253_v3  ;;  %v6429_v3 = vadd.f32 %v6365_v23, %v11322_v51  ;;  %v6435_v36 = vadd.f32 %v6371_v14, %v11340_v4  ;;  %v6436_v51 = vadd.f32 %v6372_v38, %v11343_v2 }
 0x453   : > { %2744 = vst.msk [vmem:[#allocation5 + $0xe8] sm:$0xff] %vm2714_vm4, %v2677_v1  ;;  %2743 = vst.msk [vmem:[#allocation5 + $0xe0] sm:$0xff] %vm2714_vm4, %v2675_v57  ;;  %v6370_v57 = vadd.f32 %v7978_v42, %v11213_v58  ;;  %v6378_v58 = vadd.f32 %v7986_v35, %v11282_v37  ;;  %v6438_v37 = vadd.f32 %v6374_v29, %v6118_v13  ;;  %v6494_v13 = vmul.f32 0.25, %v6430_v27 }
 0x454   : > { %2906 = vrot.lane.b32.xlu1 %v13420_v5, %s8385_s15  ;;  %2904 = vrot.lane.b32.xlu0 %v13421_v0, %s8385_s15  ;;  %v6373_v0 = vadd.f32 %v7981_v34, %v11290_v41  ;;  %v6433_v41 = vadd.f32 %v6369_v26, %v11335_v33  ;;  %v6439_v55 = vadd.f32 %v6375_v17, %v11347_v22  ;;  %v6495_v4 = vmul.f32 0.25, %v6431_v28 }
 0x455   : > { %v6440_v54 = vadd.f32 %v6376_v46, %v11350_v49  ;;  %v6441_v33 = vadd.f32 %v6377_v47, %v11356_v62  ;;  %v6443_v14 = vadd.f32 %v6379_v59, %v11363_v24  ;;  %v6496_v2 = vmul.f32 0.25, %v6432_v18 }
 0x456   : > { %v2681_v48 = vpop.permute.xlu1 %2680  ;;  %v2679_v1 = vpop.permute.xlu0 %2678  ;;  %v6437_v56 = vadd.f32 %v6373_v0, %v6117_v11  ;;  %v6493_v11 = vmul.f32 0.25, %v6429_v3  ;;  %v6497_v50 = vmul.f32 0.25, %v6433_v41  ;;  %v6492_v49 = vmul.f32 0.25, %v6428_v40 }
 0x457   : > { %2746 = vst.msk [vmem:[#allocation5 + $0xf8] sm:$0xff] %vm2714_vm4, %v2681_v48  ;;  %2745 = vst.msk [vmem:[#allocation5 + $0xf0] sm:$0xff] %vm2714_vm4, %v2679_v1  ;;  %v6502_v53 = vmul.f32 0.25, %v6438_v37  ;;  %v6499_v62 = vmul.f32 0.25, %v6435_v36  ;;  %v6500_v42 = vmul.f32 0.25, %v6436_v51  ;;  %v6504_v63 = vmul.f32 0.25, %v6440_v54 }
 0x458   : > { %3036 = vrot.lane.b32.xlu1 %v13415_v8, %s8386_s21  ;;  %3034 = vrot.lane.b32.xlu0 %v13416_v44, %s8386_s21  ;;  %v6434_v44 = vadd.f32 %v6370_v57, %v11338_v61  ;;  %v6442_v61 = vadd.f32 %v6378_v58, %v11359_v30  ;;  %v6501_v7 = vmul.f32 0.25, %v6437_v56  ;;  %v6503_v30 = vmul.f32 0.25, %v6439_v55  ;;  %v13424_v48 = vld [vmem:[#allocation83_spill] sm:$0xff]  ;;  %v13425_v1 = vld [vmem:[#allocation81_spill] sm:$0xff] }
 0x459   : > { %v6505_v24 = vmul.f32 0.25, %v6441_v33  ;;  %v6557_v52 = vpack.c.bf16 %v6493_v11, %v6493_v11  ;;  %v6558_v60 = vpack.c.bf16 %v6494_v13, %v6494_v13  ;;  %v6507_v12 = vmul.f32 0.25, %v6443_v14  ;;  %v13426_v37 = vld [vmem:[#allocation79_spill] sm:$0xff] }
 0x45a   : > { %v2752_v9 = vpop.permute.xlu1 %2751  ;;  %v2750_v8 = vpop.permute.xlu0 %2749  ;;  %v6498_v39 = vmul.f32 0.25, %v6434_v44  ;;  %v6506_v34 = vmul.f32 0.25, %v6442_v61  ;;  %v6559_v10 = vpack.c.bf16 %v6495_v4, %v6495_v4  ;;  %v6560_v16 = vpack.c.bf16 %v6496_v2, %v6496_v2 }
 0x45b   : > { %2847 = vst.msk [vmem:[#allocation5 + $0x8] sm:$0xff] %vm2845_vm13, %v2752_v9  ;;  %2846 = vst.msk [vmem:[#allocation5] sm:$0xff] %vm2845_vm13, %v2750_v8  ;;  %v6561_v0 = vpack.c.bf16 %v6497_v50, %v6497_v50  ;;  %v6556_v23 = vpack.c.bf16 %v6492_v49, %v6492_v49  ;;  %v6565_v31 = vpack.c.bf16 %v6501_v7, %v6501_v7  ;;  %v6693_v38 = vunpack.c.l.b16 %v6557_v52  ;;  %v13427_v7 = vld [vmem:[#allocation84_spill] sm:$0xff] }
 0x45c   : > { %3040 = vrot.lane.b32.xlu1 %v13422_v21, %s8386_s21  ;;  %3038 = vrot.lane.b32.xlu0 %v13423_v15, %s8386_s21  ;;  %v6562_v43 = vpack.c.bf16 %v6498_v39, %v6498_v39  ;;  %v6566_v45 = vpack.c.bf16 %v6502_v53, %v6502_v53  ;;  %v6567_v20 = vpack.c.bf16 %v6503_v30, %v6503_v30  ;;  %v6694_v17 = vunpack.c.l.b16 %v6558_v60  ;;  %v13428_v53 = vld [vmem:[#allocation85_spill] sm:$0xff] }
 0x45d   : > { %v6568_v26 = vpack.c.bf16 %v6504_v63, %v6504_v63  ;;  %v6569_v57 = vpack.c.bf16 %v6505_v24, %v6505_v24  ;;  %v6570_v29 = vpack.c.bf16 %v6506_v34, %v6506_v34  ;;  %v6571_v46 = vpack.c.bf16 %v6507_v12, %v6507_v12 }
 0x45e   : > { %v2756_v22 = vpop.permute.xlu1 %2755  ;;  %v2754_v32 = vpop.permute.xlu0 %2753  ;;  %v6695_v47 = vunpack.c.l.b16 %v6559_v10  ;;  %v6696_v58 = vunpack.c.l.b16 %v6560_v16  ;;  %v6697_v3 = vunpack.c.l.b16 %v6561_v0  ;;  %v6692_v28 = vunpack.c.l.b16 %v6556_v23 }
 0x45f   : > { %2849 = vst.msk [vmem:[#allocation5 + $0x18] sm:$0xff] %vm2845_vm13, %v2756_v22  ;;  %2848 = vst.msk [vmem:[#allocation5 + $0x10] sm:$0xff] %vm2845_vm13, %v2754_v32  ;;  %v6698_v18 = vunpack.c.l.b16 %v6562_v43  ;;  %v6701_v41 = vunpack.c.l.b16 %v6565_v31  ;;  %v6702_v9 = vunpack.c.l.b16 %v6566_v45  ;;  %v6703_v44 = vunpack.c.l.b16 %v6567_v20 }
 0x460   : > { %3167 = vrot.lane.b32.xlu1 %v13418_v6, %s8388_s8  ;;  %3165 = vrot.lane.b32.xlu0 %v13419_v19, %s8388_s8  ;;  %v6563_v6 = vpack.c.bf16 %v6499_v62, %v6499_v62  ;;  %v6564_v19 = vpack.c.bf16 %v6500_v42, %v6500_v42  ;;  %v6704_v56 = vunpack.c.l.b16 %v6568_v26  ;;  %v6705_v36 = vunpack.c.l.b16 %v6569_v57 }
 0x461   : > { %v6775_v51 = vrot.slane %v6693_v38, 7  ;;  %v6777_v55 = vrot.slane %v6694_v17, 6  ;;  %v6779_v54 = vrot.slane %v6695_v47, 5  ;;  %v6706_v33 = vunpack.c.l.b16 %v6570_v29  ;;  %v13431_v17 = vld [vmem:[#allocation82_spill] sm:$0xff] }
 0x462   : > { %v2760_v35 = vpop.permute.xlu1 %2759  ;;  %v2758_v25 = vpop.permute.xlu0 %2757  ;;  %v6699_v8 = vunpack.c.l.b16 %v6563_v6  ;;  %v6700_v40 = vunpack.c.l.b16 %v6564_v19  ;;  %v6707_v61 = vunpack.c.l.b16 %v6571_v46  ;;  %v6781_v11 = vrot.slane %v6696_v58, 4  ;;  %v13432_v46 = vld [vmem:[#allocation80_spill] sm:$0xff] }
 0x463   : > { %2851 = vst.msk [vmem:[#allocation5 + $0x28] sm:$0xff] %vm2845_vm13, %v2760_v35  ;;  %2850 = vst.msk [vmem:[#allocation5 + $0x20] sm:$0xff] %vm2845_vm13, %v2758_v25  ;;  %v6783_v13 = vrot.slane %v6697_v3, 3  ;;  %v6776_v2 = vsel %vm6741_vm6, %v6775_v51, %v6692_v28  ;;  %v6789_v50 = vrot.slane %v6701_v41, 7  ;;  %v6791_v22 = vrot.slane %v6702_v9, 6  ;;  %v13433_v3 = vld [vmem:[#allocation86_spill] sm:$0xff] }
 0x464   : > { %3171 = vrot.lane.b32.xlu1 %v13424_v48, %s8388_s8  ;;  %3169 = vrot.lane.b32.xlu0 %v13425_v1, %s8388_s8  ;;  %v6793_v32 = vrot.slane %v6703_v44, 5  ;;  %v6785_v49 = vrot.slane %v6698_v18, 2  ;;  %v6795_v39 = vrot.slane %v6704_v56, 4  ;;  %v6787_v42 = vrot.slane %v6699_v8, 1  ;;  %v13435_v9 = vld [vmem:[#allocation40_spill] sm:$0xff]  ;;  %v13436_v8 = vld [vmem:[#allocation97_spill] sm:$0xff] }
 0x465   : > { %v6790_v30 = vsel %vm6741_vm6, %v6789_v50, %v6700_v40  ;;  %v6797_v63 = vrot.slane %v6705_v36, 3  ;;  %v6799_v52 = vrot.slane %v6706_v33, 2  ;;  %v6801_v0 = vrot.slane %v6707_v61, 1  ;;  %v13438_v33 = vld [vmem:[#allocation93_spill] sm:$0xff] }
 0x466   : > { %v2764_v27 = vpop.permute.xlu1 %2763  ;;  %v2762_v59 = vpop.permute.xlu0 %2761  ;;  %v6792_v34 = vsel %vm6744_vm7, %v6791_v22, %v6790_v30  ;;  %vm3245_vm4 = vcmask 458112   ;;  %v13439_v22 = vld [vmem:[#allocation41_spill] sm:$0xff] }
 0x467   : > { %2853 = vst.msk [vmem:[#allocation5 + $0x38] sm:$0xff] %vm2845_vm13, %v2764_v27  ;;  %2852 = vst.msk [vmem:[#allocation5 + $0x30] sm:$0xff] %vm2845_vm13, %v2762_v59  ;;  %v6794_v16 = vsel %vm6747_vm8, %v6793_v32, %v6792_v34  ;;  %v13434_v27 = vld [vmem:[#allocation91_spill] sm:$0xff]  ;;  %v13440_v32 = vld [vmem:[#allocation90_spill] sm:$0xff] }
 0x468   : > { %3302 = vrot.lane.b32.xlu1 %v13420_v5, %s8389_s17  ;;  %3300 = vrot.lane.b32.xlu0 %v13426_v37, %s8389_s17  ;;  %v6778_v5 = vsel %vm6744_vm7, %v6777_v55, %v6776_v2  ;;  %v6796_v25 = vsel %vm6750_vm9, %v6795_v39, %v6794_v16  ;;  %v13443_v34 = vld [vmem:[#allocation87_spill] sm:$0xff] }
 0x469   : > { %v6780_v62 = vsel %vm6747_vm8, %v6779_v54, %v6778_v5  ;;  %v6798_v43 = vsel %vm6753_vm10, %v6797_v63, %v6796_v25  ;;  %v13437_v54 = vld [vmem:[#allocation88_spill] sm:$0xff] }
 0x46a   : > { %v2887_v14 = vpop.permute.xlu1 %2886  ;;  %v2885_v4 = vpop.permute.xlu0 %2884  ;;  %v6782_v24 = vsel %vm6750_vm9, %v6781_v11, %v6780_v62  ;;  %v6800_v31 = vsel %vm6756_vm11, %v6799_v52, %v6798_v43  ;;  %v13442_v62 = vld [vmem:[#allocation99_spill] sm:$0xff]  ;;  %v13444_v52 = vld [vmem:[#allocation92_spill] sm:$0xff] }
 0x46b   : > { %2982 = vst.msk [vmem:[#allocation5 + $0x8] sm:$0xff] %vm2980_vm15, %v2887_v14  ;;  %2981 = vst.msk [vmem:[#allocation5] sm:$0xff] %vm2980_vm15, %v2885_v4  ;;  %v6784_v10 = vsel %vm6753_vm10, %v6783_v13, %v6782_v24  ;;  %v6802_v19 = vsel %vm13154_vm12, %v6801_v0, %v6800_v31  ;;  %v13445_v0 = vld [vmem:[#allocation43_spill] sm:$0xff] }
 0x46c   : > { %3306 = vrot.lane.b32.xlu1 %v13427_v7, %s8389_s17  ;;  %3304 = vrot.lane.b32.xlu0 %v13428_v53, %s8389_s17  ;;  %v6786_v35 = vsel %vm6756_vm11, %v6785_v49, %v6784_v10 }
 0x46d   : > { %v6788_v23 = vsel %vm13154_vm12, %v6787_v42, %v6786_v35  ;;  %v13446_v35 = vld [vmem:[#allocation42_spill] sm:$0xff] }
 0x46e   : > { %v2891_v60 = vpop.permute.xlu1 %2890  ;;  %v2889_v12 = vpop.permute.xlu0 %2888  ;;  %v6860_v20 = vpack.c.b16 %v6802_v19, %v6788_v23 }
 0x46f   : > { %2984 = vst.msk [vmem:[#allocation5 + $0x18] sm:$0xff] %vm2980_vm15, %v2891_v60  ;;  %2983 = vst.msk [vmem:[#allocation5 + $0x10] sm:$0xff] %vm2980_vm15, %v2889_v12 }
 0x470   : > { %3436 = vrot.lane.b32.xlu1 %v13422_v21, %s8390_s9  ;;  %3434 = vrot.lane.b32.xlu0 %v13423_v15, %s8390_s9  ;;  %v13429_v21 = vld [vmem:[#allocation96_spill] sm:$0xff]  ;;  %v13430_v15 = vld [vmem:[#allocation39_spill] sm:$0xff] }
 0x471   : > { %8239 = vmatmul.mubr.msk.bf16.vlgmr.msra.gmra.mrb[32].mxu0 %vm342_vm0, %v6860_v20  ;;  %v13447_v20 = vld [vmem:[#allocation100_spill] sm:$0xff] }
 0x472   : > { %v3021_v45 = vpop.permute.xlu1 %3020  ;;  %v3019_v6 = vpop.permute.xlu0 %3018 }
 0x473   : > { %3116 = vst.msk [vmem:[#allocation5 + $0x8] sm:$0xff] %vm3114_vm1, %v3021_v45  ;;  %3115 = vst.msk [vmem:[#allocation5] sm:$0xff] %vm3114_vm1, %v3019_v6 }
 0x474   : > { %3440 = vrot.lane.b32.xlu1 %v13429_v21, %s8390_s9  ;;  %3438 = vrot.lane.b32.xlu0 %v13430_v15, %s8390_s9 }
 0x476   : > { %v3025_v26 = vpop.permute.xlu1 %3024  ;;  %v3023_v57 = vpop.permute.xlu0 %3022 }
 0x477   : > { %3118 = vst.msk [vmem:[#allocation5 + $0x18] sm:$0xff] %vm3114_vm1, %v3025_v26  ;;  %3117 = vst.msk [vmem:[#allocation5 + $0x10] sm:$0xff] %vm3114_vm1, %v3023_v57 }
 0x478   : > { %2775 = vrot.lane.b32.xlu1 %v13424_v48, %s8383_s23  ;;  %2773 = vrot.lane.b32.xlu0 %v13425_v1, %s8383_s23 }
 0x47a   : > { %v3152_v29 = vpop.permute.xlu1 %3151  ;;  %v3150_v38 = vpop.permute.xlu0 %3149 }
 0x47b   : > { %3247 = vst.msk [vmem:[#allocation5 + $0x8] sm:$0xff] %vm3245_vm4, %v3152_v29  ;;  %3246 = vst.msk [vmem:[#allocation5] sm:$0xff] %vm3245_vm4, %v3150_v38 }
 0x47c   : > { %2779 = vrot.lane.b32.xlu1 %v13431_v17, %s8383_s23  ;;  %2777 = vrot.lane.b32.xlu0 %v13432_v46, %s8383_s23 }
 0x47e   : > { %v3156_v47 = vpop.permute.xlu1 %3155  ;;  %v3154_v58 = vpop.permute.xlu0 %3153 }
 0x47f   : > { %3249 = vst.msk [vmem:[#allocation5 + $0x18] sm:$0xff] %vm3245_vm4, %v3156_v47  ;;  %3248 = vst.msk [vmem:[#allocation5 + $0x10] sm:$0xff] %vm3245_vm4, %v3154_v58  ;;  %v13450_v47 = vld [vmem:[#allocation113_spill] sm:$0xff] }
 0x480   : > { %2910 = vrot.lane.b32.xlu1 %v13427_v7, %s8385_s15  ;;  %2908 = vrot.lane.b32.xlu0 %v13428_v53, %s8385_s15  ;;  %v13441_v53 = vld [vmem:[#allocation98_spill] sm:$0xff] }
 0x482   : > { %v3287_v48 = vpop.permute.xlu1 %3286  ;;  %v3285_v1 = vpop.permute.xlu0 %3284 }
 0x483   : > { %3382 = vst.msk [vmem:[#allocation5 + $0x8] sm:$0xff] %vm3380_vm5, %v3287_v48  ;;  %3381 = vst.msk [vmem:[#allocation5] sm:$0xff] %vm3380_vm5, %v3285_v1  ;;  %v13451_v48 = vld [vmem:[#allocation27_spill] sm:$0xff] }
 0x484   : > { %2914 = vrot.lane.b32.xlu1 %v13433_v3, %s8385_s15  ;;  %2912 = vrot.lane.b32.xlu0 %v13434_v27, %s8385_s15  ;;  %v5534_v1 = vcombine.high %v13451_v48, %v13451_v48 }
 0x486   : > { %v3291_v59 = vpop.permute.xlu1 %3290  ;;  %v3289_v28 = vpop.permute.xlu0 %3288 }
 0x487   : > { %3384 = vst.msk [vmem:[#allocation5 + $0x18] sm:$0xff] %vm3380_vm5, %v3291_v59  ;;  %3383 = vst.msk [vmem:[#allocation5 + $0x10] sm:$0xff] %vm3380_vm5, %v3289_v28  ;;  %v13452_v28 = vld [vmem:[#allocation29_spill] sm:$0xff] }
 0x488   : > { %3044 = vrot.lane.b32.xlu1 %v13429_v21, %s8386_s21  ;;  %3042 = vrot.lane.b32.xlu0 %v13430_v15, %s8386_s21  ;;  %v13448_v21 = vld [vmem:[#allocation101_spill] sm:$0xff] }
 0x48a   : > { %v3421_v18 = vpop.permute.xlu1 %3420  ;;  %v3419_v41 = vpop.permute.xlu0 %3418 }
 0x48b   : > { %3516 = vst.msk [vmem:[#allocation5 + $0x8] sm:$0xff] %vm3514_vm14, %v3421_v18  ;;  %3515 = vst.msk [vmem:[#allocation5] sm:$0xff] %vm3514_vm14, %v3419_v41  ;;  %v5568_v18 = vcombine.high %v13452_v28, %v13452_v28  ;;  %v11611_v41 = vrot.slane %v13452_v28, %v13450_v47 }
 0x48c   : > { %3048 = vrot.lane.b32.xlu1 %v13435_v9, %s8386_s21  ;;  %3046 = vrot.lane.b32.xlu0 %v13436_v8, %s8386_s21 }
 0x48e   : > { %v3425_v40 = vpop.permute.xlu1 %3424  ;;  %v3423_v44 = vpop.permute.xlu0 %3422 }
 0x48f   : > { %3518 = vst.msk [vmem:[#allocation5 + $0x18] sm:$0xff] %vm3514_vm14, %v3425_v40  ;;  %3517 = vst.msk [vmem:[#allocation5 + $0x10] sm:$0xff] %vm3514_vm14, %v3423_v44  ;;  %v11621_v44 = vrot.slane %v5534_v1, %v13450_v47 }
 0x490   : > { %3175 = vrot.lane.b32.xlu1 %v13431_v17, %s8388_s8  ;;  %3173 = vrot.lane.b32.xlu0 %v13432_v46, %s8388_s8  ;;  %v13449_v17 = vld [vmem:[#allocation25_spill] sm:$0xff] }
 0x491   : > { %v5500_v46 = vcombine.high %v13449_v17, %v13449_v17  ;;  %v11599_v58 = vrot.slane %v13449_v17, %v13450_v47 }
 0x492   : > { %v2895_v56 = vpop.permute.xlu1 %2894  ;;  %v2893_v37 = vpop.permute.xlu0 %2892  ;;  %v3547_v36 = vld [vmem:[#allocation5] sm:$0xff]  ;;  %v3548_v51 = vld [vmem:[#allocation5 + $0x8] sm:$0xff] }
 0x493   : > { %2986 = vst.msk [vmem:[#allocation5 + $0x28] sm:$0xff] %vm2980_vm15, %v2895_v56  ;;  %2985 = vst.msk [vmem:[#allocation5 + $0x20] sm:$0xff] %vm2980_vm15, %v2893_v37  ;;  %v3579_v55 = vpack.c.bf16 %v3548_v51, %v3547_v36  ;;  %v11618_v40 = vrot.slane %v5500_v46, %v13450_v47  ;;  %v13454_v56 = vld [vmem:[#allocation67_spill] sm:$0xff]  ;;  %v13455_v37 = vld [vmem:[#allocation44_spill] sm:$0xff]  ;;  %v11629_v36 = vcombine.high %v11599_v58, %v11599_v58 }
 0x494   : > { %3179 = vrot.lane.b32.xlu1 %v13437_v54, %s8388_s8  ;;  %3177 = vrot.lane.b32.xlu0 %v13438_v33, %s8388_s8  ;;  %v11632_v51 = vrot.slane %v5568_v18, %v13450_v47  ;;  %v7932_v18 = vrot.slane %v11611_v41, 9 }
 0x495   : > { %8204 = vmatprep.mubr.msk.bf16.mxu1 %vm3638_vm3, %v3579_v55 }
 0x496   : > { %v2899_v61 = vpop.permute.xlu1 %2898  ;;  %v2897_v11 = vpop.permute.xlu0 %2896  ;;  %v3549_v13 = vld [vmem:[#allocation5 + $0x10] sm:$0xff]  ;;  %v3550_v14 = vld [vmem:[#allocation5 + $0x18] sm:$0xff] }
 0x497   : > { %2988 = vst.msk [vmem:[#allocation5 + $0x38] sm:$0xff] %vm2980_vm15, %v2899_v61  ;;  %2987 = vst.msk [vmem:[#allocation5 + $0x30] sm:$0xff] %vm2980_vm15, %v2897_v11  ;;  %v3580_v4 = vpack.c.bf16 %v3550_v14, %v3549_v13  ;;  %v11650_v13 = vcombine.high %v11611_v41, %v11611_v41 }
 0x498   : > { %3310 = vrot.lane.b32.xlu1 %v13433_v3, %s8389_s17  ;;  %3308 = vrot.lane.b32.xlu0 %v13434_v27, %s8389_s17  ;;  %v11605_v3 = vrot.slane %v13451_v48, %v13450_v47 }
 0x499   : > { %8205 = vmatmul.mubr.msk.bf16.vlgmr.msra.gmra.mrb[0].mxu1 %vm3638_vm3, %v3580_v4 }
 0x49a   : > { %v3029_v2 = vpop.permute.xlu1 %3028  ;;  %v3027_v50 = vpop.permute.xlu0 %3026  ;;  %v11646_v11 = vcombine.high %v11605_v3, %v11605_v3 }
 0x49b   : > { %3120 = vst.msk [vmem:[#allocation5 + $0x28] sm:$0xff] %vm3114_vm1, %v3029_v2  ;;  %3119 = vst.msk [vmem:[#allocation5 + $0x20] sm:$0xff] %vm3114_vm1, %v3027_v50  ;;  %v13457_v2 = vld [vmem:[#allocation28_spill] sm:$0xff] }
 0x49c   : > { %3314 = vrot.lane.b32.xlu1 %v13439_v22, %s8389_s17  ;;  %3312 = vrot.lane.b32.xlu0 %v13440_v32, %s8389_s17  ;;  %v5551_v50 = vcombine.high %v13457_v2, %v13457_v2 }
 0x49e   : > { %v3033_v5 = vpop.permute.xlu1 %3032  ;;  %v3031_v49 = vpop.permute.xlu0 %3030 }
 0x49f   : > { %3122 = vst.msk [vmem:[#allocation5 + $0x38] sm:$0xff] %vm3114_vm1, %v3033_v5  ;;  %3121 = vst.msk [vmem:[#allocation5 + $0x30] sm:$0xff] %vm3114_vm1, %v3031_v49 }
 0x4a0   : > { %3444 = vrot.lane.b32.xlu1 %v13435_v9, %s8390_s9  ;;  %3442 = vrot.lane.b32.xlu0 %v13436_v8, %s8390_s9  ;;  %v13453_v9 = vld [vmem:[#allocation31_spill] sm:$0xff] }
 0x4a1   : > { %v5602_v8 = vcombine.high %v13453_v9, %v13453_v9  ;;  %v11636_v55 = vrot.slane %v13453_v9, %v13450_v47  ;;  %v7933_v9 = vrot.slane %v11650_v13, 9 }
 0x4a2   : > { %v3160_v39 = vpop.permute.xlu1 %3159  ;;  %v3158_v7 = vpop.permute.xlu0 %3157 }
 0x4a3   : > { %3251 = vst.msk [vmem:[#allocation5 + $0x28] sm:$0xff] %vm3245_vm4, %v3160_v39  ;;  %3250 = vst.msk [vmem:[#allocation5 + $0x20] sm:$0xff] %vm3245_vm4, %v3158_v7  ;;  %v11661_v49 = vrot.slane %v5602_v8, %v13450_v47  ;;  %v5516_v39 = vcombine.high %v11618_v40, %v11618_v40  ;;  %v7934_v8 = vrot.slane %v11632_v51, 9 }
 0x4a4   : > { %3448 = vrot.lane.b32.xlu1 %v13441_v53, %s8390_s9  ;;  %3446 = vrot.lane.b32.xlu0 %v13442_v62, %s8390_s9 }
 0x4a6   : > { %v3164_v42 = vpop.permute.xlu1 %3163  ;;  %v3162_v30 = vpop.permute.xlu0 %3161 }
 0x4a7   : > { %3253 = vst.msk [vmem:[#allocation5 + $0x38] sm:$0xff] %vm3245_vm4, %v3164_v42  ;;  %3252 = vst.msk [vmem:[#allocation5 + $0x30] sm:$0xff] %vm3245_vm4, %v3162_v30  ;;  %v11681_v42 = vrot.slane %v5551_v50, %v13450_v47  ;;  %v5584_v30 = vcombine.high %v11632_v51, %v11632_v51 }
 0x4a8   : > { %2783 = vrot.lane.b32.xlu1 %v13437_v54, %s8383_s23  ;;  %2781 = vrot.lane.b32.xlu0 %v13438_v33, %s8383_s23  ;;  %v13456_v54 = vld [vmem:[#allocation26_spill] sm:$0xff] }
 0x4a9   : > { %v5517_v33 = vcombine.high %v13456_v54, %v13456_v54  ;;  %v11642_v61 = vrot.slane %v13456_v54, %v13450_v47  ;;  %v7935_v54 = vrot.slane %v5584_v30, 9 }
 0x4aa   : > { %v3295_v63 = vpop.permute.xlu1 %3294  ;;  %v3293_v24 = vpop.permute.xlu0 %3292 }
 0x4ab   : > { %3386 = vst.msk [vmem:[#allocation5 + $0x28] sm:$0xff] %vm3380_vm5, %v3295_v63  ;;  %3385 = vst.msk [vmem:[#allocation5 + $0x20] sm:$0xff] %vm3380_vm5, %v3293_v24  ;;  %v5531_v7 = vrot.slane %v5517_v33, %v13450_v47  ;;  %v5532_v24 = vcombine.high %v11642_v61, %v11642_v61 }
 0x4ac   : > { %2787 = vrot.lane.b32.xlu1 %v13443_v34, %s8383_s23  ;;  %2785 = vrot.lane.b32.xlu0 %v13444_v52, %s8383_s23 }
 0x4ad   : > { %v7929_v46 = vrot.slane %v5532_v24, 9  ;;  %v7930_v48 = vrot.slane %v5531_v7, 9 }
 0x4ae   : > { %v3299_v60 = vpop.permute.xlu1 %3298  ;;  %v3297_v12 = vpop.permute.xlu0 %3296 }
 0x4af   : > { %3388 = vst.msk [vmem:[#allocation5 + $0x38] sm:$0xff] %vm3380_vm5, %v3299_v60  ;;  %3387 = vst.msk [vmem:[#allocation5 + $0x30] sm:$0xff] %vm3380_vm5, %v3297_v12  ;;  %v13459_v60 = vld [vmem:[#allocation32_spill] sm:$0xff] }
 0x4b0   : > { %2918 = vrot.lane.b32.xlu1 %v13439_v22, %s8385_s15  ;;  %2916 = vrot.lane.b32.xlu0 %v13440_v32, %s8385_s15  ;;  %v11656_v22 = vrot.slane %v13457_v2, %v13450_v47  ;;  %v13458_v32 = vld [vmem:[#allocation30_spill] sm:$0xff]  ;;  %v5619_v12 = vcombine.high %v13459_v60, %v13459_v60 }
 0x4b1   : > { %v5585_v5 = vcombine.high %v13458_v32, %v13458_v32 }
 0x4b2   : > { %v3429_v10 = vpop.permute.xlu1 %3428  ;;  %v3427_v16 = vpop.permute.xlu0 %3426 }
 0x4b3   : > { %3520 = vst.msk [vmem:[#allocation5 + $0x28] sm:$0xff] %vm3514_vm14, %v3429_v10  ;;  %3519 = vst.msk [vmem:[#allocation5 + $0x20] sm:$0xff] %vm3514_vm14, %v3427_v16  ;;  %v11686_v63 = vrot.slane %v5585_v5, %v13450_v47 }
 0x4b4   : > { %2922 = vrot.lane.b32.xlu1 %v13445_v0, %s8385_s15  ;;  %2920 = vrot.lane.b32.xlu0 %v13446_v35, %s8385_s15 }
 0x4b6   : > { %v3433_v25 = vpop.permute.xlu1 %3432  ;;  %v3431_v23 = vpop.permute.xlu0 %3430 }
 0x4b7   : > { %3522 = vst.msk [vmem:[#allocation5 + $0x38] sm:$0xff] %vm3514_vm14, %v3433_v25  ;;  %3521 = vst.msk [vmem:[#allocation5 + $0x30] sm:$0xff] %vm3514_vm14, %v3431_v23  ;;  %v11704_v25 = vrot.slane %v13459_v60, %v13450_v47  ;;  %v7924_v23 = vrot.slane %v11599_v58, 9 }
 0x4b8   : > { %3052 = vrot.lane.b32.xlu1 %v13441_v53, %s8386_s21  ;;  %3050 = vrot.lane.b32.xlu0 %v13442_v62, %s8386_s21  ;;  %v11670_v53 = vcombine.high %v11621_v44, %v11621_v44  ;;  %v11674_v62 = vrot.slane %v13458_v32, %v13450_v47 }
 0x4b9   : > { %v11731_v17 = vcombine.high %v11704_v25, %v11704_v25  ;;  %v11749_v50 = vadd.f32 %v7924_v23, %v11599_v58 }
 0x4ba   : > { %v2768_v43 = vpop.permute.xlu1 %2767  ;;  %v2766_v31 = vpop.permute.xlu0 %2765  ;;  %v3551_v45 = vld [vmem:[#allocation5 + $0x20] sm:$0xff]  ;;  %v3552_v6 = vld [vmem:[#allocation5 + $0x28] sm:$0xff]  ;;  %v7936_v33 = vrot.slane %v11674_v62, 9 }
 0x4bb   : > { %2855 = vst.msk [vmem:[#allocation5 + $0x48] sm:$0xff] %vm2845_vm13, %v2768_v43  ;;  %2854 = vst.msk [vmem:[#allocation5 + $0x40] sm:$0xff] %vm2845_vm13, %v2766_v31  ;;  %v3581_v19 = vpack.c.bf16 %v3552_v6, %v3551_v45  ;;  %v11711_v43 = vcombine.high %v11681_v42, %v11681_v42  ;;  %v5601_v31 = vcombine.high %v11686_v63, %v11686_v63 }
 0x4bc   : > { %3056 = vrot.lane.b32.xlu1 %v13447_v20, %s8386_s21  ;;  %3054 = vrot.lane.b32.xlu0 %v13448_v21, %s8386_s21  ;;  %v11717_v45 = vcombine.high %v11661_v49, %v11661_v49  ;;  %v11720_v6 = vrot.slane %v5619_v12, %v13450_v47 }
 0x4bd   : > { %8208 = vmatprep.mubr.msk.bf16.mxu1 %vm3638_vm3, %v3581_v19  ;;  %v13460_v19 = vld [vmem:[#allocation89_spill] sm:$0xff]  ;;  %v7939_v2 = vrot.slane %v5601_v31, 9 }
 0x4be   : > { %v2772_v15 = vpop.permute.xlu1 %2771  ;;  %v2770_v26 = vpop.permute.xlu0 %2769  ;;  %v3553_v57 = vld [vmem:[#allocation5 + $0x30] sm:$0xff]  ;;  %v3554_v29 = vld [vmem:[#allocation5 + $0x38] sm:$0xff]  ;;  %v11735_v28 = vcombine.high %v11720_v6, %v11720_v6 }
 0x4bf   : > { %2857 = vst.msk [vmem:[#allocation5 + $0x58] sm:$0xff] %vm2845_vm13, %v2772_v15  ;;  %2856 = vst.msk [vmem:[#allocation5 + $0x50] sm:$0xff] %vm2845_vm13, %v2770_v26  ;;  %v3582_v38 = vpack.c.bf16 %v3554_v29, %v3553_v57  ;;  %v13461_v15 = vld [vmem:[#allocation69_spill] sm:$0xff]  ;;  %v7925_v26 = vrot.slane %v11629_v36, 9  ;;  %v7926_v57 = vrot.slane %v11618_v40, 9  ;;  %v7927_v29 = vrot.slane %v5516_v39, 9 }
 0x4c0   : > { %3183 = vrot.lane.b32.xlu1 %v13443_v34, %s8388_s8  ;;  %3181 = vrot.lane.b32.xlu0 %v13444_v52, %s8388_s8  ;;  %v5533_v34 = vcombine.high %v5531_v7, %v5531_v7  ;;  %v11692_v52 = vcombine.high %v11636_v55, %v11636_v55  ;;  %v11794_v23 = vadd.f32 %v7939_v2, %v5601_v31 }
 0x4c1   : > { %8209 = vmatmul.mubr.msk.bf16.gmra.mrb[4].mxu1 %vm3638_vm3, %v3582_v38  ;;  %v7928_v38 = vrot.slane %v11642_v61, 9  ;;  %v11752_v32 = vadd.f32 %v7925_v26, %v11629_v36  ;;  %v11755_v5 = vadd.f32 %v7926_v57, %v11618_v40  ;;  %v11757_v60 = vadd.f32 %v7927_v29, %v5516_v39 }
 0x4c2   : > { %v2903_v27 = vpop.permute.xlu1 %2902  ;;  %v2901_v59 = vpop.permute.xlu0 %2900  ;;  %v7931_v1 = vrot.slane %v5533_v34, 9  ;;  %v11770_v36 = vadd.f32 %v7932_v18, %v11611_v41  ;;  %v11773_v40 = vadd.f32 %v7933_v9, %v11650_v13  ;;  %v11780_v39 = vadd.f32 %v7935_v54, %v5584_v30  ;;  %v13462_v41 = vld [vmem:[#allocation102_spill] sm:$0xff]  ;;  %v13463_v13 = vld [vmem:[#allocation103_spill] sm:$0xff] }
 0x4c3   : > { %2990 = vst.msk [vmem:[#allocation5 + $0x48] sm:$0xff] %vm2980_vm15, %v2903_v27  ;;  %2989 = vst.msk [vmem:[#allocation5 + $0x40] sm:$0xff] %vm2980_vm15, %v2901_v59  ;;  %v11760_v12 = vadd.f32 %v7928_v38, %v11642_v61  ;;  %v11778_v61 = vadd.f32 %v7934_v8, %v11632_v51  ;;  %v7989_v51 = vrot.slane %v11646_v11, 9  ;;  %v7990_v30 = vrot.slane %v11621_v44, 9 }
 0x4c4   : > { %3187 = vrot.lane.b32.xlu1 %v13454_v56, %s8388_s8  ;;  %3185 = vrot.lane.b32.xlu0 %v13455_v37, %s8388_s8  ;;  %v11767_v58 = vadd.f32 %v7931_v1, %v5533_v34  ;;  %v7994_v57 = vrot.slane %v11681_v42, 9  ;;  %v7997_v31 = vrot.slane %v11692_v52, 9  ;;  %v7999_v1 = vrot.slane %v11717_v45, 9 }
 0x4c5   : > { %v8001_v18 = vrot.slane %v11731_v17, 9  ;;  %v8002_v9 = vrot.slane %v11720_v6, 9  ;;  %v8003_v8 = vrot.slane %v11735_v28, 9 }
 0x4c6   : > { %v2907_v14 = vpop.permute.xlu1 %2906  ;;  %v2905_v4 = vpop.permute.xlu0 %2904 }
 0x4c7   : > { %2992 = vst.msk [vmem:[#allocation5 + $0x58] sm:$0xff] %vm2980_vm15, %v2907_v14  ;;  %2991 = vst.msk [vmem:[#allocation5 + $0x50] sm:$0xff] %vm2980_vm15, %v2905_v4  ;;  %v7938_v4 = vrot.slane %v11686_v63, 9 }
 0x4c8   : > { %3318 = vrot.lane.b32.xlu1 %v13445_v0, %s8389_s17  ;;  %3316 = vrot.lane.b32.xlu0 %v13446_v35, %s8389_s17  ;;  %v11698_v0 = vcombine.high %v11656_v22, %v11656_v22  ;;  %v5600_v35 = vcombine.high %v11674_v62, %v11674_v62 }
 0x4c9   : > { %v11792_v34 = vadd.f32 %v7938_v4, %v11686_v63  ;;  %v7996_v63 = vrot.slane %v11636_v55, 9 }
 0x4ca   : > { %v3037_v10 = vpop.permute.xlu1 %3036  ;;  %v3035_v16 = vpop.permute.xlu0 %3034  ;;  %v7937_v14 = vrot.slane %v5600_v35, 9  ;;  %v7993_v26 = vrot.slane %v11698_v0, 9 }
 0x4cb   : > { %3124 = vst.msk [vmem:[#allocation5 + $0x48] sm:$0xff] %vm3114_vm1, %v3037_v10  ;;  %3123 = vst.msk [vmem:[#allocation5 + $0x40] sm:$0xff] %vm3114_vm1, %v3035_v16  ;;  %v11762_v10 = vadd.f32 %v7929_v46, %v5532_v24  ;;  %v7995_v46 = vrot.slane %v11711_v43, 9 }
 0x4cc   : > { %3322 = vrot.lane.b32.xlu1 %v13460_v19, %s8389_s17  ;;  %3320 = vrot.lane.b32.xlu0 %v13461_v15, %s8389_s17  ;;  %v11785_v24 = vadd.f32 %v7937_v14, %v5600_v35  ;;  %v7992_v35 = vrot.slane %v11656_v22, 9  ;;  %v6382_v14 = vadd.f32 %v7990_v30, %v11621_v44  ;;  %v6391_v44 = vadd.f32 %v7999_v1, %v11717_v45 }
 0x4ce   : > { %v3041_v27 = vpop.permute.xlu1 %3040  ;;  %v3039_v59 = vpop.permute.xlu0 %3038  ;;  %v6384_v2 = vadd.f32 %v7992_v35, %v11656_v22  ;;  %v6446_v45 = vadd.f32 %v6382_v14, %v11755_v5  ;;  %v6455_v5 = vadd.f32 %v6391_v44, %v11780_v39 }
 0x4cf   : > { %3126 = vst.msk [vmem:[#allocation5 + $0x58] sm:$0xff] %vm3114_vm1, %v3041_v27  ;;  %3125 = vst.msk [vmem:[#allocation5 + $0x50] sm:$0xff] %vm3114_vm1, %v3039_v59  ;;  %v11765_v27 = vadd.f32 %v7930_v48, %v5531_v7  ;;  %v11783_v7 = vadd.f32 %v7936_v33, %v11674_v62  ;;  %v7991_v62 = vrot.slane %v11670_v53, 9  ;;  %v7998_v48 = vrot.slane %v11661_v49, 9 }
 0x4d0   : > { %3452 = vrot.lane.b32.xlu1 %v13447_v20, %s8390_s9  ;;  %3450 = vrot.lane.b32.xlu0 %v13448_v21, %s8390_s9  ;;  %v7988_v20 = vrot.slane %v11605_v3, 9  ;;  %v8000_v59 = vrot.slane %v11704_v25, 9  ;;  %v6381_v33 = vadd.f32 %v7989_v51, %v11646_v11 }
 0x4d1   : > { %v6383_v4 = vadd.f32 %v7991_v62, %v11670_v53  ;;  %v6390_v11 = vadd.f32 %v7998_v48, %v11661_v49  ;;  %v6393_v53 = vadd.f32 %v8001_v18, %v11731_v17  ;;  %v6395_v49 = vadd.f32 %v8003_v8, %v11735_v28  ;;  %v13467_v48 = vld [vmem:[#allocation48_spill] sm:$0xff] }
 0x4d2   : > { %v3168_v21 = vpop.permute.xlu1 %3167  ;;  %v3166_v16 = vpop.permute.xlu0 %3165  ;;  %v6380_v54 = vadd.f32 %v7988_v20, %v11605_v3  ;;  %v6389_v3 = vadd.f32 %v7997_v31, %v11692_v52  ;;  %v6392_v22 = vadd.f32 %v8000_v59, %v11704_v25  ;;  %v6448_v17 = vadd.f32 %v6384_v2, %v11760_v12  ;;  %v13466_v31 = vld [vmem:[#allocation45_spill] sm:$0xff] }
 0x4d3   : > { %3255 = vst.msk [vmem:[#allocation5 + $0x48] sm:$0xff] %vm3245_vm4, %v3168_v21  ;;  %3254 = vst.msk [vmem:[#allocation5 + $0x40] sm:$0xff] %vm3245_vm4, %v3166_v16  ;;  %v6385_v21 = vadd.f32 %v7993_v26, %v11698_v0  ;;  %v6386_v16 = vadd.f32 %v7994_v57, %v11681_v42  ;;  %v6394_v42 = vadd.f32 %v8002_v9, %v11720_v6  ;;  %v13464_v0 = vld [vmem:[#allocation66_spill] sm:$0xff] }
 0x4d4   : > { %3456 = vrot.lane.b32.xlu1 %v13462_v41, %s8390_s9  ;;  %3454 = vrot.lane.b32.xlu0 %v13463_v13, %s8390_s9  ;;  %v6444_v52 = vadd.f32 %v6380_v54, %v11749_v50  ;;  %v6447_v25 = vadd.f32 %v6383_v4, %v11757_v60  ;;  %v6453_v50 = vadd.f32 %v6389_v3, %v11773_v40  ;;  %v6510_v40 = vmul.f32 0.25, %v6446_v45 }
 0x4d5   : > { %v6449_v6 = vadd.f32 %v6385_v21, %v11762_v10  ;;  %v6450_v30 = vadd.f32 %v6386_v16, %v11765_v27  ;;  %v6456_v60 = vadd.f32 %v6392_v22, %v11783_v7  ;;  %v6457_v12 = vadd.f32 %v6393_v53, %v11785_v24 }
 0x4d6   : > { %v3172_v29 = vpop.permute.xlu1 %3171  ;;  %v3170_v38 = vpop.permute.xlu0 %3169  ;;  %v6458_v10 = vadd.f32 %v6394_v42, %v11792_v34  ;;  %v6459_v27 = vadd.f32 %v6395_v49, %v11794_v23  ;;  %v6512_v35 = vmul.f32 0.25, %v6448_v17  ;;  %v6574_v8 = vpack.c.bf16 %v6510_v40, %v6510_v40 }
 0x4d7   : > { %3257 = vst.msk [vmem:[#allocation5 + $0x58] sm:$0xff] %vm3245_vm4, %v3172_v29  ;;  %3256 = vst.msk [vmem:[#allocation5 + $0x50] sm:$0xff] %vm3245_vm4, %v3170_v38  ;;  %v6388_v38 = vadd.f32 %v7996_v63, %v11636_v55  ;;  %v13465_v55 = vld [vmem:[#allocation64_spill] sm:$0xff]  ;;  %v6513_v39 = vmul.f32 0.25, %v6449_v6  ;;  %v6514_v57 = vmul.f32 0.25, %v6450_v30  ;;  %v6517_v63 = vmul.f32 0.25, %v6453_v50 }
 0x4d8   : > { %2791 = vrot.lane.b32.xlu1 %v13454_v56, %s8383_s23  ;;  %2789 = vrot.lane.b32.xlu0 %v13455_v37, %s8383_s23  ;;  %v6387_v37 = vadd.f32 %v7995_v46, %v11711_v43  ;;  %v6445_v43 = vadd.f32 %v6381_v33, %v11752_v32  ;;  %v6454_v32 = vadd.f32 %v6390_v11, %v11778_v61  ;;  %v6511_v61 = vmul.f32 0.25, %v6447_v25 }
 0x4d9   : > { %v6452_v28 = vadd.f32 %v6388_v38, %v11770_v36  ;;  %v6520_v34 = vmul.f32 0.25, %v6456_v60  ;;  %v6521_v23 = vmul.f32 0.25, %v6457_v12  ;;  %v6522_v1 = vmul.f32 0.25, %v6458_v10  ;;  %v13469_v60 = vld [vmem:[#allocation105_spill] sm:$0xff] }
 0x4da   : > { %v3303_v56 = vpop.permute.xlu1 %3302  ;;  %v3301_v29 = vpop.permute.xlu0 %3300  ;;  %v6451_v62 = vadd.f32 %v6387_v37, %v11767_v58  ;;  %v6508_v58 = vmul.f32 0.25, %v6444_v52  ;;  %v6509_v36 = vmul.f32 0.25, %v6445_v43  ;;  %v6523_v59 = vmul.f32 0.25, %v6459_v27 }
 0x4db   : > { %3390 = vst.msk [vmem:[#allocation5 + $0x48] sm:$0xff] %vm3380_vm5, %v3303_v56  ;;  %3389 = vst.msk [vmem:[#allocation5 + $0x40] sm:$0xff] %vm3380_vm5, %v3301_v29  ;;  %v6516_v46 = vmul.f32 0.25, %v6452_v28  ;;  %v6575_v54 = vpack.c.bf16 %v6511_v61, %v6511_v61  ;;  %v6576_v33 = vpack.c.bf16 %v6512_v35, %v6512_v35  ;;  %v6577_v14 = vpack.c.bf16 %v6513_v39, %v6513_v39 }
 0x4dc   : > { %2795 = vrot.lane.b32.xlu1 %v13464_v0, %s8383_s23  ;;  %2793 = vrot.lane.b32.xlu0 %v13465_v55, %s8383_s23  ;;  %v6515_v24 = vmul.f32 0.25, %v6451_v62  ;;  %v6572_v18 = vpack.c.bf16 %v6508_v58, %v6508_v58  ;;  %v6573_v9 = vpack.c.bf16 %v6509_v36, %v6509_v36  ;;  %v6578_v21 = vpack.c.bf16 %v6514_v57, %v6514_v57 }
 0x4dd   : > { %v6580_v56 = vpack.c.bf16 %v6516_v46, %v6516_v46  ;;  %v6581_v29 = vpack.c.bf16 %v6517_v63, %v6517_v63  ;;  %v6584_v3 = vpack.c.bf16 %v6520_v34, %v6520_v34  ;;  %v6585_v11 = vpack.c.bf16 %v6521_v23, %v6521_v23 }
 0x4de   : > { %v3307_v20 = vpop.permute.xlu1 %3306  ;;  %v3305_v51 = vpop.permute.xlu0 %3304  ;;  %v6579_v16 = vpack.c.bf16 %v6515_v24, %v6515_v24  ;;  %v6586_v44 = vpack.c.bf16 %v6522_v1, %v6522_v1  ;;  %v6587_v22 = vpack.c.bf16 %v6523_v59, %v6523_v59  ;;  %v6708_v53 = vunpack.c.l.b16 %v6572_v18 }
 0x4df   : > { %3392 = vst.msk [vmem:[#allocation5 + $0x58] sm:$0xff] %vm3380_vm5, %v3307_v20  ;;  %3391 = vst.msk [vmem:[#allocation5 + $0x50] sm:$0xff] %vm3380_vm5, %v3305_v51  ;;  %v6709_v42 = vunpack.c.l.b16 %v6573_v9  ;;  %v6710_v49 = vunpack.c.l.b16 %v6574_v8  ;;  %v6711_v52 = vunpack.c.l.b16 %v6575_v54  ;;  %v6712_v43 = vunpack.c.l.b16 %v6576_v33 }
 0x4e0   : > { %2926 = vrot.lane.b32.xlu1 %v13460_v19, %s8385_s15  ;;  %2924 = vrot.lane.b32.xlu0 %v13461_v15, %s8385_s15  ;;  %v6518_v19 = vmul.f32 0.25, %v6454_v32  ;;  %v6519_v15 = vmul.f32 0.25, %v6455_v5  ;;  %v6713_v45 = vunpack.c.l.b16 %v6577_v14  ;;  %v6714_v51 = vunpack.c.l.b16 %v6578_v21  ;;  %v13468_v5 = vld [vmem:[#allocation104_spill] sm:$0xff] }
 0x4e1   : > { %v6715_v30 = vunpack.c.l.b16 %v6579_v16  ;;  %v6716_v62 = vunpack.c.l.b16 %v6580_v56  ;;  %v6717_v28 = vunpack.c.l.b16 %v6581_v29  ;;  %v6720_v32 = vunpack.c.l.b16 %v6584_v3  ;;  %v13470_v16 = vld [vmem:[#allocation33_spill] sm:$0xff]  ;;  %v13471_v3 = vld [vmem:[#allocation34_spill] sm:$0xff] }
 0x4e2   : > { %v3437_v26 = vpop.permute.xlu1 %3436  ;;  %v3435_v7 = vpop.permute.xlu0 %3434  ;;  %v6582_v37 = vpack.c.bf16 %v6518_v19, %v6518_v19  ;;  %v6583_v38 = vpack.c.bf16 %v6519_v15, %v6519_v15  ;;  %v6721_v12 = vunpack.c.l.b16 %v6585_v11  ;;  %v6722_v10 = vunpack.c.l.b16 %v6586_v44 }
 0x4e3   : > { %3524 = vst.msk [vmem:[#allocation5 + $0x48] sm:$0xff] %vm3514_vm14, %v3437_v26  ;;  %3523 = vst.msk [vmem:[#allocation5 + $0x40] sm:$0xff] %vm3514_vm14, %v3435_v7  ;;  %v6723_v27 = vunpack.c.l.b16 %v6587_v22  ;;  %v6803_v58 = vrot.slane %v6709_v42, 7  ;;  %v6805_v36 = vrot.slane %v6710_v49, 6  ;;  %v6807_v40 = vrot.slane %v6711_v52, 5  ;;  %v13472_v22 = vld [vmem:[#allocation70_spill] sm:$0xff] }
 0x4e4   : > { %2930 = vrot.lane.b32.xlu1 %v13466_v31, %s8385_s15  ;;  %2928 = vrot.lane.b32.xlu0 %v13467_v48, %s8385_s15  ;;  %v6719_v50 = vunpack.c.l.b16 %v6583_v38  ;;  %v6809_v61 = vrot.slane %v6712_v43, 4  ;;  %v6811_v35 = vrot.slane %v6713_v45, 3  ;;  %v6813_v46 = vrot.slane %v6714_v51, 2 }
 0x4e5   : > { %v6804_v24 = vsel %vm6741_vm6, %v6803_v58, %v6708_v53  ;;  %v6815_v63 = vrot.slane %v6715_v30, 1  ;;  %v6817_v19 = vrot.slane %v6717_v28, 7  ;;  %v6823_v9 = vrot.slane %v6720_v32, 4  ;;  %v13473_v53 = vld [vmem:[#allocation68_spill] sm:$0xff]  ;;  %v13474_v28 = vld [vmem:[#allocation35_spill] sm:$0xff] }
 0x4e6   : > { %v3441_v4 = vpop.permute.xlu1 %3440  ;;  %v3439_v2 = vpop.permute.xlu0 %3438  ;;  %v6806_v34 = vsel %vm6744_vm7, %v6805_v36, %v6804_v24  ;;  %v6821_v1 = vrot.slane %v6719_v50, 5  ;;  %v6825_v8 = vrot.slane %v6721_v12, 3  ;;  %v6827_v14 = vrot.slane %v6722_v10, 2  ;;  %v13475_v12 = vld [vmem:[#allocation36_spill] sm:$0xff] }
 0x4e7   : > { %3526 = vst.msk [vmem:[#allocation5 + $0x58] sm:$0xff] %vm3514_vm14, %v3441_v4  ;;  %3525 = vst.msk [vmem:[#allocation5 + $0x50] sm:$0xff] %vm3514_vm14, %v3439_v2  ;;  %v6808_v59 = vsel %vm6747_vm8, %v6807_v40, %v6806_v34  ;;  %v6818_v18 = vsel %vm6741_vm6, %v6817_v19, %v6716_v62  ;;  %v6829_v4 = vrot.slane %v6723_v27, 1  ;;  %v5636_v56 = vcombine.high %v13470_v16, %v13470_v16  ;;  %v13476_v40 = vld [vmem:[#allocation37_spill] sm:$0xff] }
 0x4e8   : > { %3060 = vrot.lane.b32.xlu1 %v13462_v41, %s8386_s21  ;;  %3058 = vrot.lane.b32.xlu0 %v13463_v13, %s8386_s21  ;;  %v6718_v13 = vunpack.c.l.b16 %v6582_v37  ;;  %v6810_v54 = vsel %vm6750_vm9, %v6809_v61, %v6808_v59  ;;  %v11899_v29 = vrot.slane %v13470_v16, %v13450_v47  ;;  %v5653_v11 = vcombine.high %v13471_v3, %v13471_v3 }
 0x4e9   : > { %v11909_v44 = vrot.slane %v13471_v3, %v13450_v47  ;;  %v11918_v52 = vrot.slane %v5636_v56, %v13450_v47  ;;  %v5687_v10 = vcombine.high %v13475_v12, %v13475_v12  ;;  %v11954_v27 = vrot.slane %v13475_v12, %v13450_v47 }
 0x4ea   : > { %v2776_v25 = vpop.permute.xlu1 %2775  ;;  %v2774_v17 = vpop.permute.xlu0 %2773  ;;  %v3555_v6 = vld [vmem:[#allocation5 + $0x40] sm:$0xff]  ;;  %v3556_v20 = vld [vmem:[#allocation5 + $0x48] sm:$0xff]  ;;  %v6819_v23 = vrot.slane %v6718_v13, 6  ;;  %v7940_v43 = vrot.slane %v11899_v29, 9  ;;  %v11942_v13 = vrot.slane %v13474_v28, %v13450_v47  ;;  %v5704_v61 = vcombine.high %v13476_v40, %v13476_v40 }
 0x4eb   : > { %2859 = vst.msk [vmem:[#allocation5 + $0x68] sm:$0xff] %vm2845_vm13, %v2776_v25  ;;  %2858 = vst.msk [vmem:[#allocation5 + $0x60] sm:$0xff] %vm2845_vm13, %v2774_v17  ;;  %v3583_v41 = vpack.c.bf16 %v3556_v20, %v3555_v6  ;;  %v11924_v25 = vcombine.high %v11899_v29, %v11899_v29  ;;  %v11927_v17 = vrot.slane %v5653_v11, %v13450_v47  ;;  %v7944_v11 = vrot.slane %v11909_v44, 9 }
 0x4ec   : > { %3064 = vrot.lane.b32.xlu1 %v13468_v5, %s8386_s21  ;;  %3062 = vrot.lane.b32.xlu0 %v13469_v60, %s8386_s21  ;;  %v6820_v33 = vsel %vm6744_vm7, %v6819_v23, %v6818_v18  ;;  %v11931_v6 = vcombine.high %v11909_v44, %v11909_v44  ;;  %v11936_v62 = vcombine.high %v11918_v52, %v11918_v52 }
 0x4ed   : > { %8212 = vmatprep.mubr.msk.bf16.mxu1 %vm3638_vm3, %v3583_v41  ;;  %v5670_v41 = vcombine.high %v13474_v28, %v13474_v28  ;;  %v11948_v32 = vcombine.high %v11927_v17, %v11927_v17  ;;  %v11965_v36 = vcombine.high %v11942_v13, %v11942_v13 }
 0x4ee   : > { %v2780_v39 = vpop.permute.xlu1 %2779  ;;  %v2778_v26 = vpop.permute.xlu0 %2777  ;;  %v3557_v7 = vld [vmem:[#allocation5 + $0x50] sm:$0xff]  ;;  %v3558_v57 = vld [vmem:[#allocation5 + $0x58] sm:$0xff]  ;;  %v7943_v3 = vrot.slane %v11936_v62, 9 }
 0x4ef   : > { %2861 = vst.msk [vmem:[#allocation5 + $0x78] sm:$0xff] %vm2845_vm13, %v2780_v39  ;;  %2860 = vst.msk [vmem:[#allocation5 + $0x70] sm:$0xff] %vm2845_vm13, %v2778_v26  ;;  %v3584_v15 = vpack.c.bf16 %v3558_v57, %v3557_v7  ;;  %v11961_v58 = vrot.slane %v5670_v41, %v13450_v47  ;;  %v11972_v39 = vrot.slane %v5687_v10, %v13450_v47  ;;  %v13477_v26 = vld [vmem:[#allocation38_spill] sm:$0xff] }
 0x4f0   : > { %3191 = vrot.lane.b32.xlu1 %v13464_v0, %s8388_s8  ;;  %3189 = vrot.lane.b32.xlu0 %v13465_v55, %s8388_s8  ;;  %v6812_v0 = vsel %vm6753_vm10, %v6811_v35, %v6810_v54  ;;  %v6822_v55 = vsel %vm6747_vm8, %v6821_v1, %v6820_v33  ;;  %v7941_v35 = vrot.slane %v11924_v25, 9  ;;  %v5721_v7 = vcombine.high %v13477_v26, %v13477_v26 }
 0x4f1   : > { %8213 = vmatmul.mubr.msk.bf16.gmra.mrb[8].mxu1 %vm3638_vm3, %v3584_v15  ;;  %v6814_v37 = vsel %vm6756_vm11, %v6813_v46, %v6812_v0  ;;  %v6824_v38 = vsel %vm6750_vm9, %v6823_v9, %v6822_v55  ;;  %v11984_v46 = vcombine.high %v11961_v58, %v11961_v58  ;;  %v5728_v19 = vrot.slane %v13477_v26, %v13450_v47  ;;  %v13478_v15 = vld [vmem:[#allocation75_spill] sm:$0xff]  ;;  %v13481_v0 = vld [vmem:[#allocation76_spill] sm:$0xff] }
 0x4f2   : > { %v2911_v2 = vpop.permute.xlu1 %2910  ;;  %v2909_v21 = vpop.permute.xlu0 %2908  ;;  %v6816_v42 = vsel %vm13154_vm12, %v6815_v63, %v6814_v37  ;;  %v6826_v49 = vsel %vm6753_vm10, %v6825_v8, %v6824_v38  ;;  %v5718_v63 = vrot.slane %v5704_v61, %v13450_v47  ;;  %v5738_v34 = vcombine.high %v13478_v15, %v13478_v15  ;;  %v13479_v9 = vld [vmem:[#allocation71_spill] sm:$0xff]  ;;  %v13480_v8 = vld [vmem:[#allocation73_spill] sm:$0xff] }
 0x4f3   : > { %2994 = vst.msk [vmem:[#allocation5 + $0x68] sm:$0xff] %vm2980_vm15, %v2911_v2  ;;  %2993 = vst.msk [vmem:[#allocation5 + $0x60] sm:$0xff] %vm2980_vm15, %v2909_v21  ;;  %v6828_v45 = vsel %vm6756_vm11, %v6827_v14, %v6826_v49  ;;  %v11995_v23 = vcombine.high %v11972_v39, %v11972_v39  ;;  %v5735_v59 = vrot.slane %v5721_v7, %v13450_v47  ;;  %v7952_v10 = vrot.slane %v5728_v19, 9 }
 0x4f4   : > { %3195 = vrot.lane.b32.xlu1 %v13472_v22, %s8388_s8  ;;  %3193 = vrot.lane.b32.xlu0 %v13473_v53, %s8388_s8  ;;  %v6830_v30 = vsel %vm13154_vm12, %v6829_v4, %v6828_v45  ;;  %v12000_v18 = vrot.slane %v13478_v15, %v13450_v47  ;;  %v5720_v54 = vcombine.high %v5718_v63, %v5718_v63  ;;  %v7942_v4 = vrot.slane %v11918_v52, 9 }
 0x4f5   : > { %v6861_v50 = vpack.c.b16 %v6830_v30, %v6816_v42  ;;  %v5736_v33 = vcombine.high %v5728_v19, %v5728_v19  ;;  %v12007_v14 = vrot.slane %v5738_v34, %v13450_v47  ;;  %v5737_v2 = vcombine.high %v5735_v59, %v5735_v59 }
 0x4f6   : > { %v2915_v20 = vpop.permute.xlu1 %2914  ;;  %v2913_v51 = vpop.permute.xlu0 %2912  ;;  %v12012_v21 = vcombine.high %v12000_v18, %v12000_v18  ;;  %v5755_v55 = vcombine.high %v13481_v0, %v13481_v0  ;;  %v12018_v16 = vrot.slane %v13481_v0, %v13450_v47  ;;  %v7945_v42 = vrot.slane %v11931_v6, 9 }
 0x4f7   : > { %2996 = vst.msk [vmem:[#allocation5 + $0x78] sm:$0xff] %vm2980_vm15, %v2915_v20  ;;  %2995 = vst.msk [vmem:[#allocation5 + $0x70] sm:$0xff] %vm2980_vm15, %v2913_v51  ;;  %8242 = vmatprep.mubr.msk.bf16.mxu0 %vm342_vm0, %v6861_v50  ;;  %v12022_v38 = vcombine.high %v12007_v14, %v12007_v14  ;;  %v7946_v20 = vrot.slane %v11927_v17, 9  ;;  %v7947_v51 = vrot.slane %v11948_v32, 9  ;;  %v7950_v41 = vrot.slane %v5718_v63, 9 }
 0x4f8   : > { %3326 = vrot.lane.b32.xlu1 %v13466_v31, %s8389_s17  ;;  %3324 = vrot.lane.b32.xlu0 %v13467_v48, %s8389_s17  ;;  %v11976_v31 = vcombine.high %v11954_v27, %v11954_v27  ;;  %v5711_v48 = vrot.slane %v13476_v40, %v13450_v47  ;;  %v12030_v49 = vrot.slane %v5755_v55, %v13450_v47  ;;  %v7951_v50 = vrot.slane %v5720_v54, 9 }
 0x4f9   : > { %v12034_v45 = vcombine.high %v12018_v16, %v12018_v16  ;;  %v7953_v40 = vrot.slane %v5736_v33, 9  ;;  %v7954_v61 = vrot.slane %v5735_v59, 9  ;;  %v12060_v15 = vadd.f32 %v7943_v3, %v11936_v62 }
 0x4fa   : > { %v3045_v57 = vpop.permute.xlu1 %3044  ;;  %v3043_v24 = vpop.permute.xlu0 %3042  ;;  %v5719_v1 = vcombine.high %v5711_v48, %v5711_v48  ;;  %v7948_v30 = vrot.slane %v5711_v48, 9  ;;  %v12044_v12 = vcombine.high %v12030_v49, %v12030_v49  ;;  %v12063_v34 = vadd.f32 %v7944_v11, %v11909_v44 }
 0x4fb   : > { %3128 = vst.msk [vmem:[#allocation5 + $0x68] sm:$0xff] %vm3114_vm1, %v3045_v57  ;;  %3127 = vst.msk [vmem:[#allocation5 + $0x60] sm:$0xff] %vm3114_vm1, %v3043_v24  ;;  %v7955_v57 = vrot.slane %v5737_v2, 9  ;;  %v12055_v24 = vadd.f32 %v7942_v4, %v11918_v52  ;;  %v12066_v0 = vadd.f32 %v7945_v42, %v11931_v6  ;;  %v13483_v52 = vld [vmem:[#allocation107_spill] sm:$0xff]  ;;  %v8004_v44 = vrot.slane %v11942_v13, 9 }
 0x4fc   : > { %3330 = vrot.lane.b32.xlu1 %v13479_v9, %s8389_s17  ;;  %3328 = vrot.lane.b32.xlu0 %v13480_v8, %s8389_s17  ;;  %v7949_v28 = vrot.slane %v5719_v1, 9  ;;  %v12078_v62 = vadd.f32 %v7948_v30, %v5711_v48  ;;  %v12083_v6 = vadd.f32 %v7950_v41, %v5718_v63  ;;  %v12085_v4 = vadd.f32 %v7951_v50, %v5720_v54 }
 0x4fd   : > { %v12089_v55 = vadd.f32 %v7953_v40, %v5736_v33  ;;  %v12091_v3 = vadd.f32 %v7954_v61, %v5735_v59  ;;  %v8005_v48 = vrot.slane %v11965_v36, 9  ;;  %v8007_v63 = vrot.slane %v11984_v46, 9 }
 0x4fe   : > { %v3049_v56 = vpop.permute.xlu1 %3048  ;;  %v3047_v37 = vpop.permute.xlu0 %3046  ;;  %v8009_v54 = vrot.slane %v11976_v31, 9  ;;  %v8010_v33 = vrot.slane %v11972_v39, 9  ;;  %v8011_v59 = vrot.slane %v11995_v23, 9  ;;  %v8013_v11 = vrot.slane %v12012_v21, 9 }
 0x4ff   : > { %3130 = vst.msk [vmem:[#allocation5 + $0x78] sm:$0xff] %vm3114_vm1, %v3049_v56  ;;  %3129 = vst.msk [vmem:[#allocation5 + $0x70] sm:$0xff] %vm3114_vm1, %v3047_v37  ;;  %v8014_v42 = vrot.slane %v12007_v14, 9  ;;  %v8017_v30 = vrot.slane %v12034_v45, 9  ;;  %v6396_v50 = vadd.f32 %v8004_v44, %v11942_v13  ;;  %v6399_v61 = vadd.f32 %v8007_v63, %v11984_v46  ;;  %v13485_v13 = vld [vmem:[#allocation46_spill] sm:$0xff] }
 0x500   : > { %3460 = vrot.lane.b32.xlu1 %v13468_v5, %s8390_s9  ;;  %3458 = vrot.lane.b32.xlu0 %v13469_v60, %s8390_s9  ;;  %v12049_v5 = vadd.f32 %v7940_v43, %v11899_v29  ;;  %v12052_v60 = vadd.f32 %v7941_v35, %v11924_v25  ;;  %v12069_v29 = vadd.f32 %v7946_v20, %v11927_v17  ;;  %v13482_v43 = vld [vmem:[#allocation106_spill] sm:$0xff]  ;;  %v8015_v20 = vrot.slane %v12022_v38, 9 }
 0x501   : > { %v12076_v25 = vadd.f32 %v7947_v51, %v11948_v32  ;;  %v12080_v35 = vadd.f32 %v7949_v28, %v5719_v1  ;;  %v12087_v17 = vadd.f32 %v7952_v10, %v5728_v19  ;;  %v12093_v32 = vadd.f32 %v7955_v57, %v5737_v2 }
 0x502   : > { %v3176_v26 = vpop.permute.xlu1 %3175  ;;  %v3174_v7 = vpop.permute.xlu0 %3173  ;;  %v8006_v1 = vrot.slane %v11961_v58, 9  ;;  %v8008_v19 = vrot.slane %v11954_v27, 9  ;;  %v8012_v2 = vrot.slane %v12000_v18, 9  ;;  %v8016_v51 = vrot.slane %v12018_v16, 9 }
 0x503   : > { %3259 = vst.msk [vmem:[#allocation5 + $0x68] sm:$0xff] %vm3245_vm4, %v3176_v26  ;;  %3258 = vst.msk [vmem:[#allocation5 + $0x60] sm:$0xff] %vm3245_vm4, %v3174_v7  ;;  %v8018_v28 = vrot.slane %v12030_v49, 9  ;;  %v6397_v10 = vadd.f32 %v8005_v48, %v11965_v36  ;;  %v6401_v7 = vadd.f32 %v8009_v54, %v11976_v31  ;;  %v6402_v57 = vadd.f32 %v8010_v33, %v11972_v39 }
 0x504   : > { %3464 = vrot.lane.b32.xlu1 %v13482_v43, %s8390_s9  ;;  %3462 = vrot.lane.b32.xlu0 %v13483_v52, %s8390_s9  ;;  %v6398_v40 = vadd.f32 %v8006_v1, %v11961_v58  ;;  %v6400_v26 = vadd.f32 %v8008_v19, %v11954_v27  ;;  %v6403_v58 = vadd.f32 %v8011_v59, %v11995_v23 }
 0x505   : > { %v6404_v36 = vadd.f32 %v8012_v2, %v12000_v18  ;;  %v6405_v44 = vadd.f32 %v8013_v11, %v12012_v21  ;;  %v6406_v46 = vadd.f32 %v8014_v42, %v12007_v14  ;;  %v6407_v27 = vadd.f32 %v8015_v20, %v12022_v38 }
 0x506   : > { %v3180_v56 = vpop.permute.xlu1 %3179  ;;  %v3178_v37 = vpop.permute.xlu0 %3177  ;;  %v6408_v31 = vadd.f32 %v8016_v51, %v12018_v16  ;;  %v6409_v39 = vadd.f32 %v8017_v30, %v12034_v45  ;;  %v6410_v1 = vadd.f32 %v8018_v28, %v12030_v49  ;;  %v6460_v23 = vadd.f32 %v6396_v50, %v12049_v5 }
 0x507   : > { %3261 = vst.msk [vmem:[#allocation5 + $0x78] sm:$0xff] %vm3245_vm4, %v3180_v56  ;;  %3260 = vst.msk [vmem:[#allocation5 + $0x70] sm:$0xff] %vm3245_vm4, %v3178_v37  ;;  %v13484_v56 = vld [vmem:[#allocation49_spill] sm:$0xff]  ;;  %v6461_v18 = vadd.f32 %v6397_v10, %v12052_v60  ;;  %v6462_v14 = vadd.f32 %v6398_v40, %v12055_v24  ;;  %v6463_v21 = vadd.f32 %v6399_v61, %v12060_v15 }
 0x508   : > { %2799 = vrot.lane.b32.xlu1 %v13472_v22, %s8383_s23  ;;  %2797 = vrot.lane.b32.xlu0 %v13473_v53, %s8383_s23  ;;  %v8019_v53 = vrot.slane %v12044_v12, 9  ;;  %v6464_v16 = vadd.f32 %v6400_v26, %v12063_v34  ;;  %v6465_v38 = vadd.f32 %v6401_v7, %v12066_v0  ;;  %v6466_v49 = vadd.f32 %v6402_v57, %v12069_v29 }
 0x509   : > { %v6467_v45 = vadd.f32 %v6403_v58, %v12076_v25  ;;  %v6469_v5 = vadd.f32 %v6405_v44, %v12080_v35  ;;  %v6470_v60 = vadd.f32 %v6406_v46, %v12083_v6  ;;  %v6471_v24 = vadd.f32 %v6407_v27, %v12085_v4  ;;  %v13486_v4 = vld [vmem:[#allocation94_spill] sm:$0xff] }
 0x50a   : > { %v3311_v22 = vpop.permute.xlu1 %3310  ;;  %v3309_v41 = vpop.permute.xlu0 %3308  ;;  %v6411_v63 = vadd.f32 %v8019_v53, %v12044_v12  ;;  %v6468_v12 = vadd.f32 %v6404_v36, %v12078_v62  ;;  %v6472_v15 = vadd.f32 %v6408_v31, %v12087_v17  ;;  %v6524_v19 = vmul.f32 0.25, %v6460_v23  ;;  %v13487_v17 = vld [vmem:[#allocation51_spill] sm:$0xff] }
 0x50b   : > { %3394 = vst.msk [vmem:[#allocation5 + $0x68] sm:$0xff] %vm3380_vm5, %v3311_v22  ;;  %3393 = vst.msk [vmem:[#allocation5 + $0x60] sm:$0xff] %vm3380_vm5, %v3309_v41  ;;  %v6525_v29 = vmul.f32 0.25, %v6461_v18  ;;  %v6526_v25 = vmul.f32 0.25, %v6462_v14  ;;  %v6527_v62 = vmul.f32 0.25, %v6463_v21  ;;  %v6528_v35 = vmul.f32 0.25, %v6464_v16 }
 0x50c   : > { %2803 = vrot.lane.b32.xlu1 %v13484_v56, %s8383_s23  ;;  %2801 = vrot.lane.b32.xlu0 %v13485_v13, %s8383_s23  ;;  %v6529_v6 = vmul.f32 0.25, %v6465_v38  ;;  %v6530_v54 = vmul.f32 0.25, %v6466_v49  ;;  %v6532_v33 = vmul.f32 0.25, %v6468_v12  ;;  %v6533_v59 = vmul.f32 0.25, %v6469_v5  ;;  %v13488_v14 = vld [vmem:[#allocation108_spill] sm:$0xff]  ;;  %v13489_v21 = vld [vmem:[#allocation109_spill] sm:$0xff] }
 0x50d   : > { %v6534_v2 = vmul.f32 0.25, %v6470_v60  ;;  %v6535_v11 = vmul.f32 0.25, %v6471_v24  ;;  %v6536_v42 = vmul.f32 0.25, %v6472_v15  ;;  %v6588_v22 = vpack.c.bf16 %v6524_v19, %v6524_v19 }
 0x50e   : > { %v3315_v37 = vpop.permute.xlu1 %3314  ;;  %v3313_v48 = vpop.permute.xlu0 %3312  ;;  %v6589_v41 = vpack.c.bf16 %v6525_v29, %v6525_v29  ;;  %v6590_v53 = vpack.c.bf16 %v6526_v25, %v6526_v25  ;;  %v6591_v50 = vpack.c.bf16 %v6527_v62, %v6527_v62  ;;  %v6593_v10 = vpack.c.bf16 %v6529_v6, %v6529_v6 }
 0x50f   : > { %3396 = vst.msk [vmem:[#allocation5 + $0x78] sm:$0xff] %vm3380_vm5, %v3315_v37  ;;  %3395 = vst.msk [vmem:[#allocation5 + $0x70] sm:$0xff] %vm3380_vm5, %v3313_v48  ;;  %v6594_v61 = vpack.c.bf16 %v6530_v54, %v6530_v54  ;;  %v6596_v7 = vpack.c.bf16 %v6532_v33, %v6532_v33  ;;  %v6597_v57 = vpack.c.bf16 %v6533_v59, %v6533_v59  ;;  %v6724_v44 = vunpack.c.l.b16 %v6588_v22 }
 0x510   : > { %2934 = vrot.lane.b32.xlu1 %v13479_v9, %s8385_s15  ;;  %2932 = vrot.lane.b32.xlu0 %v13480_v8, %s8385_s15  ;;  %v6473_v9 = vadd.f32 %v6409_v39, %v12089_v55  ;;  %v6474_v8 = vadd.f32 %v6410_v1, %v12091_v3  ;;  %v6475_v55 = vadd.f32 %v6411_v63, %v12093_v32  ;;  %v6531_v3 = vmul.f32 0.25, %v6467_v45 }
 0x511   : > { %v6592_v32 = vpack.c.bf16 %v6528_v35, %v6528_v35  ;;  %v6598_v58 = vpack.c.bf16 %v6534_v2, %v6534_v2  ;;  %v6599_v36 = vpack.c.bf16 %v6535_v11, %v6535_v11  ;;  %v6600_v37 = vpack.c.bf16 %v6536_v42, %v6536_v42 }
 0x512   : > { %v3445_v34 = vpop.permute.xlu1 %3444  ;;  %v3443_v0 = vpop.permute.xlu0 %3442  ;;  %v6537_v30 = vmul.f32 0.25, %v6473_v9  ;;  %v6538_v28 = vmul.f32 0.25, %v6474_v8  ;;  %v6539_v40 = vmul.f32 0.25, %v6475_v55  ;;  %v6595_v26 = vpack.c.bf16 %v6531_v3, %v6531_v3 }
 0x513   : > { %3528 = vst.msk [vmem:[#allocation5 + $0x68] sm:$0xff] %vm3514_vm14, %v3445_v34  ;;  %3527 = vst.msk [vmem:[#allocation5 + $0x60] sm:$0xff] %vm3514_vm14, %v3443_v0  ;;  %v6725_v63 = vunpack.c.l.b16 %v6589_v41  ;;  %v6727_v23 = vunpack.c.l.b16 %v6591_v50  ;;  %v6728_v18 = vunpack.c.l.b16 %v6592_v32  ;;  %v6729_v38 = vunpack.c.l.b16 %v6593_v10  ;;  %v13490_v50 = vld [vmem:[#allocation52_spill] sm:$0xff]  ;;  %v13491_v32 = vld [vmem:[#allocation53_spill] sm:$0xff] }
 0x514   : > { %2938 = vrot.lane.b32.xlu1 %v13486_v4, %s8385_s15  ;;  %2936 = vrot.lane.b32.xlu0 %v13487_v17, %s8385_s15  ;;  %v6601_v48 = vpack.c.bf16 %v6537_v30, %v6537_v30  ;;  %v6602_v1 = vpack.c.bf16 %v6538_v28, %v6538_v28  ;;  %v6603_v16 = vpack.c.bf16 %v6539_v40, %v6539_v40  ;;  %v6730_v49 = vunpack.c.l.b16 %v6594_v61 }
 0x515   : > { %v6731_v45 = vunpack.c.l.b16 %v6595_v26  ;;  %v6732_v12 = vunpack.c.l.b16 %v6596_v7  ;;  %v6733_v5 = vunpack.c.l.b16 %v6597_v57  ;;  %v6734_v60 = vunpack.c.l.b16 %v6598_v58 }
 0x516   : > { %v3449_v20 = vpop.permute.xlu1 %3448  ;;  %v3447_v51 = vpop.permute.xlu0 %3446  ;;  %v6735_v24 = vunpack.c.l.b16 %v6599_v36  ;;  %v6736_v8 = vunpack.c.l.b16 %v6600_v37  ;;  %v6737_v19 = vunpack.c.l.b16 %v6601_v48  ;;  %v6738_v29 = vunpack.c.l.b16 %v6602_v1 }
 0x517   : > { %3530 = vst.msk [vmem:[#allocation5 + $0x78] sm:$0xff] %vm3514_vm14, %v3449_v20  ;;  %3529 = vst.msk [vmem:[#allocation5 + $0x70] sm:$0xff] %vm3514_vm14, %v3447_v51  ;;  %v6831_v25 = vrot.slane %v6725_v63, 7  ;;  %v6835_v6 = vrot.slane %v6727_v23, 5  ;;  %v6837_v55 = vrot.slane %v6728_v18, 4  ;;  %v6739_v54 = vunpack.c.l.b16 %v6603_v16  ;;  %v13492_v63 = vld [vmem:[#allocation72_spill] sm:$0xff] }
 0x518   : > { %3068 = vrot.lane.b32.xlu1 %v13482_v43, %s8386_s21  ;;  %3066 = vrot.lane.b32.xlu0 %v13483_v52, %s8386_s21  ;;  %v6726_v52 = vunpack.c.l.b16 %v6590_v53  ;;  %v6839_v33 = vrot.slane %v6729_v38, 3  ;;  %v6841_v59 = vrot.slane %v6730_v49, 2  ;;  %v6845_v11 = vrot.slane %v6733_v5, 7  ;;  %v13494_v18 = vld [vmem:[#allocation110_spill] sm:$0xff]  ;;  %v13495_v16 = vld [vmem:[#allocation111_spill] sm:$0xff] }
 0x519   : > { %v6832_v3 = vsel %vm6741_vm6, %v6831_v25, %v6724_v44  ;;  %v6847_v42 = vrot.slane %v6734_v60, 6  ;;  %v6849_v20 = vrot.slane %v6735_v24, 5  ;;  %v6843_v22 = vrot.slane %v6731_v45, 1  ;;  %v2244_v45 = vld [vmem:[#allocation3 + $0x188] sm:$0xff]  ;;  %v2245_v5 = vld [vmem:[#allocation3 + $0x190] sm:$0x3] }
 0x51a   : > { %v2784_v46 = vpop.permute.xlu1 %2783  ;;  %v2782_v27 = vpop.permute.xlu0 %2781  ;;  %v3559_v31 = vld [vmem:[#allocation5 + $0x60] sm:$0xff]  ;;  %v3560_v39 = vld [vmem:[#allocation5 + $0x68] sm:$0xff]  ;;  %v6833_v35 = vrot.slane %v6726_v52, 6  ;;  %v6846_v41 = vsel %vm6741_vm6, %v6845_v11, %v6732_v12  ;;  %v6853_v53 = vrot.slane %v6737_v19, 3  ;;  %v6855_v61 = vrot.slane %v6738_v29, 2  ;;  %v2243_v12 = vld [vmem:[#allocation3 + $0x180] sm:$0xff] }
 0x51b   : > { %2863 = vst.msk [vmem:[#allocation5 + $0x88] sm:$0xff] %vm2845_vm13, %v2784_v46  ;;  %2862 = vst.msk [vmem:[#allocation5 + $0x80] sm:$0xff] %vm2845_vm13, %v2782_v27  ;;  %v3585_v43 = vpack.c.bf16 %v3560_v39, %v3559_v31  ;;  %v6848_v40 = vsel %vm6744_vm7, %v6847_v42, %v6846_v41  ;;  %v6857_v57 = vrot.slane %v6739_v54, 1  ;;  %v3013_v54 = vrot.slane %v2243_v12, 2 }
 0x51c   : > { %3072 = vrot.lane.b32.xlu1 %v13488_v14, %s8386_s21  ;;  %3070 = vrot.lane.b32.xlu0 %v13489_v21, %s8386_s21  ;;  %v6834_v2 = vsel %vm6744_vm7, %v6833_v35, %v6832_v3  ;;  %v6850_v7 = vsel %vm6747_vm8, %v6849_v20, %v6848_v40  ;;  %v3014_v35 = vrot.slane %v2244_v45, 2 }
 0x51d   : > { %8216 = vmatprep.mubr.msk.bf16.mxu1 %vm3638_vm3, %v3585_v43  ;;  %v6836_v28 = vsel %vm6747_vm8, %v6835_v6, %v6834_v2  ;;  %v13493_v43 = vld [vmem:[#allocation54_spill] sm:$0xff]  ;;  %v3016_v6 = vrot.slane %v2245_v5, 2 }
 0x51e   : > { %v2788_v15 = vpop.permute.xlu1 %2787  ;;  %v2786_v34 = vpop.permute.xlu0 %2785  ;;  %v3561_v0 = vld [vmem:[#allocation5 + $0x70] sm:$0xff]  ;;  %v3562_v9 = vld [vmem:[#allocation5 + $0x78] sm:$0xff] }
 0x51f   : > { %2865 = vst.msk [vmem:[#allocation5 + $0x98] sm:$0xff] %vm2845_vm13, %v2788_v15  ;;  %2864 = vst.msk [vmem:[#allocation5 + $0x90] sm:$0xff] %vm2845_vm13, %v2786_v34  ;;  %v3586_v62 = vpack.c.bf16 %v3562_v9, %v3561_v0  ;;  %v2880_v15 = vrot.slane %v2244_v45, 1  ;;  %v2882_v34 = vrot.slane %v2245_v5, 1  ;;  %v2879_v0 = vrot.slane %v2243_v12, 1 }
 0x520   : > { %3199 = vrot.lane.b32.xlu1 %v13484_v56, %s8388_s8  ;;  %3197 = vrot.lane.b32.xlu0 %v13485_v13, %s8388_s8  ;;  %v6851_v56 = vrot.slane %v6736_v8, 4  ;;  %v6838_v13 = vsel %vm6750_vm9, %v6837_v55, %v6836_v28 }
 0x521   : > { %8217 = vmatmul.mubr.msk.bf16.gmra.mrb[12].mxu1 %vm3638_vm3, %v3586_v62  ;;  %v6840_v10 = vsel %vm6753_vm10, %v6839_v33, %v6838_v13  ;;  %v2883_v19 = vsel %vm565_vm2, %v2880_v15, %v2882_v34  ;;  %v2881_v29 = vsel %vm565_vm2, %v2879_v0, %v2880_v15 }
 0x522   : > { %v2919_v51 = vpop.permute.xlu1 %2918  ;;  %v2917_v30 = vpop.permute.xlu0 %2916  ;;  %v6842_v26 = vsel %vm6756_vm11, %v6841_v59, %v6840_v10  ;;  %v6852_v44 = vsel %vm6750_vm9, %v6851_v56, %v6850_v7 }
 0x523   : > { %2998 = vst.msk [vmem:[#allocation5 + $0x88] sm:$0xff] %vm2980_vm15, %v2919_v51  ;;  %2997 = vst.msk [vmem:[#allocation5 + $0x80] sm:$0xff] %vm2980_vm15, %v2917_v30  ;;  %v6844_v46 = vsel %vm13154_vm12, %v6843_v22, %v6842_v26  ;;  %v6854_v27 = vsel %vm6753_vm10, %v6853_v53, %v6852_v44 }
 0x524   : > { %3203 = vrot.lane.b32.xlu1 %v13490_v50, %s8388_s8  ;;  %3201 = vrot.lane.b32.xlu0 %v13491_v32, %s8388_s8  ;;  %v6856_v31 = vsel %vm6756_vm11, %v6855_v61, %v6854_v27  ;;  %v2248_v61 = vld [vmem:[#allocation3 + $0x1a8] sm:$0x3] }
 0x525   : > { %v6858_v39 = vsel %vm13154_vm12, %v6857_v57, %v6856_v31  ;;  %v3282_v57 = vrot.slane %v2248_v61, 1 }
 0x526   : > { %v2923_v58 = vpop.permute.xlu1 %2922  ;;  %v2921_v36 = vpop.permute.xlu0 %2920  ;;  %v6862_v1 = vpack.c.b16 %v6858_v39, %v6844_v46 }
 0x527   : > { %3000 = vst.msk [vmem:[#allocation5 + $0x98] sm:$0xff] %vm2980_vm15, %v2923_v58  ;;  %2999 = vst.msk [vmem:[#allocation5 + $0x90] sm:$0xff] %vm2980_vm15, %v2921_v36 }
 0x528   : > { %3334 = vrot.lane.b32.xlu1 %v13486_v4, %s8389_s17  ;;  %3332 = vrot.lane.b32.xlu0 %v13487_v17, %s8389_s17 }
 0x529   : > { %8243 = vmatmul.mubr.msk.bf16.gmra.mrb[36].mxu0 %vm342_vm0, %v6862_v1  ;;  %vm13496_vm0 = vcmask 1045504  }
 0x52a   : > { %v3053_v37 = vpop.permute.xlu1 %3052  ;;  %v3051_v48 = vpop.permute.xlu0 %3050  ;;  %v3017_v42 = vsel %vm13496_vm0, %v3014_v35, %v3016_v6  ;;  %vm13497_vm12 = vmmov %vm13496_vm0 }
 0x52b   : > { %3132 = vst.msk [vmem:[#allocation5 + $0x88] sm:$0xff] %vm3114_vm1, %v3053_v37  ;;  %3131 = vst.msk [vmem:[#allocation5 + $0x80] sm:$0xff] %vm3114_vm1, %v3051_v48  ;;  %v3015_v20 = vsel %vm13497_vm12, %v3013_v54, %v3014_v35  ;;  %v3416_v48 = vrot.slane %v2248_v61, 2 }
 0x52c   : > { %3338 = vrot.lane.b32.xlu1 %v13492_v63, %s8389_s17  ;;  %3336 = vrot.lane.b32.xlu0 %v13493_v43, %s8389_s17  ;;  %vm13499_vm12 = vmmov %vm13496_vm0 }
 0x52e   : > { %v3057_v4 = vpop.permute.xlu1 %3056  ;;  %v3055_v17 = vpop.permute.xlu0 %3054 }
 0x52f   : > { %3134 = vst.msk [vmem:[#allocation5 + $0x98] sm:$0xff] %vm3114_vm1, %v3057_v4  ;;  %3133 = vst.msk [vmem:[#allocation5 + $0x90] sm:$0xff] %vm3114_vm1, %v3055_v17 }
 0x530   : > { %3468 = vrot.lane.b32.xlu1 %v13488_v14, %s8390_s9  ;;  %3466 = vrot.lane.b32.xlu0 %v13489_v21, %s8390_s9 }
 0x532   : > { %v3184_v52 = vpop.permute.xlu1 %3183  ;;  %v3182_v23 = vpop.permute.xlu0 %3181 }
 0x533   : > { %3263 = vst.msk [vmem:[#allocation5 + $0x88] sm:$0xff] %vm3245_vm4, %v3184_v52  ;;  %3262 = vst.msk [vmem:[#allocation5 + $0x80] sm:$0xff] %vm3245_vm4, %v3182_v23 }
 0x534   : > { %3472 = vrot.lane.b32.xlu1 %v13494_v18, %s8390_s9  ;;  %3470 = vrot.lane.b32.xlu0 %v13495_v16, %s8390_s9 }
 0x536   : > { %v3188_v38 = vpop.permute.xlu1 %3187  ;;  %v3186_v49 = vpop.permute.xlu0 %3185 }
 0x537   : > { %3265 = vst.msk [vmem:[#allocation5 + $0x98] sm:$0xff] %vm3245_vm4, %v3188_v38  ;;  %3264 = vst.msk [vmem:[#allocation5 + $0x90] sm:$0xff] %vm3245_vm4, %v3186_v49 }
 0x538   : > { %2807 = vrot.lane.b32.xlu1 %v13490_v50, %s8383_s23  ;;  %2805 = vrot.lane.b32.xlu0 %v13491_v32, %s8383_s23  ;;  %v2247_v50 = vld [vmem:[#allocation3 + $0x1a0] sm:$0xff]  ;;  %v2246_v32 = vld [vmem:[#allocation3 + $0x198] sm:$0xff] }
 0x539   : > { %v3280_v26 = vrot.slane %v2247_v50, 1  ;;  %v3279_v7 = vrot.slane %v2246_v32, 1  ;;  %v3414_v39 = vrot.slane %v2247_v50, 2  ;;  %v3413_v37 = vrot.slane %v2246_v32, 2 }
 0x53a   : > { %v3319_v14 = vpop.permute.xlu1 %3318  ;;  %v3317_v21 = vpop.permute.xlu0 %3316 }
 0x53b   : > { %3398 = vst.msk [vmem:[#allocation5 + $0x88] sm:$0xff] %vm3380_vm5, %v3319_v14  ;;  %3397 = vst.msk [vmem:[#allocation5 + $0x80] sm:$0xff] %vm3380_vm5, %v3317_v21  ;;  %v3283_v44 = vsel %vm565_vm2, %v3280_v26, %v3282_v57  ;;  %v3281_v46 = vsel %vm565_vm2, %v3279_v7, %v3280_v26  ;;  %v3415_v17 = vsel %vm13499_vm12, %v3413_v37, %v3414_v39 }
 0x53c   : > { %2811 = vrot.lane.b32.xlu1 %v2244_v45, %s8383_s23  ;;  %2809 = vrot.lane.b32.xlu0 %v2243_v12, %s8383_s23  ;;  %vm13498_vm2 = vmmov %vm13496_vm0  ;;  %vm13501_vm0 = vcmask 1047559  }
 0x53d   : > { %v3417_v4 = vsel %vm13498_vm2, %v3414_v39, %v3416_v48  ;;  %vm13502_vm2 = vcmask 64512  }
 0x53e   : > { %v3323_v60 = vpop.permute.xlu1 %3322  ;;  %v3321_v24 = vpop.permute.xlu0 %3320  ;;  %vm13504_vm12 = vmmov %vm13502_vm2 }
 0x53f   : > { %3400 = vst.msk [vmem:[#allocation5 + $0x98] sm:$0xff] %vm3380_vm5, %v3323_v60  ;;  %3399 = vst.msk [vmem:[#allocation5 + $0x90] sm:$0xff] %vm3380_vm5, %v3321_v24 }
 0x540   : > { %2942 = vrot.lane.b32.xlu1 %v13492_v63, %s8385_s15  ;;  %2940 = vrot.lane.b32.xlu0 %v13493_v43, %s8385_s15  ;;  %v12300_v43 = vld [vmem:[%s12847_s6] ss:$0 sm:$0xff] }
 0x542   : > { %v3453_v9 = vpop.permute.xlu1 %3452  ;;  %v3451_v8 = vpop.permute.xlu0 %3450 }
 0x543   : > { %3532 = vst.msk [vmem:[#allocation5 + $0x88] sm:$0xff] %vm3514_vm14, %v3453_v9  ;;  %3531 = vst.msk [vmem:[#allocation5 + $0x80] sm:$0xff] %vm3514_vm14, %v3451_v8 }
 0x544   : > { %2946 = vrot.lane.b32.xlu1 %v2883_v19, %s8385_s15  ;;  %2944 = vrot.lane.b32.xlu0 %v2881_v29, %s8385_s15  ;;  %v12259_v55 = vpop.f32.mrb[32].mxu0 }
 0x545   : > { %v12261_v3 = vpop.f32.mrb[33].mxu0 }
 0x546   : > { %v3457_v25 = vpop.permute.xlu1 %3456  ;;  %v3455_v62 = vpop.permute.xlu0 %3454 }
 0x547   : > { %3534 = vst.msk [vmem:[#allocation5 + $0x98] sm:$0xff] %vm3514_vm14, %v3457_v25  ;;  %3533 = vst.msk [vmem:[#allocation5 + $0x90] sm:$0xff] %vm3514_vm14, %v3455_v62  ;;  %v12267_v30 = vpop.f32.mrb[34].mxu0 }
 0x548   : > { %3076 = vrot.lane.b32.xlu1 %v13494_v18, %s8386_s21  ;;  %3074 = vrot.lane.b32.xlu0 %v13495_v16, %s8386_s21  ;;  %v12271_v28 = vpop.f32.mrb[35].mxu0  ;;  %v6913_v18 = vadd.f32 %v12300_v43, %v12261_v3 }
 0x54a   : > { %v2792_v33 = vpop.permute.xlu1 %2791  ;;  %v2790_v59 = vpop.permute.xlu0 %2789  ;;  %v3563_v2 = vld [vmem:[#allocation5 + $0x80] sm:$0xff]  ;;  %v3564_v11 = vld [vmem:[#allocation5 + $0x88] sm:$0xff]  ;;  %v6951_v49 = vcombine.high %v6913_v18, %v6913_v18  ;;  %v12313_v14 = vrot.slane %v6913_v18, %v13450_v47 }
 0x54b   : > { %2867 = vst.msk [vmem:[#allocation5 + $0xa8] sm:$0xff] %vm2845_vm13, %v2792_v33  ;;  %2866 = vst.msk [vmem:[#allocation5 + $0xa0] sm:$0xff] %vm2845_vm13, %v2790_v59  ;;  %v3587_v51 = vpack.c.bf16 %v3564_v11, %v3563_v2 }
 0x54c   : > { %3080 = vrot.lane.b32.xlu1 %v3017_v42, %s8386_s21  ;;  %3078 = vrot.lane.b32.xlu0 %v3015_v20, %s8386_s21  ;;  %v12323_v5 = vrot.slane %v6951_v49, %v13450_v47  ;;  %v12327_v60 = vcombine.high %v12313_v14, %v12313_v14  ;;  %s12789_s21 = scalar_lea.hbm %s12848_s7, %s8031_s13 }
 0x54d   : > { %8220 = vmatprep.mubr.msk.bf16.mxu1 %vm3638_vm3, %v3587_v51 }
 0x54e   : > { %v2796_v56 = vpop.permute.xlu1 %2795  ;;  %v2794_v13 = vpop.permute.xlu0 %2793  ;;  %v3565_v22 = vld [vmem:[#allocation5 + $0x90] sm:$0xff]  ;;  %v3566_v41 = vld [vmem:[#allocation5 + $0x98] sm:$0xff]  ;;  %v12340_v54 = vcombine.high %v12323_v5, %v12323_v5  ;;  %v7088_v3 = vrot.slane %v12327_v60, 1 }
 0x54f   : > { %2869 = vst.msk [vmem:[#allocation5 + $0xb8] sm:$0xff] %vm2845_vm13, %v2796_v56  ;;  %2868 = vst.msk [vmem:[#allocation5 + $0xb0] sm:$0xff] %vm2845_vm13, %v2794_v13  ;;  %v3588_v53 = vpack.c.bf16 %v3566_v41, %v3565_v22 }
 0x550   : > { %3207 = vrot.lane.b32.xlu1 %v2244_v45, %s8388_s8  ;;  %3205 = vrot.lane.b32.xlu0 %v2243_v12, %s8388_s8  ;;  %v12318_v12 = vld [vmem:[%s12845_s4] ss:$0 sm:$0xff] }
 0x551   : > { %8221 = vmatmul.mubr.msk.bf16.gmra.mrb[16].mxu1 %vm3638_vm3, %v3588_v53 }
 0x552   : > { %v2927_v10 = vpop.permute.xlu1 %2926  ;;  %v2925_v40 = vpop.permute.xlu0 %2924 }
 0x553   : > { %3002 = vst.msk [vmem:[#allocation5 + $0xa8] sm:$0xff] %vm2980_vm15, %v2927_v10  ;;  %3001 = vst.msk [vmem:[#allocation5 + $0xa0] sm:$0xff] %vm2980_vm15, %v2925_v40 }
 0x554   : > { %3211 = vrot.lane.b32.xlu1 %v2247_v50, %s8388_s8  ;;  %3209 = vrot.lane.b32.xlu0 %v2246_v32, %s8388_s8 }
 0x556   : > { %v2931_v58 = vpop.permute.xlu1 %2930  ;;  %v2929_v36 = vpop.permute.xlu0 %2928 }
 0x557   : > { %3004 = vst.msk [vmem:[#allocation5 + $0xb8] sm:$0xff] %vm2980_vm15, %v2931_v58  ;;  %3003 = vst.msk [vmem:[#allocation5 + $0xb0] sm:$0xff] %vm2980_vm15, %v2929_v36 }
 0x558   : > { %3342 = vrot.lane.b32.xlu1 %v2883_v19, %s8389_s17  ;;  %3340 = vrot.lane.b32.xlu0 %v2881_v29, %s8389_s17  ;;  %v7087_v19 = vrot.slane %v12313_v14, 1  ;;  %v13500_v29 = vld [vmem:[#allocation112_spill] sm:$0xff] }
 0x559   : > { %v12333_v25 = vsub.s32 0, %v13500_v29 }
 0x55a   : > { %v3061_v27 = vpop.permute.xlu1 %3060  ;;  %v3059_v31 = vpop.permute.xlu0 %3058 }
 0x55b   : > { %3136 = vst.msk [vmem:[#allocation5 + $0xa8] sm:$0xff] %vm3114_vm1, %v3061_v27  ;;  %3135 = vst.msk [vmem:[#allocation5 + $0xa0] sm:$0xff] %vm3114_vm1, %v3059_v31 }
 0x55c   : > { %3346 = vrot.lane.b32.xlu1 %v3283_v44, %s8389_s17  ;;  %3344 = vrot.lane.b32.xlu0 %v3281_v46, %s8389_s17  ;;  %s7719_s17 = sshll.u32 %s269_s16, 6 }
 0x55d   : > { %s12400_s18 = scalar_lea.vmem [#allocation6], %s7719_s17  ;;  %s8391_s17 = smov [#allocation6]  }
 0x55e   : > { %v3065_v1 = vpop.permute.xlu1 %3064  ;;  %v3063_v63 = vpop.permute.xlu0 %3062  ;;  %s7653_s14 = sshll.u32 %s12400_s18, 4  ;;  %s8317_s20 = sshll.u32 %s8391_s17, 4  ;;  %s12792_s14 = int_to_ptr.vmem [resolvable:$true] %s7653_s14  ;;  %s8318_s20 = int_to_ptr.vmem [resolvable:$false] %s8317_s20 }
 0x55f   : > { %3138 = vst.msk [vmem:[#allocation5 + $0xb8] sm:$0xff] %vm3114_vm1, %v3065_v1  ;;  %3137 = vst.msk [vmem:[#allocation5 + $0xb0] sm:$0xff] %vm3114_vm1, %v3063_v63  ;;  %s8313_s8 = scalar_lea.vmem %s12792_s14, 1024  ;;  %s8319_s22 = scalar_lea.vmem %s8318_s20, 2048 }
 0x560   : > { %3476 = vrot.lane.b32.xlu1 %v3017_v42, %s8390_s9  ;;  %3474 = vrot.lane.b32.xlu0 %v3015_v20, %s8390_s9  ;;  %v7089_v42 = vrot.slane %v12323_v5, 1  ;;  %p8314_p11 = scmp.ne.s32.totalorder %s12792_s14, %s8313_s8  ;;  %p8320_p0 = scmp.lt.s32.totalorder %s12792_s14, %s8318_s20 }
 0x561   : > { %p8321_p1 = scmp.lt.s32.totalorder %s8319_s22, %s8313_s8 }
 0x562   : > { %v3192_v52 = vpop.permute.xlu1 %3191  ;;  %v3190_v23 = vpop.permute.xlu0 %3189  ;;  %p8315_p12 = pnand %p8314_p11, %p8471_p5 }
 0x563   : > { %3267 = vst.msk [vmem:[#allocation5 + $0xa8] sm:$0xff] %vm3245_vm4, %v3192_v52  ;;  %3266 = vst.msk [vmem:[#allocation5 + $0xa0] sm:$0xff] %vm3245_vm4, %v3190_v23  ;;  %p8322_p2 = por %p8321_p1, %p8320_p0 }
 0x564   : > { %3480 = vrot.lane.b32.xlu1 %v3417_v4, %s8390_s9  ;;  %3478 = vrot.lane.b32.xlu0 %v3415_v17, %s8390_s9  ;;  %p8316_p13 = pneg %p8315_p12 }
 0x566   : > { %v3196_v16 = vpop.permute.xlu1 %3195  ;;  %v3194_v38 = vpop.permute.xlu0 %3193  ;;  %p8323_p3 = pnand %p8322_p2, %p8316_p13 }
 0x567   : > { %3269 = vst.msk [vmem:[#allocation5 + $0xb8] sm:$0xff] %vm3245_vm4, %v3196_v16  ;;  %3268 = vst.msk [vmem:[#allocation5 + $0xb0] sm:$0xff] %vm3245_vm4, %v3194_v38 }
 0x56a   : > { %v3327_v21 = vpop.permute.xlu1 %3326  ;;  %v3325_v45 = vpop.permute.xlu0 %3324 }
 0x56b   : > { %3402 = vst.msk [vmem:[#allocation5 + $0xa8] sm:$0xff] %vm3380_vm5, %v3327_v21  ;;  %3401 = vst.msk [vmem:[#allocation5 + $0xa0] sm:$0xff] %vm3380_vm5, %v3325_v45 }
 0x56c   : > { %v8206_v24 = vpop.f32.mrb[0].mxu1 }
 0x56d   : > { %v3734_v15 = vadd.f32 %v8206_v24, %v12318_v12  ;;  %v3725_v34 = vpop.f32.mrb[1].mxu1 }
 0x56e   : > { %v3726_v0 = vadd.f32 %v12318_v12, %v3725_v34  ;;  %v3331_v9 = vpop.permute.xlu1 %3330  ;;  %v3329_v8 = vpop.permute.xlu0 %3328 }
 0x56f   : > { %v3918_v62 = vcombine.high %v3734_v15, %v3734_v15  ;;  %v3925_v35 = vrot.slane %v3734_v15, %v13450_v47  ;;  %3404 = vst.msk [vmem:[#allocation5 + $0xb8] sm:$0xff] %vm3380_vm5, %v3331_v9  ;;  %3403 = vst.msk [vmem:[#allocation5 + $0xb0] sm:$0xff] %vm3380_vm5, %v3329_v8  ;;  %v8207_v6 = vpop.f32.mrb[2].mxu1 }
 0x570   : > { %v3884_v33 = vcombine.high %v3726_v0, %v3726_v0  ;;  %v3891_v59 = vrot.slane %v3726_v0, %v13450_v47  ;;  %v3737_v2 = vadd.f32 %v8207_v6, %v12318_v12  ;;  %v3728_v11 = vpop.f32.mrb[3].mxu1 }
 0x571   : > { %v3932_v20 = vrot.slane %v3918_v62, %v13450_v47  ;;  %v3933_v51 = vcombine.high %v3925_v35, %v3925_v35  ;;  %v7828_v56 = vrot.slane %v3925_v35, 9  ;;  %v3729_v13 = vadd.f32 %v12318_v12, %v3728_v11 }
 0x572   : > { %v3898_v22 = vrot.slane %v3884_v33, %v13450_v47  ;;  %v3899_v41 = vcombine.high %v3891_v59, %v3891_v59  ;;  %v7764_v53 = vrot.slane %v3891_v59, 9  ;;  %v3935_v50 = vcombine.high %v3737_v2, %v3737_v2  ;;  %v3461_v32 = vpop.permute.xlu1 %3460  ;;  %v3459_v10 = vpop.permute.xlu0 %3458 }
 0x573   : > { %v3934_v40 = vcombine.high %v3932_v20, %v3932_v20  ;;  %v7829_v61 = vrot.slane %v3933_v51, 9  ;;  %v7830_v26 = vrot.slane %v3932_v20, 9  ;;  %v5004_v7 = vadd.f32 %v7828_v56, %v3925_v35  ;;  %3536 = vst.msk [vmem:[#allocation5 + $0xa8] sm:$0xff] %vm3514_vm14, %v3461_v32  ;;  %3535 = vst.msk [vmem:[#allocation5 + $0xa0] sm:$0xff] %vm3514_vm14, %v3459_v10 }
 0x574   : > { %v3900_v57 = vcombine.high %v3898_v22, %v3898_v22  ;;  %v7765_v58 = vrot.slane %v3899_v41, 9  ;;  %v7766_v36 = vrot.slane %v3898_v22, 9  ;;  %v4748_v44 = vadd.f32 %v7764_v53, %v3891_v59 }
 0x575   : > { %v7831_v46 = vrot.slane %v3934_v40, 9  ;;  %v5005_v27 = vadd.f32 %v7829_v61, %v3933_v51  ;;  %v5006_v31 = vadd.f32 %v7830_v26, %v3932_v20  ;;  %v3942_v39 = vrot.slane %v3737_v2, %v13450_v47 }
 0x576   : > { %v7767_v37 = vrot.slane %v3900_v57, 9  ;;  %v4749_v48 = vadd.f32 %v7765_v58, %v3899_v41  ;;  %v4750_v1 = vadd.f32 %v7766_v36, %v3898_v22  ;;  %v5068_v63 = vadd.f32 %v5004_v7, %v4748_v44  ;;  %v3465_v4 = vpop.permute.xlu1 %3464  ;;  %v3463_v17 = vpop.permute.xlu0 %3462 }
 0x577   : > { %v5007_v52 = vadd.f32 %v7831_v46, %v3934_v40  ;;  %v3949_v23 = vrot.slane %v3935_v50, %v13450_v47  ;;  %v3950_v18 = vcombine.high %v3942_v39, %v3942_v39  ;;  %v7832_v16 = vrot.slane %v3942_v39, 9  ;;  %3538 = vst.msk [vmem:[#allocation5 + $0xb8] sm:$0xff] %vm3514_vm14, %v3465_v4  ;;  %3537 = vst.msk [vmem:[#allocation5 + $0xb0] sm:$0xff] %vm3514_vm14, %v3463_v17 }
 0x578   : > { %v4751_v38 = vadd.f32 %v7767_v37, %v3900_v57  ;;  %v5069_v49 = vadd.f32 %v5005_v27, %v4749_v48  ;;  %v5070_v21 = vadd.f32 %v5006_v31, %v4750_v1  ;;  %v3901_v45 = vcombine.high %v3729_v13, %v3729_v13 }
 0x579   : > { %v3951_v24 = vcombine.high %v3949_v23, %v3949_v23  ;;  %v7833_v15 = vrot.slane %v3950_v18, 9  ;;  %v7834_v34 = vrot.slane %v3949_v23, 9  ;;  %v5008_v0 = vadd.f32 %v7832_v16, %v3942_v39 }
 0x57a   : > { %v5071_v9 = vadd.f32 %v5007_v52, %v4751_v38  ;;  %v3908_v8 = vrot.slane %v3729_v13, %v13450_v47  ;;  %v3915_v29 = vrot.slane %v3901_v45, %v13450_v47  ;;  %v5132_v62 = vmul.f32 0.25, %v5068_v63  ;;  %v2800_v35 = vpop.permute.xlu1 %2799  ;;  %v2798_v6 = vpop.permute.xlu0 %2797  ;;  %v3567_v26 = vld [vmem:[#allocation5 + $0xa0] sm:$0xff]  ;;  %v3568_v7 = vld [vmem:[#allocation5 + $0xa8] sm:$0xff] }
 0x57b   : > { %v7835_v33 = vrot.slane %v3951_v24, 9  ;;  %v5009_v59 = vadd.f32 %v7833_v15, %v3950_v18  ;;  %v5010_v2 = vadd.f32 %v7834_v34, %v3949_v23  ;;  %v5133_v11 = vmul.f32 0.25, %v5069_v49  ;;  %2871 = vst.msk [vmem:[#allocation5 + $0xc8] sm:$0xff] %vm2845_vm13, %v2800_v35  ;;  %2870 = vst.msk [vmem:[#allocation5 + $0xc0] sm:$0xff] %vm2845_vm13, %v2798_v6 }
 0x57c   : > { %v3916_v20 = vcombine.high %v3908_v8, %v3908_v8  ;;  %v3917_v51 = vcombine.high %v3915_v29, %v3915_v29  ;;  %v7768_v56 = vrot.slane %v3908_v8, 9  ;;  %v7770_v22 = vrot.slane %v3915_v29, 9 }
 0x57d   : > { %v5011_v41 = vadd.f32 %v7835_v33, %v3951_v24  ;;  %v5134_v53 = vmul.f32 0.25, %v5070_v21  ;;  %v5135_v13 = vmul.f32 0.25, %v5071_v9  ;;  %v7183_v50 = vadd.f32 %v12313_v14, %v5132_v62 }
 0x57e   : > { %v7769_v32 = vrot.slane %v3916_v20, 9  ;;  %v7771_v10 = vrot.slane %v3917_v51, 9  ;;  %v4752_v40 = vadd.f32 %v7768_v56, %v3908_v8  ;;  %v4754_v61 = vadd.f32 %v7770_v22, %v3915_v29  ;;  %v2804_v57 = vpop.permute.xlu1 %2803  ;;  %v2802_v58 = vpop.permute.xlu0 %2801  ;;  %v3569_v1 = vld [vmem:[#allocation5 + $0xb0] sm:$0xff]  ;;  %v3570_v63 = vld [vmem:[#allocation5 + $0xb8] sm:$0xff] }
 0x57f   : > { %v7090_v36 = vrot.slane %v12340_v54, 1  ;;  %v7184_v44 = vadd.f32 %v7087_v19, %v5133_v11  ;;  %v7185_v46 = vadd.f32 %v12327_v60, %v5134_v53  ;;  %v7186_v27 = vadd.f32 %v7088_v3, %v5135_v13  ;;  %2873 = vst.msk [vmem:[#allocation5 + $0xd8] sm:$0xff] %vm2845_vm13, %v2804_v57  ;;  %2872 = vst.msk [vmem:[#allocation5 + $0xd0] sm:$0xff] %vm2845_vm13, %v2802_v58 }
 0x580   : > { %v4753_v31 = vadd.f32 %v7769_v32, %v3916_v20  ;;  %v4755_v39 = vadd.f32 %v7771_v10, %v3917_v51  ;;  %v5072_v37 = vadd.f32 %v5008_v0, %v4752_v40  ;;  %v5074_v48 = vadd.f32 %v5010_v2, %v4754_v61 }
 0x581   : > { %v7314_v4 = vrot.slane %v7183_v50, %v12333_v25  ;;  %v7318_v14 = vrot.slane %v7184_v44, %v12333_v25  ;;  %v7322_v19 = vrot.slane %v7185_v46, %v12333_v25  ;;  %v3589_v17 = vpack.c.bf16 %v3568_v7, %v3567_v26 }
 0x582   : > { %v5073_v60 = vadd.f32 %v5009_v59, %v4753_v31  ;;  %v5075_v3 = vadd.f32 %v5011_v41, %v4755_v39  ;;  %v5136_v52 = vmul.f32 0.25, %v5072_v37  ;;  %v5138_v23 = vmul.f32 0.25, %v5074_v48  ;;  %v2935_v18 = vpop.permute.xlu1 %2934  ;;  %v2933_v16 = vpop.permute.xlu0 %2932 }
 0x583   : > { %v7326_v38 = vrot.slane %v7186_v27, %v12333_v25  ;;  %v7567_v49 = vsel %vm6741_vm6, %v7318_v14, %v7314_v4  ;;  %8224 = vmatprep.mubr.msk.bf16.mxu1 %vm3638_vm3, %v3589_v17  ;;  %v3590_v21 = vpack.c.bf16 %v3570_v63, %v3569_v1  ;;  %3006 = vst.msk [vmem:[#allocation5 + $0xc8] sm:$0xff] %vm2980_vm15, %v2935_v18  ;;  %3005 = vst.msk [vmem:[#allocation5 + $0xc0] sm:$0xff] %vm2980_vm15, %v2933_v16 }
 0x584   : > { %v5137_v45 = vmul.f32 0.25, %v5073_v60  ;;  %v5139_v24 = vmul.f32 0.25, %v5075_v3  ;;  %v7187_v15 = vadd.f32 %v12323_v5, %v5136_v52  ;;  %v7189_v34 = vadd.f32 %v12340_v54, %v5138_v23 }
 0x585   : > { %v7568_v0 = vsel %vm6744_vm7, %v7322_v19, %v7567_v49  ;;  %8225 = vmatmul.mubr.msk.bf16.gmra.mrb[20].mxu1 %vm3638_vm3, %v3590_v21  ;;  %v6916_v51 = vadd.f32 %v12300_v43, %v12271_v28 }
 0x586   : > { %v7188_v9 = vadd.f32 %v7089_v42, %v5137_v45  ;;  %v7190_v8 = vadd.f32 %v7090_v36, %v5139_v24  ;;  %v7330_v29 = vrot.slane %v7187_v15, %v12333_v25  ;;  %v2939_v62 = vpop.permute.xlu1 %2938  ;;  %v2937_v35 = vpop.permute.xlu0 %2936  ;;  %v7569_v6 = vsel %vm6747_vm8, %v7326_v38, %v7568_v0 }
 0x587   : > { %3008 = vst.msk [vmem:[#allocation5 + $0xd8] sm:$0xff] %vm2980_vm15, %v2939_v62  ;;  %3007 = vst.msk [vmem:[#allocation5 + $0xd0] sm:$0xff] %vm2980_vm15, %v2937_v35  ;;  %v7338_v5 = vrot.slane %v7189_v34, %v12333_v25  ;;  %v6968_v53 = vcombine.high %v6916_v51, %v6916_v51  ;;  %v12407_v13 = vrot.slane %v6916_v51, %v13450_v47 }
 0x588   : > { %v7334_v54 = vrot.slane %v7188_v9, %v12333_v25  ;;  %v7570_v33 = vsel %vm6750_vm9, %v7330_v29, %v7569_v6  ;;  %v7342_v42 = vrot.slane %v7190_v8, %v12333_v25 }
 0x589   : > { %v12412_v28 = vrot.slane %v6968_v53, %v13450_v47  ;;  %v12416_v40 = vcombine.high %v12407_v13, %v12407_v13  ;;  %v7091_v31 = vrot.slane %v12407_v13, 1 }
 0x58a   : > { %v7571_v59 = vsel %vm6753_vm10, %v7334_v54, %v7570_v33  ;;  %v3069_v2 = vpop.permute.xlu1 %3068  ;;  %v3067_v11 = vpop.permute.xlu0 %3066 }
 0x58b   : > { %v7572_v20 = vsel %vm6756_vm11, %v7338_v5, %v7571_v59  ;;  %3140 = vst.msk [vmem:[#allocation5 + $0xc8] sm:$0xff] %vm3114_vm1, %v3069_v2  ;;  %3139 = vst.msk [vmem:[#allocation5 + $0xc0] sm:$0xff] %vm3114_vm1, %v3067_v11  ;;  %v12425_v27 = vcombine.high %v12412_v28, %v12412_v28  ;;  %v7092_v63 = vrot.slane %v12416_v40, 1 }
 0x58c   : > { %v7573_v56 = vsel %vm13501_vm0, %v7342_v42, %v7572_v20 }
 0x58d   : > { %7631 = vst.msk [vmem:[%s12400_s18] sm:$0xff] %vm13502_vm2, %v7573_v56 }
 0x58e   : > { %v3073_v22 = vpop.permute.xlu1 %3072  ;;  %v3071_v41 = vpop.permute.xlu0 %3070 }
 0x58f   : > { %3142 = vst.msk [vmem:[#allocation5 + $0xd8] sm:$0xff] %vm3114_vm1, %v3073_v22  ;;  %3141 = vst.msk [vmem:[#allocation5 + $0xd0] sm:$0xff] %vm3114_vm1, %v3071_v41 }
 0x592   : > { %v3200_v50 = vpop.permute.xlu1 %3199  ;;  %v3198_v32 = vpop.permute.xlu0 %3197 }
 0x593   : > { %3271 = vst.msk [vmem:[#allocation5 + $0xc8] sm:$0xff] %vm3245_vm4, %v3200_v50  ;;  %3270 = vst.msk [vmem:[#allocation5 + $0xc0] sm:$0xff] %vm3245_vm4, %v3198_v32 }
 0x594   : > { %v8210_v10 = vpop.f32.mrb[4].mxu1 }
 0x595   : > { %v3750_v61 = vadd.f32 %v8210_v10, %v12318_v12  ;;  %v3741_v26 = vpop.f32.mrb[5].mxu1 }
 0x596   : > { %v3742_v7 = vadd.f32 %v12318_v12, %v3741_v26  ;;  %v3204_v57 = vpop.permute.xlu1 %3203  ;;  %v3202_v58 = vpop.permute.xlu0 %3201 }
 0x597   : > { %v3986_v36 = vcombine.high %v3750_v61, %v3750_v61  ;;  %v3993_v44 = vrot.slane %v3750_v61, %v13450_v47  ;;  %3273 = vst.msk [vmem:[#allocation5 + $0xd8] sm:$0xff] %vm3245_vm4, %v3204_v57  ;;  %3272 = vst.msk [vmem:[#allocation5 + $0xd0] sm:$0xff] %vm3245_vm4, %v3202_v58  ;;  %v8211_v46 = vpop.f32.mrb[6].mxu1 }
 0x598   : > { %v3952_v39 = vcombine.high %v3742_v7, %v3742_v7  ;;  %v3959_v37 = vrot.slane %v3742_v7, %v13450_v47  ;;  %v3753_v48 = vadd.f32 %v8211_v46, %v12318_v12  ;;  %v3744_v1 = vpop.f32.mrb[7].mxu1 }
 0x599   : > { %v4000_v4 = vrot.slane %v3986_v36, %v13450_v47  ;;  %v4001_v14 = vcombine.high %v3993_v44, %v3993_v44  ;;  %v7836_v19 = vrot.slane %v3993_v44, 9  ;;  %v3745_v17 = vadd.f32 %v12318_v12, %v3744_v1 }
 0x59a   : > { %v3966_v60 = vrot.slane %v3952_v39, %v13450_v47  ;;  %v3967_v3 = vcombine.high %v3959_v37, %v3959_v37  ;;  %v7772_v52 = vrot.slane %v3959_v37, 9  ;;  %v4003_v23 = vcombine.high %v3753_v48, %v3753_v48  ;;  %v3335_v18 = vpop.permute.xlu1 %3334  ;;  %v3333_v16 = vpop.permute.xlu0 %3332 }
 0x59b   : > { %v4002_v38 = vcombine.high %v4000_v4, %v4000_v4  ;;  %v7837_v49 = vrot.slane %v4001_v14, 9  ;;  %v7838_v21 = vrot.slane %v4000_v4, 9  ;;  %v5012_v45 = vadd.f32 %v7836_v19, %v3993_v44  ;;  %3406 = vst.msk [vmem:[#allocation5 + $0xc8] sm:$0xff] %vm3380_vm5, %v3335_v18  ;;  %3405 = vst.msk [vmem:[#allocation5 + $0xc0] sm:$0xff] %vm3380_vm5, %v3333_v16 }
 0x59c   : > { %v3968_v24 = vcombine.high %v3966_v60, %v3966_v60  ;;  %v7773_v15 = vrot.slane %v3967_v3, 9  ;;  %v7774_v34 = vrot.slane %v3966_v60, 9  ;;  %v4756_v0 = vadd.f32 %v7772_v52, %v3959_v37 }
 0x59d   : > { %v7839_v9 = vrot.slane %v4002_v38, 9  ;;  %v5013_v8 = vadd.f32 %v7837_v49, %v4001_v14  ;;  %v5014_v29 = vadd.f32 %v7838_v21, %v4000_v4  ;;  %v4010_v62 = vrot.slane %v3753_v48, %v13450_v47 }
 0x59e   : > { %v7775_v35 = vrot.slane %v3968_v24, 9  ;;  %v4757_v6 = vadd.f32 %v7773_v15, %v3967_v3  ;;  %v4758_v54 = vadd.f32 %v7774_v34, %v3966_v60  ;;  %v5076_v33 = vadd.f32 %v5012_v45, %v4756_v0  ;;  %v3339_v5 = vpop.permute.xlu1 %3338  ;;  %v3337_v42 = vpop.permute.xlu0 %3336 }
 0x59f   : > { %v5015_v59 = vadd.f32 %v7839_v9, %v4002_v38  ;;  %v4017_v2 = vrot.slane %v4003_v23, %v13450_v47  ;;  %v4018_v11 = vcombine.high %v4010_v62, %v4010_v62  ;;  %v7840_v20 = vrot.slane %v4010_v62, 9  ;;  %3408 = vst.msk [vmem:[#allocation5 + $0xd8] sm:$0xff] %vm3380_vm5, %v3339_v5  ;;  %3407 = vst.msk [vmem:[#allocation5 + $0xd0] sm:$0xff] %vm3380_vm5, %v3337_v42 }
 0x5a0   : > { %v4759_v51 = vadd.f32 %v7775_v35, %v3968_v24  ;;  %v5077_v56 = vadd.f32 %v5013_v8, %v4757_v6  ;;  %v5078_v22 = vadd.f32 %v5014_v29, %v4758_v54  ;;  %v3969_v41 = vcombine.high %v3745_v17, %v3745_v17 }
 0x5a1   : > { %v4019_v53 = vcombine.high %v4017_v2, %v4017_v2  ;;  %v7841_v50 = vrot.slane %v4018_v11, 9  ;;  %v7842_v32 = vrot.slane %v4017_v2, 9  ;;  %v5016_v10 = vadd.f32 %v7840_v20, %v4010_v62 }
 0x5a2   : > { %v5079_v61 = vadd.f32 %v5015_v59, %v4759_v51  ;;  %v3976_v26 = vrot.slane %v3745_v17, %v13450_v47  ;;  %v3983_v7 = vrot.slane %v3969_v41, %v13450_v47  ;;  %v5140_v57 = vmul.f32 0.25, %v5076_v33  ;;  %v3469_v58 = vpop.permute.xlu1 %3468  ;;  %v3467_v36 = vpop.permute.xlu0 %3466 }
 0x5a3   : > { %v7843_v44 = vrot.slane %v4019_v53, 9  ;;  %v5017_v46 = vadd.f32 %v7841_v50, %v4018_v11  ;;  %v5018_v39 = vadd.f32 %v7842_v32, %v4017_v2  ;;  %v5141_v37 = vmul.f32 0.25, %v5077_v56  ;;  %3540 = vst.msk [vmem:[#allocation5 + $0xc8] sm:$0xff] %vm3514_vm14, %v3469_v58  ;;  %3539 = vst.msk [vmem:[#allocation5 + $0xc0] sm:$0xff] %vm3514_vm14, %v3467_v36 }
 0x5a4   : > { %v3984_v48 = vcombine.high %v3976_v26, %v3976_v26  ;;  %v3985_v1 = vcombine.high %v3983_v7, %v3983_v7  ;;  %v7776_v4 = vrot.slane %v3976_v26, 9  ;;  %v7778_v14 = vrot.slane %v3983_v7, 9 }
 0x5a5   : > { %v5019_v19 = vadd.f32 %v7843_v44, %v4019_v53  ;;  %v5142_v60 = vmul.f32 0.25, %v5078_v22  ;;  %v5143_v17 = vmul.f32 0.25, %v5079_v61  ;;  %v7191_v3 = vadd.f32 %v12407_v13, %v5140_v57 }
 0x5a6   : > { %v7777_v52 = vrot.slane %v3984_v48, 9  ;;  %v7779_v23 = vrot.slane %v3985_v1, 9  ;;  %v4760_v18 = vadd.f32 %v7776_v4, %v3976_v26  ;;  %v4762_v16 = vadd.f32 %v7778_v14, %v3983_v7  ;;  %v3473_v38 = vpop.permute.xlu1 %3472  ;;  %v3471_v49 = vpop.permute.xlu0 %3470 }
 0x5a7   : > { %v7093_v21 = vrot.slane %v12412_v28, 1  ;;  %v7192_v45 = vadd.f32 %v7091_v31, %v5141_v37  ;;  %v7193_v24 = vadd.f32 %v12416_v40, %v5142_v60  ;;  %v7194_v15 = vadd.f32 %v7092_v63, %v5143_v17  ;;  %3542 = vst.msk [vmem:[#allocation5 + $0xd8] sm:$0xff] %vm3514_vm14, %v3473_v38  ;;  %3541 = vst.msk [vmem:[#allocation5 + $0xd0] sm:$0xff] %vm3514_vm14, %v3471_v49 }
 0x5a8   : > { %v4761_v34 = vadd.f32 %v7777_v52, %v3984_v48  ;;  %v4763_v0 = vadd.f32 %v7779_v23, %v3985_v1  ;;  %v5080_v9 = vadd.f32 %v5016_v10, %v4760_v18  ;;  %v5082_v8 = vadd.f32 %v5018_v39, %v4762_v16 }
 0x5a9   : > { %v7094_v29 = vrot.slane %v12425_v27, 1  ;;  %v7346_v62 = vrot.slane %v7191_v3, %v12333_v25  ;;  %v7350_v13 = vrot.slane %v7192_v45, %v12333_v25  ;;  %v7354_v31 = vrot.slane %v7193_v24, %v12333_v25 }
 0x5aa   : > { %v5081_v35 = vadd.f32 %v5017_v46, %v4761_v34  ;;  %v5083_v6 = vadd.f32 %v5019_v19, %v4763_v0  ;;  %v5144_v40 = vmul.f32 0.25, %v5080_v9  ;;  %v5146_v63 = vmul.f32 0.25, %v5082_v8  ;;  %v2808_v54 = vpop.permute.xlu1 %2807  ;;  %v2806_v33 = vpop.permute.xlu0 %2805  ;;  %v3571_v5 = vld [vmem:[#allocation5 + $0xc0] sm:$0xff]  ;;  %v3572_v42 = vld [vmem:[#allocation5 + $0xc8] sm:$0xff] }
 0x5ab   : > { %v7358_v59 = vrot.slane %v7194_v15, %v12333_v25  ;;  %v7574_v2 = vsel %vm6741_vm6, %v7350_v13, %v7346_v62  ;;  %2875 = vst.msk [vmem:[#allocation5 + $0xe8] sm:$0xff] %vm2845_vm13, %v2808_v54  ;;  %2874 = vst.msk [vmem:[#allocation5 + $0xe0] sm:$0xff] %vm2845_vm13, %v2806_v33  ;;  %v3591_v11 = vpack.c.bf16 %v3572_v42, %v3571_v5 }
 0x5ac   : > { %v5145_v20 = vmul.f32 0.25, %v5081_v35  ;;  %v5147_v51 = vmul.f32 0.25, %v5083_v6  ;;  %v7195_v56 = vadd.f32 %v12412_v28, %v5144_v40  ;;  %v7197_v22 = vadd.f32 %v12425_v27, %v5146_v63 }
 0x5ad   : > { %v7575_v41 = vsel %vm6744_vm7, %v7354_v31, %v7574_v2  ;;  %8228 = vmatprep.mubr.msk.bf16.mxu1 %vm3638_vm3, %v3591_v11  ;;  %v6921_v52 = vadd.f32 %v12259_v55, %v12300_v43 }
 0x5ae   : > { %v7196_v53 = vadd.f32 %v7093_v21, %v5145_v20  ;;  %v7198_v50 = vadd.f32 %v7094_v29, %v5147_v51  ;;  %v7362_v32 = vrot.slane %v7195_v56, %v12333_v25  ;;  %v2812_v10 = vpop.permute.xlu1 %2811  ;;  %v2810_v61 = vpop.permute.xlu0 %2809  ;;  %v3573_v26 = vld [vmem:[#allocation5 + $0xd0] sm:$0xff]  ;;  %v3574_v7 = vld [vmem:[#allocation5 + $0xd8] sm:$0xff]  ;;  %v7576_v57 = vsel %vm6747_vm8, %v7358_v59, %v7575_v41 }
 0x5af   : > { %2877 = vst.msk [vmem:[#allocation5 + $0xf8] sm:$0xff] %vm2845_vm13, %v2812_v10  ;;  %2876 = vst.msk [vmem:[#allocation5 + $0xf0] sm:$0xff] %vm2845_vm13, %v2810_v61  ;;  %v3592_v28 = vpack.c.bf16 %v3574_v7, %v3573_v26  ;;  %v7370_v36 = vrot.slane %v7197_v22, %v12333_v25  ;;  %v6985_v16 = vcombine.high %v6921_v52, %v6921_v52 }
 0x5b0   : > { %v7366_v27 = vrot.slane %v7196_v53, %v12333_v25  ;;  %v7577_v58 = vsel %vm6750_vm9, %v7362_v32, %v7576_v57  ;;  %v7374_v44 = vrot.slane %v7198_v50, %v12333_v25  ;;  %vm13503_vm13 = vmmov %vm13501_vm0  ;;  %v12492_v38 = vrot.slane %v6921_v52, %v13450_v47 }
 0x5b1   : > { %8229 = vmatmul.mubr.msk.bf16.gmra.mrb[24].mxu1 %vm3638_vm3, %v3592_v28  ;;  %v12497_v34 = vrot.slane %v6985_v16, %v13450_v47 }
 0x5b2   : > { %v7578_v46 = vsel %vm6753_vm10, %v7366_v27, %v7577_v58  ;;  %v2943_v39 = vpop.permute.xlu1 %2942  ;;  %v2941_v37 = vpop.permute.xlu0 %2940  ;;  %v12504_v29 = vcombine.high %v12492_v38, %v12492_v38  ;;  %v7095_v6 = vrot.slane %v12492_v38, 1 }
 0x5b3   : > { %v7579_v48 = vsel %vm6756_vm11, %v7370_v36, %v7578_v46  ;;  %3010 = vst.msk [vmem:[#allocation5 + $0xe8] sm:$0xff] %vm2980_vm15, %v2943_v39  ;;  %3009 = vst.msk [vmem:[#allocation5 + $0xe0] sm:$0xff] %vm2980_vm15, %v2941_v37 }
 0x5b4   : > { %v7580_v1 = vsel %vm13503_vm13, %v7374_v44, %v7579_v48  ;;  %vm13512_vm13 = vmmov %vm13501_vm0 }
 0x5b5   : > { %7632 = vst.msk [vmem:[%s12400_s18 + $0x8] sm:$0xff] %vm13504_vm12, %v7580_v1 }
 0x5b6   : > { %v2947_v4 = vpop.permute.xlu1 %2946  ;;  %v2945_v14 = vpop.permute.xlu0 %2944 }
 0x5b7   : > { %3012 = vst.msk [vmem:[#allocation5 + $0xf8] sm:$0xff] %vm2980_vm15, %v2947_v4  ;;  %3011 = vst.msk [vmem:[#allocation5 + $0xf0] sm:$0xff] %vm2980_vm15, %v2945_v14 }
 0x5b8   : > { %vm13506_vm15 = vmmov %vm13502_vm2 }
 0x5ba   : > { %v3077_v19 = vpop.permute.xlu1 %3076  ;;  %v3075_v60 = vpop.permute.xlu0 %3074 }
 0x5bb   : > { %3144 = vst.msk [vmem:[#allocation5 + $0xe8] sm:$0xff] %vm3114_vm1, %v3077_v19  ;;  %3143 = vst.msk [vmem:[#allocation5 + $0xe0] sm:$0xff] %vm3114_vm1, %v3075_v60  ;;  %v7096_v60 = vrot.slane %v12504_v29, 1 }
 0x5be   : > { %v3081_v17 = vpop.permute.xlu1 %3080  ;;  %v3079_v3 = vpop.permute.xlu0 %3078 }
 0x5bf   : > { %3146 = vst.msk [vmem:[#allocation5 + $0xf8] sm:$0xff] %vm3114_vm1, %v3081_v17  ;;  %3145 = vst.msk [vmem:[#allocation5 + $0xf0] sm:$0xff] %vm3114_vm1, %v3079_v3 }
 0x5c0   : > { %vm13508_vm1 = vmmov %vm13502_vm2 }
 0x5c1   : > { %vm13511_vm2 = vmmov %vm13508_vm1 }
 0x5c2   : > { %v3208_v23 = vpop.permute.xlu1 %3207  ;;  %v3206_v18 = vpop.permute.xlu0 %3205  ;;  %vm13513_vm12 = vmmov %vm13508_vm1 }
 0x5c3   : > { %3275 = vst.msk [vmem:[#allocation5 + $0xe8] sm:$0xff] %vm3245_vm4, %v3208_v23  ;;  %3274 = vst.msk [vmem:[#allocation5 + $0xe0] sm:$0xff] %vm3245_vm4, %v3206_v18 }
 0x5c4   : > { %v8214_v49 = vpop.f32.mrb[8].mxu1 }
 0x5c5   : > { %v3766_v21 = vadd.f32 %v8214_v49, %v12318_v12  ;;  %v3757_v45 = vpop.f32.mrb[9].mxu1 }
 0x5c6   : > { %v3758_v55 = vadd.f32 %v12318_v12, %v3757_v45  ;;  %v3212_v24 = vpop.permute.xlu1 %3211  ;;  %v3210_v15 = vpop.permute.xlu0 %3209 }
 0x5c7   : > { %v4054_v0 = vcombine.high %v3766_v21, %v3766_v21  ;;  %v4061_v9 = vrot.slane %v3766_v21, %v13450_v47  ;;  %3277 = vst.msk [vmem:[#allocation5 + $0xf8] sm:$0xff] %vm3245_vm4, %v3212_v24  ;;  %3276 = vst.msk [vmem:[#allocation5 + $0xf0] sm:$0xff] %vm3245_vm4, %v3210_v15  ;;  %v8215_v8 = vpop.f32.mrb[10].mxu1 }
 0x5c8   : > { %v4020_v62 = vcombine.high %v3758_v55, %v3758_v55  ;;  %v4027_v13 = vrot.slane %v3758_v55, %v13450_v47  ;;  %v3769_v31 = vadd.f32 %v8215_v8, %v12318_v12  ;;  %v3760_v35 = vpop.f32.mrb[11].mxu1  ;;  %v7001_v55 = vcombine.high %v12497_v34, %v12497_v34  ;;  %vm13509_vm4 = vmmov %vm13501_vm0 }
 0x5c9   : > { %v4068_v40 = vrot.slane %v4054_v0, %v13450_v47  ;;  %v4069_v63 = vcombine.high %v4061_v9, %v4061_v9  ;;  %v7844_v54 = vrot.slane %v4061_v9, 9  ;;  %v3761_v48 = vadd.f32 %v12318_v12, %v3760_v35 }
 0x5ca   : > { %v4034_v33 = vrot.slane %v4020_v62, %v13450_v47  ;;  %v4035_v5 = vcombine.high %v4027_v13, %v4027_v13  ;;  %v7780_v42 = vrot.slane %v4027_v13, 9  ;;  %v4071_v59 = vcombine.high %v3769_v31, %v3769_v31  ;;  %v3343_v2 = vpop.permute.xlu1 %3342  ;;  %v3341_v11 = vpop.permute.xlu0 %3340 }
 0x5cb   : > { %v4070_v20 = vcombine.high %v4068_v40, %v4068_v40  ;;  %v7845_v51 = vrot.slane %v4069_v63, 9  ;;  %v7846_v56 = vrot.slane %v4068_v40, 9  ;;  %v5020_v22 = vadd.f32 %v7844_v54, %v4061_v9  ;;  %3410 = vst.msk [vmem:[#allocation5 + $0xe8] sm:$0xff] %vm3380_vm5, %v3343_v2  ;;  %3409 = vst.msk [vmem:[#allocation5 + $0xe0] sm:$0xff] %vm3380_vm5, %v3341_v11 }
 0x5cc   : > { %v4036_v41 = vcombine.high %v4034_v33, %v4034_v33  ;;  %v7781_v53 = vrot.slane %v4035_v5, 9  ;;  %v7782_v50 = vrot.slane %v4034_v33, 9  ;;  %v4764_v32 = vadd.f32 %v7780_v42, %v4027_v13 }
 0x5cd   : > { %v7847_v10 = vrot.slane %v4070_v20, 9  ;;  %v5021_v61 = vadd.f32 %v7845_v51, %v4069_v63  ;;  %v5022_v26 = vadd.f32 %v7846_v56, %v4068_v40  ;;  %v4078_v7 = vrot.slane %v3769_v31, %v13450_v47 }
 0x5ce   : > { %v7783_v57 = vrot.slane %v4036_v41, 9  ;;  %v4765_v28 = vadd.f32 %v7781_v53, %v4035_v5  ;;  %v4766_v27 = vadd.f32 %v7782_v50, %v4034_v33  ;;  %v5084_v58 = vadd.f32 %v5020_v22, %v4764_v32  ;;  %v3347_v36 = vpop.permute.xlu1 %3346  ;;  %v3345_v44 = vpop.permute.xlu0 %3344 }
 0x5cf   : > { %v5023_v46 = vadd.f32 %v7847_v10, %v4070_v20  ;;  %v4085_v39 = vrot.slane %v4071_v59, %v13450_v47  ;;  %v4086_v37 = vcombine.high %v4078_v7, %v4078_v7  ;;  %3412 = vst.msk [vmem:[#allocation5 + $0xf8] sm:$0xff] %vm3380_vm5, %v3347_v36  ;;  %3411 = vst.msk [vmem:[#allocation5 + $0xf0] sm:$0xff] %vm3380_vm5, %v3345_v44  ;;  %v7848_v3 = vrot.slane %v4078_v7, 9 }
 0x5d0   : > { %v4767_v1 = vadd.f32 %v7783_v57, %v4036_v41  ;;  %v5085_v4 = vadd.f32 %v5021_v61, %v4765_v28  ;;  %v5086_v14 = vadd.f32 %v5022_v26, %v4766_v27  ;;  %v5148_v19 = vmul.f32 0.25, %v5084_v58  ;;  %vm13510_vm5 = vmmov %vm13508_vm1 }
 0x5d1   : > { %v4087_v17 = vcombine.high %v4085_v39, %v4085_v39  ;;  %v7849_v52 = vrot.slane %v4086_v37, 9  ;;  %v7850_v24 = vrot.slane %v4085_v39, 9  ;;  %v4037_v15 = vcombine.high %v3761_v48, %v3761_v48 }
 0x5d2   : > { %v5087_v23 = vadd.f32 %v5023_v46, %v4767_v1  ;;  %v5149_v18 = vmul.f32 0.25, %v5085_v4  ;;  %v5150_v16 = vmul.f32 0.25, %v5086_v14  ;;  %v7199_v49 = vadd.f32 %v12492_v38, %v5148_v19  ;;  %v3477_v21 = vpop.permute.xlu1 %3476  ;;  %v3475_v45 = vpop.permute.xlu0 %3474 }
 0x5d3   : > { %3544 = vst.msk [vmem:[#allocation5 + $0xe8] sm:$0xff] %vm3514_vm14, %v3477_v21  ;;  %3543 = vst.msk [vmem:[#allocation5 + $0xe0] sm:$0xff] %vm3514_vm14, %v3475_v45  ;;  %v7851_v62 = vrot.slane %v4087_v17, 9  ;;  %v5024_v13 = vadd.f32 %v7848_v3, %v4078_v7  ;;  %v5025_v31 = vadd.f32 %v7849_v52, %v4086_v37  ;;  %v4044_v38 = vrot.slane %v3761_v48, %v13450_v47 }
 0x5d4   : > { %v5151_v0 = vmul.f32 0.25, %v5087_v23  ;;  %v7200_v9 = vadd.f32 %v7095_v6, %v5149_v18  ;;  %v7201_v8 = vadd.f32 %v12504_v29, %v5150_v16  ;;  %v4051_v35 = vrot.slane %v4037_v15, %v13450_v47 }
 0x5d5   : > { %v7378_v63 = vrot.slane %v7199_v49, %v12333_v25  ;;  %v4052_v59 = vcombine.high %v4044_v38, %v4044_v38  ;;  %v7784_v2 = vrot.slane %v4044_v38, 9  ;;  %v5026_v51 = vadd.f32 %v7850_v24, %v4085_v39 }
 0x5d6   : > { %v7202_v40 = vadd.f32 %v7096_v60, %v5151_v0  ;;  %v7382_v54 = vrot.slane %v7200_v9, %v12333_v25  ;;  %v7386_v33 = vrot.slane %v7201_v8, %v12333_v25  ;;  %v3481_v5 = vpop.permute.xlu1 %3480  ;;  %v3479_v42 = vpop.permute.xlu0 %3478  ;;  %v4053_v6 = vcombine.high %v4051_v35, %v4051_v35 }
 0x5d7   : > { %v7786_v29 = vrot.slane %v4051_v35, 9  ;;  %3546 = vst.msk [vmem:[#allocation5 + $0xf8] sm:$0xff] %vm3514_vm14, %v3481_v5  ;;  %3545 = vst.msk [vmem:[#allocation5 + $0xf0] sm:$0xff] %vm3514_vm14, %v3479_v42  ;;  %v5027_v56 = vadd.f32 %v7851_v62, %v4087_v17  ;;  %v7785_v41 = vrot.slane %v4052_v59, 9  ;;  %v4768_v50 = vadd.f32 %v7784_v2, %v4044_v38 }
 0x5d8   : > { %v7390_v11 = vrot.slane %v7202_v40, %v12333_v25  ;;  %v7581_v20 = vsel %vm6741_vm6, %v7382_v54, %v7378_v63  ;;  %v7787_v53 = vrot.slane %v4053_v6, 9  ;;  %v7097_v58 = vrot.slane %v12497_v34, 1  ;;  %vm13505_vm14 = vmmov %vm13501_vm0 }
 0x5d9   : > { %v7582_v22 = vsel %vm6744_vm7, %v7386_v33, %v7581_v20  ;;  %v4770_v32 = vadd.f32 %v7786_v29, %v4051_v35  ;;  %v4769_v7 = vadd.f32 %v7785_v41, %v4052_v59  ;;  %v5088_v28 = vadd.f32 %v5024_v13, %v4768_v50 }
 0x5da   : > { %v7583_v10 = vsel %vm6747_vm8, %v7390_v11, %v7582_v22  ;;  %v3575_v61 = vld [vmem:[#allocation5 + $0xe0] sm:$0xff]  ;;  %v3576_v26 = vld [vmem:[#allocation5 + $0xe8] sm:$0xff]  ;;  %v4771_v57 = vadd.f32 %v7787_v53, %v4053_v6  ;;  %v7098_v44 = vrot.slane %v7001_v55, 1  ;;  %v6924_v15 = vadd.f32 %v12267_v30, %v12300_v43 }
 0x5db   : > { %v3593_v27 = vpack.c.bf16 %v3576_v26, %v3575_v61  ;;  %v5090_v36 = vadd.f32 %v5026_v51, %v4770_v32  ;;  %v5089_v46 = vadd.f32 %v5025_v31, %v4769_v7  ;;  %v5152_v37 = vmul.f32 0.25, %v5088_v28 }
 0x5dc   : > { %v5091_v39 = vadd.f32 %v5027_v56, %v4771_v57  ;;  %v7002_v0 = vcombine.high %v6924_v15, %v6924_v15  ;;  %v12553_v9 = vrot.slane %v6924_v15, %v13450_v47 }
 0x5dd   : > { %8232 = vmatprep.mubr.msk.bf16.mxu1 %vm3638_vm3, %v3593_v27  ;;  %v5154_v48 = vmul.f32 0.25, %v5090_v36  ;;  %v5153_v14 = vmul.f32 0.25, %v5089_v46  ;;  %v7203_v60 = vadd.f32 %v12497_v34, %v5152_v37 }
 0x5de   : > { %v3577_v1 = vld [vmem:[#allocation5 + $0xf0] sm:$0xff]  ;;  %v3578_v4 = vld [vmem:[#allocation5 + $0xf8] sm:$0xff]  ;;  %v5155_v19 = vmul.f32 0.25, %v5091_v39  ;;  %v12558_v35 = vrot.slane %v7002_v0, %v13450_v47  ;;  %v7017_v43 = vcombine.high %v12553_v9, %v12553_v9  ;;  %v7099_v33 = vrot.slane %v12553_v9, 1 }
 0x5df   : > { %v3594_v17 = vpack.c.bf16 %v3578_v4, %v3577_v1  ;;  %v7205_v3 = vadd.f32 %v7001_v55, %v5154_v48  ;;  %v7204_v52 = vadd.f32 %v7097_v58, %v5153_v14  ;;  %v7394_v18 = vrot.slane %v7203_v60, %v12333_v25 }
 0x5e0   : > { %v7206_v23 = vadd.f32 %v7098_v44, %v5155_v19 }
 0x5e1   : > { %8233 = vmatmul.mubr.msk.bf16.gmra.mrb[28].mxu1 %vm3638_vm3, %v3594_v17  ;;  %v7398_v16 = vrot.slane %v7204_v52, %v12333_v25  ;;  %v7584_v49 = vsel %vm6750_vm9, %v7394_v18, %v7583_v10  ;;  %v7402_v21 = vrot.slane %v7205_v3, %v12333_v25  ;;  %v7100_v3 = vrot.slane %v7017_v43, 1  ;;  %vm13507_vm3 = vmmov %vm13501_vm0 }
 0x5e2   : > { %v7406_v45 = vrot.slane %v7206_v23, %v12333_v25 }
 0x5e3   : > { %v7585_v24 = vsel %vm6753_vm10, %v7398_v16, %v7584_v49 }
 0x5e4   : > { %v7586_v34 = vsel %vm6756_vm11, %v7402_v21, %v7585_v24 }
 0x5e5   : > { %v7587_v55 = vsel %vm13505_vm14, %v7406_v45, %v7586_v34 }
 0x5e6   : > { %7633 = vst.msk [vmem:[%s12400_s18 + $0x10] sm:$0xff] %vm13506_vm15, %v7587_v55 }
 0x5f4   : > { %v8218_v8 = vpop.f32.mrb[12].mxu1 }
 0x5f5   : > { %v3782_v62 = vadd.f32 %v8218_v8, %v12318_v12  ;;  %v3773_v13 = vpop.f32.mrb[13].mxu1 }
 0x5f6   : > { %v3774_v31 = vadd.f32 %v12318_v12, %v3773_v13  ;;  %v8219_v38 = vpop.f32.mrb[14].mxu1 }
 0x5f7   : > { %v4122_v40 = vcombine.high %v3782_v62, %v3782_v62  ;;  %v4129_v63 = vrot.slane %v3782_v62, %v13450_v47  ;;  %v3785_v54 = vadd.f32 %v8219_v38, %v12318_v12  ;;  %v3776_v30 = vpop.f32.mrb[15].mxu1 }
 0x5f8   : > { %v4088_v5 = vcombine.high %v3774_v31, %v3774_v31  ;;  %v4095_v42 = vrot.slane %v3774_v31, %v13450_v47  ;;  %v3777_v1 = vadd.f32 %v12318_v12, %v3776_v30  ;;  %v7018_v12 = vcombine.high %v12558_v35, %v12558_v35 }
 0x5f9   : > { %v4136_v59 = vrot.slane %v4122_v40, %v13450_v47  ;;  %v4137_v6 = vcombine.high %v4129_v63, %v4129_v63  ;;  %v7852_v2 = vrot.slane %v4129_v63, 9  ;;  %v4139_v29 = vcombine.high %v3785_v54, %v3785_v54 }
 0x5fa   : > { %v4102_v11 = vrot.slane %v4088_v5, %v13450_v47  ;;  %v4103_v20 = vcombine.high %v4095_v42, %v4095_v42  ;;  %v7788_v51 = vrot.slane %v4095_v42, 9  ;;  %v4146_v56 = vrot.slane %v3785_v54, %v13450_v47 }
 0x5fb   : > { %v4138_v22 = vcombine.high %v4136_v59, %v4136_v59  ;;  %v7853_v41 = vrot.slane %v4137_v6, 9  ;;  %v7854_v53 = vrot.slane %v4136_v59, 9  ;;  %v5028_v50 = vadd.f32 %v7852_v2, %v4129_v63 }
 0x5fc   : > { %v4104_v32 = vcombine.high %v4102_v11, %v4102_v11  ;;  %v7789_v10 = vrot.slane %v4103_v20, 9  ;;  %v7790_v61 = vrot.slane %v4102_v11, 9  ;;  %v4772_v26 = vadd.f32 %v7788_v51, %v4095_v42  ;;  %v12571_v17 = vpop.f32.mrb[36].mxu0 }
 0x5fd   : > { %v7855_v7 = vrot.slane %v4138_v22, 9  ;;  %v5029_v57 = vadd.f32 %v7853_v41, %v4137_v6  ;;  %v5030_v28 = vadd.f32 %v7854_v53, %v4136_v59  ;;  %v4153_v27 = vrot.slane %v4139_v29, %v13450_v47  ;;  %v6928_v18 = vpop.f32.mrb[37].mxu0 }
 0x5fe   : > { %v7791_v58 = vrot.slane %v4104_v32, 9  ;;  %v4773_v36 = vadd.f32 %v7789_v10, %v4103_v20  ;;  %v4774_v44 = vadd.f32 %v7790_v61, %v4102_v11  ;;  %v5092_v46 = vadd.f32 %v5028_v50, %v4772_v26  ;;  %v12574_v24 = vpop.f32.mrb[38].mxu0 }
 0x5ff   : > { %v5031_v39 = vadd.f32 %v7855_v7, %v4138_v22  ;;  %v4154_v37 = vcombine.high %v4146_v56, %v4146_v56  ;;  %v4155_v48 = vcombine.high %v4153_v27, %v4153_v27  ;;  %v7856_v52 = vrot.slane %v4146_v56, 9  ;;  %v12578_v15 = vpop.f32.mrb[39].mxu0 }
 0x600   : > { %v4775_v4 = vadd.f32 %v7791_v58, %v4104_v32  ;;  %v5093_v14 = vadd.f32 %v5029_v57, %v4773_v36  ;;  %v5094_v19 = vadd.f32 %v5030_v28, %v4774_v44  ;;  %v5156_v60 = vmul.f32 0.25, %v5092_v46 }
 0x601   : > { %v7857_v23 = vrot.slane %v4154_v37, 9  ;;  %v7858_v34 = vrot.slane %v4153_v27, 9  ;;  %v4105_v55 = vcombine.high %v3777_v1, %v3777_v1  ;;  %v7859_v13 = vrot.slane %v4155_v48, 9 }
 0x602   : > { %v5095_v16 = vadd.f32 %v5031_v39, %v4775_v4  ;;  %v5157_v49 = vmul.f32 0.25, %v5093_v14  ;;  %v5158_v21 = vmul.f32 0.25, %v5094_v19  ;;  %v7207_v45 = vadd.f32 %v12553_v9, %v5156_v60 }
 0x603   : > { %v5032_v31 = vadd.f32 %v7856_v52, %v4146_v56  ;;  %v5033_v38 = vadd.f32 %v7857_v23, %v4154_v37  ;;  %v4112_v40 = vrot.slane %v3777_v1, %v13450_v47  ;;  %v4119_v63 = vrot.slane %v4105_v55, %v13450_v47  ;;  %v12620_v55 = vld [vmem:[%s12845_s4] ss:$0 sm:$0xff] }
 0x604   : > { %v5159_v0 = vmul.f32 0.25, %v5095_v16  ;;  %v7208_v8 = vadd.f32 %v7099_v33, %v5157_v49  ;;  %v7209_v62 = vadd.f32 %v7017_v43, %v5158_v21  ;;  %v7410_v54 = vrot.slane %v7207_v45, %v12333_v25 }
 0x605   : > { %v4120_v42 = vcombine.high %v4112_v40, %v4112_v40  ;;  %v4121_v59 = vcombine.high %v4119_v63, %v4119_v63  ;;  %v7792_v6 = vrot.slane %v4112_v40, 9  ;;  %v7794_v2 = vrot.slane %v4119_v63, 9 }
 0x606   : > { %v7210_v9 = vadd.f32 %v7100_v3, %v5159_v0  ;;  %v7414_v30 = vrot.slane %v7208_v8, %v12333_v25  ;;  %v7418_v5 = vrot.slane %v7209_v62, %v12333_v25  ;;  %v5034_v29 = vadd.f32 %v7858_v34, %v4153_v27 }
 0x607   : > { %v5035_v11 = vadd.f32 %v7859_v13, %v4155_v48  ;;  %v7793_v51 = vrot.slane %v4120_v42, 9  ;;  %v7795_v56 = vrot.slane %v4121_v59, 9  ;;  %v4776_v22 = vadd.f32 %v7792_v6, %v4112_v40 }
 0x608   : > { %v7422_v43 = vrot.slane %v7210_v9, %v12333_v25  ;;  %v7588_v33 = vsel %vm6741_vm6, %v7414_v30, %v7410_v54  ;;  %v4778_v41 = vadd.f32 %v7794_v2, %v4119_v63  ;;  %v7101_v61 = vrot.slane %v12558_v35, 1 }
 0x609   : > { %v7589_v20 = vsel %vm6744_vm7, %v7418_v5, %v7588_v33  ;;  %v4777_v50 = vadd.f32 %v7793_v51, %v4120_v42  ;;  %v4779_v32 = vadd.f32 %v7795_v56, %v4121_v59  ;;  %v5096_v10 = vadd.f32 %v5032_v31, %v4776_v22 }
 0x60a   : > { %v7590_v53 = vsel %vm6747_vm8, %v7422_v43, %v7589_v20  ;;  %v5098_v26 = vadd.f32 %v5034_v29, %v4778_v41  ;;  %v7102_v7 = vrot.slane %v7018_v12, 1 }
 0x60b   : > { %v5097_v57 = vadd.f32 %v5033_v38, %v4777_v50  ;;  %v5099_v28 = vadd.f32 %v5035_v11, %v4779_v32  ;;  %v5160_v58 = vmul.f32 0.25, %v5096_v10 }
 0x60c   : > { %v5162_v27 = vmul.f32 0.25, %v5098_v26 }
 0x60d   : > { %v5161_v36 = vmul.f32 0.25, %v5097_v57  ;;  %v5163_v44 = vmul.f32 0.25, %v5099_v28  ;;  %v7211_v46 = vadd.f32 %v12558_v35, %v5160_v58  ;;  %v12604_v35 = vld [vmem:[%s12847_s6] ss:$0 sm:$0xff] }
 0x60e   : > { %v7213_v39 = vadd.f32 %v7018_v12, %v5162_v27  ;;  %v6929_v16 = vadd.f32 %v12604_v35, %v6928_v18 }
 0x60f   : > { %v7212_v37 = vadd.f32 %v7101_v61, %v5161_v36  ;;  %v7214_v48 = vadd.f32 %v7102_v7, %v5163_v44  ;;  %v7426_v1 = vrot.slane %v7211_v46, %v12333_v25 }
 0x610   : > { %v7434_v19 = vrot.slane %v7213_v39, %v12333_v25  ;;  %v7019_v49 = vcombine.high %v6929_v16, %v6929_v16  ;;  %v12608_v21 = vrot.slane %v6929_v16, %v13450_v47 }
 0x611   : > { %v7430_v4 = vrot.slane %v7212_v37, %v12333_v25  ;;  %v7591_v14 = vsel %vm6750_vm9, %v7426_v1, %v7590_v53  ;;  %v7438_v60 = vrot.slane %v7214_v48, %v12333_v25 }
 0x612   : > { %v12611_v45 = vrot.slane %v7019_v49, %v13450_v47  ;;  %v12615_v34 = vcombine.high %v12608_v21, %v12608_v21  ;;  %v7103_v13 = vrot.slane %v12608_v21, 1 }
 0x613   : > { %v7592_v3 = vsel %vm6753_vm10, %v7430_v4, %v7591_v14 }
 0x614   : > { %v7593_v52 = vsel %vm6756_vm11, %v7434_v19, %v7592_v3  ;;  %v12629_v9 = vcombine.high %v12611_v45, %v12611_v45  ;;  %v7104_v42 = vrot.slane %v12615_v34, 1 }
 0x615   : > { %v7594_v23 = vsel %vm13507_vm3, %v7438_v60, %v7593_v52 }
 0x616   : > { %7634 = vst.msk [vmem:[%s12400_s18 + $0x18] sm:$0xff] %vm13508_vm1, %v7594_v23 }
 0x624   : > { %v8222_v12 = vpop.f32.mrb[16].mxu1 }
 0x625   : > { %v3798_v0 = vadd.f32 %v12620_v55, %v8222_v12  ;;  %v3789_v18 = vpop.f32.mrb[17].mxu1 }
 0x626   : > { %v3790_v8 = vadd.f32 %v12620_v55, %v3789_v18  ;;  %v8223_v62 = vpop.f32.mrb[18].mxu1 }
 0x627   : > { %v4190_v31 = vcombine.high %v3798_v0, %v3798_v0  ;;  %v4197_v38 = vrot.slane %v3798_v0, %v13450_v47  ;;  %v3801_v40 = vadd.f32 %v12620_v55, %v8223_v62  ;;  %v3792_v63 = vpop.f32.mrb[19].mxu1 }
 0x628   : > { %v4156_v54 = vcombine.high %v3790_v8, %v3790_v8  ;;  %v4163_v30 = vrot.slane %v3790_v8, %v13450_v47  ;;  %v3793_v5 = vadd.f32 %v12620_v55, %v3792_v63 }
 0x629   : > { %v4204_v59 = vrot.slane %v4190_v31, %v13450_v47  ;;  %v4205_v6 = vcombine.high %v4197_v38, %v4197_v38  ;;  %v7860_v2 = vrot.slane %v4197_v38, 9  ;;  %v4207_v43 = vcombine.high %v3801_v40, %v3801_v40 }
 0x62a   : > { %v4170_v33 = vrot.slane %v4156_v54, %v13450_v47  ;;  %v4171_v29 = vcombine.high %v4163_v30, %v4163_v30  ;;  %v7796_v11 = vrot.slane %v4163_v30, 9  ;;  %v4214_v20 = vrot.slane %v3801_v40, %v13450_v47 }
 0x62b   : > { %v4206_v51 = vcombine.high %v4204_v59, %v4204_v59  ;;  %v7861_v56 = vrot.slane %v4205_v6, 9  ;;  %v7862_v22 = vrot.slane %v4204_v59, 9  ;;  %v5036_v41 = vadd.f32 %v7860_v2, %v4197_v38 }
 0x62c   : > { %v4172_v53 = vcombine.high %v4170_v33, %v4170_v33  ;;  %v7797_v50 = vrot.slane %v4171_v29, 9  ;;  %v7798_v32 = vrot.slane %v4170_v33, 9  ;;  %v4780_v10 = vadd.f32 %v7796_v11, %v4163_v30 }
 0x62d   : > { %v7863_v61 = vrot.slane %v4206_v51, 9  ;;  %v5037_v26 = vadd.f32 %v7861_v56, %v4205_v6  ;;  %v5038_v7 = vadd.f32 %v7862_v22, %v4204_v59  ;;  %v4221_v57 = vrot.slane %v4207_v43, %v13450_v47 }
 0x62e   : > { %v7799_v28 = vrot.slane %v4172_v53, 9  ;;  %v4781_v58 = vadd.f32 %v7797_v50, %v4171_v29  ;;  %v4782_v27 = vadd.f32 %v7798_v32, %v4170_v33  ;;  %v5100_v36 = vadd.f32 %v5036_v41, %v4780_v10 }
 0x62f   : > { %v5039_v44 = vadd.f32 %v7863_v61, %v4206_v51  ;;  %v4222_v46 = vcombine.high %v4214_v20, %v4214_v20  ;;  %v4223_v39 = vcombine.high %v4221_v57, %v4221_v57  ;;  %v7864_v37 = vrot.slane %v4214_v20, 9 }
 0x630   : > { %v4783_v48 = vadd.f32 %v7799_v28, %v4172_v53  ;;  %v5101_v1 = vadd.f32 %v5037_v26, %v4781_v58  ;;  %v5102_v4 = vadd.f32 %v5038_v7, %v4782_v27  ;;  %v7866_v14 = vrot.slane %v4221_v57, 9 }
 0x631   : > { %v7865_v19 = vrot.slane %v4222_v46, 9  ;;  %v7867_v60 = vrot.slane %v4223_v39, 9  ;;  %v5040_v3 = vadd.f32 %v7864_v37, %v4214_v20  ;;  %v4173_v52 = vcombine.high %v3793_v5, %v3793_v5 }
 0x632   : > { %v5103_v23 = vadd.f32 %v5039_v44, %v4783_v48  ;;  %v5042_v16 = vadd.f32 %v7866_v14, %v4221_v57  ;;  %v4180_v49 = vrot.slane %v3793_v5, %v13450_v47  ;;  %v5164_v12 = vmul.f32 0.25, %v5100_v36 }
 0x633   : > { %v5041_v0 = vadd.f32 %v7865_v19, %v4222_v46  ;;  %v5043_v18 = vadd.f32 %v7867_v60, %v4223_v39  ;;  %v4187_v8 = vrot.slane %v4173_v52, %v13450_v47  ;;  %v5165_v62 = vmul.f32 0.25, %v5101_v1 }
 0x634   : > { %v4188_v31 = vcombine.high %v4180_v49, %v4180_v49  ;;  %v7800_v38 = vrot.slane %v4180_v49, 9  ;;  %v5166_v40 = vmul.f32 0.25, %v5102_v4  ;;  %v5167_v63 = vmul.f32 0.25, %v5103_v23 }
 0x635   : > { %v4189_v54 = vcombine.high %v4187_v8, %v4187_v8  ;;  %v7802_v30 = vrot.slane %v4187_v8, 9  ;;  %v7215_v59 = vadd.f32 %v12608_v21, %v5164_v12  ;;  %v7216_v6 = vadd.f32 %v7103_v13, %v5165_v62 }
 0x636   : > { %v7801_v2 = vrot.slane %v4188_v31, 9  ;;  %v4784_v43 = vadd.f32 %v7800_v38, %v4180_v49  ;;  %v7217_v33 = vadd.f32 %v12615_v34, %v5166_v40  ;;  %v7218_v5 = vadd.f32 %v7104_v42, %v5167_v63 }
 0x637   : > { %v7803_v29 = vrot.slane %v4189_v54, 9  ;;  %v4786_v11 = vadd.f32 %v7802_v30, %v4187_v8  ;;  %v7442_v20 = vrot.slane %v7215_v59, %v12333_v25  ;;  %v7446_v51 = vrot.slane %v7216_v6, %v12333_v25 }
 0x638   : > { %v4785_v56 = vadd.f32 %v7801_v2, %v4188_v31  ;;  %v5104_v22 = vadd.f32 %v5040_v3, %v4784_v43  ;;  %v7450_v41 = vrot.slane %v7217_v33, %v12333_v25  ;;  %v7454_v53 = vrot.slane %v7218_v5, %v12333_v25 }
 0x639   : > { %v4787_v50 = vadd.f32 %v7803_v29, %v4189_v54  ;;  %v5106_v21 = vadd.f32 %v5042_v16, %v4786_v11  ;;  %v7595_v13 = vsel %vm6741_vm6, %v7446_v51, %v7442_v20  ;;  %v7105_v34 = vrot.slane %v12611_v45, 1 }
 0x63a   : > { %v5105_v32 = vadd.f32 %v5041_v0, %v4785_v56  ;;  %v5168_v10 = vmul.f32 0.25, %v5104_v22  ;;  %v7596_v42 = vsel %vm6744_vm7, %v7450_v41, %v7595_v13  ;;  %v7106_v7 = vrot.slane %v12629_v9, 1 }
 0x63b   : > { %v5107_v61 = vadd.f32 %v5043_v18, %v4787_v50  ;;  %v5170_v26 = vmul.f32 0.25, %v5106_v21  ;;  %v7597_v57 = vsel %vm6747_vm8, %v7454_v53, %v7596_v42 }
 0x63c   : > { %v5169_v28 = vmul.f32 0.25, %v5105_v32  ;;  %v7219_v58 = vadd.f32 %v12611_v45, %v5168_v10 }
 0x63d   : > { %v5171_v27 = vmul.f32 0.25, %v5107_v61  ;;  %v7221_v36 = vadd.f32 %v12629_v9, %v5170_v26  ;;  %v6932_v9 = vadd.f32 %v12604_v35, %v12578_v15 }
 0x63e   : > { %v7220_v44 = vadd.f32 %v7105_v34, %v5169_v28  ;;  %v7458_v46 = vrot.slane %v7219_v58, %v12333_v25 }
 0x63f   : > { %v7222_v39 = vadd.f32 %v7106_v7, %v5171_v27  ;;  %v7466_v1 = vrot.slane %v7221_v36, %v12333_v25  ;;  %v7036_v60 = vcombine.high %v6932_v9, %v6932_v9  ;;  %v12666_v3 = vrot.slane %v6932_v9, %v13450_v47 }
 0x640   : > { %v7462_v37 = vrot.slane %v7220_v44, %v12333_v25  ;;  %v7598_v48 = vsel %vm6750_vm9, %v7458_v46, %v7597_v57 }
 0x641   : > { %v7470_v4 = vrot.slane %v7222_v39, %v12333_v25  ;;  %v12669_v52 = vrot.slane %v7036_v60, %v13450_v47  ;;  %v12673_v16 = vcombine.high %v12666_v3, %v12666_v3  ;;  %v7107_v15 = vrot.slane %v12666_v3, 1 }
 0x642   : > { %v7599_v14 = vsel %vm6753_vm10, %v7462_v37, %v7598_v48 }
 0x643   : > { %v7600_v19 = vsel %vm6756_vm11, %v7466_v1, %v7599_v14  ;;  %v12682_v40 = vcombine.high %v12669_v52, %v12669_v52  ;;  %v7108_v59 = vrot.slane %v12673_v16, 1 }
 0x644   : > { %v7601_v45 = vsel %vm13509_vm4, %v7470_v4, %v7600_v19 }
 0x645   : > { %7635 = vst.msk [vmem:[%s12400_s18 + $0x20] sm:$0xff] %vm13510_vm5, %v7601_v45 }
 0x658   : > { %v8226_v23 = vpop.f32.mrb[20].mxu1 }
 0x659   : > { %v3814_v49 = vadd.f32 %v12620_v55, %v8226_v23  ;;  %v3805_v12 = vpop.f32.mrb[21].mxu1 }
 0x65a   : > { %v3806_v0 = vadd.f32 %v12620_v55, %v3805_v12  ;;  %v8227_v18 = vpop.f32.mrb[22].mxu1 }
 0x65b   : > { %v4258_v8 = vcombine.high %v3814_v49, %v3814_v49  ;;  %v4265_v62 = vrot.slane %v3814_v49, %v13450_v47  ;;  %v3817_v31 = vadd.f32 %v12620_v55, %v8227_v18  ;;  %v3808_v38 = vpop.f32.mrb[23].mxu1 }
 0x65c   : > { %v4224_v63 = vcombine.high %v3806_v0, %v3806_v0  ;;  %v4231_v54 = vrot.slane %v3806_v0, %v13450_v47  ;;  %v3809_v30 = vadd.f32 %v12620_v55, %v3808_v38 }
 0x65d   : > { %v4272_v6 = vrot.slane %v4258_v8, %v13450_v47  ;;  %v4273_v2 = vcombine.high %v4265_v62, %v4265_v62  ;;  %v7868_v43 = vrot.slane %v4265_v62, 9  ;;  %v4275_v33 = vcombine.high %v3817_v31, %v3817_v31 }
 0x65e   : > { %v4238_v5 = vrot.slane %v4224_v63, %v13450_v47  ;;  %v4239_v29 = vcombine.high %v4231_v54, %v4231_v54  ;;  %v7804_v11 = vrot.slane %v4231_v54, 9  ;;  %v4282_v20 = vrot.slane %v3817_v31, %v13450_v47 }
 0x65f   : > { %v4274_v51 = vcombine.high %v4272_v6, %v4272_v6  ;;  %v7869_v56 = vrot.slane %v4273_v2, 9  ;;  %v7870_v22 = vrot.slane %v4272_v6, 9  ;;  %v5044_v41 = vadd.f32 %v7868_v43, %v4265_v62 }
 0x660   : > { %v4240_v53 = vcombine.high %v4238_v5, %v4238_v5  ;;  %v7805_v50 = vrot.slane %v4239_v29, 9  ;;  %v7806_v21 = vrot.slane %v4238_v5, 9  ;;  %v4788_v13 = vadd.f32 %v7804_v11, %v4231_v54 }
 0x661   : > { %v7871_v32 = vrot.slane %v4274_v51, 9  ;;  %v5045_v10 = vadd.f32 %v7869_v56, %v4273_v2  ;;  %v5046_v34 = vadd.f32 %v7870_v22, %v4272_v6  ;;  %v4289_v42 = vrot.slane %v4275_v33, %v13450_v47 }
 0x662   : > { %v7807_v61 = vrot.slane %v4240_v53, 9  ;;  %v4789_v26 = vadd.f32 %v7805_v50, %v4239_v29  ;;  %v4790_v7 = vadd.f32 %v7806_v21, %v4238_v5  ;;  %v5108_v57 = vadd.f32 %v5044_v41, %v4788_v13 }
 0x663   : > { %v5047_v28 = vadd.f32 %v7871_v32, %v4274_v51  ;;  %v4290_v58 = vcombine.high %v4282_v20, %v4282_v20  ;;  %v4291_v27 = vcombine.high %v4289_v42, %v4289_v42  ;;  %v7872_v36 = vrot.slane %v4282_v20, 9 }
 0x664   : > { %v4791_v44 = vadd.f32 %v7807_v61, %v4240_v53  ;;  %v5109_v46 = vadd.f32 %v5045_v10, %v4789_v26  ;;  %v5110_v39 = vadd.f32 %v5046_v34, %v4790_v7  ;;  %v7874_v37 = vrot.slane %v4289_v42, 9 }
 0x665   : > { %v7873_v48 = vrot.slane %v4290_v58, 9  ;;  %v7875_v1 = vrot.slane %v4291_v27, 9  ;;  %v5048_v4 = vadd.f32 %v7872_v36, %v4282_v20  ;;  %v4241_v14 = vcombine.high %v3809_v30, %v3809_v30 }
 0x666   : > { %v5111_v19 = vadd.f32 %v5047_v28, %v4791_v44  ;;  %v5050_v45 = vadd.f32 %v7874_v37, %v4289_v42  ;;  %v4248_v9 = vrot.slane %v3809_v30, %v13450_v47  ;;  %v5172_v60 = vmul.f32 0.25, %v5108_v57 }
 0x667   : > { %v5049_v23 = vadd.f32 %v7873_v48, %v4290_v58  ;;  %v5051_v49 = vadd.f32 %v7875_v1, %v4291_v27  ;;  %v4255_v12 = vrot.slane %v4241_v14, %v13450_v47  ;;  %v5173_v0 = vmul.f32 0.25, %v5109_v46 }
 0x668   : > { %v4256_v18 = vcombine.high %v4248_v9, %v4248_v9  ;;  %v7808_v8 = vrot.slane %v4248_v9, 9  ;;  %v5174_v62 = vmul.f32 0.25, %v5110_v39  ;;  %v5175_v31 = vmul.f32 0.25, %v5111_v19 }
 0x669   : > { %v4257_v38 = vcombine.high %v4255_v12, %v4255_v12  ;;  %v7810_v63 = vrot.slane %v4255_v12, 9  ;;  %v7223_v54 = vadd.f32 %v12666_v3, %v5172_v60  ;;  %v7224_v6 = vadd.f32 %v7107_v15, %v5173_v0 }
 0x66a   : > { %v7809_v2 = vrot.slane %v4256_v18, 9  ;;  %v4792_v43 = vadd.f32 %v7808_v8, %v4248_v9  ;;  %v7225_v33 = vadd.f32 %v12673_v16, %v5174_v62  ;;  %v7226_v30 = vadd.f32 %v7108_v59, %v5175_v31 }
 0x66b   : > { %v7811_v5 = vrot.slane %v4257_v38, 9  ;;  %v4794_v29 = vadd.f32 %v7810_v63, %v4255_v12  ;;  %v7474_v11 = vrot.slane %v7223_v54, %v12333_v25  ;;  %v7478_v20 = vrot.slane %v7224_v6, %v12333_v25 }
 0x66c   : > { %v4793_v51 = vadd.f32 %v7809_v2, %v4256_v18  ;;  %v5112_v56 = vadd.f32 %v5048_v4, %v4792_v43  ;;  %v7482_v22 = vrot.slane %v7225_v33, %v12333_v25  ;;  %v7486_v41 = vrot.slane %v7226_v30, %v12333_v25 }
 0x66d   : > { %v4795_v53 = vadd.f32 %v7811_v5, %v4257_v38  ;;  %v5114_v3 = vadd.f32 %v5050_v45, %v4794_v29  ;;  %v7602_v15 = vsel %vm6741_vm6, %v7478_v20, %v7474_v11  ;;  %v7109_v16 = vrot.slane %v12669_v52, 1 }
 0x66e   : > { %v5113_v50 = vadd.f32 %v5049_v23, %v4793_v51  ;;  %v5176_v21 = vmul.f32 0.25, %v5112_v56  ;;  %v7603_v59 = vsel %vm6744_vm7, %v7482_v22, %v7602_v15  ;;  %v7110_v10 = vrot.slane %v12682_v40, 1 }
 0x66f   : > { %v5115_v13 = vadd.f32 %v5051_v49, %v4795_v53  ;;  %v5178_v32 = vmul.f32 0.25, %v5114_v3  ;;  %v7604_v34 = vsel %vm6747_vm8, %v7486_v41, %v7603_v59 }
 0x670   : > { %v5177_v42 = vmul.f32 0.25, %v5113_v50  ;;  %v7227_v61 = vadd.f32 %v12669_v52, %v5176_v21 }
 0x671   : > { %v5179_v26 = vmul.f32 0.25, %v5115_v13  ;;  %v7229_v7 = vadd.f32 %v12682_v40, %v5178_v32  ;;  %v6937_v40 = vadd.f32 %v12604_v35, %v12571_v17 }
 0x672   : > { %v7228_v57 = vadd.f32 %v7109_v16, %v5177_v42  ;;  %v7490_v28 = vrot.slane %v7227_v61, %v12333_v25 }
 0x673   : > { %v7230_v58 = vadd.f32 %v7110_v10, %v5179_v26  ;;  %v7498_v44 = vrot.slane %v7229_v7, %v12333_v25  ;;  %v7053_v48 = vcombine.high %v6937_v40, %v6937_v40  ;;  %v7060_v1 = vrot.slane %v6937_v40, %v13450_v47 }
 0x674   : > { %v7494_v27 = vrot.slane %v7228_v57, %v12333_v25  ;;  %v7605_v36 = vsel %vm6750_vm9, %v7490_v28, %v7604_v34 }
 0x675   : > { %v7502_v46 = vrot.slane %v7230_v58, %v12333_v25  ;;  %v12722_v60 = vrot.slane %v7053_v48, %v13450_v47  ;;  %v7068_v17 = vcombine.high %v7060_v1, %v7060_v1  ;;  %v7111_v18 = vrot.slane %v7060_v1, 1 }
 0x676   : > { %v7606_v39 = vsel %vm6753_vm10, %v7494_v27, %v7605_v36 }
 0x677   : > { %v7607_v37 = vsel %vm6756_vm11, %v7498_v44, %v7606_v39  ;;  %v7112_v57 = vrot.slane %v7068_v17, 1  ;;  %v7069_v39 = vcombine.high %v12722_v60, %v12722_v60 }
 0x678   : > { %v7608_v52 = vsel %vm13501_vm0, %v7502_v46, %v7607_v37 }
 0x679   : > { %7636 = vst.msk [vmem:[%s12400_s18 + $0x28] sm:$0xff] %vm13511_vm2, %v7608_v52 }
 0x684   : > { %v8230_v4 = vpop.f32.mrb[24].mxu1 }
 0x685   : > { %v3830_v14 = vadd.f32 %v12620_v55, %v8230_v4  ;;  %v3821_v19 = vpop.f32.mrb[25].mxu1 }
 0x686   : > { %v3822_v45 = vadd.f32 %v12620_v55, %v3821_v19  ;;  %v8231_v9 = vpop.f32.mrb[26].mxu1 }
 0x687   : > { %v4326_v23 = vcombine.high %v3830_v14, %v3830_v14  ;;  %v4333_v49 = vrot.slane %v3830_v14, %v13450_v47  ;;  %v3833_v12 = vadd.f32 %v12620_v55, %v8231_v9  ;;  %v3824_v0 = vpop.f32.mrb[27].mxu1 }
 0x688   : > { %v4292_v8 = vcombine.high %v3822_v45, %v3822_v45  ;;  %v4299_v62 = vrot.slane %v3822_v45, %v13450_v47  ;;  %v3825_v34 = vadd.f32 %v12620_v55, %v3824_v0 }
 0x689   : > { %v4340_v31 = vrot.slane %v4326_v23, %v13450_v47  ;;  %v4341_v38 = vcombine.high %v4333_v49, %v4333_v49  ;;  %v7876_v63 = vrot.slane %v4333_v49, 9  ;;  %v4343_v54 = vcombine.high %v3833_v12, %v3833_v12 }
 0x68a   : > { %v4306_v6 = vrot.slane %v4292_v8, %v13450_v47  ;;  %v4307_v2 = vcombine.high %v4299_v62, %v4299_v62  ;;  %v7812_v43 = vrot.slane %v4299_v62, 9  ;;  %v4350_v33 = vrot.slane %v3833_v12, %v13450_v47 }
 0x68b   : > { %v4342_v30 = vcombine.high %v4340_v31, %v4340_v31  ;;  %v7877_v5 = vrot.slane %v4341_v38, 9  ;;  %v7878_v29 = vrot.slane %v4340_v31, 9  ;;  %v5052_v11 = vadd.f32 %v7876_v63, %v4333_v49 }
 0x68c   : > { %v4308_v20 = vcombine.high %v4306_v6, %v4306_v6  ;;  %v7813_v51 = vrot.slane %v4307_v2, 9  ;;  %v7814_v56 = vrot.slane %v4306_v6, 9  ;;  %v4796_v22 = vadd.f32 %v7812_v43, %v4299_v62 }
 0x68d   : > { %v7879_v41 = vrot.slane %v4342_v30, 9  ;;  %v5053_v53 = vadd.f32 %v7877_v5, %v4341_v38  ;;  %v5054_v3 = vadd.f32 %v7878_v29, %v4340_v31  ;;  %v4357_v15 = vrot.slane %v4343_v54, %v13450_v47 }
 0x68e   : > { %v7815_v50 = vrot.slane %v4308_v20, 9  ;;  %v4797_v21 = vadd.f32 %v7813_v51, %v4307_v2  ;;  %v4798_v16 = vadd.f32 %v7814_v56, %v4306_v6  ;;  %v5116_v59 = vadd.f32 %v5052_v11, %v4796_v22 }
 0x68f   : > { %v5055_v13 = vadd.f32 %v7879_v41, %v4342_v30  ;;  %v4358_v32 = vcombine.high %v4350_v33, %v4350_v33  ;;  %v4359_v10 = vcombine.high %v4357_v15, %v4357_v15  ;;  %v7880_v28 = vrot.slane %v4350_v33, 9 }
 0x690   : > { %v4799_v42 = vadd.f32 %v7815_v50, %v4308_v20  ;;  %v5117_v61 = vadd.f32 %v5053_v53, %v4797_v21  ;;  %v5118_v26 = vadd.f32 %v5054_v3, %v4798_v16  ;;  %v5180_v7 = vmul.f32 0.25, %v5116_v59 }
 0x691   : > { %v7881_v58 = vrot.slane %v4358_v32, 9  ;;  %v7882_v37 = vrot.slane %v4357_v15, 9  ;;  %v4309_v52 = vcombine.high %v3825_v34, %v3825_v34  ;;  %v7883_v14 = vrot.slane %v4359_v10, 9 }
 0x692   : > { %v5119_v27 = vadd.f32 %v5055_v13, %v4799_v42  ;;  %v5181_v36 = vmul.f32 0.25, %v5117_v61  ;;  %v5182_v44 = vmul.f32 0.25, %v5118_v26  ;;  %v7231_v46 = vadd.f32 %v7060_v1, %v5180_v7 }
 0x693   : > { %v5056_v19 = vadd.f32 %v7880_v28, %v4350_v33  ;;  %v5057_v45 = vadd.f32 %v7881_v58, %v4358_v32  ;;  %v4316_v9 = vrot.slane %v3825_v34, %v13450_v47  ;;  %v4323_v23 = vrot.slane %v4309_v52, %v13450_v47 }
 0x694   : > { %v5183_v40 = vmul.f32 0.25, %v5119_v27  ;;  %v7232_v48 = vadd.f32 %v7111_v18, %v5181_v36  ;;  %v7233_v4 = vadd.f32 %v7068_v17, %v5182_v44  ;;  %v7506_v12 = vrot.slane %v7231_v46, %v12333_v25 }
 0x695   : > { %v4324_v8 = vcombine.high %v4316_v9, %v4316_v9  ;;  %v4325_v62 = vcombine.high %v4323_v23, %v4323_v23  ;;  %v7816_v31 = vrot.slane %v4316_v9, 9  ;;  %v7818_v38 = vrot.slane %v4323_v23, 9 }
 0x696   : > { %v7234_v49 = vadd.f32 %v7112_v57, %v5183_v40  ;;  %v7510_v1 = vrot.slane %v7232_v48, %v12333_v25  ;;  %v7514_v0 = vrot.slane %v7233_v4, %v12333_v25  ;;  %v5058_v63 = vadd.f32 %v7882_v37, %v4357_v15 }
 0x697   : > { %v5059_v54 = vadd.f32 %v7883_v14, %v4359_v10  ;;  %v7817_v2 = vrot.slane %v4324_v8, 9  ;;  %v7819_v43 = vrot.slane %v4325_v62, 9  ;;  %v4800_v33 = vadd.f32 %v7816_v31, %v4316_v9 }
 0x698   : > { %v7518_v17 = vrot.slane %v7234_v49, %v12333_v25  ;;  %v7609_v18 = vsel %vm6741_vm6, %v7510_v1, %v7506_v12  ;;  %v4802_v30 = vadd.f32 %v7818_v38, %v4323_v23  ;;  %v7113_v51 = vrot.slane %v12722_v60, 1 }
 0x699   : > { %v7610_v6 = vsel %vm6744_vm7, %v7514_v0, %v7609_v18  ;;  %v4801_v29 = vadd.f32 %v7817_v2, %v4324_v8  ;;  %v4803_v11 = vadd.f32 %v7819_v43, %v4325_v62  ;;  %v5120_v20 = vadd.f32 %v5056_v19, %v4800_v33 }
 0x69a   : > { %v7611_v5 = vsel %vm6747_vm8, %v7518_v17, %v7610_v6  ;;  %v5122_v56 = vadd.f32 %v5058_v63, %v4802_v30  ;;  %v7114_v22 = vrot.slane %v7069_v39, 1 }
 0x69b   : > { %v5121_v41 = vadd.f32 %v5057_v45, %v4801_v29  ;;  %v5123_v53 = vadd.f32 %v5059_v54, %v4803_v11  ;;  %v5184_v3 = vmul.f32 0.25, %v5120_v20 }
 0x69c   : > { %v5186_v15 = vmul.f32 0.25, %v5122_v56 }
 0x69d   : > { %v5185_v50 = vmul.f32 0.25, %v5121_v41  ;;  %v5187_v21 = vmul.f32 0.25, %v5123_v53  ;;  %v7235_v16 = vadd.f32 %v12722_v60, %v5184_v3  ;;  %v6940_v60 = vadd.f32 %v12604_v35, %v12574_v24 }
 0x69e   : > { %v7237_v59 = vadd.f32 %v7069_v39, %v5186_v15 }
 0x69f   : > { %v7236_v13 = vadd.f32 %v7113_v51, %v5185_v50  ;;  %v7238_v32 = vadd.f32 %v7114_v22, %v5187_v21  ;;  %v7522_v10 = vrot.slane %v7235_v16, %v12333_v25  ;;  %v7077_v58 = vrot.slane %v6940_v60, %v13450_v47 }
 0x6a0   : > { %v7530_v61 = vrot.slane %v7237_v59, %v12333_v25  ;;  %v7070_v4 = vcombine.high %v6940_v60, %v6940_v60 }
 0x6a1   : > { %v7526_v34 = vrot.slane %v7236_v13, %v12333_v25  ;;  %v7612_v42 = vsel %vm6750_vm9, %v7522_v10, %v7611_v5  ;;  %v7534_v26 = vrot.slane %v7238_v32, %v12333_v25  ;;  %v7085_v14 = vcombine.high %v7077_v58, %v7077_v58 }
 0x6a2   : > { %v7115_v50 = vrot.slane %v7077_v58, 1 }
 0x6a3   : > { %v7613_v7 = vsel %vm6753_vm10, %v7526_v34, %v7612_v42  ;;  %v7084_v34 = vrot.slane %v7070_v4, %v13450_v47  ;;  %v7116_v42 = vrot.slane %v7085_v14, 1 }
 0x6a4   : > { %v7614_v57 = vsel %vm6756_vm11, %v7530_v61, %v7613_v7 }
 0x6a5   : > { %v7615_v28 = vsel %vm13512_vm13, %v7534_v26, %v7614_v57 }
 0x6a6   : > { %7637 = vst.msk [vmem:[%s12400_s18 + $0x30] sm:$0xff] %vm13513_vm12, %v7615_v28 }
 0x6b4   : > { %v8234_v27 = vpop.f32.mrb[28].mxu1 }
 0x6b5   : > { %v3846_v36 = vadd.f32 %v12620_v55, %v8234_v27  ;;  %v3837_v44 = vpop.f32.mrb[29].mxu1 }
 0x6b6   : > { %v3838_v46 = vadd.f32 %v12620_v55, %v3837_v44  ;;  %v8235_v39 = vpop.f32.mrb[30].mxu1 }
 0x6b7   : > { %v4394_v37 = vcombine.high %v3846_v36, %v3846_v36  ;;  %v4401_v52 = vrot.slane %v3846_v36, %v13450_v47  ;;  %v3849_v40 = vadd.f32 %v12620_v55, %v8235_v39  ;;  %v3840_v48 = vpop.f32.mrb[31].mxu1 }
 0x6b8   : > { %v4360_v19 = vcombine.high %v3838_v46, %v3838_v46  ;;  %v4367_v24 = vrot.slane %v3838_v46, %v13450_v47  ;;  %v3841_v22 = vadd.f32 %v12620_v55, %v3840_v48 }
 0x6b9   : > { %v4408_v35 = vrot.slane %v4394_v37, %v13450_v47  ;;  %v4409_v45 = vcombine.high %v4401_v52, %v4401_v52  ;;  %v7884_v9 = vrot.slane %v4401_v52, 9  ;;  %v4411_v23 = vcombine.high %v3849_v40, %v3849_v40 }
 0x6ba   : > { %v4374_v49 = vrot.slane %v4360_v19, %v13450_v47  ;;  %v4375_v12 = vcombine.high %v4367_v24, %v4367_v24  ;;  %v7820_v1 = vrot.slane %v4367_v24, 9  ;;  %v4418_v0 = vrot.slane %v3849_v40, %v13450_v47 }
 0x6bb   : > { %v4410_v8 = vcombine.high %v4408_v35, %v4408_v35  ;;  %v7885_v62 = vrot.slane %v4409_v45, 9  ;;  %v7886_v31 = vrot.slane %v4408_v35, 9  ;;  %v5060_v38 = vadd.f32 %v7884_v9, %v4401_v52 }
 0x6bc   : > { %v4376_v17 = vcombine.high %v4374_v49, %v4374_v49  ;;  %v7821_v18 = vrot.slane %v4375_v12, 9  ;;  %v7822_v63 = vrot.slane %v4374_v49, 9  ;;  %v4804_v54 = vadd.f32 %v7820_v1, %v4367_v24 }
 0x6bd   : > { %v7887_v6 = vrot.slane %v4410_v8, 9  ;;  %v5061_v2 = vadd.f32 %v7885_v62, %v4409_v45  ;;  %v5062_v43 = vadd.f32 %v7886_v31, %v4408_v35  ;;  %v4425_v33 = vrot.slane %v4411_v23, %v13450_v47 }
 0x6be   : > { %v7823_v30 = vrot.slane %v4376_v17, 9  ;;  %v4805_v5 = vadd.f32 %v7821_v18, %v4375_v12  ;;  %v4806_v29 = vadd.f32 %v7822_v63, %v4374_v49  ;;  %v5124_v11 = vadd.f32 %v5060_v38, %v4804_v54 }
 0x6bf   : > { %v5063_v20 = vadd.f32 %v7887_v6, %v4410_v8  ;;  %v4426_v51 = vcombine.high %v4418_v0, %v4418_v0  ;;  %v4427_v56 = vcombine.high %v4425_v33, %v4425_v33  ;;  %v7888_v21 = vrot.slane %v4418_v0, 9 }
 0x6c0   : > { %v4807_v41 = vadd.f32 %v7823_v30, %v4376_v17  ;;  %v5125_v53 = vadd.f32 %v5061_v2, %v4805_v5  ;;  %v5126_v3 = vadd.f32 %v5062_v43, %v4806_v29  ;;  %v5188_v15 = vmul.f32 0.25, %v5124_v11 }
 0x6c1   : > { %v7889_v16 = vrot.slane %v4426_v51, 9  ;;  %v7890_v61 = vrot.slane %v4425_v33, 9  ;;  %v4377_v26 = vcombine.high %v3841_v22, %v3841_v22  ;;  %v7891_v55 = vrot.slane %v4427_v56, 9 }
 0x6c2   : > { %v5127_v59 = vadd.f32 %v5063_v20, %v4807_v41  ;;  %v5189_v13 = vmul.f32 0.25, %v5125_v53  ;;  %v5190_v32 = vmul.f32 0.25, %v5126_v3  ;;  %v7239_v10 = vadd.f32 %v7077_v58, %v5188_v15 }
 0x6c3   : > { %v5064_v60 = vadd.f32 %v7888_v21, %v4418_v0  ;;  %v5065_v27 = vadd.f32 %v7889_v16, %v4426_v51  ;;  %v4384_v36 = vrot.slane %v3841_v22, %v13450_v47  ;;  %v4391_v44 = vrot.slane %v4377_v26, %v13450_v47 }
 0x6c4   : > { %v5191_v7 = vmul.f32 0.25, %v5127_v59  ;;  %v7240_v57 = vadd.f32 %v7115_v50, %v5189_v13  ;;  %v7241_v28 = vadd.f32 %v7085_v14, %v5190_v32  ;;  %v7538_v39 = vrot.slane %v7239_v10, %v12333_v25 }
 0x6c5   : > { %v4392_v52 = vcombine.high %v4384_v36, %v4384_v36  ;;  %v4393_v40 = vcombine.high %v4391_v44, %v4391_v44  ;;  %v7824_v48 = vrot.slane %v4384_v36, 9  ;;  %v7826_v4 = vrot.slane %v4391_v44, 9 }
 0x6c6   : > { %v7242_v46 = vadd.f32 %v7116_v42, %v5191_v7  ;;  %v7542_v58 = vrot.slane %v7240_v57, %v12333_v25  ;;  %v7546_v37 = vrot.slane %v7241_v28, %v12333_v25  ;;  %v5066_v24 = vadd.f32 %v7890_v61, %v4425_v33 }
 0x6c7   : > { %v5067_v35 = vadd.f32 %v7891_v55, %v4427_v56  ;;  %v7825_v47 = vrot.slane %v4392_v52, 9  ;;  %v7827_v9 = vrot.slane %v4393_v40, 9  ;;  %v4808_v23 = vadd.f32 %v7824_v48, %v4384_v36 }
 0x6c8   : > { %v7550_v14 = vrot.slane %v7242_v46, %v12333_v25  ;;  %v7616_v19 = vsel %vm6741_vm6, %v7542_v58, %v7538_v39  ;;  %v4810_v49 = vadd.f32 %v7826_v4, %v4391_v44  ;;  %v7086_v1 = vcombine.high %v7084_v34, %v7084_v34  ;;  %vm13514_vm6 = vmmov %vm13501_vm0 }
 0x6c9   : > { %v7617_v45 = vsel %vm6744_vm7, %v7546_v37, %v7616_v19  ;;  %v4809_v0 = vadd.f32 %v7825_v47, %v4392_v52  ;;  %v4811_v8 = vadd.f32 %v7827_v9, %v4393_v40  ;;  %v5128_v62 = vadd.f32 %v5064_v60, %v4808_v23  ;;  %vm13515_vm7 = vmmov %vm13508_vm1 }
 0x6ca   : > { %v7618_v12 = vsel %vm6747_vm8, %v7550_v14, %v7617_v45  ;;  %v5130_v31 = vadd.f32 %v5066_v24, %v4810_v49  ;;  %v7117_v63 = vrot.slane %v7084_v34, 1  ;;  %v7118_v6 = vrot.slane %v7086_v1, 1 }
 0x6cb   : > { %v5129_v38 = vadd.f32 %v5065_v27, %v4809_v0  ;;  %v5131_v17 = vadd.f32 %v5067_v35, %v4811_v8  ;;  %v5192_v18 = vmul.f32 0.25, %v5128_v62 }
 0x6cc   : > { %v5194_v54 = vmul.f32 0.25, %v5130_v31 }
 0x6cd   : > { %v5193_v2 = vmul.f32 0.25, %v5129_v38  ;;  %v5195_v43 = vmul.f32 0.25, %v5131_v17  ;;  %v7243_v33 = vadd.f32 %v7084_v34, %v5192_v18 }
 0x6ce   : > { %v7245_v30 = vadd.f32 %v7086_v1, %v5194_v54 }
 0x6cf   : > { %v7244_v5 = vadd.f32 %v7117_v63, %v5193_v2  ;;  %v7246_v29 = vadd.f32 %v7118_v6, %v5195_v43  ;;  %v7554_v11 = vrot.slane %v7243_v33, %v12333_v25 }
 0x6d0   : > { %v7562_v56 = vrot.slane %v7245_v30, %v12333_v25 }
 0x6d1   : > { %v7558_v20 = vrot.slane %v7244_v5, %v12333_v25  ;;  %v7619_v51 = vsel %vm6750_vm9, %v7554_v11, %v7618_v12  ;;  %v7566_v22 = vrot.slane %v7246_v29, %v12333_v25 }
 0x6d3   : > { %v7620_v41 = vsel %vm6753_vm10, %v7558_v20, %v7619_v51 }
 0x6d4   : > { %v7621_v53 = vsel %vm6756_vm11, %v7562_v56, %v7620_v41 }
 0x6d5   : > { %v7622_v3 = vsel %vm13514_vm6, %v7566_v22, %v7621_v53 }
 0x6d6   : > { %7638 = vst.msk [vmem:[%s12400_s18 + $0x38] sm:$0xff] %vm13515_vm7, %v7622_v3 }
 0x6d7   : > { %8326 = shalt.err (!%p8323_p3)
}
 0x6d8   : > { %s8327_s16 = scalar_lea.hbm %s12789_s21, 1024  ;;  %s8331_s9 = scalar_lea.hbm %s12848_s7, 2048 }
 0x6d9   : > { %p8328_p4 = scmp.ne.s32.totalorder %s12789_s21, %s8327_s16  ;;  %p8332_p9 = scmp.lt.u32.totalorder %s12789_s21, %s12848_s7 }
 0x6da   : > { %p8333_p10 = scmp.lt.u32.totalorder %s8331_s9, %s8327_s16  ;;  %p8335_p12 = scmp.lt.u32.totalorder %s8327_s16, %s12789_s21 }
 0x6db   : > { %p8329_p7 = pnand %p8328_p4, %p8471_p5 }
 0x6dc   : > { %p8334_p11 = por %p8333_p10, %p8332_p9 }
 0x6dd   : > { %p8330_p8 = pneg %p8329_p7 }
 0x6de   : > { %p8336_p13 = por %p8335_p12, %p8334_p11 }
 0x6e0   : > { %p8337_p0 = pnand %p8336_p13, %p8330_p8 }
 0x6e2   : > { %8340 = shalt.err (!%p8337_p0)
}
 0x6e3   : > { %s8392_s15 = smov 128  }
 0x6e4   : > { %8249 = dma.vmem_to_hbm [thread:$0]  (%p8471_p5), %s12792_s14, 1024, %s12789_s21, %s12799_s28, %s8392_s15, %s8392_s15, %s8379_s19  }
 0x6e5 PF: > { %p8255_p1 = scmp.ge.s32.totalorder %s8375_s27, 2  ;;  %s7668_s8 = sand.u32 1, %s8363_s24  }
 0x6e6   : > { %s7669_s17 = scalar_lea.sflag [#allocation7], %s7668_s8 }
 0x6e7   : > { %p8252_p2 = pnand %p8255_p1, %p8475_p6 }
 0x6e9   : > { %8358 = dma.done.wait (!%p8252_p2), %s7669_s17, 1024  }
 0x6ea   : > { %8360 = vsyncadd (!%p8252_p2), %s7669_s17, 4294966272  ;;  %p17_p3 = scmp.ge.s32.totalorder %s8458_s30, 4   ;;  %s13516_s24 = smov %s8367_s25 }
 0x6eb   : > { %s13517_s25 = smov %s8371_s26  ;;  %s13518_s26 = smov %s8469_s10 }
 0x6ec   : > { %s13519_s27 = smov %s8458_s30  ;;  %19 = sbr.rel (!%p17_p3) target bundleno = 3 (0x3), region = 85 }
 0x6f3   :  { %7674 = vsyncpa [#allocation7], 1 }
 0x6f4   :  { %7676 = vsyncpa [#allocation7 + $0x1], 1 }

</bundles_post_ra>
